<compile_context>
chip_gen: v6e
topology: v6e:2x2x1
jax: 0.10.0
libtpu: 0.0.40
codegen_flags: <defaults>
</compile_context>

<pallas_src>
from functools import partial

import numpy as np
import jax
import jax.numpy as jnp
from jax import lax
from jax.experimental import pallas as pl
from jax.experimental.pallas import tpu as pltpu


# -----------------------------------------------------------------------------
# The single fused kernel
# -----------------------------------------------------------------------------
def _mshgat_kernel(times,
                   a_ref, arow_ref, xemb_ref, w12_ref, bn_s_ref, c12s_ref,
                   bias_out_ref, gs_ref, hgc1_b_ref, fc1wt_ref,
                   f1w1t_ref, f1b1_ref, f1w2_ref, f1b2_ref,
                   inp_ref, ts_ref, prefix_ref,
                   f2w1t_ref, f2b1_ref, f2w2_ref, f2b2_ref,
                   rwt_ref, rb_ref, o_ref):
    f32 = jnp.float32
    bf16 = jnp.bfloat16
    n = a_ref.shape[0]          # n_node == vocab size V
    n_g = gs_ref.shape[0]       # number of hypergraphs (static)
    BL = inp_ref.shape[0]       # batch * seq_len

    # ---- GraphNN: collapsed GCN1∘GCN2 (+ folded BatchNorm eval) -------------
    # h2 = A@(A@(X@W12)) + (A@1)(b1@W2) + b2 ;  hidden = h2*s + beta  (folded)
    a = a_ref[...]                                                     # bf16
    t0 = jnp.dot(xemb_ref[...], w12_ref[...], preferred_element_type=f32)
    t1 = jnp.dot(a, t0.astype(bf16), preferred_element_type=f32)
    t2 = jnp.dot(a, t1.astype(bf16), preferred_element_type=f32)
    hidden = t2 * bn_s_ref[...] + arow_ref[...] * c12s_ref[...] + bias_out_ref[...]

    # ---- HGNN_ATT: per-hypergraph (HGNN2 -> Fusion), x carried in vregs -----
    x = hidden
    mem_nodes = []
    for g in range(n_g):                         # static unroll (n_g == 3)
        G = gs_ref[g]                                                  # bf16
        # HGNN2: relu -> +bias -> edge = G^T @ xb -> xg = G @ edge
        #        -> softmax(dim=1) -> @ fc1.W^T
        xb = jnp.maximum(x, 0.0) + hgc1_b_ref[...]
        edge = lax.dot_general(G, xb.astype(bf16),
                               dimension_numbers=(((0,), (0,)), ((), ())),
                               preferred_element_type=f32)             # G^T @ xb
        xg = jnp.dot(G, edge.astype(bf16), preferred_element_type=f32)
        xm = xg - jnp.max(xg, axis=1, keepdims=True)
        e = jnp.exp(xm)
        pm = e / jnp.sum(e, axis=1, keepdims=True)
        node = jnp.dot(pm, fc1wt_ref[...], preferred_element_type=f32)

        # Fusion(x, node): one stacked (2n, d) @ (d, d) matmul for both scores.
        hd = jnp.concatenate([x, node], axis=0)
        t = jnp.tanh(jnp.dot(hd, f1w1t_ref[...], preferred_element_type=f32)
                     + f1b1_ref[...])
        s = jnp.sum(t * f1w2_ref[...], axis=-1, keepdims=True) + f1b2_ref[...]
        sh, sd = s[:n, :], s[n:, :]
        mx = jnp.maximum(sh, sd)
        eh, ed = jnp.exp(sh - mx), jnp.exp(sd - mx)
        inv = 1.0 / (eh + ed)
        x = (eh * inv) * x + (ed * inv) * node
        mem_nodes.append(x)                      # embedding_list[key][0]

    # ---- temporal-split gathers as one-hot MXU matmuls ----------------------
    # Per position: dyemb = table_bucket[u] if u != 0 else 0, where bucket is
    # which time interval ts falls in (0: hidden, k: mem_nodes[k-1]).
    inp = inp_ref[...]                           # (BL, 1) int32
    ts = ts_ref[...]                             # (BL, 1) f32
    bucket = jnp.zeros_like(inp)
    for tthr in times:                           # times are static Python floats
        bucket = bucket + (ts > tthr).astype(jnp.int32)

    tables = jnp.concatenate([hidden] + mem_nodes, axis=0)     # ((n_g+1)*n, D)
    col_big = lax.broadcasted_iota(jnp.int32, (BL, (n_g + 1) * n), 1)
    onehot_dy = ((col_big == bucket * n + inp) & (inp != 0)).astype(f32)
    dyemb = jnp.dot(onehot_dy, tables, preferred_element_type=f32)      # (BL, D)

    col_n = lax.broadcasted_iota(jnp.int32, (BL, n), 1)        # V == n_node == n
    onehot_fri = (col_n == inp).astype(f32)
    fri = jnp.dot(onehot_fri, hidden, preferred_element_type=f32)       # (BL, D)

    # ---- Fusion(dyemb, fri) + MLPReadout + previous-user mask ---------------
    hd2 = jnp.concatenate([dyemb, fri], axis=0)                         # (2BL, D)
    tt = jnp.tanh(jnp.dot(hd2, f2w1t_ref[...], preferred_element_type=f32)
                  + f2b1_ref[...])
    s2 = jnp.sum(tt * f2w2_ref[...], axis=-1, keepdims=True) + f2b2_ref[...]
    sh, sd = s2[:BL, :], s2[BL:, :]
    mx = jnp.maximum(sh, sd)
    eh, ed = jnp.exp(sh - mx), jnp.exp(sd - mx)
    inv = 1.0 / (eh + ed)
    att = (eh * inv) * dyemb + (ed * inv) * fri

    logits = jnp.dot(att, rwt_ref[...], preferred_element_type=f32) + rb_ref[...]

    # previous-user mask: user v is masked at row r if v == 0 (PAD) or v was
    # seen at-or-before position l within the same batch row.
    counts = jnp.dot(prefix_ref[...], onehot_fri, preferred_element_type=f32)
    hit = (counts > 0.5) | (col_n == 0)
    o_ref[...] = logits + jnp.where(hit, -1000.0, 0.0)


def mshgat_fused_call(prep, graphs, inp_col, ts_col, prefix, hyper_times,
                      n_node, hidden_size):
    BL = inp_col.shape[0]
    V = n_node
    kernel = partial(_mshgat_kernel, tuple(float(t) for t in hyper_times))

    def full(shape):
        zeros = (0,) * len(shape)
        return pl.BlockSpec(shape, lambda i, z=zeros: z)

    in_arrays = [
        graphs['a_bf'], graphs['a_rowsum'], prep['emb_bf'], prep['w12_bf'],
        prep['bn_s_r'], prep['c12s_r'], prep['bias_out_r'],
        graphs['gs_bf'], prep['hgc1_bias_r'], prep['fc1_wt'],
        prep['fus1_w1t'], prep['fus1_b1_r'], prep['fus1_w2_r'], prep['fus1_b2_r'],
        inp_col, ts_col, prefix,
        prep['fus2_w1t'], prep['fus2_b1_r'], prep['fus2_w2_r'], prep['fus2_b2_r'],
        prep['readout_wt'], prep['readout_b_r'],
    ]
    return pl.pallas_call(
        kernel,
        out_shape=jax.ShapeDtypeStruct((BL, V), jnp.float32),
        grid=(1,),
        in_specs=[full(a.shape) for a in in_arrays],
        out_specs=full((BL, V)),
        compiler_params=pltpu.CompilerParams(
            dimension_semantics=("arbitrary",)),
    )(*in_arrays)


# -----------------------------------------------------------------------------
# JAX glue: adjacency builders, parameter init / preparation
# -----------------------------------------------------------------------------
def build_gcn_adj(n):
    # ring graph, symmetric edges + self loops, GCN symmetric normalisation
    A = np.zeros((n, n), np.float32)
    for i in range(n):
        A[i, (i + 1) % n] = 1.0
        A[(i + 1) % n, i] = 1.0
    A = A + np.eye(n, dtype=np.float32)
    deg = A.sum(axis=1)
    dinv = 1.0 / np.sqrt(np.maximum(deg, 1e-12))
    return (dinv[:, None] * A) * dinv[None, :]


def get_norm_adj_mat_dense(inter):
    # dense equivalent of get_norm_adj_mat (bipartite adjacency, D^-1/2 A D^-1/2)
    n_u, n_i = inter.shape
    n = n_u + n_i
    A = np.zeros((n, n), np.float32)
    A[:n_u, n_u:] = inter
    A[n_u:, :n_u] = inter.T
    diag = (A > 0).sum(axis=1).astype(np.float32) + 1e-7
    dinv = np.power(diag, -0.5)
    return (dinv[:, None] * A) * dinv[None, :]


def make_hypergraph(n_u, n_i, shift):
    inter = np.zeros((n_u, n_i), np.float32)
    for u in range(n_u):
        for k in range(3):
            inter[u, (u + shift + 2 * k) % n_i] = 1.0
    return get_norm_adj_mat_dense(inter)


def init_params(key, n_node, feat, hidden):
    # MSHGAT.reset_parameters: every parameter ~ U(-1/sqrt(hidden), +1/sqrt(hidden))
    stdv = 1.0 / np.sqrt(hidden)
    shapes = dict(
        emb_weight=(n_node, feat),                      # GraphNN.embedding
        gcn1_w=(feat, 2 * feat), gcn1_b=(2 * feat,),    # GCNConv 1 (stored (in,out))
        gcn2_w=(2 * feat, feat), gcn2_b=(feat,),        # GCNConv 2
        bn_gamma=(feat,), bn_beta=(feat,),              # GraphNN.batch_norm (eval)
        hgc1_bias=(feat,),                              # HGNN2.hgc1.bias
        fc1_w=(feat, feat),                             # HGNN2.fc1 (no bias), (out,in)
        fus1_w1=(hidden, hidden), fus1_b1=(hidden,),    # HGNN_ATT.fus1
        fus1_w2=(1, hidden), fus1_b2=(1,),
        fus2_w1=(hidden, hidden), fus2_b1=(hidden,),    # MSHGAT.fus2
        fus2_w2=(1, hidden), fus2_b2=(1,),
        readout_w=(n_node, hidden), readout_b=(n_node,),  # MLPReadout.layer1
    )
    keys = jax.random.split(key, len(shapes))
    return {name: jax.random.uniform(k, shp, jnp.float32, -stdv, stdv)
            for k, (name, shp) in zip(keys, shapes.items())}


def prepare_params(params):
    # All transposes / reshapes / algebraic folds done ONCE on the host.
    p = {}
    bn_s = params['bn_gamma'] * np.float32(1.0 / np.sqrt(1.0 + 1e-5))   # BN eval scale
    # GCN collapse (valid: no activation between gnn1 and gnn2; dropout = id in eval)
    w12 = params['gcn1_w'] @ params['gcn2_w']                            # (feat, feat)
    c12 = params['gcn1_b'].reshape(1, -1) @ params['gcn2_w']             # (1, feat)
    p['emb_bf'] = params['emb_weight'].astype(jnp.bfloat16)
    p['w12_bf'] = w12.astype(jnp.bfloat16)
    p['bn_s_r'] = bn_s.reshape(1, -1)
    p['c12s_r'] = c12 * bn_s.reshape(1, -1)
    p['bias_out_r'] = (params['gcn2_b'] * bn_s + params['bn_beta']).reshape(1, -1)
    p['hgc1_bias_r'] = params['hgc1_bias'].reshape(1, -1)
    p['fc1_wt'] = params['fc1_w'].T
    p['fus1_w1t'] = params['fus1_w1'].T
    p['fus1_b1_r'] = params['fus1_b1'].reshape(1, -1)
    p['fus1_w2_r'] = params['fus1_w2'].reshape(1, -1)
    p['fus1_b2_r'] = params['fus1_b2'].reshape(1, 1)
    p['fus2_w1t'] = params['fus2_w1'].T
    p['fus2_b1_r'] = params['fus2_b1'].reshape(1, -1)
    p['fus2_w2_r'] = params['fus2_w2'].reshape(1, -1)
    p['fus2_b2_r'] = params['fus2_b2'].reshape(1, 1)
    p['readout_wt'] = params['readout_w'].T
    p['readout_b_r'] = params['readout_b'].reshape(1, -1)
    return p


def prepare_graphs(A_gcn, hyper_Gs):
    A = jnp.asarray(A_gcn, jnp.float32)
    Gs = jnp.asarray(hyper_Gs, jnp.float32)
    return {'a_bf': A.astype(jnp.bfloat16),
            'a_rowsum': jnp.sum(A, axis=1, keepdims=True),   # A @ 1 (f32, exact)
            'gs_bf': Gs.astype(jnp.bfloat16)}


# -----------------------------------------------------------------------------
# Full MSHGAT forward
# -----------------------------------------------------------------------------
@partial(jax.jit, static_argnums=(5, 6, 7))
def mshgat_forward(prep, graphs, inp_full, ts_full, input_idx,
                   hyper_times, n_node, hidden_size):
    del input_idx  # only feeds the dead cas_emb path of the reference forward
    inp = inp_full[:, :-1]
    ts = ts_full[:, :-1]
    B, L = inp.shape
    BL = B * L
    # same-batch prefix matrix (trace-time constant): P[r, r'] = 1 iff same batch
    # row and position(r') <= position(r)  -> drives the previous-user mask.
    r = np.arange(BL)
    prefix = jnp.asarray(((r[:, None] // L) == (r[None, :] // L)) &
                         ((r[None, :] % L) <= (r[:, None] % L)), jnp.float32)
    inp_col = inp.reshape(BL, 1).astype(jnp.int32)
    ts_col = ts.reshape(BL, 1).astype(jnp.float32)
    return mshgat_fused_call(prep, graphs, inp_col, ts_col, prefix,
                             hyper_times, n_node, hidden_size)


# -----------------------------------------------------------------------------
if __name__ == "__main__":
    key = jax.random.PRNGKey(0)
    n_node = 128          # opt.user_size (== vocab V)
    hidden_size = 32      # opt.d_word_vec
    feat = 32             # opt.initialFeatureSize (== hidden_size so the torch
                          # forward type-checks)
    B, L_full = 2, 9

    k_inp, k_ts, k_idx, k_par = jax.random.split(key, 4)
    inp_full = jax.random.randint(k_inp, (B, L_full), 0, n_node, dtype=jnp.int32)
    ts_full = jax.random.uniform(k_ts, (B, L_full), minval=0.0, maxval=4.0)
    input_idx = jax.random.randint(k_idx, (B,), 0, n_node, dtype=jnp.int32)
    params = init_params(k_par, n_node, feat, hidden_size)
    prep = prepare_params(params)

    A_gcn = build_gcn_adj(n_node)
    hyper_times = (1.0, 2.0, 3.0)   # sorted keys == dict insertion order (as in torch)
    hyper_Gs = np.stack([make_hypergraph(n_node // 2, n_node // 2, s)
                         for s in (0, 3, 7)])
    graphs = prepare_graphs(A_gcn, hyper_Gs)

    out = mshgat_forward(prep, graphs, inp_full, ts_full, input_idx,
                         hyper_times, n_node, hidden_size)
    out = jax.block_until_ready(out)
    assert out.shape == (B * (L_full - 1), n_node), out.shape
    assert bool(jnp.all(jnp.isfinite(out)))
    print("KERNEL_OK")
</pallas_src>

<mosaic_0001>
module attributes {stable_mosaic.version = 11 : i64} {
  func.func @_mshgat_kernel(%arg0: i32, %arg1: memref<128x128xbf16, #tpu.memory_space<vmem>>, %arg2: memref<128x1xf32, #tpu.memory_space<vmem>>, %arg3: memref<128x32xbf16, #tpu.memory_space<vmem>>, %arg4: memref<32x32xbf16, #tpu.memory_space<vmem>>, %arg5: memref<1x32xf32, #tpu.memory_space<vmem>>, %arg6: memref<1x32xf32, #tpu.memory_space<vmem>>, %arg7: memref<1x32xf32, #tpu.memory_space<vmem>>, %arg8: memref<3x128x128xbf16, #tpu.memory_space<vmem>>, %arg9: memref<1x32xf32, #tpu.memory_space<vmem>>, %arg10: memref<32x32xf32, #tpu.memory_space<vmem>>, %arg11: memref<32x32xf32, #tpu.memory_space<vmem>>, %arg12: memref<1x32xf32, #tpu.memory_space<vmem>>, %arg13: memref<1x32xf32, #tpu.memory_space<vmem>>, %arg14: memref<1x1xf32, #tpu.memory_space<vmem>>, %arg15: memref<16x1xi32, #tpu.memory_space<vmem>>, %arg16: memref<16x1xf32, #tpu.memory_space<vmem>>, %arg17: memref<16x16xf32, #tpu.memory_space<vmem>>, %arg18: memref<32x32xf32, #tpu.memory_space<vmem>>, %arg19: memref<1x32xf32, #tpu.memory_space<vmem>>, %arg20: memref<1x32xf32, #tpu.memory_space<vmem>>, %arg21: memref<1x1xf32, #tpu.memory_space<vmem>>, %arg22: memref<32x128xf32, #tpu.memory_space<vmem>>, %arg23: memref<1x128xf32, #tpu.memory_space<vmem>>, %arg24: memref<16x128xf32, #tpu.memory_space<vmem>>) attributes {dimension_semantics = [#tpu.dimension_semantics<arbitrary>], iteration_bounds = array<i64: 1>, scalar_prefetch = 0 : i64, scratch_operands = 0 : i64, tpu.core_type = #tpu.core_type<tc>, window_params = [{pipeline_mode = #tpu.pipeline_mode<synchronous>, transform_indices = @transform_0, window_bounds = array<i64: 128, 128>}, {pipeline_mode = #tpu.pipeline_mode<synchronous>, transform_indices = @transform_1, window_bounds = array<i64: 128, 1>}, {pipeline_mode = #tpu.pipeline_mode<synchronous>, transform_indices = @transform_2, window_bounds = array<i64: 128, 32>}, {pipeline_mode = #tpu.pipeline_mode<synchronous>, transform_indices = @transform_3, window_bounds = array<i64: 32, 32>}, {pipeline_mode = #tpu.pipeline_mode<synchronous>, transform_indices = @transform_4, window_bounds = array<i64: 1, 32>}, {pipeline_mode = #tpu.pipeline_mode<synchronous>, transform_indices = @transform_5, window_bounds = array<i64: 1, 32>}, {pipeline_mode = #tpu.pipeline_mode<synchronous>, transform_indices = @transform_6, window_bounds = array<i64: 1, 32>}, {pipeline_mode = #tpu.pipeline_mode<synchronous>, transform_indices = @transform_7, window_bounds = array<i64: 3, 128, 128>}, {pipeline_mode = #tpu.pipeline_mode<synchronous>, transform_indices = @transform_8, window_bounds = array<i64: 1, 32>}, {pipeline_mode = #tpu.pipeline_mode<synchronous>, transform_indices = @transform_9, window_bounds = array<i64: 32, 32>}, {pipeline_mode = #tpu.pipeline_mode<synchronous>, transform_indices = @transform_10, window_bounds = array<i64: 32, 32>}, {pipeline_mode = #tpu.pipeline_mode<synchronous>, transform_indices = @transform_11, window_bounds = array<i64: 1, 32>}, {pipeline_mode = #tpu.pipeline_mode<synchronous>, transform_indices = @transform_12, window_bounds = array<i64: 1, 32>}, {pipeline_mode = #tpu.pipeline_mode<synchronous>, transform_indices = @transform_13, window_bounds = array<i64: 1, 1>}, {pipeline_mode = #tpu.pipeline_mode<synchronous>, transform_indices = @transform_14, window_bounds = array<i64: 16, 1>}, {pipeline_mode = #tpu.pipeline_mode<synchronous>, transform_indices = @transform_15, window_bounds = array<i64: 16, 1>}, {pipeline_mode = #tpu.pipeline_mode<synchronous>, transform_indices = @transform_16, window_bounds = array<i64: 16, 16>}, {pipeline_mode = #tpu.pipeline_mode<synchronous>, transform_indices = @transform_17, window_bounds = array<i64: 32, 32>}, {pipeline_mode = #tpu.pipeline_mode<synchronous>, transform_indices = @transform_18, window_bounds = array<i64: 1, 32>}, {pipeline_mode = #tpu.pipeline_mode<synchronous>, transform_indices = @transform_19, window_bounds = array<i64: 1, 32>}, {pipeline_mode = #tpu.pipeline_mode<synchronous>, transform_indices = @transform_20, window_bounds = array<i64: 1, 1>}, {pipeline_mode = #tpu.pipeline_mode<synchronous>, transform_indices = @transform_21, window_bounds = array<i64: 32, 128>}, {pipeline_mode = #tpu.pipeline_mode<synchronous>, transform_indices = @transform_22, window_bounds = array<i64: 1, 128>}, {pipeline_mode = #tpu.pipeline_mode<synchronous>, transform_indices = @transform_23, window_bounds = array<i64: 16, 128>}]} {
    %c0 = arith.constant 0 : index
    %c0_0 = arith.constant 0 : index
    %0 = vector.load %arg1[%c0, %c0_0] : memref<128x128xbf16, #tpu.memory_space<vmem>>, vector<128x128xbf16>
    %c0_1 = arith.constant 0 : index
    %c0_2 = arith.constant 0 : index
    %1 = vector.load %arg3[%c0_1, %c0_2] : memref<128x32xbf16, #tpu.memory_space<vmem>>, vector<128x32xbf16>
    %c0_3 = arith.constant 0 : index
    %c0_4 = arith.constant 0 : index
    %2 = vector.load %arg4[%c0_3, %c0_4] : memref<32x32xbf16, #tpu.memory_space<vmem>>, vector<32x32xbf16>
    %cst = arith.constant dense<0.000000e+00> : vector<128x32xf32>
    %3 = tpu.matmul %1, %2, %cst {dimension_numbers = #tpu.dot_dimension_numbers<[1], [0], [0], [1], [0, 0, 1, 1], [], []>} : vector<128x32xbf16>, vector<32x32xbf16>, vector<128x32xf32> -> vector<128x32xf32>
    %4 = arith.truncf %3 : vector<128x32xf32> to vector<128x32xbf16>
    %cst_5 = arith.constant dense<0.000000e+00> : vector<128x32xf32>
    %5 = tpu.matmul %0, %4, %cst_5 {dimension_numbers = #tpu.dot_dimension_numbers<[1], [0], [0], [1], [0, 0, 1, 1], [], []>} : vector<128x128xbf16>, vector<128x32xbf16>, vector<128x32xf32> -> vector<128x32xf32>
    %6 = arith.truncf %5 : vector<128x32xf32> to vector<128x32xbf16>
    %cst_6 = arith.constant dense<0.000000e+00> : vector<128x32xf32>
    %7 = tpu.matmul %0, %6, %cst_6 {dimension_numbers = #tpu.dot_dimension_numbers<[1], [0], [0], [1], [0, 0, 1, 1], [], []>} : vector<128x128xbf16>, vector<128x32xbf16>, vector<128x32xf32> -> vector<128x32xf32>
    %c0_7 = arith.constant 0 : index
    %c0_8 = arith.constant 0 : index
    %8 = vector.load %arg5[%c0_7, %c0_8] : memref<1x32xf32, #tpu.memory_space<vmem>>, vector<1x32xf32>
    %9 = vector.broadcast %8 : vector<1x32xf32> to vector<128x32xf32>
    %10 = arith.mulf %7, %9 : vector<128x32xf32>
    %c0_9 = arith.constant 0 : index
    %c0_10 = arith.constant 0 : index
    %11 = vector.load %arg2[%c0_9, %c0_10] : memref<128x1xf32, #tpu.memory_space<vmem>>, vector<128x1xf32>
    %c0_11 = arith.constant 0 : index
    %c0_12 = arith.constant 0 : index
    %12 = vector.load %arg6[%c0_11, %c0_12] : memref<1x32xf32, #tpu.memory_space<vmem>>, vector<1x32xf32>
    %13 = vector.broadcast %11 : vector<128x1xf32> to vector<128x32xf32>
    %14 = vector.broadcast %12 : vector<1x32xf32> to vector<128x32xf32>
    %15 = arith.mulf %13, %14 : vector<128x32xf32>
    %16 = arith.addf %10, %15 : vector<128x32xf32>
    %c0_13 = arith.constant 0 : index
    %c0_14 = arith.constant 0 : index
    %17 = vector.load %arg7[%c0_13, %c0_14] : memref<1x32xf32, #tpu.memory_space<vmem>>, vector<1x32xf32>
    %18 = vector.broadcast %17 : vector<1x32xf32> to vector<128x32xf32>
    %19 = arith.addf %16, %18 : vector<128x32xf32>
    %c0_15 = arith.constant 0 : index
    %c0_16 = arith.constant 0 : index
    %c0_17 = arith.constant 0 : index
    %20 = vector.load %arg8[%c0_15, %c0_16, %c0_17] : memref<3x128x128xbf16, #tpu.memory_space<vmem>>, vector<1x128x128xbf16>
    %21 = vector.shape_cast %20 : vector<1x128x128xbf16> to vector<128x128xbf16>
    %cst_18 = arith.constant 0.000000e+00 : f32
    %22 = vector.broadcast %cst_18 : f32 to vector<128x32xf32>
    %23 = arith.maximumf %19, %22 : vector<128x32xf32>
    %c0_19 = arith.constant 0 : index
    %c0_20 = arith.constant 0 : index
    %24 = vector.load %arg9[%c0_19, %c0_20] : memref<1x32xf32, #tpu.memory_space<vmem>>, vector<1x32xf32>
    %25 = vector.broadcast %24 : vector<1x32xf32> to vector<128x32xf32>
    %26 = arith.addf %23, %25 : vector<128x32xf32>
    %27 = arith.truncf %26 : vector<128x32xf32> to vector<128x32xbf16>
    %cst_21 = arith.constant dense<0.000000e+00> : vector<128x32xf32>
    %28 = tpu.matmul %21, %27, %cst_21 {dimension_numbers = #tpu.dot_dimension_numbers<[0], [0], [1], [1], [0, 1, 1, 1], [], []>} : vector<128x128xbf16>, vector<128x32xbf16>, vector<128x32xf32> -> vector<128x32xf32>
    %29 = arith.truncf %28 : vector<128x32xf32> to vector<128x32xbf16>
    %cst_22 = arith.constant dense<0.000000e+00> : vector<128x32xf32>
    %30 = tpu.matmul %21, %29, %cst_22 {dimension_numbers = #tpu.dot_dimension_numbers<[1], [0], [0], [1], [0, 0, 1, 1], [], []>} : vector<128x128xbf16>, vector<128x32xbf16>, vector<128x32xf32> -> vector<128x32xf32>
    %cst_23 = arith.constant dense<0xFF800000> : vector<128xf32>
    %31 = vector.multi_reduction <maximumf>, %30, %cst_23 [1] : vector<128x32xf32> to vector<128xf32>
    %32 = vector.shape_cast %31 : vector<128xf32> to vector<128x1xf32>
    %33 = vector.broadcast %32 : vector<128x1xf32> to vector<128x32xf32>
    %34 = arith.subf %30, %33 : vector<128x32xf32>
    %35 = math.exp %34 : vector<128x32xf32>
    %cst_24 = arith.constant dense<0.000000e+00> : vector<128xf32>
    %36 = vector.multi_reduction <add>, %35, %cst_24 [1] : vector<128x32xf32> to vector<128xf32>
    %37 = vector.shape_cast %36 : vector<128xf32> to vector<128x1xf32>
    %38 = vector.broadcast %37 : vector<128x1xf32> to vector<128x32xf32>
    %39 = arith.divf %35, %38 : vector<128x32xf32>
    %c0_25 = arith.constant 0 : index
    %c0_26 = arith.constant 0 : index
    %40 = vector.load %arg10[%c0_25, %c0_26] : memref<32x32xf32, #tpu.memory_space<vmem>>, vector<32x32xf32>
    %cst_27 = arith.constant dense<0.000000e+00> : vector<128x32xf32>
    %41 = tpu.matmul %39, %40, %cst_27 {dimension_numbers = #tpu.dot_dimension_numbers<[1], [0], [0], [1], [0, 0, 1, 1], [], []>} : vector<128x32xf32>, vector<32x32xf32>, vector<128x32xf32> -> vector<128x32xf32>
    %42 = tpu.concatenate %19, %41 in 0 : vector<128x32xf32>, vector<128x32xf32> -> vector<256x32xf32>
    %c0_28 = arith.constant 0 : index
    %c0_29 = arith.constant 0 : index
    %43 = vector.load %arg11[%c0_28, %c0_29] : memref<32x32xf32, #tpu.memory_space<vmem>>, vector<32x32xf32>
    %cst_30 = arith.constant dense<0.000000e+00> : vector<256x32xf32>
    %44 = tpu.matmul %42, %43, %cst_30 {dimension_numbers = #tpu.dot_dimension_numbers<[1], [0], [0], [1], [0, 0, 1, 1], [], []>} : vector<256x32xf32>, vector<32x32xf32>, vector<256x32xf32> -> vector<256x32xf32>
    %c0_31 = arith.constant 0 : index
    %c0_32 = arith.constant 0 : index
    %45 = vector.load %arg12[%c0_31, %c0_32] : memref<1x32xf32, #tpu.memory_space<vmem>>, vector<1x32xf32>
    %46 = vector.broadcast %45 : vector<1x32xf32> to vector<256x32xf32>
    %47 = arith.addf %44, %46 : vector<256x32xf32>
    %48 = math.tanh %47 : vector<256x32xf32>
    %c0_33 = arith.constant 0 : index
    %c0_34 = arith.constant 0 : index
    %49 = vector.load %arg13[%c0_33, %c0_34] : memref<1x32xf32, #tpu.memory_space<vmem>>, vector<1x32xf32>
    %50 = vector.broadcast %49 : vector<1x32xf32> to vector<256x32xf32>
    %51 = arith.mulf %48, %50 : vector<256x32xf32>
    %cst_35 = arith.constant dense<0.000000e+00> : vector<256xf32>
    %52 = vector.multi_reduction <add>, %51, %cst_35 [1] : vector<256x32xf32> to vector<256xf32>
    %53 = vector.shape_cast %52 : vector<256xf32> to vector<256x1xf32>
    %c0_36 = arith.constant 0 : index
    %c0_37 = arith.constant 0 : index
    %54 = vector.load %arg14[%c0_36, %c0_37] : memref<1x1xf32, #tpu.memory_space<vmem>>, vector<1x1xf32>
    %55 = vector.broadcast %54 : vector<1x1xf32> to vector<256x1xf32>
    %56 = arith.addf %53, %55 : vector<256x1xf32>
    %57 = vector.extract_strided_slice %56 {offsets = [0, 0], sizes = [128, 1], strides = [1, 1]} : vector<256x1xf32> to vector<128x1xf32>
    %58 = vector.extract_strided_slice %56 {offsets = [128, 0], sizes = [128, 1], strides = [1, 1]} : vector<256x1xf32> to vector<128x1xf32>
    %59 = arith.maximumf %57, %58 : vector<128x1xf32>
    %60 = arith.subf %57, %59 : vector<128x1xf32>
    %61 = math.exp %60 : vector<128x1xf32>
    %62 = arith.subf %58, %59 : vector<128x1xf32>
    %63 = math.exp %62 : vector<128x1xf32>
    %64 = arith.addf %61, %63 : vector<128x1xf32>
    %cst_38 = arith.constant 1.000000e+00 : f32
    %65 = vector.broadcast %cst_38 : f32 to vector<128x1xf32>
    %66 = arith.divf %65, %64 : vector<128x1xf32>
    %67 = arith.mulf %61, %66 : vector<128x1xf32>
    %68 = vector.broadcast %67 : vector<128x1xf32> to vector<128x32xf32>
    %69 = arith.mulf %68, %19 : vector<128x32xf32>
    %70 = arith.mulf %63, %66 : vector<128x1xf32>
    %71 = vector.broadcast %70 : vector<128x1xf32> to vector<128x32xf32>
    %72 = arith.mulf %71, %41 : vector<128x32xf32>
    %73 = arith.addf %69, %72 : vector<128x32xf32>
    %c1 = arith.constant 1 : index
    %c0_39 = arith.constant 0 : index
    %c0_40 = arith.constant 0 : index
    %74 = vector.load %arg8[%c1, %c0_39, %c0_40] : memref<3x128x128xbf16, #tpu.memory_space<vmem>>, vector<1x128x128xbf16>
    %75 = vector.shape_cast %74 : vector<1x128x128xbf16> to vector<128x128xbf16>
    %cst_41 = arith.constant 0.000000e+00 : f32
    %76 = vector.broadcast %cst_41 : f32 to vector<128x32xf32>
    %77 = arith.maximumf %73, %76 : vector<128x32xf32>
    %c0_42 = arith.constant 0 : index
    %c0_43 = arith.constant 0 : index
    %78 = vector.load %arg9[%c0_42, %c0_43] : memref<1x32xf32, #tpu.memory_space<vmem>>, vector<1x32xf32>
    %79 = vector.broadcast %78 : vector<1x32xf32> to vector<128x32xf32>
    %80 = arith.addf %77, %79 : vector<128x32xf32>
    %81 = arith.truncf %80 : vector<128x32xf32> to vector<128x32xbf16>
    %cst_44 = arith.constant dense<0.000000e+00> : vector<128x32xf32>
    %82 = tpu.matmul %75, %81, %cst_44 {dimension_numbers = #tpu.dot_dimension_numbers<[0], [0], [1], [1], [0, 1, 1, 1], [], []>} : vector<128x128xbf16>, vector<128x32xbf16>, vector<128x32xf32> -> vector<128x32xf32>
    %83 = arith.truncf %82 : vector<128x32xf32> to vector<128x32xbf16>
    %cst_45 = arith.constant dense<0.000000e+00> : vector<128x32xf32>
    %84 = tpu.matmul %75, %83, %cst_45 {dimension_numbers = #tpu.dot_dimension_numbers<[1], [0], [0], [1], [0, 0, 1, 1], [], []>} : vector<128x128xbf16>, vector<128x32xbf16>, vector<128x32xf32> -> vector<128x32xf32>
    %cst_46 = arith.constant dense<0xFF800000> : vector<128xf32>
    %85 = vector.multi_reduction <maximumf>, %84, %cst_46 [1] : vector<128x32xf32> to vector<128xf32>
    %86 = vector.shape_cast %85 : vector<128xf32> to vector<128x1xf32>
    %87 = vector.broadcast %86 : vector<128x1xf32> to vector<128x32xf32>
    %88 = arith.subf %84, %87 : vector<128x32xf32>
    %89 = math.exp %88 : vector<128x32xf32>
    %cst_47 = arith.constant dense<0.000000e+00> : vector<128xf32>
    %90 = vector.multi_reduction <add>, %89, %cst_47 [1] : vector<128x32xf32> to vector<128xf32>
    %91 = vector.shape_cast %90 : vector<128xf32> to vector<128x1xf32>
    %92 = vector.broadcast %91 : vector<128x1xf32> to vector<128x32xf32>
    %93 = arith.divf %89, %92 : vector<128x32xf32>
    %c0_48 = arith.constant 0 : index
    %c0_49 = arith.constant 0 : index
    %94 = vector.load %arg10[%c0_48, %c0_49] : memref<32x32xf32, #tpu.memory_space<vmem>>, vector<32x32xf32>
    %cst_50 = arith.constant dense<0.000000e+00> : vector<128x32xf32>
    %95 = tpu.matmul %93, %94, %cst_50 {dimension_numbers = #tpu.dot_dimension_numbers<[1], [0], [0], [1], [0, 0, 1, 1], [], []>} : vector<128x32xf32>, vector<32x32xf32>, vector<128x32xf32> -> vector<128x32xf32>
    %96 = tpu.concatenate %73, %95 in 0 : vector<128x32xf32>, vector<128x32xf32> -> vector<256x32xf32>
    %c0_51 = arith.constant 0 : index
    %c0_52 = arith.constant 0 : index
    %97 = vector.load %arg11[%c0_51, %c0_52] : memref<32x32xf32, #tpu.memory_space<vmem>>, vector<32x32xf32>
    %cst_53 = arith.constant dense<0.000000e+00> : vector<256x32xf32>
    %98 = tpu.matmul %96, %97, %cst_53 {dimension_numbers = #tpu.dot_dimension_numbers<[1], [0], [0], [1], [0, 0, 1, 1], [], []>} : vector<256x32xf32>, vector<32x32xf32>, vector<256x32xf32> -> vector<256x32xf32>
    %c0_54 = arith.constant 0 : index
    %c0_55 = arith.constant 0 : index
    %99 = vector.load %arg12[%c0_54, %c0_55] : memref<1x32xf32, #tpu.memory_space<vmem>>, vector<1x32xf32>
    %100 = vector.broadcast %99 : vector<1x32xf32> to vector<256x32xf32>
    %101 = arith.addf %98, %100 : vector<256x32xf32>
    %102 = math.tanh %101 : vector<256x32xf32>
    %c0_56 = arith.constant 0 : index
    %c0_57 = arith.constant 0 : index
    %103 = vector.load %arg13[%c0_56, %c0_57] : memref<1x32xf32, #tpu.memory_space<vmem>>, vector<1x32xf32>
    %104 = vector.broadcast %103 : vector<1x32xf32> to vector<256x32xf32>
    %105 = arith.mulf %102, %104 : vector<256x32xf32>
    %cst_58 = arith.constant dense<0.000000e+00> : vector<256xf32>
    %106 = vector.multi_reduction <add>, %105, %cst_58 [1] : vector<256x32xf32> to vector<256xf32>
    %107 = vector.shape_cast %106 : vector<256xf32> to vector<256x1xf32>
    %c0_59 = arith.constant 0 : index
    %c0_60 = arith.constant 0 : index
    %108 = vector.load %arg14[%c0_59, %c0_60] : memref<1x1xf32, #tpu.memory_space<vmem>>, vector<1x1xf32>
    %109 = vector.broadcast %108 : vector<1x1xf32> to vector<256x1xf32>
    %110 = arith.addf %107, %109 : vector<256x1xf32>
    %111 = vector.extract_strided_slice %110 {offsets = [0, 0], sizes = [128, 1], strides = [1, 1]} : vector<256x1xf32> to vector<128x1xf32>
    %112 = vector.extract_strided_slice %110 {offsets = [128, 0], sizes = [128, 1], strides = [1, 1]} : vector<256x1xf32> to vector<128x1xf32>
    %113 = arith.maximumf %111, %112 : vector<128x1xf32>
    %114 = arith.subf %111, %113 : vector<128x1xf32>
    %115 = math.exp %114 : vector<128x1xf32>
    %116 = arith.subf %112, %113 : vector<128x1xf32>
    %117 = math.exp %116 : vector<128x1xf32>
    %118 = arith.addf %115, %117 : vector<128x1xf32>
    %cst_61 = arith.constant 1.000000e+00 : f32
    %119 = vector.broadcast %cst_61 : f32 to vector<128x1xf32>
    %120 = arith.divf %119, %118 : vector<128x1xf32>
    %121 = arith.mulf %115, %120 : vector<128x1xf32>
    %122 = vector.broadcast %121 : vector<128x1xf32> to vector<128x32xf32>
    %123 = arith.mulf %122, %73 : vector<128x32xf32>
    %124 = arith.mulf %117, %120 : vector<128x1xf32>
    %125 = vector.broadcast %124 : vector<128x1xf32> to vector<128x32xf32>
    %126 = arith.mulf %125, %95 : vector<128x32xf32>
    %127 = arith.addf %123, %126 : vector<128x32xf32>
    %c2 = arith.constant 2 : index
    %c0_62 = arith.constant 0 : index
    %c0_63 = arith.constant 0 : index
    %128 = vector.load %arg8[%c2, %c0_62, %c0_63] : memref<3x128x128xbf16, #tpu.memory_space<vmem>>, vector<1x128x128xbf16>
    %129 = vector.shape_cast %128 : vector<1x128x128xbf16> to vector<128x128xbf16>
    %cst_64 = arith.constant 0.000000e+00 : f32
    %130 = vector.broadcast %cst_64 : f32 to vector<128x32xf32>
    %131 = arith.maximumf %127, %130 : vector<128x32xf32>
    %c0_65 = arith.constant 0 : index
    %c0_66 = arith.constant 0 : index
    %132 = vector.load %arg9[%c0_65, %c0_66] : memref<1x32xf32, #tpu.memory_space<vmem>>, vector<1x32xf32>
    %133 = vector.broadcast %132 : vector<1x32xf32> to vector<128x32xf32>
    %134 = arith.addf %131, %133 : vector<128x32xf32>
    %135 = arith.truncf %134 : vector<128x32xf32> to vector<128x32xbf16>
    %cst_67 = arith.constant dense<0.000000e+00> : vector<128x32xf32>
    %136 = tpu.matmul %129, %135, %cst_67 {dimension_numbers = #tpu.dot_dimension_numbers<[0], [0], [1], [1], [0, 1, 1, 1], [], []>} : vector<128x128xbf16>, vector<128x32xbf16>, vector<128x32xf32> -> vector<128x32xf32>
    %137 = arith.truncf %136 : vector<128x32xf32> to vector<128x32xbf16>
    %cst_68 = arith.constant dense<0.000000e+00> : vector<128x32xf32>
    %138 = tpu.matmul %129, %137, %cst_68 {dimension_numbers = #tpu.dot_dimension_numbers<[1], [0], [0], [1], [0, 0, 1, 1], [], []>} : vector<128x128xbf16>, vector<128x32xbf16>, vector<128x32xf32> -> vector<128x32xf32>
    %cst_69 = arith.constant dense<0xFF800000> : vector<128xf32>
    %139 = vector.multi_reduction <maximumf>, %138, %cst_69 [1] : vector<128x32xf32> to vector<128xf32>
    %140 = vector.shape_cast %139 : vector<128xf32> to vector<128x1xf32>
    %141 = vector.broadcast %140 : vector<128x1xf32> to vector<128x32xf32>
    %142 = arith.subf %138, %141 : vector<128x32xf32>
    %143 = math.exp %142 : vector<128x32xf32>
    %cst_70 = arith.constant dense<0.000000e+00> : vector<128xf32>
    %144 = vector.multi_reduction <add>, %143, %cst_70 [1] : vector<128x32xf32> to vector<128xf32>
    %145 = vector.shape_cast %144 : vector<128xf32> to vector<128x1xf32>
    %146 = vector.broadcast %145 : vector<128x1xf32> to vector<128x32xf32>
    %147 = arith.divf %143, %146 : vector<128x32xf32>
    %c0_71 = arith.constant 0 : index
    %c0_72 = arith.constant 0 : index
    %148 = vector.load %arg10[%c0_71, %c0_72] : memref<32x32xf32, #tpu.memory_space<vmem>>, vector<32x32xf32>
    %cst_73 = arith.constant dense<0.000000e+00> : vector<128x32xf32>
    %149 = tpu.matmul %147, %148, %cst_73 {dimension_numbers = #tpu.dot_dimension_numbers<[1], [0], [0], [1], [0, 0, 1, 1], [], []>} : vector<128x32xf32>, vector<32x32xf32>, vector<128x32xf32> -> vector<128x32xf32>
    %150 = tpu.concatenate %127, %149 in 0 : vector<128x32xf32>, vector<128x32xf32> -> vector<256x32xf32>
    %c0_74 = arith.constant 0 : index
    %c0_75 = arith.constant 0 : index
    %151 = vector.load %arg11[%c0_74, %c0_75] : memref<32x32xf32, #tpu.memory_space<vmem>>, vector<32x32xf32>
    %cst_76 = arith.constant dense<0.000000e+00> : vector<256x32xf32>
    %152 = tpu.matmul %150, %151, %cst_76 {dimension_numbers = #tpu.dot_dimension_numbers<[1], [0], [0], [1], [0, 0, 1, 1], [], []>} : vector<256x32xf32>, vector<32x32xf32>, vector<256x32xf32> -> vector<256x32xf32>
    %c0_77 = arith.constant 0 : index
    %c0_78 = arith.constant 0 : index
    %153 = vector.load %arg12[%c0_77, %c0_78] : memref<1x32xf32, #tpu.memory_space<vmem>>, vector<1x32xf32>
    %154 = vector.broadcast %153 : vector<1x32xf32> to vector<256x32xf32>
    %155 = arith.addf %152, %154 : vector<256x32xf32>
    %156 = math.tanh %155 : vector<256x32xf32>
    %c0_79 = arith.constant 0 : index
    %c0_80 = arith.constant 0 : index
    %157 = vector.load %arg13[%c0_79, %c0_80] : memref<1x32xf32, #tpu.memory_space<vmem>>, vector<1x32xf32>
    %158 = vector.broadcast %157 : vector<1x32xf32> to vector<256x32xf32>
    %159 = arith.mulf %156, %158 : vector<256x32xf32>
    %cst_81 = arith.constant dense<0.000000e+00> : vector<256xf32>
    %160 = vector.multi_reduction <add>, %159, %cst_81 [1] : vector<256x32xf32> to vector<256xf32>
    %161 = vector.shape_cast %160 : vector<256xf32> to vector<256x1xf32>
    %c0_82 = arith.constant 0 : index
    %c0_83 = arith.constant 0 : index
    %162 = vector.load %arg14[%c0_82, %c0_83] : memref<1x1xf32, #tpu.memory_space<vmem>>, vector<1x1xf32>
    %163 = vector.broadcast %162 : vector<1x1xf32> to vector<256x1xf32>
    %164 = arith.addf %161, %163 : vector<256x1xf32>
    %165 = vector.extract_strided_slice %164 {offsets = [0, 0], sizes = [128, 1], strides = [1, 1]} : vector<256x1xf32> to vector<128x1xf32>
    %166 = vector.extract_strided_slice %164 {offsets = [128, 0], sizes = [128, 1], strides = [1, 1]} : vector<256x1xf32> to vector<128x1xf32>
    %167 = arith.maximumf %165, %166 : vector<128x1xf32>
    %168 = arith.subf %165, %167 : vector<128x1xf32>
    %169 = math.exp %168 : vector<128x1xf32>
    %170 = arith.subf %166, %167 : vector<128x1xf32>
    %171 = math.exp %170 : vector<128x1xf32>
    %172 = arith.addf %169, %171 : vector<128x1xf32>
    %cst_84 = arith.constant 1.000000e+00 : f32
    %173 = vector.broadcast %cst_84 : f32 to vector<128x1xf32>
    %174 = arith.divf %173, %172 : vector<128x1xf32>
    %175 = arith.mulf %169, %174 : vector<128x1xf32>
    %176 = vector.broadcast %175 : vector<128x1xf32> to vector<128x32xf32>
    %177 = arith.mulf %176, %127 : vector<128x32xf32>
    %178 = arith.mulf %171, %174 : vector<128x1xf32>
    %179 = vector.broadcast %178 : vector<128x1xf32> to vector<128x32xf32>
    %180 = arith.mulf %179, %149 : vector<128x32xf32>
    %181 = arith.addf %177, %180 : vector<128x32xf32>
    %c0_85 = arith.constant 0 : index
    %c0_86 = arith.constant 0 : index
    %182 = vector.load %arg15[%c0_85, %c0_86] : memref<16x1xi32, #tpu.memory_space<vmem>>, vector<16x1xi32>
    %c0_87 = arith.constant 0 : index
    %c0_88 = arith.constant 0 : index
    %183 = vector.load %arg16[%c0_87, %c0_88] : memref<16x1xf32, #tpu.memory_space<vmem>>, vector<16x1xf32>
    %c0_i32 = arith.constant 0 : i32
    %184 = vector.broadcast %c0_i32 : i32 to vector<16x1xi32>
    %cst_89 = arith.constant 1.000000e+00 : f32
    %185 = vector.broadcast %cst_89 : f32 to vector<16x1xf32>
    %186 = arith.cmpf ogt, %183, %185 : vector<16x1xf32>
    %187 = arith.extui %186 : vector<16x1xi1> to vector<16x1xi32>
    %188 = arith.addi %184, %187 : vector<16x1xi32>
    %cst_90 = arith.constant 2.000000e+00 : f32
    %189 = vector.broadcast %cst_90 : f32 to vector<16x1xf32>
    %190 = arith.cmpf ogt, %183, %189 : vector<16x1xf32>
    %191 = arith.extui %190 : vector<16x1xi1> to vector<16x1xi32>
    %192 = arith.addi %188, %191 : vector<16x1xi32>
    %cst_91 = arith.constant 3.000000e+00 : f32
    %193 = vector.broadcast %cst_91 : f32 to vector<16x1xf32>
    %194 = arith.cmpf ogt, %183, %193 : vector<16x1xf32>
    %195 = arith.extui %194 : vector<16x1xi1> to vector<16x1xi32>
    %196 = arith.addi %192, %195 : vector<16x1xi32>
    %197 = tpu.concatenate %19, %73, %127, %181 in 0 : vector<128x32xf32>, vector<128x32xf32>, vector<128x32xf32>, vector<128x32xf32> -> vector<512x32xf32>
    %198 = tpu.iota {dimensions = array<i32: 1>} : vector<16x512xi32>
    %c128_i32 = arith.constant 128 : i32
    %199 = vector.broadcast %c128_i32 : i32 to vector<16x1xi32>
    %200 = arith.muli %196, %199 : vector<16x1xi32>
    %201 = arith.addi %200, %182 : vector<16x1xi32>
    %202 = vector.broadcast %201 : vector<16x1xi32> to vector<16x512xi32>
    %203 = arith.cmpi eq, %198, %202 : vector<16x512xi32>
    %c0_i32_92 = arith.constant 0 : i32
    %204 = vector.broadcast %c0_i32_92 : i32 to vector<16x1xi32>
    %205 = arith.cmpi ne, %182, %204 : vector<16x1xi32>
    %206 = vector.broadcast %205 : vector<16x1xi1> to vector<16x512xi1>
    %207 = arith.andi %203, %206 : vector<16x512xi1>
    %208 = arith.extui %207 : vector<16x512xi1> to vector<16x512xi32>
    %209 = arith.sitofp %208 : vector<16x512xi32> to vector<16x512xf32>
    %cst_93 = arith.constant dense<0.000000e+00> : vector<16x32xf32>
    %210 = tpu.matmul %209, %197, %cst_93 {dimension_numbers = #tpu.dot_dimension_numbers<[1], [0], [0], [1], [0, 0, 1, 1], [], []>} : vector<16x512xf32>, vector<512x32xf32>, vector<16x32xf32> -> vector<16x32xf32>
    %211 = tpu.iota {dimensions = array<i32: 1>} : vector<16x128xi32>
    %212 = vector.broadcast %182 : vector<16x1xi32> to vector<16x128xi32>
    %213 = arith.cmpi eq, %211, %212 : vector<16x128xi32>
    %214 = arith.extui %213 : vector<16x128xi1> to vector<16x128xi32>
    %215 = arith.sitofp %214 : vector<16x128xi32> to vector<16x128xf32>
    %cst_94 = arith.constant dense<0.000000e+00> : vector<16x32xf32>
    %216 = tpu.matmul %215, %19, %cst_94 {dimension_numbers = #tpu.dot_dimension_numbers<[1], [0], [0], [1], [0, 0, 1, 1], [], []>} : vector<16x128xf32>, vector<128x32xf32>, vector<16x32xf32> -> vector<16x32xf32>
    %217 = tpu.concatenate %210, %216 in 0 : vector<16x32xf32>, vector<16x32xf32> -> vector<32x32xf32>
    %c0_95 = arith.constant 0 : index
    %c0_96 = arith.constant 0 : index
    %218 = vector.load %arg18[%c0_95, %c0_96] : memref<32x32xf32, #tpu.memory_space<vmem>>, vector<32x32xf32>
    %cst_97 = arith.constant dense<0.000000e+00> : vector<32x32xf32>
    %219 = tpu.matmul %217, %218, %cst_97 {dimension_numbers = #tpu.dot_dimension_numbers<[1], [0], [0], [1], [0, 0, 1, 1], [], []>} : vector<32x32xf32>, vector<32x32xf32>, vector<32x32xf32> -> vector<32x32xf32>
    %c0_98 = arith.constant 0 : index
    %c0_99 = arith.constant 0 : index
    %220 = vector.load %arg19[%c0_98, %c0_99] : memref<1x32xf32, #tpu.memory_space<vmem>>, vector<1x32xf32>
    %221 = vector.broadcast %220 : vector<1x32xf32> to vector<32x32xf32>
    %222 = arith.addf %219, %221 : vector<32x32xf32>
    %223 = math.tanh %222 : vector<32x32xf32>
    %c0_100 = arith.constant 0 : index
    %c0_101 = arith.constant 0 : index
    %224 = vector.load %arg20[%c0_100, %c0_101] : memref<1x32xf32, #tpu.memory_space<vmem>>, vector<1x32xf32>
    %225 = vector.broadcast %224 : vector<1x32xf32> to vector<32x32xf32>
    %226 = arith.mulf %223, %225 : vector<32x32xf32>
    %cst_102 = arith.constant dense<0.000000e+00> : vector<32xf32>
    %227 = vector.multi_reduction <add>, %226, %cst_102 [1] : vector<32x32xf32> to vector<32xf32>
    %228 = vector.shape_cast %227 : vector<32xf32> to vector<32x1xf32>
    %c0_103 = arith.constant 0 : index
    %c0_104 = arith.constant 0 : index
    %229 = vector.load %arg21[%c0_103, %c0_104] : memref<1x1xf32, #tpu.memory_space<vmem>>, vector<1x1xf32>
    %230 = vector.broadcast %229 : vector<1x1xf32> to vector<32x1xf32>
    %231 = arith.addf %228, %230 : vector<32x1xf32>
    %232 = vector.extract_strided_slice %231 {offsets = [0, 0], sizes = [16, 1], strides = [1, 1]} : vector<32x1xf32> to vector<16x1xf32>
    %233 = vector.extract_strided_slice %231 {offsets = [16, 0], sizes = [16, 1], strides = [1, 1]} : vector<32x1xf32> to vector<16x1xf32>
    %234 = arith.maximumf %232, %233 : vector<16x1xf32>
    %235 = arith.subf %232, %234 : vector<16x1xf32>
    %236 = math.exp %235 : vector<16x1xf32>
    %237 = arith.subf %233, %234 : vector<16x1xf32>
    %238 = math.exp %237 : vector<16x1xf32>
    %239 = arith.addf %236, %238 : vector<16x1xf32>
    %cst_105 = arith.constant 1.000000e+00 : f32
    %240 = vector.broadcast %cst_105 : f32 to vector<16x1xf32>
    %241 = arith.divf %240, %239 : vector<16x1xf32>
    %242 = arith.mulf %236, %241 : vector<16x1xf32>
    %243 = vector.broadcast %242 : vector<16x1xf32> to vector<16x32xf32>
    %244 = arith.mulf %243, %210 : vector<16x32xf32>
    %245 = arith.mulf %238, %241 : vector<16x1xf32>
    %246 = vector.broadcast %245 : vector<16x1xf32> to vector<16x32xf32>
    %247 = arith.mulf %246, %216 : vector<16x32xf32>
    %248 = arith.addf %244, %247 : vector<16x32xf32>
    %c0_106 = arith.constant 0 : index
    %c0_107 = arith.constant 0 : index
    %249 = vector.load %arg22[%c0_106, %c0_107] : memref<32x128xf32, #tpu.memory_space<vmem>>, vector<32x128xf32>
    %cst_108 = arith.constant dense<0.000000e+00> : vector<16x128xf32>
    %250 = tpu.matmul %248, %249, %cst_108 {dimension_numbers = #tpu.dot_dimension_numbers<[1], [0], [0], [1], [0, 0, 1, 1], [], []>} : vector<16x32xf32>, vector<32x128xf32>, vector<16x128xf32> -> vector<16x128xf32>
    %c0_109 = arith.constant 0 : index
    %c0_110 = arith.constant 0 : index
    %251 = vector.load %arg23[%c0_109, %c0_110] : memref<1x128xf32, #tpu.memory_space<vmem>>, vector<1x128xf32>
    %252 = vector.broadcast %251 : vector<1x128xf32> to vector<16x128xf32>
    %253 = arith.addf %250, %252 : vector<16x128xf32>
    %c0_111 = arith.constant 0 : index
    %c0_112 = arith.constant 0 : index
    %254 = vector.load %arg17[%c0_111, %c0_112] : memref<16x16xf32, #tpu.memory_space<vmem>>, vector<16x16xf32>
    %cst_113 = arith.constant dense<0.000000e+00> : vector<16x128xf32>
    %255 = tpu.matmul %254, %215, %cst_113 {dimension_numbers = #tpu.dot_dimension_numbers<[1], [0], [0], [1], [0, 0, 1, 1], [], []>} : vector<16x16xf32>, vector<16x128xf32>, vector<16x128xf32> -> vector<16x128xf32>
    %cst_114 = arith.constant 5.000000e-01 : f32
    %256 = vector.broadcast %cst_114 : f32 to vector<16x128xf32>
    %257 = arith.cmpf ogt, %255, %256 : vector<16x128xf32>
    %c0_i32_115 = arith.constant 0 : i32
    %258 = vector.broadcast %c0_i32_115 : i32 to vector<16x128xi32>
    %259 = arith.cmpi eq, %211, %258 : vector<16x128xi32>
    %260 = arith.ori %257, %259 : vector<16x128xi1>
    %cst_116 = arith.constant -1.000000e+03 : f32
    %cst_117 = arith.constant 0.000000e+00 : f32
    %261 = vector.broadcast %cst_116 : f32 to vector<16x128xf32>
    %262 = vector.broadcast %cst_117 : f32 to vector<16x128xf32>
    %263 = arith.select %260, %261, %262 : vector<16x128xi1>, vector<16x128xf32>
    %264 = arith.addf %253, %263 : vector<16x128xf32>
    %c0_118 = arith.constant 0 : index
    %c0_119 = arith.constant 0 : index
    %265 = vector.load %arg24[%c0_118, %c0_119] : memref<16x128xf32, #tpu.memory_space<vmem>>, vector<16x128xf32>
    tpu.vector_store %arg24[%c0_118, %c0_119], %264 {strides = array<i32>} : memref<16x128xf32, #tpu.memory_space<vmem>>, vector<16x128xf32>,
    return
  }
  func.func @transform_0(%arg0: i32) -> (i32, i32) {
    %c0_i32 = arith.constant 0 : i32
    %c0_i32_0 = arith.constant 0 : i32
    %c0_i32_1 = arith.constant 0 : i32
    return %c0_i32, %c0_i32_0 : i32, i32
  }
  func.func @transform_1(%arg0: i32) -> (i32, i32) {
    %c0_i32 = arith.constant 0 : i32
    %c0_i32_0 = arith.constant 0 : i32
    %c0_i32_1 = arith.constant 0 : i32
    return %c0_i32, %c0_i32_0 : i32, i32
  }
  func.func @transform_2(%arg0: i32) -> (i32, i32) {
    %c0_i32 = arith.constant 0 : i32
    %c0_i32_0 = arith.constant 0 : i32
    %c0_i32_1 = arith.constant 0 : i32
    return %c0_i32, %c0_i32_0 : i32, i32
  }
  func.func @transform_3(%arg0: i32) -> (i32, i32) {
    %c0_i32 = arith.constant 0 : i32
    %c0_i32_0 = arith.constant 0 : i32
    %c0_i32_1 = arith.constant 0 : i32
    return %c0_i32, %c0_i32_0 : i32, i32
  }
  func.func @transform_4(%arg0: i32) -> (i32, i32) {
    %c0_i32 = arith.constant 0 : i32
    %c0_i32_0 = arith.constant 0 : i32
    %c0_i32_1 = arith.constant 0 : i32
    return %c0_i32, %c0_i32_0 : i32, i32
  }
  func.func @transform_5(%arg0: i32) -> (i32, i32) {
    %c0_i32 = arith.constant 0 : i32
    %c0_i32_0 = arith.constant 0 : i32
    %c0_i32_1 = arith.constant 0 : i32
    return %c0_i32, %c0_i32_0 : i32, i32
  }
  func.func @transform_6(%arg0: i32) -> (i32, i32) {
    %c0_i32 = arith.constant 0 : i32
    %c0_i32_0 = arith.constant 0 : i32
    %c0_i32_1 = arith.constant 0 : i32
    return %c0_i32, %c0_i32_0 : i32, i32
  }
  func.func @transform_7(%arg0: i32) -> (i32, i32, i32) {
    %c0_i32 = arith.constant 0 : i32
    %c0_i32_0 = arith.constant 0 : i32
    %c0_i32_1 = arith.constant 0 : i32
    %c0_i32_2 = arith.constant 0 : i32
    return %c0_i32, %c0_i32_0, %c0_i32_1 : i32, i32, i32
  }
  func.func @transform_8(%arg0: i32) -> (i32, i32) {
    %c0_i32 = arith.constant 0 : i32
    %c0_i32_0 = arith.constant 0 : i32
    %c0_i32_1 = arith.constant 0 : i32
    return %c0_i32, %c0_i32_0 : i32, i32
  }
  func.func @transform_9(%arg0: i32) -> (i32, i32) {
    %c0_i32 = arith.constant 0 : i32
    %c0_i32_0 = arith.constant 0 : i32
    %c0_i32_1 = arith.constant 0 : i32
    return %c0_i32, %c0_i32_0 : i32, i32
  }
  func.func @transform_10(%arg0: i32) -> (i32, i32) {
    %c0_i32 = arith.constant 0 : i32
    %c0_i32_0 = arith.constant 0 : i32
    %c0_i32_1 = arith.constant 0 : i32
    return %c0_i32, %c0_i32_0 : i32, i32
  }
  func.func @transform_11(%arg0: i32) -> (i32, i32) {
    %c0_i32 = arith.constant 0 : i32
    %c0_i32_0 = arith.constant 0 : i32
    %c0_i32_1 = arith.constant 0 : i32
    return %c0_i32, %c0_i32_0 : i32, i32
  }
  func.func @transform_12(%arg0: i32) -> (i32, i32) {
    %c0_i32 = arith.constant 0 : i32
    %c0_i32_0 = arith.constant 0 : i32
    %c0_i32_1 = arith.constant 0 : i32
    return %c0_i32, %c0_i32_0 : i32, i32
  }
  func.func @transform_13(%arg0: i32) -> (i32, i32) {
    %c0_i32 = arith.constant 0 : i32
    %c0_i32_0 = arith.constant 0 : i32
    %c0_i32_1 = arith.constant 0 : i32
    return %c0_i32, %c0_i32_0 : i32, i32
  }
  func.func @transform_14(%arg0: i32) -> (i32, i32) {
    %c0_i32 = arith.constant 0 : i32
    %c0_i32_0 = arith.constant 0 : i32
    %c0_i32_1 = arith.constant 0 : i32
    return %c0_i32, %c0_i32_0 : i32, i32
  }
  func.func @transform_15(%arg0: i32) -> (i32, i32) {
    %c0_i32 = arith.constant 0 : i32
    %c0_i32_0 = arith.constant 0 : i32
    %c0_i32_1 = arith.constant 0 : i32
    return %c0_i32, %c0_i32_0 : i32, i32
  }
  func.func @transform_16(%arg0: i32) -> (i32, i32) {
    %c0_i32 = arith.constant 0 : i32
    %c0_i32_0 = arith.constant 0 : i32
    %c0_i32_1 = arith.constant 0 : i32
    return %c0_i32, %c0_i32_0 : i32, i32
  }
  func.func @transform_17(%arg0: i32) -> (i32, i32) {
    %c0_i32 = arith.constant 0 : i32
    %c0_i32_0 = arith.constant 0 : i32
    %c0_i32_1 = arith.constant 0 : i32
    return %c0_i32, %c0_i32_0 : i32, i32
  }
  func.func @transform_18(%arg0: i32) -> (i32, i32) {
    %c0_i32 = arith.constant 0 : i32
    %c0_i32_0 = arith.constant 0 : i32
    %c0_i32_1 = arith.constant 0 : i32
    return %c0_i32, %c0_i32_0 : i32, i32
  }
  func.func @transform_19(%arg0: i32) -> (i32, i32) {
    %c0_i32 = arith.constant 0 : i32
    %c0_i32_0 = arith.constant 0 : i32
    %c0_i32_1 = arith.constant 0 : i32
    return %c0_i32, %c0_i32_0 : i32, i32
  }
  func.func @transform_20(%arg0: i32) -> (i32, i32) {
    %c0_i32 = arith.constant 0 : i32
    %c0_i32_0 = arith.constant 0 : i32
    %c0_i32_1 = arith.constant 0 : i32
    return %c0_i32, %c0_i32_0 : i32, i32
  }
  func.func @transform_21(%arg0: i32) -> (i32, i32) {
    %c0_i32 = arith.constant 0 : i32
    %c0_i32_0 = arith.constant 0 : i32
    %c0_i32_1 = arith.constant 0 : i32
    return %c0_i32, %c0_i32_0 : i32, i32
  }
  func.func @transform_22(%arg0: i32) -> (i32, i32) {
    %c0_i32 = arith.constant 0 : i32
    %c0_i32_0 = arith.constant 0 : i32
    %c0_i32_1 = arith.constant 0 : i32
    return %c0_i32, %c0_i32_0 : i32, i32
  }
  func.func @transform_23(%arg0: i32) -> (i32, i32) {
    %c0_i32 = arith.constant 0 : i32
    %c0_i32_0 = arith.constant 0 : i32
    %c0_i32_1 = arith.constant 0 : i32
    return %c0_i32, %c0_i32_0 : i32, i32
  }
}

</mosaic_0001>

<bundles_post_ra>
// kernel: mshgat_forward.1
= control target key start
LH: loop header
LB: loop body
LE: loop exit
PB: predicated region body
PF: predicated region fallthrough
CT: control target
= control target key end

     0   :  { %s11530_s0 = inlined_call_operand.vmem [shape: bf16[128,128], index: 0, kind: input, shape index: {}]   ;;  %s11531_s1 = inlined_call_operand.vmem [shape: f32[128,1], index: 1, kind: input, shape index: {}]   ;;  %s11532_s2 = inlined_call_operand.vmem [shape: bf16[128,32], index: 2, kind: input, shape index: {}]   ;;  %s11533_s3 = inlined_call_operand.vmem [shape: bf16[32,32], index: 3, kind: input, shape index: {}]   ;;  %s11534_s4 = inlined_call_operand.vmem [shape: f32[1,32], index: 4, kind: input, shape index: {}]   ;;  %s11535_s5 = inlined_call_operand.hbm [shape: f32[1,32], index: 5, kind: input, shape index: {}]   ;;  %s11536_s6 = inlined_call_operand.hbm [shape: f32[1,32], index: 6, kind: input, shape index: {}]   ;;  %s11537_s7 = inlined_call_operand.vmem [shape: bf16[3,128,128], index: 7, kind: input, shape index: {}]   ;;  %s11538_s8 = inlined_call_operand.hbm [shape: f32[1,32], index: 8, kind: input, shape index: {}]   ;;  %s11539_s9 = inlined_call_operand.hbm [shape: f32[32,32], index: 9, kind: input, shape index: {}]   ;;  %s11540_s10 = inlined_call_operand.hbm [shape: f32[32,32], index: 10, kind: input, shape index: {}]   ;;  %s11541_s11 = inlined_call_operand.hbm [shape: f32[1,32], index: 11, kind: input, shape index: {}]   ;;  %s11542_s12 = inlined_call_operand.hbm [shape: f32[1,32], index: 12, kind: input, shape index: {}]   ;;  %s11543_s13 = inlined_call_operand.<no memory space> [shape: f32[1,1], index: 13, kind: input, shape index: {}]   ;;  %s11544_s14 = inlined_call_operand.vmem [shape: s32[16,1], index: 14, kind: input, shape index: {}]   ;;  %s11545_s15 = inlined_call_operand.vmem [shape: f32[16,1], index: 15, kind: input, shape index: {}]   ;;  %s11546_s16 = inlined_call_operand.vmem [shape: f32[16,16], index: 16, kind: input, shape index: {}]   ;;  %s11547_s17 = inlined_call_operand.hbm [shape: f32[32,32], index: 17, kind: input, shape index: {}]   ;;  %s11548_s18 = inlined_call_operand.hbm [shape: f32[1,32], index: 18, kind: input, shape index: {}]   ;;  %s11549_s19 = inlined_call_operand.hbm [shape: f32[1,32], index: 19, kind: input, shape index: {}]   ;;  %s11550_s21 = inlined_call_operand.hbm [shape: f32[32,128], index: 21, kind: input, shape index: {}]   ;;  %s11551_s22 = inlined_call_operand.hbm [shape: f32[1,128], index: 22, kind: input, shape index: {}]   ;;  %s11552_s23 = inlined_call_operand.hbm [shape: f32[16,128], index: 23, kind: output, shape index: {}]   ;;  %s11553_s20 = inlined_call_operand.<no memory space> [shape: f32[1,1], index: 20, kind: input, shape index: {}]  }
   0x1   :  { %11658 = sst [smem:[#allocation71_spill]] %s11530_s0  ;;  %v28_v0 = vstv %s11543_s13  ;;  %v30_v1 = vstv %s11553_s20 }
   0x2   :  { %11659 = sst [smem:[#allocation72_spill]] %s11531_s1  ;;  %29 = vst [vmem:[#allocation2] sm:$0x1] %v28_v0  ;;  %31 = vst [vmem:[#allocation3] sm:$0x1] %v30_v1 }
   0x3   :  { %11660 = sst [smem:[#allocation73_spill]] %s11532_s2 }
   0x4   :  { %11661 = sst [smem:[#allocation74_spill]] %s11533_s3 }
   0x5   :  { %11662 = sst [smem:[#allocation75_spill]] %s11534_s4 }
   0x6   :  { %11663 = sst [smem:[#allocation76_spill]] %s11535_s5 }
   0x7   :  { %11664 = sst [smem:[#allocation77_spill]] %s11536_s6 }
   0x8   :  { %11665 = sst [smem:[#allocation78_spill]] %s11537_s7 }
   0x9   :  { %32 = vsyncpa [#allocation5], 0 }
   0xa   :  { %33 = vsyncpa [#allocation8], 0 }
   0xb   :  { %34 = vsyncpa [#allocation11], 0 }
   0xc   :  { %35 = vsyncpa [#allocation14], 0 }
   0xd   :  { %36 = vsyncpa [#allocation17], 0 }
   0xe   :  { %37 = vsyncpa [#allocation20], 0 }
   0xf   :  { %38 = vsyncpa [#allocation23], 0 }
  0x10   :  { %39 = vsyncpa [#allocation6], 0  ;;  %s8791_s5 = smov [#allocation7]   ;;  %s8792_s26 = smov [#allocation10]  }
  0x11   :  { %s66_s1 = sshll.u32 %s8791_s5, 4  ;;  %s87_s2 = sshll.u32 %s8792_s26, 4  ;;  %s67_s1 = int_to_ptr.vmem [resolvable:$true] %s66_s1  ;;  %s88_s2 = int_to_ptr.vmem [resolvable:$true] %s87_s2 }
  0x12   :  { %s8523_s13 = scalar_lea.vmem %s67_s1, 16  ;;  %s8527_s6 = scalar_lea.vmem %s67_s1, 32 }
  0x13   :  { %p8524_p0 = scmp.ne.s32.totalorder %s67_s1, %s8523_s13  ;;  %p8528_p1 = scmp.lt.s32.totalorder %s67_s1, %s67_s1 }
  0x14   :  { %p8529_p2 = scmp.lt.s32.totalorder %s8527_s6, %s8523_s13 }
  0x16   :  { %p8530_p3 = por %p8529_p2, %p8528_p1 }
  0x18   :  { %p8531_p4 = pnand %p8530_p3, %p8524_p0 }
  0x1a   :  { %8534 = shalt.err (!%p8531_p4)
}
  0x1b   :  { %s11666_s7 = sld [smem:[#allocation77_spill]]  ;;  %s8543_s28 = scalar_lea.vmem %s88_s2, 512 }
  0x1c   :  { %p8544_p5 = scmp.ne.s32.totalorder %s88_s2, %s8543_s28  ;;  %p8548_p6 = scmp.lt.s32.totalorder %s88_s2, %s88_s2 }
  0x1d   :  { %p8549_p7 = scmp.lt.s32.totalorder %s8543_s28, %s8543_s28 }
  0x1f   :  { %p8550_p8 = por %p8549_p7, %p8548_p6 }
  0x21   :  { %69 = dma.hbm_to_vmem [thread:$0]  %s11666_s7, 16, %s67_s1, [#allocation8]  }
  0x22   :  { %p8551_p9 = pnand %p8550_p8, %p8544_p5 }
  0x24   :  { %8554 = shalt.err (!%p8551_p9)
}
  0x25   :  { %s8793_s29 = smov 128   ;;  %s8794_s3 = smov 8  }
  0x26   :  { %93 = dma.hbm_to_vmem [thread:$0]  %s11539_s9, 512, %s88_s2, [#allocation11], %s8793_s29, %s8793_s29, %s8794_s3  }
  0x27   :  { %s8795_s30 = smov [#allocation13]   ;;  %s8796_s25 = smov [#allocation16]  }
  0x28   :  { %s112_s24 = sshll.u32 %s8795_s30, 4  ;;  %s139_s5 = sshll.u32 %s8796_s25, 4  ;;  %s113_s24 = int_to_ptr.vmem [resolvable:$true] %s112_s24  ;;  %s140_s5 = int_to_ptr.vmem [resolvable:$true] %s139_s5 }
  0x29   :  { %s8563_s1 = scalar_lea.vmem %s113_s24, 16  ;;  %s8567_s26 = scalar_lea.vmem %s113_s24, 32 }
  0x2a   :  { %p8564_p10 = scmp.ne.s32.totalorder %s113_s24, %s8563_s1  ;;  %p8568_p11 = scmp.lt.s32.totalorder %s113_s24, %s113_s24 }
  0x2b   :  { %p8569_p12 = scmp.lt.s32.totalorder %s8567_s26, %s8563_s1 }
  0x2d   :  { %p8570_p13 = por %p8569_p12, %p8568_p11 }
  0x2f   :  { %p8571_p0 = pnand %p8570_p13, %p8564_p10 }
  0x31   :  { %8574 = shalt.err (!%p8571_p0)
}
  0x32   :  { %115 = dma.hbm_to_vmem [thread:$0]  %s11541_s11, 16, %s113_s24, [#allocation14]  }
  0x33   :  { %s8583_s20 = scalar_lea.vmem %s140_s5, 512  ;;  %p8588_p2 = scmp.lt.s32.totalorder %s140_s5, %s140_s5 }
  0x34   :  { %p8584_p1 = scmp.ne.s32.totalorder %s140_s5, %s8583_s20  ;;  %p8589_p3 = scmp.lt.s32.totalorder %s8583_s20, %s8583_s20 }
  0x36   :  { %p8590_p4 = por %p8589_p3, %p8588_p2 }
  0x38   :  { %p8591_p5 = pnand %p8590_p4, %p8584_p1 }
  0x3a   :  { %8594 = shalt.err (!%p8591_p5)
}
  0x3b   :  { %145 = dma.hbm_to_vmem [thread:$0]  %s11547_s17, 512, %s140_s5, [#allocation17], %s8793_s29, %s8793_s29, %s8794_s3  }
  0x3c   :  { %s8797_s27 = smov [#allocation19]   ;;  %s8798_s28 = smov [#allocation4]  }
  0x3d   :  { %s162_s7 = sshll.u32 %s8797_s27, 4  ;;  %s56_s0 = sshll.u32 %s8798_s28, 4  ;;  %s163_s7 = int_to_ptr.vmem [resolvable:$true] %s162_s7  ;;  %s57_s0 = int_to_ptr.vmem [resolvable:$true] %s56_s0 }
  0x3e   :  { %s8603_s11 = scalar_lea.vmem %s163_s7, 16  ;;  %s8607_s4 = scalar_lea.vmem %s163_s7, 32 }
  0x3f   :  { %p8604_p6 = scmp.ne.s32.totalorder %s163_s7, %s8603_s11  ;;  %p8608_p7 = scmp.lt.s32.totalorder %s163_s7, %s163_s7 }
  0x40   :  { %p8609_p8 = scmp.lt.s32.totalorder %s8607_s4, %s8603_s11 }
  0x42   :  { %p8610_p9 = por %p8609_p8, %p8608_p7 }
  0x44   :  { %p8611_p10 = pnand %p8610_p9, %p8604_p6 }
  0x46   :  { %8614 = shalt.err (!%p8611_p10)
}
  0x47   :  { %165 = dma.hbm_to_vmem [thread:$0]  %s11549_s19, 16, %s163_s7, [#allocation20]  }
  0x48   :  { %s8623_s25 = scalar_lea.vmem %s57_s0, 16  ;;  %s8627_s17 = scalar_lea.vmem %s57_s0, 32 }
  0x49   :  { %p8624_p11 = scmp.ne.s32.totalorder %s57_s0, %s8623_s25  ;;  %p8628_p12 = scmp.lt.s32.totalorder %s57_s0, %s57_s0 }
  0x4a   :  { %p8629_p13 = scmp.lt.s32.totalorder %s8627_s17, %s8623_s25 }
  0x4c   :  { %p8630_p0 = por %p8629_p13, %p8628_p12 }
  0x4e   :  { %p8631_p1 = pnand %p8630_p0, %p8624_p11 }
  0x50   :  { %8634 = shalt.err (!%p8631_p1)
}
  0x51   :  { %s11667_s26 = sld [smem:[#allocation76_spill]]  ;;  %s8799_s13 = smov [#allocation9]  }
  0x52   :  { %s78_s6 = sshll.u32 %s8799_s13, 4  ;;  %s8800_s20 = smov [#allocation12]   ;;  %s79_s6 = int_to_ptr.vmem [resolvable:$true] %s78_s6 }
  0x53   :  { %s99_s9 = sshll.u32 %s8800_s20, 4  ;;  %s8643_s2 = scalar_lea.vmem %s79_s6, 16  ;;  %s100_s9 = int_to_ptr.vmem [resolvable:$true] %s99_s9 }
  0x54   :  { %p8644_p2 = scmp.ne.s32.totalorder %s79_s6, %s8643_s2  ;;  %s8647_s19 = scalar_lea.vmem %s79_s6, 32 }
  0x55   :  { %p8648_p3 = scmp.lt.s32.totalorder %s79_s6, %s79_s6  ;;  %p8649_p4 = scmp.lt.s32.totalorder %s8647_s19, %s8643_s2 }
  0x57   :  { %59 = dma.hbm_to_vmem [thread:$0]  %s11667_s26, 16, %s57_s0, [#allocation5]  }
  0x58   :  { %p8650_p5 = por %p8649_p4, %p8648_p3 }
  0x5a   :  { %p8651_p6 = pnand %p8650_p5, %p8644_p2 }
  0x5c   :  { %8654 = shalt.err (!%p8651_p6)
}
  0x5d   :  { %81 = dma.hbm_to_vmem [thread:$0]  %s11538_s8, 16, %s79_s6, [#allocation8]  }
  0x5e   :  { %s8663_s28 = scalar_lea.vmem %s100_s9, 512  ;;  %p8668_p8 = scmp.lt.s32.totalorder %s100_s9, %s100_s9 }
  0x5f   :  { %p8664_p7 = scmp.ne.s32.totalorder %s100_s9, %s8663_s28  ;;  %p8669_p9 = scmp.lt.s32.totalorder %s8663_s28, %s8663_s28 }
  0x61   :  { %p8670_p10 = por %p8669_p9, %p8668_p8 }
  0x63   :  { %p8671_p11 = pnand %p8670_p10, %p8664_p7 }
  0x65   :  { %8674 = shalt.err (!%p8671_p11)
}
  0x66   :  { %105 = dma.hbm_to_vmem [thread:$0]  %s11540_s10, 512, %s100_s9, [#allocation11], %s8793_s29, %s8793_s29, %s8794_s3  }
  0x67   :  { %s8801_s4 = smov [#allocation15]   ;;  %s8802_s24 = smov [#allocation18]  }
  0x68   :  { %s122_s30 = sshll.u32 %s8801_s4, 4  ;;  %s152_s25 = sshll.u32 %s8802_s24, 4  ;;  %s123_s30 = int_to_ptr.vmem [resolvable:$true] %s122_s30  ;;  %s153_s25 = int_to_ptr.vmem [resolvable:$true] %s152_s25 }
  0x69   :  { %s8683_s8 = scalar_lea.vmem %s123_s30, 16  ;;  %s8687_s17 = scalar_lea.vmem %s123_s30, 32 }
  0x6a   :  { %p8684_p12 = scmp.ne.s32.totalorder %s123_s30, %s8683_s8  ;;  %p8688_p13 = scmp.lt.s32.totalorder %s123_s30, %s123_s30 }
  0x6b   :  { %p8689_p0 = scmp.lt.s32.totalorder %s8687_s17, %s8683_s8 }
  0x6d   :  { %p8690_p1 = por %p8689_p0, %p8688_p13 }
  0x6f   :  { %p8691_p2 = pnand %p8690_p1, %p8684_p12 }
  0x71   :  { %8694 = shalt.err (!%p8691_p2)
}
  0x72   :  { %125 = dma.hbm_to_vmem [thread:$0]  %s11542_s12, 16, %s123_s30, [#allocation14]  }
  0x73   :  { %s8703_s26 = scalar_lea.vmem %s153_s25, 16  ;;  %s8707_s10 = scalar_lea.vmem %s153_s25, 32 }
  0x74   :  { %p8704_p3 = scmp.ne.s32.totalorder %s153_s25, %s8703_s26  ;;  %p8708_p4 = scmp.lt.s32.totalorder %s153_s25, %s153_s25 }
  0x75   :  { %p8709_p5 = scmp.lt.s32.totalorder %s8707_s10, %s8703_s26 }
  0x77   :  { %p8710_p6 = por %p8709_p5, %p8708_p4 }
  0x79   :  { %p8711_p7 = pnand %p8710_p6, %p8704_p3 }
  0x7b   :  { %8714 = shalt.err (!%p8711_p7)
}
  0x7c   :  { %155 = dma.hbm_to_vmem [thread:$0]  %s11548_s18, 16, %s153_s25, [#allocation17]  }
  0x7d   :  { %s8803_s20 = smov [#allocation21]   ;;  %s8804_s2 = smov [#allocation22]  }
  0x7e   :  { %s173_s9 = sshll.u32 %s8803_s20, 4  ;;  %s186_s19 = sshll.u32 %s8804_s2, 4  ;;  %s174_s9 = int_to_ptr.vmem [resolvable:$true] %s173_s9  ;;  %s187_s19 = int_to_ptr.vmem [resolvable:$true] %s186_s19 }
  0x7f   :  { %s8723_s27 = scalar_lea.vmem %s174_s9, 512  ;;  %p8728_p9 = scmp.lt.s32.totalorder %s174_s9, %s174_s9 }
  0x80   :  { %p8724_p8 = scmp.ne.s32.totalorder %s174_s9, %s8723_s27  ;;  %p8729_p10 = scmp.lt.s32.totalorder %s8723_s27, %s8723_s27 }
  0x82   :  { %p8730_p11 = por %p8729_p10, %p8728_p9 }
  0x84   :  { %p8731_p12 = pnand %p8730_p11, %p8724_p8 }
  0x86   :  { %8734 = shalt.err (!%p8731_p12)
}
  0x87   :  { %179 = dma.hbm_to_vmem [thread:$0]  %s11550_s21, 512, %s174_s9, [#allocation20], %s8793_s29, %s8793_s29, %s8794_s3  }
  0x88   :  { %s8743_s18 = scalar_lea.vmem %s187_s19, 16  ;;  %s8747_s28 = scalar_lea.vmem %s187_s19, 32 }
  0x89   :  { %p8744_p13 = scmp.ne.s32.totalorder %s187_s19, %s8743_s18  ;;  %p8748_p0 = scmp.lt.s32.totalorder %s187_s19, %s187_s19 }
  0x8a   :  { %p8749_p1 = scmp.lt.s32.totalorder %s8747_s28, %s8743_s18 }
  0x8c   :  { %p8750_p2 = por %p8749_p1, %p8748_p0 }
  0x8e   :  { %p8751_p3 = pnand %p8750_p2, %p8744_p13 }
  0x90   :  { %8754 = shalt.err (!%p8751_p3)
}
  0x91   :  { %189 = dma.hbm_to_vmem [thread:$0]  %s11551_s22, 16, %s187_s19, [#allocation23]  }
  0x92   :  { %8775 = dma.done.wait [#allocation5], 16  }
  0x93   :  { %8776 = vsyncadd [#allocation5], 4294967280 }
  0x94   :  { %8777 = dma.done.wait [#allocation8], 32  }
  0x95   :  { %8778 = vsyncadd [#allocation8], 4294967264 }
  0x96   :  { %8779 = dma.done.wait [#allocation11], 1024  }
  0x97   :  { %8780 = vsyncadd [#allocation11], 4294966272 }
  0x98   :  { %8781 = dma.done.wait [#allocation14], 32  }
  0x99   :  { %8782 = vsyncadd [#allocation14], 4294967264 }
  0x9a   :  { %8783 = dma.done.wait [#allocation17], 528  }
  0x9b   :  { %8784 = vsyncadd [#allocation17], 4294966768 }
  0x9c   :  { %8785 = dma.done.wait [#allocation20], 528  }
  0x9d   :  { %8786 = vsyncadd [#allocation20], 4294966768 }
  0x9e   :  { %8787 = dma.done.wait [#allocation23], 16  }
  0x9f   :  { %8788 = vsyncadd [#allocation23], 4294967280  ;;  %s11668_s30 = sld [smem:[#allocation74_spill]]  ;;  %vm315_vm0 = vcmask 261120   ;;  %v11559_v46 = vmov 0  }
  0xa0   :  { %s11669_s17 = sld [smem:[#allocation73_spill]]  ;;  %7758 = vset.pattern.permute.xlu0 %v11559_v46  ;;  %7759 = vset.pattern.permute.xlu1 %v11559_v46 }
  0xa1   :  { %s11670_s11 = sld [smem:[#allocation71_spill]] }
  0xa2   :  { %s11671_s2 = sld [smem:[#allocation72_spill]] }
  0xa3   :  { %s11672_s21 = sld [smem:[#allocation78_spill]] }
  0xa4   :  { %s11673_s19 = sld [smem:[#allocation75_spill]] }
  0xa5   :  { %v7760_v2 = vld [vmem:[%s11668_s30 + $0x8] sm:$0xff]   ;;  %v7761_v3 = vld [vmem:[%s11668_s30] sm:$0xff]  }
  0xa6   :  { %7133 = vmatprep.subr.bf16.mxu0 %v7760_v2  ;;  %v7762_v4 = vld [vmem:[%s11669_s17] sm:$0xff]   ;;  %v7763_v5 = vld [vmem:[%s11669_s17 + $0x8] sm:$0xff]   ;;  %v7764_v6 = vld [vmem:[%s11669_s17 + $0x10] sm:$0xff]  }
  0xa7   :  { %7134 = vmatpush3.bf16.msra.mxu0 %v7760_v2  ;;  %7137 = vmatprep.mubr.msk.bf16.mxu0 %vm315_vm0, %v7762_v4  ;;  %v7765_v7 = vld [vmem:[%s11669_s17 + $0x18] sm:$0xff]   ;;  %v7766_v8 = vld [vmem:[%s11669_s17 + $0x20] sm:$0xff]   ;;  %v7767_v9 = vld [vmem:[%s11669_s17 + $0x28] sm:$0xff]  }
  0xa8   :  { %7135 = vmatprep.subr.bf16.mxu0 %v7761_v3  ;;  %v7768_v10 = vld [vmem:[%s11669_s17 + $0x30] sm:$0xff]   ;;  %v7769_v11 = vld [vmem:[%s11669_s17 + $0x38] sm:$0xff]   ;;  %v7770_v12 = vld [vmem:[%s11670_s11] sm:$0xff]  }
  0xa9   :  { %7169 = vmatprep.mubr.bf16.mxu1 %v7770_v12  ;;  %v9027_v37 = vld [vmem:[%s11670_s11 + $0x8] sm:$0xff]   ;;  %v9032_v38 = vld [vmem:[%s11670_s11 + $0x10] sm:$0xff]   ;;  %v9039_v39 = vld [vmem:[%s11670_s11 + $0x18] sm:$0xff]  }
  0xaa   :  { %v9044_v40 = vld [vmem:[%s11670_s11 + $0x20] sm:$0xff]   ;;  %v9051_v41 = vld [vmem:[%s11670_s11 + $0x28] sm:$0xff]   ;;  %v9056_v42 = vld [vmem:[%s11670_s11 + $0x30] sm:$0xff]  }
  0xab   :  { %7136 = vmatpush3.bf16.msra.mxu0 %v7761_v3  ;;  %v9063_v43 = vld [vmem:[%s11670_s11 + $0x38] sm:$0xff]   ;;  %v732_v44 = vld [vmem:[%s11671_s2 + $0x70] sm:$0xff]  ;;  %v730_v45 = vld [vmem:[%s11671_s2 + $0x60] sm:$0xff] }
  0xac   :  { %807 = vperm.xlu0 %7758, %v732_v44   ;;  %797 = vperm.xlu1 %7759, %v730_v45   ;;  %v733_v47 = vld [vmem:[%s11671_s2 + $0x78] sm:$0xff]  ;;  %v731_v48 = vld [vmem:[%s11671_s2 + $0x68] sm:$0xff]  ;;  %v728_v49 = vld [vmem:[%s11671_s2 + $0x50] sm:$0xff] }
  0xad   :  { %v729_v50 = vld [vmem:[%s11671_s2 + $0x58] sm:$0xff]  ;;  %v726_v51 = vld [vmem:[%s11671_s2 + $0x40] sm:$0xff]  ;;  %v727_v52 = vld [vmem:[%s11671_s2 + $0x48] sm:$0xff] }
  0xae   :  { %7138 = vmatmul.mubr.msk.bf16.vlgmr.msra.gmra.mxu0 %vm315_vm0, %v7763_v5  ;;  %v724_v53 = vld [vmem:[%s11671_s2 + $0x30] sm:$0xff]  ;;  %v725_v54 = vld [vmem:[%s11671_s2 + $0x38] sm:$0xff]  ;;  %v722_v55 = vld [vmem:[%s11671_s2 + $0x20] sm:$0xff] }
  0xaf   :  { %7141 = vmatprep.mubr.msk.bf16.mxu0 %vm315_vm0, %v7764_v6  ;;  %v723_v56 = vld [vmem:[%s11671_s2 + $0x28] sm:$0xff]  ;;  %v720_v57 = vld [vmem:[%s11671_s2 + $0x10] sm:$0xff]  ;;  %v721_v58 = vld [vmem:[%s11671_s2 + $0x18] sm:$0xff] }
  0xb0   :  { %812 = vperm.xlu0 %7758, %v733_v47   ;;  %802 = vperm.xlu1 %7759, %v731_v48   ;;  %v718_v59 = vld [vmem:[%s11671_s2] sm:$0xff]  ;;  %v719_v60 = vld [vmem:[%s11671_s2 + $0x8] sm:$0xff] }
  0xb1   :  { %v7778_v5 = vld [vmem:[%s11672_s21] sm:$0xff]  }
  0xb4   :  { %787 = vperm.xlu0 %7758, %v728_v49   ;;  %792 = vperm.xlu1 %7759, %v729_v50  }
  0xb6   :  { %7142 = vmatmul.mubr.msk.bf16.gmra.mxu0 %vm315_vm0, %v7765_v7 }
  0xb7   :  { %7145 = vmatprep.mubr.msk.bf16.mxu0 %vm315_vm0, %v7766_v8  ;;  %v9122_v8 = vld [vmem:[%s11672_s21 + $0x8] sm:$0xff]  }
  0xb8   :  { %777 = vperm.xlu0 %7758, %v726_v51   ;;  %782 = vperm.xlu1 %7759, %v727_v52  }
  0xbc   :  { %767 = vperm.xlu0 %7758, %v724_v53   ;;  %772 = vperm.xlu1 %7759, %v725_v54   ;;  %v9184_v54 = vld [vmem:[#allocation4] ss:$0 sm:$0xff] }
  0xbe   :  { %7146 = vmatmul.mubr.msk.bf16.gmra.mxu0 %vm315_vm0, %v7767_v9 }
  0xbf   :  { %7149 = vmatprep.mubr.msk.bf16.mxu0 %vm315_vm0, %v7768_v10 }
  0xc0   :  { %757 = vperm.xlu0 %7758, %v722_v55   ;;  %762 = vperm.xlu1 %7759, %v723_v56  }
  0xc4   :  { %747 = vperm.xlu0 %7758, %v720_v57   ;;  %752 = vperm.xlu1 %7759, %v721_v58   ;;  %v9190_v58 = vld [vmem:[%s11673_s19] ss:$0 sm:$0xff] }
  0xc6   :  { %7150 = vmatmul.mubr.msk.bf16.gmra.mxu0 %vm315_vm0, %v7769_v11  ;;  %v9128_v11 = vld [vmem:[%s11672_s21 + $0x10] sm:$0xff]  }
  0xc7   :  { %7201 = vmatprep.mubr.bf16.mxu0 %v7770_v12 }
  0xc8   :  { %737 = vperm.xlu0 %7758, %v718_v59   ;;  %742 = vperm.xlu1 %7759, %v719_v60  }
  0xe6   :  { %987 = vxpose.xlu0.c.b16.start [1/8] %v7778_v5, 128 }
  0xea   :  { %988 = vxpose.xlu0.c.b16.cont [2/8] %v9122_v8, 128 }
  0xee   :  { %989 = vxpose.xlu0.c.b16.cont [3/8] %v9128_v11, 128 }
 0x16e   :  { %v7139_v13 = vpop.f32.mrf.mxu0 }
 0x170   :  { %v374_v14 = vpop.f32.mrf.mxu0 }
 0x172   :  { %v7140_v15 = vpop.f32.mrf.mxu0 }
 0x173   :  { %v438_v35 = vpack.c.bf16 %v7140_v15, %v7139_v13 }
 0x174   :  { %v377_v16 = vpop.f32.mrf.mxu0 }
 0x175   :  { %v437_v36 = vpack.c.bf16 %v377_v16, %v374_v14  ;;  %v9134_v14 = vld [vmem:[%s11672_s21 + $0x18] sm:$0xff]  }
 0x176   :  { %v7143_v17 = vpop.f32.mrf.mxu0  ;;  %990 = vxpose.xlu0.c.b16.cont [4/8] %v9134_v14, 128 }
 0x178   :  { %v390_v18 = vpop.f32.mrf.mxu0 }
 0x17a   :  { %v7144_v19 = vpop.f32.mrf.mxu0 }
 0x17b   :  { %v440_v33 = vpack.c.bf16 %v7144_v19, %v7143_v17  ;;  %v9140_v19 = vld [vmem:[%s11672_s21 + $0x20] sm:$0xff]  }
 0x17c   :  { %v393_v20 = vpop.f32.mrf.mxu0  ;;  %991 = vxpose.xlu0.c.b16.cont [5/8] %v9140_v19, 128 }
 0x17d   :  { %v439_v34 = vpack.c.bf16 %v393_v20, %v390_v18 }
 0x17e   :  { %v7147_v21 = vpop.f32.mrf.mxu0 }
 0x180   :  { %v406_v22 = vpop.f32.mrf.mxu0 }
 0x182   :  { %v7148_v23 = vpop.f32.mrf.mxu0 }
 0x183   :  { %v442_v31 = vpack.c.bf16 %v7148_v23, %v7147_v21  ;;  %v9146_v21 = vld [vmem:[%s11672_s21 + $0x28] sm:$0xff]   ;;  %v9152_v23 = vld [vmem:[%s11672_s21 + $0x30] sm:$0xff]  }
 0x184   :  { %v409_v24 = vpop.f32.mrf.mxu0  ;;  %992 = vxpose.xlu0.c.b16.cont [6/8] %v9146_v21, 128 }
 0x185   :  { %v441_v32 = vpack.c.bf16 %v409_v24, %v406_v22 }
 0x186   :  { %v7151_v25 = vpop.f32.mrf.mxu0 }
 0x188   :  { %v422_v26 = vpop.f32.mrf.mxu0  ;;  %993 = vxpose.xlu0.c.b16.cont [7/8] %v9152_v23, 128 }
 0x18a   :  { %v7152_v27 = vpop.f32.mrf.mxu0 }
 0x18b   :  { %v444_v28 = vpack.c.bf16 %v7152_v27, %v7151_v25  ;;  %v9158_v25 = vld [vmem:[%s11672_s21 + $0x38] sm:$0xff]  }
 0x18c   :  { %v425_v29 = vpop.f32.mrf.mxu0  ;;  %994 = vxpose.xlu0.c.b16.end [8/8] %v9158_v25, 128 }
 0x18d   :  { %v443_v30 = vpack.c.bf16 %v425_v29, %v422_v26  ;;  %7153 = vmatprep.subr.bf16.mxu1 %v444_v28  ;;  %v808_v29 = vpop.permute.xlu0 %807 }
 0x18e   :  { %7154 = vmatpush3.bf16.msra.mxu1 %v444_v28  ;;  %v835_v56 = vmul.f32 %v9184_v54, %v808_v29 }
 0x18f   :  { %7155 = vmatprep.subr.bf16.mxu1 %v443_v30 }
 0x192   :  { %7156 = vmatpush3.bf16.msra.mxu1 %v443_v30  ;;  %v813_v30 = vpop.permute.xlu0 %812 }
 0x193   :  { %7157 = vmatprep.subr.bf16.mxu1 %v442_v31 }
 0x196   :  { %7158 = vmatpush3.bf16.msra.mxu1 %v442_v31  ;;  %v788_v31 = vpop.permute.xlu0 %787 }
 0x197   :  { %7159 = vmatprep.subr.bf16.mxu1 %v441_v32 }
 0x19a   :  { %7160 = vmatpush3.bf16.msra.mxu1 %v441_v32  ;;  %v778_v32 = vpop.permute.xlu0 %777 }
 0x19b   :  { %7161 = vmatprep.subr.bf16.mxu1 %v440_v33 }
 0x19e   :  { %7162 = vmatpush3.bf16.msra.mxu1 %v440_v33  ;;  %v768_v33 = vpop.permute.xlu0 %767 }
 0x19f   :  { %7163 = vmatprep.subr.bf16.mxu1 %v439_v34 }
 0x1a2   :  { %7164 = vmatpush3.bf16.msra.mxu1 %v439_v34  ;;  %v9168_v34 = vpop.permute.xlu0 %757 }
 0x1a3   :  { %7165 = vmatprep.subr.bf16.mxu1 %v438_v35 }
 0x1a6   :  { %7166 = vmatpush3.bf16.msra.mxu1 %v438_v35  ;;  %v9170_v35 = vpop.permute.xlu0 %747 }
 0x1a7   :  { %7167 = vmatprep.subr.bf16.mxu1 %v437_v36 }
 0x1aa   :  { %7168 = vmatpush3.bf16.msra.mxu1 %v437_v36  ;;  %v9172_v36 = vpop.permute.xlu0 %737 }
 0x1ad   :  { %7170 = vmatmul.mubr.bf16.vlgmr.msra.gmra.mxu1 %v9027_v37 }
 0x1ae   :  { %7173 = vmatprep.mubr.bf16.mxu1 %v9032_v38 }
 0x1b5   :  { %7174 = vmatmul.mubr.bf16.gmra.mxu1 %v9039_v39 }
 0x1b6   :  { %7177 = vmatprep.mubr.bf16.mxu1 %v9044_v40 }
 0x1bd   :  { %7178 = vmatmul.mubr.bf16.gmra.mxu1 %v9051_v41 }
 0x1be   :  { %7181 = vmatprep.mubr.bf16.mxu1 %v9056_v42 }
 0x1c5   :  { %7182 = vmatmul.mubr.bf16.gmra.mxu1 %v9063_v43 }
 0x26d   :  { %v7171_v61 = vpop.f32.mrf.mxu1 }
 0x26f   :  { %v527_v62 = vpop.f32.mrf.mxu1 }
 0x271   :  { %v7172_v63 = vpop.f32.mrf.mxu1 }
 0x272   :  { %v591_v27 = vpack.c.bf16 %v7172_v63, %v7171_v61 }
 0x273   :  { %v530_v0 = vpop.f32.mrf.mxu1 }
 0x274   :  { %v590_v28 = vpack.c.bf16 %v530_v0, %v527_v62 }
 0x275   :  { %v7175_v1 = vpop.f32.mrf.mxu1 }
 0x277   :  { %v543_v2 = vpop.f32.mrf.mxu1 }
 0x279   :  { %v7176_v3 = vpop.f32.mrf.mxu1 }
 0x27a   :  { %v593_v24 = vpack.c.bf16 %v7176_v3, %v7175_v1  ;;  %v831_v1 = vmul.f32 %v9184_v54, %v788_v31 }
 0x27b   :  { %v546_v4 = vpop.f32.mrf.mxu1 }
 0x27c   :  { %v592_v26 = vpack.c.bf16 %v546_v4, %v543_v2 }
 0x27d   :  { %v7179_v6 = vpop.f32.mrf.mxu1 }
 0x27f   :  { %v559_v7 = vpop.f32.mrf.mxu1 }
 0x281   :  { %v7180_v9 = vpop.f32.mrf.mxu1 }
 0x282   :  { %v595_v20 = vpack.c.bf16 %v7180_v9, %v7179_v6 }
 0x283   :  { %v562_v10 = vpop.f32.mrf.mxu1 }
 0x284   :  { %v594_v22 = vpack.c.bf16 %v562_v10, %v559_v7  ;;  %v9201_v7 = vld [vmem:[#allocation7] ss:$0 sm:$0xff] }
 0x285   :  { %v7183_v12 = vpop.f32.mrf.mxu1 }
 0x287   :  { %v575_v13 = vpop.f32.mrf.mxu1 }
 0x289   :  { %v7184_v15 = vpop.f32.mrf.mxu1 }
 0x28a   :  { %v597_v16 = vpack.c.bf16 %v7184_v15, %v7183_v12 }
 0x28b   :  { %v578_v17 = vpop.f32.mrf.mxu1 }
 0x28c   :  { %v596_v18 = vpack.c.bf16 %v578_v17, %v575_v13  ;;  %7185 = vmatprep.subr.bf16.mxu0 %v597_v16 }
 0x28d   :  { %7186 = vmatpush3.bf16.msra.mxu0 %v597_v16 }
 0x28e   :  { %7187 = vmatprep.subr.bf16.mxu0 %v596_v18 }
 0x291   :  { %7188 = vmatpush3.bf16.msra.mxu0 %v596_v18 }
 0x292   :  { %7189 = vmatprep.subr.bf16.mxu0 %v595_v20 }
 0x295   :  { %7190 = vmatpush3.bf16.msra.mxu0 %v595_v20  ;;  %v829_v20 = vmul.f32 %v9184_v54, %v778_v32 }
 0x296   :  { %7191 = vmatprep.subr.bf16.mxu0 %v594_v22 }
 0x299   :  { %7192 = vmatpush3.bf16.msra.mxu0 %v594_v22 }
 0x29a   :  { %7193 = vmatprep.subr.bf16.mxu0 %v593_v24 }
 0x29d   :  { %7194 = vmatpush3.bf16.msra.mxu0 %v593_v24 }
 0x29e   :  { %7195 = vmatprep.subr.bf16.mxu0 %v592_v26 }
 0x2a1   :  { %7196 = vmatpush3.bf16.msra.mxu0 %v592_v26 }
 0x2a2   :  { %7197 = vmatprep.subr.bf16.mxu0 %v591_v27 }
 0x2a5   :  { %7198 = vmatpush3.bf16.msra.mxu0 %v591_v27 }
 0x2a6   :  { %7199 = vmatprep.subr.bf16.mxu0 %v590_v28 }
 0x2a9   :  { %7200 = vmatpush3.bf16.msra.mxu0 %v590_v28 }
 0x2ac   :  { %7202 = vmatmul.mubr.bf16.vlgmr.msra.gmra.mxu0 %v9027_v37  ;;  %v995_v37 = vpop.trf.xlu0 }
 0x2ad   :  { %7205 = vmatprep.mubr.bf16.mxu0 %v9032_v38  ;;  %7233 = vmatprep.mubr.bf16.mxu1 %v995_v37  ;;  %v798_v38 = vpop.permute.xlu1 %797 }
 0x2ae   :  { %v833_v60 = vmul.f32 %v9184_v54, %v798_v38 }
 0x2b4   :  { %7206 = vmatmul.mubr.bf16.gmra.mxu0 %v9039_v39 }
 0x2b5   :  { %7209 = vmatprep.mubr.bf16.mxu0 %v9044_v40 }
 0x2bc   :  { %7210 = vmatmul.mubr.bf16.gmra.mxu0 %v9051_v41 }
 0x2bd   :  { %7213 = vmatprep.mubr.bf16.mxu0 %v9056_v42  ;;  %v803_v42 = vpop.permute.xlu1 %802 }
 0x2be   :  { %v834_v18 = vmul.f32 %v9184_v54, %v803_v42 }
 0x2c1   :  { %v793_v47 = vpop.permute.xlu1 %792 }
 0x2c2   :  { %v832_v61 = vmul.f32 %v9184_v54, %v793_v47 }
 0x2c4   :  { %7214 = vmatmul.mubr.bf16.gmra.mxu0 %v9063_v43 }
 0x2c5   :  { %7265 = vmatprep.mubr.bf16.mxu0 %v7778_v5  ;;  %v783_v51 = vpop.permute.xlu1 %782  ;;  %v836_v5 = vmul.f32 %v9184_v54, %v813_v30 }
 0x2c6   :  { %v830_v6 = vmul.f32 %v9184_v54, %v783_v51 }
 0x2c9   :  { %v773_v57 = vpop.permute.xlu1 %772 }
 0x2ca   :  { %v828_v30 = vmul.f32 %v9184_v54, %v773_v57 }
 0x2cd   :  { %v763_v12 = vpop.permute.xlu1 %762 }
 0x36c   :  { %v9174_v39 = vpop.f32.mrf.mxu0 }
 0x36e   :  { %v9176_v40 = vpop.f32.mrf.mxu0 }
 0x370   :  { %v9178_v41 = vpop.f32.mrf.mxu0 }
 0x372   :  { %v9180_v43 = vpop.f32.mrf.mxu0 }
 0x374   :  { %v7207_v44 = vpop.f32.mrf.mxu0 }
 0x375   :  { %v708_v51 = vmul.f32 %v7207_v44, %v9190_v58  ;;  %v9239_v44 = vld [vmem:[#allocation9] ss:$0 sm:$0xff] }
 0x376   :  { %v9182_v45 = vpop.f32.mrf.mxu0 }
 0x378   :  { %v7208_v48 = vpop.f32.mrf.mxu0 }
 0x379   :  { %v709_v31 = vmul.f32 %v7208_v48, %v9190_v58 }
 0x37a   :  { %v651_v49 = vpop.f32.mrf.mxu0 }
 0x37c   :  { %v7211_v50 = vpop.f32.mrf.mxu0 }
 0x37d   :  { %v712_v2 = vmul.f32 %v7211_v50, %v9190_v58  ;;  %v827_v50 = vmul.f32 %v9184_v54, %v768_v33 }
 0x37e   :  { %v664_v52 = vpop.f32.mrf.mxu0 }
 0x37f   :  { %v710_v22 = vmul.f32 %v9190_v58, %v664_v52  ;;  %v847_v26 = vadd.f32 %v831_v1, %v712_v2  ;;  %v825_v2 = vmul.f32 %v9184_v54, %v9168_v34 }
 0x380   :  { %v7212_v53 = vpop.f32.mrf.mxu0 }
 0x381   :  { %v713_v62 = vmul.f32 %v7212_v53, %v9190_v58  ;;  %v845_v52 = vadd.f32 %v829_v20, %v710_v22  ;;  %v753_v53 = vpop.permute.xlu1 %752  ;;  %v823_v22 = vmul.f32 %v9184_v54, %v9170_v35 }
 0x382   :  { %v667_v55 = vpop.f32.mrf.mxu0 }
 0x383   :  { %v711_v9 = vmul.f32 %v9190_v58, %v667_v55  ;;  %v848_v13 = vadd.f32 %v832_v61, %v713_v62  ;;  %v9227_v55 = vadd.f32 %v9201_v7, %v847_v26  ;;  %v707_v61 = vmul.f32 %v9190_v58, %v651_v49 }
 0x384   :  { %v7215_v59 = vpop.f32.mrf.mxu0  ;;  %v706_v49 = vmul.f32 %v9190_v58, %v9182_v45 }
 0x385   :  { %v716_v63 = vmul.f32 %v7215_v59, %v9190_v58  ;;  %v846_v37 = vadd.f32 %v830_v6, %v711_v9  ;;  %v9218_v38 = vadd.f32 %v9201_v7, %v848_v13  ;;  %11678 = vst [vmem:[#allocation37_spill] sm:$0xff] %v9227_v55  ;;  %v826_v59 = vmul.f32 %v9184_v54, %v763_v12 }
 0x386   :  { %v680_v0 = vpop.f32.mrf.mxu0  ;;  %v824_v12 = vmul.f32 %v9184_v54, %v753_v53  ;;  %v705_v13 = vmul.f32 %v9178_v41, %v9190_v58  ;;  %v841_v26 = vadd.f32 %v825_v2, %v706_v49 }
 0x387   :  { %v851_v3 = vadd.f32 %v835_v56, %v716_v63  ;;  %v714_v4 = vmul.f32 %v9190_v58, %v680_v0  ;;  %11676 = vst [vmem:[#allocation35_spill] sm:$0xff] %v9218_v38  ;;  %v9237_v33 = vadd.f32 %v9201_v7, %v846_v37  ;;  %v903_v1 = vmax.f32 %v9218_v38, 0.0 }
 0x388   :  { %v7216_v10 = vpop.f32.mrf.mxu0  ;;  %v842_v45 = vadd.f32 %v826_v59, %v707_v61  ;;  %v703_v37 = vmul.f32 %v9190_v58, %v9180_v43  ;;  %v9285_v53 = vadd.f32 %v9201_v7, %v841_v26 }
 0x389   :  { %v9205_v15 = vadd.f32 %v9201_v7, %v851_v3  ;;  %v849_v16 = vadd.f32 %v833_v60, %v714_v4  ;;  %v717_v17 = vmul.f32 %v7216_v10, %v9190_v58  ;;  %v844_v60 = vadd.f32 %v828_v30, %v709_v31  ;;  %11680 = vst [vmem:[#allocation39_spill] sm:$0xff] %v9237_v33 }
 0x38a   :  { %v683_v24 = vpop.f32.mrf.mxu0  ;;  %v843_v3 = vadd.f32 %v827_v50, %v708_v51  ;;  %v9250_v4 = vadd.f32 %v9201_v7, %v845_v52  ;;  %v902_v10 = vmax.f32 %v9227_v55, 0.0  ;;  %v901_v20 = vmax.f32 %v9237_v33, 0.0  ;;  %11685 = vst [vmem:[#allocation44_spill] sm:$0xff] %v9285_v53 }
 0x38b   :  { %11674 = vst [vmem:[#allocation33_spill] sm:$0xff] %v9205_v15  ;;  %v9212_v27 = vadd.f32 %v9201_v7, %v849_v16  ;;  %v852_v28 = vadd.f32 %v836_v5, %v717_v17  ;;  %v715_v29 = vmul.f32 %v9190_v58, %v683_v24  ;;  %v906_v47 = vmax.f32 %v9205_v15, 0.0  ;;  %v743_v16 = vpop.permute.xlu1 %742 }
 0x38c   :  { %11681 = vst [vmem:[#allocation40_spill] sm:$0xff] %v9250_v4  ;;  %v9259_v34 = vadd.f32 %v9201_v7, %v844_v60  ;;  %v704_v24 = vmul.f32 %v9174_v39, %v9190_v58  ;;  %v9268_v41 = vadd.f32 %v9201_v7, %v843_v3  ;;  %v840_v30 = vadd.f32 %v824_v12, %v705_v13  ;;  %v996_v12 = vpop.trf.xlu0 }
 0x38d   :  { %11675 = vst [vmem:[#allocation34_spill] sm:$0xff] %v9212_v27  ;;  %v9221_v32 = vadd.f32 %v9201_v7, %v852_v28  ;;  %v850_v42 = vadd.f32 %v834_v18, %v715_v29  ;;  %v904_v57 = vmax.f32 %v9212_v27, 0.0  ;;  %v929_v62 = vadd.f32 %v9239_v44, %v906_v47 }
 0x38e   :  { %11682 = vst [vmem:[#allocation41_spill] sm:$0xff] %v9259_v34  ;;  %v926_v18 = vadd.f32 %v9239_v44, %v903_v1  ;;  %11683 = vst [vmem:[#allocation42_spill] sm:$0xff] %v9268_v41  ;;  %v925_v28 = vadd.f32 %v9239_v44, %v902_v10  ;;  %v900_v29 = vmax.f32 %v9250_v4, 0.0  ;;  %v822_v31 = vmul.f32 %v9184_v54, %v743_v16 }
 0x38f   :  { %11677 = vst [vmem:[#allocation36_spill] sm:$0xff] %v9221_v32  ;;  %v9230_v48 = vadd.f32 %v9201_v7, %v850_v42  ;;  %v907_v56 = vmax.f32 %v9221_v32, 0.0  ;;  %v927_v6 = vadd.f32 %v9239_v44, %v904_v57  ;;  %v9276_v35 = vadd.f32 %v9201_v7, %v842_v45 }
 0x390   :  { %v936_v39 = vpack.c.bf16 %v926_v18, %v925_v28  ;;  %v924_v42 = vadd.f32 %v9239_v44, %v901_v20  ;;  %v899_v47 = vmax.f32 %v9259_v34, 0.0  ;;  %v839_v50 = vadd.f32 %v823_v22, %v704_v24  ;;  %v997_v18 = vpop.trf.xlu0 }
 0x391   :  { %11679 = vst [vmem:[#allocation38_spill] sm:$0xff] %v9230_v48  ;;  %v930_v63 = vadd.f32 %v9239_v44, %v907_v56  ;;  %v905_v0 = vmax.f32 %v9230_v48, 0.0  ;;  %11684 = vst [vmem:[#allocation43_spill] sm:$0xff] %v9276_v35  ;;  %v821_v51 = vmul.f32 %v9184_v54, %v9172_v36  ;;  %v702_v52 = vmul.f32 %v9190_v58, %v9176_v40 }
 0x392   :  { %v923_v43 = vadd.f32 %v9239_v44, %v900_v29  ;;  %v898_v56 = vmax.f32 %v9268_v41, 0.0  ;;  %v9290_v57 = vadd.f32 %v9201_v7, %v840_v30  ;;  %v838_v59 = vadd.f32 %v822_v31, %v703_v37 }
 0x393   :  { %v938_v5 = vpack.c.bf16 %v930_v63, %v929_v62  ;;  %v928_v9 = vadd.f32 %v9239_v44, %v905_v0  ;;  %v922_v61 = vadd.f32 %v9239_v44, %v899_v47  ;;  %v897_v36 = vmax.f32 %v9276_v35, 0.0 }
 0x394   :  { %11686 = vst [vmem:[#allocation45_spill] sm:$0xff] %v9290_v57  ;;  %v935_v60 = vpack.c.bf16 %v924_v42, %v923_v43  ;;  %v9295_v40 = vadd.f32 %v9201_v7, %v839_v50  ;;  %v837_v54 = vadd.f32 %v821_v51, %v702_v52  ;;  %v921_v58 = vadd.f32 %v9239_v44, %v898_v56  ;;  %v998_v22 = vpop.trf.xlu0 }
 0x395   :  { %7217 = vmatprep.subr.bf16.mxu1 %v938_v5  ;;  %v937_v17 = vpack.c.bf16 %v928_v9, %v927_v6  ;;  %v896_v62 = vmax.f32 %v9285_v53, 0.0  ;;  %v9300_v63 = vadd.f32 %v9201_v7, %v838_v59  ;;  %v920_v1 = vadd.f32 %v9239_v44, %v897_v36 }
 0x396   :  { %7218 = vmatpush3.bf16.msra.mxu1 %v938_v5  ;;  %11687 = vst [vmem:[#allocation46_spill] sm:$0xff] %v9295_v40  ;;  %v934_v0 = vpack.c.bf16 %v922_v61, %v921_v58  ;;  %v895_v2 = vmax.f32 %v9290_v57, 0.0  ;;  %v9305_v3 = vadd.f32 %v9201_v7, %v837_v54  ;;  %v894_v5 = vmax.f32 %v9295_v40, 0.0 }
 0x397   :  { %7219 = vmatprep.subr.bf16.mxu1 %v937_v17  ;;  %11688 = vst [vmem:[#allocation47_spill] sm:$0xff] %v9300_v63  ;;  %v919_v49 = vadd.f32 %v9239_v44, %v896_v62  ;;  %v893_v10 = vmax.f32 %v9300_v63, 0.0 }
 0x398   :  { %11689 = vst [vmem:[#allocation48_spill] sm:$0xff] %v9305_v3  ;;  %v918_v9 = vadd.f32 %v9239_v44, %v895_v2  ;;  %v917_v13 = vadd.f32 %v9239_v44, %v894_v5  ;;  %v892_v16 = vmax.f32 %v9305_v3, 0.0  ;;  %v999_v24 = vpop.trf.xlu0 }
 0x399   :  { %v933_v6 = vpack.c.bf16 %v920_v1, %v919_v49  ;;  %v916_v7 = vadd.f32 %v9239_v44, %v893_v10  ;;  %v1579_v10 = vld [vmem:[#allocation12 + $0x8] sm:$0xff] }
 0x39a   :  { %7220 = vmatpush3.bf16.msra.mxu1 %v937_v17  ;;  %v932_v45 = vpack.c.bf16 %v918_v9, %v917_v13  ;;  %v915_v17 = vadd.f32 %v9239_v44, %v892_v16  ;;  %v1580_v9 = vld [vmem:[#allocation12 + $0x10] sm:$0xff] }
 0x39b   :  { %7221 = vmatprep.subr.bf16.mxu1 %v936_v39 }
 0x39c   :  { %v931_v20 = vpack.c.bf16 %v916_v7, %v915_v17  ;;  %v1000_v26 = vpop.trf.xlu0 }
 0x39e   :  { %7222 = vmatpush3.bf16.msra.mxu1 %v936_v39 }
 0x39f   :  { %7223 = vmatprep.subr.bf16.mxu1 %v935_v60 }
 0x3a0   :  { %v1001_v28 = vpop.trf.xlu0 }
 0x3a2   :  { %7224 = vmatpush3.bf16.msra.mxu1 %v935_v60 }
 0x3a3   :  { %7225 = vmatprep.subr.bf16.mxu1 %v934_v0 }
 0x3a4   :  { %v1002_v29 = vpop.trf.xlu0 }
 0x3a6   :  { %7226 = vmatpush3.bf16.msra.mxu1 %v934_v0 }
 0x3a7   :  { %7227 = vmatprep.subr.bf16.mxu1 %v933_v6 }
 0x3aa   :  { %7228 = vmatpush3.bf16.msra.mxu1 %v933_v6  ;;  %v1581_v6 = vld [vmem:[#allocation12 + $0x18] sm:$0xff] }
 0x3ab   :  { %7229 = vmatprep.subr.bf16.mxu1 %v932_v45 }
 0x3ae   :  { %7230 = vmatpush3.bf16.msra.mxu1 %v932_v45 }
 0x3af   :  { %7231 = vmatprep.subr.bf16.mxu1 %v931_v20 }
 0x3b2   :  { %7232 = vmatpush3.bf16.msra.mxu1 %v931_v20 }
 0x3b5   :  { %7234 = vmatmul.mubr.bf16.vlgmr.msra.gmra.mxu1 %v996_v12  ;;  %v1578_v12 = vld [vmem:[#allocation12] sm:$0xff] }
 0x3b6   :  { %7237 = vmatprep.mubr.bf16.mxu1 %v997_v18 }
 0x3bd   :  { %7238 = vmatmul.mubr.bf16.gmra.mxu1 %v998_v22 }
 0x3be   :  { %7241 = vmatprep.mubr.bf16.mxu1 %v999_v24 }
 0x3c5   :  { %7242 = vmatmul.mubr.bf16.gmra.mxu1 %v1000_v26 }
 0x3c6   :  { %7245 = vmatprep.mubr.bf16.mxu1 %v1001_v28 }
 0x3cd   :  { %7246 = vmatmul.mubr.bf16.gmra.mxu1 %v1002_v29 }
 0x475   :  { %v7235_v30 = vpop.f32.mrf.mxu1 }
 0x477   :  { %v1037_v31 = vpop.f32.mrf.mxu1 }
 0x479   :  { %v7236_v44 = vpop.f32.mrf.mxu1 }
 0x47a   :  { %v1101_v49 = vpack.c.bf16 %v7236_v44, %v7235_v30 }
 0x47b   :  { %v1040_v37 = vpop.f32.mrf.mxu1 }
 0x47c   :  { %v1100_v5 = vpack.c.bf16 %v1040_v37, %v1037_v31 }
 0x47d   :  { %v7239_v39 = vpop.f32.mrf.mxu1 }
 0x47f   :  { %v1053_v42 = vpop.f32.mrf.mxu1 }
 0x481   :  { %v7240_v47 = vpop.f32.mrf.mxu1 }
 0x482   :  { %v1103_v1 = vpack.c.bf16 %v7240_v47, %v7239_v39 }
 0x483   :  { %v1056_v50 = vpop.f32.mrf.mxu1 }
 0x484   :  { %v1102_v2 = vpack.c.bf16 %v1056_v50, %v1053_v42 }
 0x485   :  { %v7243_v51 = vpop.f32.mrf.mxu1 }
 0x487   :  { %v1069_v52 = vpop.f32.mrf.mxu1 }
 0x489   :  { %v7244_v43 = vpop.f32.mrf.mxu1 }
 0x48a   :  { %v1105_v62 = vpack.c.bf16 %v7244_v43, %v7243_v51 }
 0x48b   :  { %v1072_v56 = vpop.f32.mrf.mxu1 }
 0x48c   :  { %v1104_v0 = vpack.c.bf16 %v1072_v56, %v1069_v52 }
 0x48d   :  { %v7247_v59 = vpop.f32.mrf.mxu1 }
 0x48f   :  { %v1085_v60 = vpop.f32.mrf.mxu1 }
 0x491   :  { %v7248_v61 = vpop.f32.mrf.mxu1 }
 0x492   :  { %v1107_v36 = vpack.c.bf16 %v7248_v61, %v7247_v59 }
 0x493   :  { %v1088_v54 = vpop.f32.mrf.mxu1 }
 0x494   :  { %v1106_v58 = vpack.c.bf16 %v1088_v54, %v1085_v60  ;;  %7249 = vmatprep.subr.bf16.mxu0 %v1107_v36  ;;  %v1384_v60 = vld [vmem:[#allocation10 + $0x18] sm:$0xff] }
 0x495   :  { %7250 = vmatpush3.bf16.msra.mxu0 %v1107_v36  ;;  %7281 = vmatprep.subr.mxu1 %v1384_v60 }
 0x496   :  { %7251 = vmatprep.subr.bf16.mxu0 %v1106_v58  ;;  %7282 = vmatpush3.msra.mxu1 %v1384_v60 }
 0x499   :  { %7252 = vmatpush3.bf16.msra.mxu0 %v1106_v58 }
 0x49a   :  { %7253 = vmatprep.subr.bf16.mxu0 %v1105_v62 }
 0x49d   :  { %7254 = vmatpush3.bf16.msra.mxu0 %v1105_v62 }
 0x49e   :  { %7255 = vmatprep.subr.bf16.mxu0 %v1104_v0 }
 0x4a1   :  { %7256 = vmatpush3.bf16.msra.mxu0 %v1104_v0 }
 0x4a2   :  { %7257 = vmatprep.subr.bf16.mxu0 %v1103_v1 }
 0x4a5   :  { %7258 = vmatpush3.bf16.msra.mxu0 %v1103_v1 }
 0x4a6   :  { %7259 = vmatprep.subr.bf16.mxu0 %v1102_v2 }
 0x4a9   :  { %7260 = vmatpush3.bf16.msra.mxu0 %v1102_v2 }
 0x4aa   :  { %7261 = vmatprep.subr.bf16.mxu0 %v1101_v49 }
 0x4ad   :  { %7262 = vmatpush3.bf16.msra.mxu0 %v1101_v49 }
 0x4ae   :  { %7263 = vmatprep.subr.bf16.mxu0 %v1100_v5 }
 0x4b1   :  { %7264 = vmatpush3.bf16.msra.mxu0 %v1100_v5 }
 0x4b2   :  { %7313 = vmatprep.subr.mxu0 %v1581_v6 }
 0x4b4   :  { %7266 = vmatmul.mubr.bf16.vlgmr.msra.gmra.mxu0 %v9122_v8 }
 0x4b5   :  { %7269 = vmatprep.mubr.bf16.mxu0 %v9128_v11  ;;  %7314 = vmatpush3.msra.mxu0 %v1581_v6 }
 0x4b6   :  { %7315 = vmatprep.subr.mxu0 %v1580_v9 }
 0x4b7   :  { %7316 = vmatpush3.msra.mxu0 %v1580_v9 }
 0x4b8   :  { %7317 = vmatprep.subr.mxu0 %v1579_v10 }
 0x4b9   :  { %7318 = vmatpush3.msra.mxu0 %v1579_v10 }
 0x4ba   :  { %7319 = vmatprep.subr.mxu0 %v1578_v12 }
 0x4bb   :  { %7320 = vmatpush3.msra.mxu0 %v1578_v12 }
 0x4bc   :  { %7270 = vmatmul.mubr.bf16.gmra.mxu0 %v9134_v14  ;;  %7433 = vmatprep.subr.mxu0 %v1384_v60 }
 0x4bd   :  { %7273 = vmatprep.mubr.bf16.mxu0 %v9140_v19 }
 0x4c4   :  { %7274 = vmatmul.mubr.bf16.gmra.mxu0 %v9146_v21 }
 0x4c5   :  { %7277 = vmatprep.mubr.bf16.mxu0 %v9152_v23 }
 0x4cc   :  { %7278 = vmatmul.mubr.bf16.gmra.mxu0 %v9158_v25 }
 0x4cd   :  { %7321 = vmatprep.mubr.msk.f32.mxu0 %vm315_vm0, %v9305_v3 }
 0x4d4   :  { %7322 = vmatmul.mubr.msk.f32.vlgmr.msra.gmra.mxu0 %vm315_vm0, %v9300_v63 }
 0x4d5   :  { %7324 = vmatprep.mubr.msk.f32.mxu0 %vm315_vm0, %v9295_v40  ;;  %7434 = vmatpush3.msra.mxu0 %v1384_v60 }
 0x4d8   :  { %7325 = vmatmul.mubr.msk.f32.gmra.mxu0 %vm315_vm0, %v9290_v57 }
 0x4d9   :  { %7327 = vmatprep.mubr.msk.f32.mxu0 %vm315_vm0, %v9285_v53 }
 0x4dc   :  { %7328 = vmatmul.mubr.msk.f32.gmra.mxu0 %vm315_vm0, %v9276_v35 }
 0x4dd   :  { %7330 = vmatprep.mubr.msk.f32.mxu0 %vm315_vm0, %v9268_v41 }
 0x4e0   :  { %7331 = vmatmul.mubr.msk.f32.gmra.mxu0 %vm315_vm0, %v9259_v34 }
 0x4e1   :  { %7333 = vmatprep.mubr.msk.f32.mxu0 %vm315_vm0, %v9250_v4 }
 0x4e4   :  { %7334 = vmatmul.mubr.msk.f32.gmra.mxu0 %vm315_vm0, %v9237_v33 }
 0x4e5   :  { %7336 = vmatprep.mubr.msk.f32.mxu0 %vm315_vm0, %v9227_v55 }
 0x4e8   :  { %7337 = vmatmul.mubr.msk.f32.gmra.mxu0 %vm315_vm0, %v9218_v38 }
 0x4e9   :  { %7339 = vmatprep.mubr.msk.f32.mxu0 %vm315_vm0, %v9212_v27 }
 0x4ec   :  { %7340 = vmatmul.mubr.msk.f32.gmra.mxu0 %vm315_vm0, %v9230_v48 }
 0x4ed   :  { %7342 = vmatprep.mubr.msk.f32.mxu0 %vm315_vm0, %v9205_v15 }
 0x4f0   :  { %7343 = vmatmul.mubr.msk.f32.gmra.mxu0 %vm315_vm0, %v9221_v32 }
 0x574   :  { %v9354_v8 = vpop.f32.mrf.mxu0 }
 0x575   :  { %v1211_v11 = vsel %vm315_vm0, %v9354_v8, -inf }
 0x576   :  { %1212 = vmax.xlane.f32.xlu1 %v1211_v11  ;;  %v9358_v14 = vpop.f32.mrf.mxu0 }
 0x577   :  { %v1205_v21 = vsel %vm315_vm0, %v9358_v14, -inf }
 0x578   :  { %v9360_v19 = vpop.f32.mrf.mxu0 }
 0x579   :  { %v1214_v13 = vsel %vm315_vm0, %v9360_v19, -inf }
 0x57a   :  { %1206 = vmax.xlane.f32.xlu1 %v1205_v21  ;;  %v9364_v23 = vpop.f32.mrf.mxu0 }
 0x57b   :  { %v1208_v7 = vsel %vm315_vm0, %v9364_v23, -inf }
 0x57c   :  { %v9366_v25 = vpop.f32.mrf.mxu0 }
 0x57d   :  { %v1223_v20 = vsel %vm315_vm0, %v9366_v25, -inf }
 0x57e   :  { %1215 = vmax.xlane.f32.xlu1 %v1214_v13  ;;  %v9370_v16 = vpop.f32.mrf.mxu0 }
 0x57f   :  { %v1217_v28 = vsel %vm315_vm0, %v9370_v16, -inf }
 0x580   :  { %v9372_v45 = vpop.f32.mrf.mxu0 }
 0x581   :  { %v1226_v17 = vsel %vm315_vm0, %v9372_v45, -inf }
 0x582   :  { %1209 = vmax.xlane.f32.xlu1 %v1208_v7  ;;  %1227 = vmax.xlane.f32.xlu0 %v1226_v17  ;;  %v9378_v18 = vpop.f32.mrf.mxu0 }
 0x583   :  { %v1220_v44 = vsel %vm315_vm0, %v9378_v18, -inf }
 0x584   :  { %v9382_v22 = vpop.f32.mrf.mxu0 }
 0x585   :  { %v1235_v43 = vsel %vm315_vm0, %v9382_v22, -inf }
 0x586   :  { %1224 = vmax.xlane.f32.xlu1 %v1223_v20  ;;  %v9384_v24 = vpop.f32.mrf.mxu0 }
 0x587   :  { %v1229_v42 = vsel %vm315_vm0, %v9384_v24, -inf }
 0x588   :  { %v9386_v26 = vpop.f32.mrf.mxu0 }
 0x589   :  { %v1238_v29 = vsel %vm315_vm0, %v9386_v26, -inf }
 0x58a   :  { %1218 = vmax.xlane.f32.xlu1 %v1217_v28  ;;  %1239 = vmax.xlane.f32.xlu0 %v1238_v29  ;;  %v9392_v30 = vpop.f32.mrf.mxu0 }
 0x58b   :  { %v1232_v51 = vsel %vm315_vm0, %v9392_v30, -inf }
 0x58c   :  { %v9394_v31 = vpop.f32.mrf.mxu0 }
 0x58d   :  { %v1247_v59 = vsel %vm315_vm0, %v9394_v31, -inf }
 0x58e   :  { %1221 = vmax.xlane.f32.xlu1 %v1220_v44  ;;  %v9398_v37 = vpop.f32.mrf.mxu0 }
 0x58f   :  { %v1241_v56 = vsel %vm315_vm0, %v9398_v37, -inf }
 0x590   :  { %v9400_v39 = vpop.f32.mrf.mxu0 }
 0x591   :  { %v1250_v52 = vsel %vm315_vm0, %v9400_v39, -inf }
 0x592   :  { %1230 = vmax.xlane.f32.xlu1 %v1229_v42  ;;  %v9404_v47 = vpop.f32.mrf.mxu0 }
 0x593   :  { %v1244_v50 = vsel %vm315_vm0, %v9404_v47, -inf }
 0x594   :  { %1245 = vmax.xlane.f32.xlu0 %v1244_v50  ;;  %v9418_v61 = vpop.f32.mrf.mxu0 }
 0x596   :  { %1233 = vmax.xlane.f32.xlu1 %v1232_v51  ;;  %v9420_v36 = vpop.f32.mrf.mxu0 }
 0x598   :  { %1251 = vmax.xlane.f32.xlu0 %v1250_v52  ;;  %v9422_v54 = vpop.f32.mrf.mxu0 }
 0x59a   :  { %1236 = vmax.xlane.f32.xlu1 %v1235_v43  ;;  %v9424_v58 = vpop.f32.mrf.mxu0 }
 0x59c   :  { %v9426_v62 = vpop.f32.mrf.mxu0 }
 0x59e   :  { %1242 = vmax.xlane.f32.xlu1 %v1241_v56  ;;  %v9428_v0 = vpop.f32.mrf.mxu0 }
 0x5a0   :  { %v9430_v2 = vpop.f32.mrf.mxu0 }
 0x5a2   :  { %1248 = vmax.xlane.f32.xlu1 %v1247_v59  ;;  %v9434_v9 = vpop.f32.mrf.mxu0 }
 0x5a4   :  { %v9436_v21 = vpop.f32.mrf.mxu0 }
 0x5a6   :  { %v9440_v20 = vpop.f32.mrf.mxu0 }
 0x5ff   :  { %v1213_v1 = vpop.xlane.xlu1 %1212 }
 0x600   :  { %v1255_v49 = vsub.f32 %v9354_v8, %v1213_v1 }
 0x602   :  { %v1273_v10 = vmul.f32 1.442695, %v1255_v49 }
 0x603   :  { %v1207_v5 = vpop.xlane.xlu1 %1206 }
 0x604   :  { %v1253_v6 = vsub.f32 %v9358_v14, %v1207_v5  ;;  %v9442_v14 = vpop.f32.mrf.mxu0 }
 0x606   :  { %v1269_v12 = vmul.f32 1.442695, %v1253_v6 }
 0x607   :  { %v1216_v11 = vpop.xlane.xlu1 %1215 }
 0x608   :  { %7802 = vpow2.f32 %v1269_v12  ;;  %v1256_v13 = vsub.f32 %v9360_v19, %v1216_v11  ;;  %v9448_v19 = vpop.f32.mrf.mxu0 }
 0x609   :  { %7804 = vpow2.f32 %v1273_v10 }
 0x60a   :  { %v1275_v8 = vmul.f32 1.442695, %v1256_v13 }
 0x60b   :  { %v1210_v7 = vpop.xlane.xlu1 %1209  ;;  %v1228_v42 = vpop.xlane.xlu0 %1227 }
 0x60c   :  { %v1254_v17 = vsub.f32 %v9364_v23, %v1210_v7  ;;  %v1260_v23 = vsub.f32 %v9372_v45, %v1228_v42 }
 0x60e   :  { %v1271_v28 = vmul.f32 1.442695, %v1254_v17  ;;  %v1283_v5 = vmul.f32 1.442695, %v1260_v23 }
 0x60f   :  { %v1225_v29 = vpop.xlane.xlu1 %1224 }
 0x610   :  { %7806 = vpow2.f32 %v1271_v28  ;;  %v1259_v44 = vsub.f32 %v9366_v25, %v1225_v29 }
 0x611   :  { %7808 = vpow2.f32 %v1275_v8 }
 0x612   :  { %v1281_v43 = vmul.f32 1.442695, %v1259_v44 }
 0x613   :  { %v1219_v50 = vpop.xlane.xlu1 %1218  ;;  %v1240_v49 = vpop.xlane.xlu0 %1239 }
 0x614   :  { %v1257_v51 = vsub.f32 %v9370_v16, %v1219_v50  ;;  %v9456_v16 = vpop.f32.mrf.mxu0 }
 0x615   :  { %v9446_v52 = vpop.eup %7802 }
 0x616   :  { %v1277_v56 = vmul.f32 1.442695, %v1257_v51  ;;  %v1301_v59 = vsel %vm315_vm0, %v9446_v52, 0.0  ;;  %v9453_v60 = vpop.eup %7804  ;;  %v1811_v7 = vpop.f32.mrf.mxu0 }
 0x617   :  { %v1222_v1 = vpop.xlane.xlu1 %1221  ;;  %1302 = vadd.xlane.f32.xlu1 %v1301_v59  ;;  %v1307_v45 = vsel %vm315_vm0, %v9453_v60, 0.0 }
 0x618   :  { %7810 = vpow2.f32 %v1277_v56  ;;  %v1258_v25 = vsub.f32 %v9378_v18, %v1222_v1  ;;  %v1264_v18 = vsub.f32 %v9386_v26, %v1240_v49  ;;  %v7344_v42 = vpop.f32.mrf.mxu0  ;;  %v9475_v49 = vld [vmem:[#allocation13] ss:$0 sm:$0xff] }
 0x619   :  { %7812 = vpow2.f32 %v1281_v43 }
 0x61a   :  { %v1279_v6 = vmul.f32 1.442695, %v1258_v25  ;;  %v1291_v50 = vmul.f32 1.442695, %v1264_v18  ;;  %v1383_v25 = vld [vmem:[#allocation10 + $0x10] sm:$0xff] }
 0x61b   :  { %v1231_v10 = vpop.xlane.xlu1 %1230  ;;  %1308 = vadd.xlane.f32.xlu1 %v1307_v45  ;;  %7283 = vmatprep.subr.mxu1 %v1383_v25 }
 0x61c   :  { %7814 = vpow2.f32 %v1279_v6  ;;  %v1261_v12 = vsub.f32 %v9384_v24, %v1231_v10  ;;  %7435 = vmatprep.subr.mxu0 %v1383_v25  ;;  %7284 = vmatpush3.msra.mxu1 %v1383_v25 }
 0x61d   :  { %v9461_v11 = vpop.eup %7806  ;;  %v1246_v13 = vpop.xlane.xlu0 %1245  ;;  %7816 = vpow2.f32 %v1283_v5  ;;  %7436 = vmatpush3.msra.mxu0 %v1383_v25 }
 0x61e   :  { %v1285_v17 = vmul.f32 1.442695, %v1261_v12  ;;  %v1304_v8 = vsel %vm315_vm0, %v9461_v11, 0.0  ;;  %v9466_v28 = vpop.eup %7808  ;;  %v1266_v24 = vsub.f32 %v9404_v47, %v1246_v13 }
 0x61f   :  { %v1234_v29 = vpop.xlane.xlu1 %1233  ;;  %1305 = vadd.xlane.f32.xlu0 %v1304_v8  ;;  %v1310_v23 = vsel %vm315_vm0, %v9466_v28, 0.0 }
 0x620   :  { %7818 = vpow2.f32 %v1285_v17  ;;  %v1262_v44 = vsub.f32 %v9392_v30, %v1234_v29  ;;  %v1295_v1 = vmul.f32 1.442695, %v1266_v24  ;;  %v1821_v30 = vpop.f32.mrf.mxu0 }
 0x621   :  { %v1252_v26 = vpop.xlane.xlu0 %1251 }
 0x622   :  { %v1287_v51 = vmul.f32 1.442695, %v1262_v44  ;;  %v1268_v47 = vsub.f32 %v9400_v39, %v1252_v26  ;;  %v1822_v39 = vadd.f32 %v9475_v49, %v1821_v30  ;;  %v1797_v30 = vadd.f32 %v9436_v21, %v9475_v49 }
 0x623   :  { %v1237_v43 = vpop.xlane.xlu1 %1236  ;;  %1311 = vadd.xlane.f32.xlu0 %v1310_v23 }
 0x624   :  { %7820 = vpow2.f32 %v1287_v51  ;;  %v1263_v56 = vsub.f32 %v9382_v22, %v1237_v43  ;;  %v1827_v22 = vadd.f32 %v7344_v42, %v9475_v49  ;;  %v1299_v18 = vmul.f32 1.442695, %v1268_v47  ;;  %v1382_v47 = vld [vmem:[#allocation10 + $0x8] sm:$0xff] }
 0x625   :  { %v9473_v59 = vpop.eup %7810  ;;  %7822 = vpow2.f32 %v1291_v50  ;;  %v1817_v50 = vadd.f32 %v9456_v16, %v9475_v49  ;;  %v1812_v51 = vadd.f32 %v9475_v49, %v1811_v7  ;;  %v1802_v16 = vadd.f32 %v9475_v49, %v9448_v19  ;;  %7285 = vmatprep.subr.mxu1 %v1382_v47  ;;  %7437 = vmatprep.subr.mxu0 %v1382_v47 }
 0x626   :  { %v1289_v5 = vmul.f32 1.442695, %v1263_v56  ;;  %v1313_v6 = vsel %vm315_vm0, %v9473_v59, 0.0  ;;  %v9480_v45 = vpop.eup %7812  ;;  %v1807_v56 = vadd.f32 %v9442_v14, %v9475_v49  ;;  %v1792_v14 = vadd.f32 %v9475_v49, %v9440_v20  ;;  %7286 = vmatpush3.msra.mxu1 %v1382_v47  ;;  %7438 = vmatpush3.msra.mxu0 %v1382_v47 }
 0x627   :  { %1314 = vadd.xlane.f32.xlu1 %v1313_v6  ;;  %v1243_v10 = vpop.xlane.xlu1 %1242  ;;  %v1319_v8 = vsel %vm315_vm0, %v9480_v45, 0.0  ;;  %v1782_v20 = vadd.f32 %v9475_v49, %v9434_v9  ;;  %v9539_v9 = vld [vmem:[#allocation15] ss:$0 sm:$0xff] }
 0x628   :  { %7824 = vpow2.f32 %v1289_v5  ;;  %v1265_v12 = vsub.f32 %v9398_v37, %v1243_v10  ;;  %v1787_v10 = vadd.f32 %v9430_v2, %v9475_v49 }
 0x629   :  { %v9484_v13 = vpop.eup %7814  ;;  %7826 = vpow2.f32 %v1295_v1 }
 0x62a   :  { %v1293_v17 = vmul.f32 1.442695, %v1265_v12  ;;  %v1316_v29 = vsel %vm315_vm0, %v9484_v13, 0.0  ;;  %v9491_v44 = vpop.eup %7816  ;;  %7828 = vtanh.f32 %v1827_v22  ;;  %v1381_v22 = vld [vmem:[#allocation10] sm:$0xff] }
 0x62b   :  { %1320 = vadd.xlane.f32.xlu1 %v1319_v8  ;;  %v1249_v24 = vpop.xlane.xlu1 %1248  ;;  %1317 = vadd.xlane.f32.xlu0 %v1316_v29  ;;  %v1322_v43 = vsel %vm315_vm0, %v9491_v44, 0.0 }
 0x62c   :  { %7830 = vpow2.f32 %v1293_v17  ;;  %v1267_v37 = vsub.f32 %v9394_v31, %v1249_v24  ;;  %7287 = vmatprep.subr.mxu1 %v1381_v22  ;;  %7439 = vmatprep.subr.mxu0 %v1381_v22 }
 0x62d   :  { %v9494_v42 = vpop.eup %7818  ;;  %7832 = vtanh.f32 %v1822_v39  ;;  %7288 = vmatpush3.msra.mxu1 %v1381_v22  ;;  %7440 = vmatpush3.msra.mxu0 %v1381_v22 }
 0x62e   :  { %7834 = vpow2.f32 %v1299_v18  ;;  %v1297_v23 = vmul.f32 1.442695, %v1267_v37  ;;  %v1325_v26 = vsel %vm315_vm0, %v9494_v42, 0.0 }
 0x62f   :  { %1326 = vadd.xlane.f32.xlu1 %v1325_v26  ;;  %1323 = vadd.xlane.f32.xlu0 %v1322_v43 }
 0x630   :  { %7836 = vpow2.f32 %v1297_v23 }
 0x631   :  { %v9503_v31 = vpop.eup %7820  ;;  %7838 = vtanh.f32 %v1817_v50 }
 0x632   :  { %7840 = vtanh.f32 %v1812_v51  ;;  %v1328_v7 = vsel %vm315_vm0, %v9503_v31, 0.0  ;;  %v9511_v1 = vpop.eup %7822 }
 0x633   :  { %1329 = vadd.xlane.f32.xlu0 %v1328_v7  ;;  %7842 = vtanh.f32 %v1807_v56  ;;  %v1334_v6 = vsel %vm315_vm0, %v9511_v1, 0.0 }
 0x634   :  { %7844 = vtanh.f32 %v1802_v16 }
 0x635   :  { %v9513_v25 = vpop.eup %7824  ;;  %7846 = vtanh.f32 %v1797_v30 }
 0x636   :  { %v9517_v5 = vpop.eup %7826  ;;  %v1331_v19 = vsel %vm315_vm0, %v9513_v25, 0.0  ;;  %7848 = vtanh.f32 %v1792_v14 }
 0x637   :  { %1332 = vadd.xlane.f32.xlu1 %v1331_v19  ;;  %1335 = vadd.xlane.f32.xlu0 %v1334_v6  ;;  %v7829_v21 = vpop.eup %7828  ;;  %v1340_v17 = vsel %vm315_vm0, %v9517_v5, 0.0  ;;  %7850 = vtanh.f32 %v1787_v10 }
 0x638   :  { %7852 = vtanh.f32 %v1782_v20  ;;  %v1964_v51 = vmul.f32 %v7829_v21, %v9539_v9 }
 0x639   :  { %v9527_v12 = vpop.eup %7830 }
 0x63a   :  { %v7833_v39 = vpop.eup %7832  ;;  %v1337_v18 = vsel %vm315_vm0, %v9527_v12, 0.0  ;;  %v2026_v56 = vsel %vm315_vm0, %v1964_v51, 0.0 }
 0x63b   :  { %v9535_v2 = vpop.eup %7834  ;;  %1338 = vadd.xlane.f32.xlu1 %v1337_v18  ;;  %1341 = vadd.xlane.f32.xlu0 %v1340_v17  ;;  %v1963_v50 = vmul.f32 %v7833_v39, %v9539_v9 }
 0x63c   :  { %v1346_v37 = vsel %vm315_vm0, %v9535_v2, 0.0 }
 0x63d   :  { %v9537_v8 = vpop.eup %7836  ;;  %v2023_v43 = vsel %vm315_vm0, %v1963_v50, 0.0 }
 0x63e   :  { %v7839_v29 = vpop.eup %7838  ;;  %v1343_v24 = vsel %vm315_vm0, %v9537_v8, 0.0 }
 0x63f   :  { %v7841_v23 = vpop.eup %7840  ;;  %1344 = vadd.xlane.f32.xlu1 %v1343_v24  ;;  %1347 = vadd.xlane.f32.xlu0 %v1346_v37  ;;  %v1962_v7 = vmul.f32 %v7839_v29, %v9539_v9 }
 0x640   :  { %v7843_v26 = vpop.eup %7842  ;;  %v1961_v16 = vmul.f32 %v7841_v23, %v9539_v9 }
 0x641   :  { %v7845_v30 = vpop.eup %7844  ;;  %v2020_v19 = vsel %vm315_vm0, %v1962_v7, 0.0  ;;  %v1960_v22 = vmul.f32 %v7843_v26, %v9539_v9 }
 0x642   :  { %v7847_v47 = vpop.eup %7846  ;;  %v2017_v14 = vsel %vm315_vm0, %v1961_v16, 0.0  ;;  %v1959_v6 = vmul.f32 %v7845_v30, %v9539_v9 }
 0x643   :  { %2024 = vadd.xlane.f32.xlu1 %v2023_v43  ;;  %2027 = vadd.xlane.f32.xlu0 %v2026_v56  ;;  %v7849_v21 = vpop.eup %7848  ;;  %v2014_v18 = vsel %vm315_vm0, %v1960_v22, 0.0  ;;  %v1958_v29 = vmul.f32 %v7847_v47, %v9539_v9 }
 0x644   :  { %v7851_v10 = vpop.eup %7850  ;;  %v2011_v39 = vsel %vm315_vm0, %v1959_v6, 0.0  ;;  %v1957_v17 = vmul.f32 %v7849_v21, %v9539_v9 }
 0x645   :  { %v7853_v20 = vpop.eup %7852  ;;  %v2008_v37 = vsel %vm315_vm0, %v1958_v29, 0.0  ;;  %v1956_v51 = vmul.f32 %v7851_v10, %v9539_v9 }
 0x646   :  { %v2005_v24 = vsel %vm315_vm0, %v1957_v17, 0.0  ;;  %v1955_v50 = vmul.f32 %v7853_v20, %v9539_v9 }
 0x647   :  { %2018 = vadd.xlane.f32.xlu1 %v2017_v14  ;;  %2021 = vadd.xlane.f32.xlu0 %v2020_v19  ;;  %v2002_v26 = vsel %vm315_vm0, %v1956_v51, 0.0 }
 0x648   :  { %v1999_v23 = vsel %vm315_vm0, %v1955_v50, 0.0 }
 0x64b   :  { %2012 = vadd.xlane.f32.xlu1 %v2011_v39  ;;  %2015 = vadd.xlane.f32.xlu0 %v2014_v18 }
 0x64f   :  { %2006 = vadd.xlane.f32.xlu1 %v2005_v24  ;;  %2009 = vadd.xlane.f32.xlu0 %v2008_v37 }
 0x653   :  { %2000 = vadd.xlane.f32.xlu1 %v1999_v23  ;;  %2003 = vadd.xlane.f32.xlu0 %v2002_v26 }
 0x6a0   :  { %v1303_v43 = vpop.xlane.xlu1 %1302 }
 0x6a1   :  { %7854 = vrcp.f32 %v1303_v43 }
 0x6a4   :  { %v1309_v56 = vpop.xlane.xlu1 %1308 }
 0x6a5   :  { %7856 = vrcp.f32 %v1309_v56 }
 0x6a8   :  { %v1306_v16 = vpop.xlane.xlu0 %1305 }
 0x6a9   :  { %7858 = vrcp.f32 %v1306_v16 }
 0x6ac   :  { %v1312_v7 = vpop.xlane.xlu0 %1311 }
 0x6ad   :  { %7860 = vrcp.f32 %v1312_v7 }
 0x6ae   :  { %v7855_v30 = vpop.eup %7854 }
 0x6af   :  { %v1350_v47 = vmul.f32 %v7855_v30, %v9446_v52 }
 0x6b0   :  { %v1315_v14 = vpop.xlane.xlu1 %1314 }
 0x6b1   :  { %7862 = vrcp.f32 %v1315_v14  ;;  %7289 = vmatprep.mubr.msk.f32.mxu1 %vm315_vm0, %v1350_v47 }
 0x6b2   :  { %v7857_v22 = vpop.eup %7856 }
 0x6b3   :  { %v1354_v18 = vmul.f32 %v7857_v22, %v9453_v60 }
 0x6b4   :  { %v1321_v19 = vpop.xlane.xlu1 %1320  ;;  %v1318_v6 = vpop.xlane.xlu0 %1317 }
 0x6b5   :  { %7864 = vrcp.f32 %v1321_v19 }
 0x6b6   :  { %v7859_v21 = vpop.eup %7858  ;;  %7866 = vrcp.f32 %v1318_v6 }
 0x6b7   :  { %v1352_v10 = vmul.f32 %v7859_v21, %v9461_v11 }
 0x6b8   :  { %v1327_v20 = vpop.xlane.xlu1 %1326  ;;  %v1324_v39 = vpop.xlane.xlu0 %1323 }
 0x6b9   :  { %7868 = vrcp.f32 %v1327_v20  ;;  %7290 = vmatmul.mubr.msk.f32.vlgmr.msra.gmra.mxu1 %vm315_vm0, %v1352_v10 }
 0x6ba   :  { %v7861_v52 = vpop.eup %7860  ;;  %7870 = vrcp.f32 %v1324_v39  ;;  %7292 = vmatprep.mubr.msk.f32.mxu1 %vm315_vm0, %v1354_v18 }
 0x6bb   :  { %v1356_v17 = vmul.f32 %v7861_v52, %v9466_v28 }
 0x6bc   :  { %v1330_v29 = vpop.xlane.xlu0 %1329 }
 0x6bd   :  { %7872 = vrcp.f32 %v1330_v29  ;;  %7293 = vmatmul.mubr.msk.f32.gmra.mxu1 %vm315_vm0, %v1356_v17 }
 0x6be   :  { %v7863_v24 = vpop.eup %7862 }
 0x6bf   :  { %v1358_v11 = vmul.f32 %v7863_v24, %v9473_v59 }
 0x6c0   :  { %v1333_v37 = vpop.xlane.xlu1 %1332  ;;  %v1336_v50 = vpop.xlane.xlu0 %1335 }
 0x6c1   :  { %7874 = vrcp.f32 %v1333_v37  ;;  %7295 = vmatprep.mubr.msk.f32.mxu1 %vm315_vm0, %v1358_v11 }
 0x6c2   :  { %v7865_v60 = vpop.eup %7864  ;;  %7876 = vrcp.f32 %v1336_v50 }
 0x6c3   :  { %v7867_v51 = vpop.eup %7866  ;;  %v1362_v23 = vmul.f32 %v7865_v60, %v9480_v45 }
 0x6c4   :  { %v1339_v26 = vpop.xlane.xlu1 %1338  ;;  %v1342_v43 = vpop.xlane.xlu0 %1341  ;;  %v1360_v28 = vmul.f32 %v7867_v51, %v9484_v13 }
 0x6c5   :  { %7878 = vrcp.f32 %v1339_v26 }
 0x6c6   :  { %v7869_v56 = vpop.eup %7868  ;;  %7880 = vrcp.f32 %v1342_v43  ;;  %7296 = vmatmul.mubr.msk.f32.gmra.mxu1 %vm315_vm0, %v1360_v28 }
 0x6c7   :  { %v7871_v59 = vpop.eup %7870  ;;  %7298 = vmatprep.mubr.msk.f32.mxu1 %vm315_vm0, %v1362_v23  ;;  %v1366_v16 = vmul.f32 %v7869_v56, %v9494_v42 }
 0x6c8   :  { %v1345_v7 = vpop.xlane.xlu1 %1344  ;;  %v1348_v30 = vpop.xlane.xlu0 %1347  ;;  %v1364_v47 = vmul.f32 %v7871_v59, %v9491_v44 }
 0x6c9   :  { %7882 = vrcp.f32 %v1345_v7 }
 0x6ca   :  { %v7873_v45 = vpop.eup %7872  ;;  %7884 = vrcp.f32 %v1348_v30  ;;  %7299 = vmatmul.mubr.msk.f32.gmra.mxu1 %vm315_vm0, %v1364_v47 }
 0x6cb   :  { %7301 = vmatprep.mubr.msk.f32.mxu1 %vm315_vm0, %v1366_v16  ;;  %v1368_v13 = vmul.f32 %v7873_v45, %v9503_v31 }
 0x6ce   :  { %v7875_v14 = vpop.eup %7874  ;;  %7302 = vmatmul.mubr.msk.f32.gmra.mxu1 %vm315_vm0, %v1368_v13 }
 0x6cf   :  { %v7877_v19 = vpop.eup %7876  ;;  %v1370_v6 = vmul.f32 %v7875_v14, %v9513_v25 }
 0x6d0   :  { %v1372_v42 = vmul.f32 %v7877_v19, %v9511_v1 }
 0x6d1   :  { %7304 = vmatprep.mubr.msk.f32.mxu1 %vm315_vm0, %v1370_v6 }
 0x6d2   :  { %v7879_v44 = vpop.eup %7878  ;;  %7305 = vmatmul.mubr.msk.f32.gmra.mxu1 %vm315_vm0, %v1372_v42 }
 0x6d3   :  { %v7881_v22 = vpop.eup %7880  ;;  %v1374_v21 = vmul.f32 %v7879_v44, %v9527_v12 }
 0x6d4   :  { %v1376_v10 = vmul.f32 %v7881_v22, %v9517_v5 }
 0x6d5   :  { %7307 = vmatprep.mubr.msk.f32.mxu1 %vm315_vm0, %v1374_v21 }
 0x6d6   :  { %v7883_v31 = vpop.eup %7882  ;;  %7308 = vmatmul.mubr.msk.f32.gmra.mxu1 %vm315_vm0, %v1376_v10 }
 0x6d7   :  { %v7885_v20 = vpop.eup %7884  ;;  %v1378_v25 = vmul.f32 %v7883_v31, %v9537_v8 }
 0x6d8   :  { %v1380_v1 = vmul.f32 %v7885_v20, %v9535_v2 }
 0x6d9   :  { %7310 = vmatprep.mubr.msk.f32.mxu1 %vm315_vm0, %v1378_v25 }
 0x6da   :  { %7311 = vmatmul.mubr.msk.f32.gmra.mxu1 %vm315_vm0, %v1380_v1 }
 0x779   :  { %v9597_v39 = vpop.f32.mrf.mxu1 }
 0x77a   :  { %11690 = vst [vmem:[#allocation49_spill] sm:$0xff] %v9597_v39 }
 0x77b   :  { %v9599_v18 = vpop.f32.mrf.mxu1 }
 0x77c   :  { %11691 = vst [vmem:[#allocation50_spill] sm:$0xff] %v9599_v18  ;;  %7345 = vmatprep.mubr.msk.f32.mxu0 %vm315_vm0, %v9599_v18 }
 0x77d   :  { %v9603_v5 = vpop.f32.mrf.mxu1  ;;  %7346 = vmatmul.mubr.msk.f32.gmra.mxu0 %vm315_vm0, %v9597_v39 }
 0x77e   :  { %11692 = vst [vmem:[#allocation51_spill] sm:$0xff] %v9603_v5 }
 0x77f   :  { %v9607_v12 = vpop.f32.mrf.mxu1 }
 0x780   :  { %11693 = vst [vmem:[#allocation52_spill] sm:$0xff] %v9607_v12  ;;  %7348 = vmatprep.mubr.msk.f32.mxu0 %vm315_vm0, %v9607_v12 }
 0x781   :  { %7349 = vmatmul.mubr.msk.f32.gmra.mxu0 %vm315_vm0, %v9603_v5 }
 0x786   :  { %v9613_v2 = vpop.f32.mrf.mxu1 }
 0x787   :  { %11694 = vst [vmem:[#allocation53_spill] sm:$0xff] %v9613_v2 }
 0x788   :  { %v9615_v8 = vpop.f32.mrf.mxu1 }
 0x789   :  { %11695 = vst [vmem:[#allocation54_spill] sm:$0xff] %v9615_v8  ;;  %7351 = vmatprep.mubr.msk.f32.mxu0 %vm315_vm0, %v9615_v8 }
 0x78a   :  { %v9619_v52 = vpop.f32.mrf.mxu1  ;;  %7352 = vmatmul.mubr.msk.f32.gmra.mxu0 %vm315_vm0, %v9613_v2 }
 0x78c   :  { %v9623_v17 = vpop.f32.mrf.mxu1 }
 0x78d   :  { %11696 = vst [vmem:[#allocation55_spill] sm:$0xff] %v9623_v17  ;;  %7354 = vmatprep.mubr.msk.f32.mxu0 %vm315_vm0, %v9623_v17 }
 0x78e   :  { %v9627_v29 = vpop.f32.mrf.mxu1  ;;  %7355 = vmatmul.mubr.msk.f32.gmra.mxu0 %vm315_vm0, %v9619_v52 }
 0x790   :  { %v9631_v24 = vpop.f32.mrf.mxu1 }
 0x791   :  { %7357 = vmatprep.mubr.msk.f32.mxu0 %vm315_vm0, %v9631_v24 }
 0x792   :  { %7358 = vmatmul.mubr.msk.f32.gmra.mxu0 %vm315_vm0, %v9627_v29  ;;  %v9637_v11 = vpop.f32.mrf.mxu1 }
 0x794   :  { %v9639_v37 = vpop.f32.mrf.mxu1 }
 0x795   :  { %7360 = vmatprep.mubr.msk.f32.mxu0 %vm315_vm0, %v9639_v37 }
 0x796   :  { %v9643_v50 = vpop.f32.mrf.mxu1  ;;  %7361 = vmatmul.mubr.msk.f32.gmra.mxu0 %vm315_vm0, %v9637_v11 }
 0x798   :  { %v9647_v60 = vpop.f32.mrf.mxu1 }
 0x799   :  { %7363 = vmatprep.mubr.msk.f32.mxu0 %vm315_vm0, %v9647_v60 }
 0x79a   :  { %v9651_v51 = vpop.f32.mrf.mxu1  ;;  %7364 = vmatmul.mubr.msk.f32.gmra.mxu0 %vm315_vm0, %v9643_v50 }
 0x79c   :  { %v9655_v23 = vpop.f32.mrf.mxu1 }
 0x79d   :  { %7366 = vmatprep.mubr.msk.f32.mxu0 %vm315_vm0, %v9655_v23 }
 0x79e   :  { %7367 = vmatmul.mubr.msk.f32.gmra.mxu0 %vm315_vm0, %v9651_v51 }
 0x83d   :  { %v9661_v26 = vpop.f32.mrf.mxu0 }
 0x83f   :  { %v9663_v43 = vpop.f32.mrf.mxu0 }
 0x841   :  { %v9665_v28 = vpop.f32.mrf.mxu0 }
 0x843   :  { %v9667_v56 = vpop.f32.mrf.mxu0 }
 0x84a   :  { %v7353_v59 = vpop.f32.mrf.mxu0 }
 0x84c   :  { %v1851_v16 = vpop.f32.mrf.mxu0 }
 0x84e   :  { %v7356_v7 = vpop.f32.mrf.mxu0 }
 0x84f   :  { %v1867_v10 = vadd.f32 %v7356_v7, %v9475_v49  ;;  %v1772_v7 = vadd.f32 %v9475_v49, %v9428_v0 }
 0x850   :  { %v1861_v30 = vpop.f32.mrf.mxu0 }
 0x851   :  { %v1862_v25 = vadd.f32 %v9475_v49, %v1861_v30 }
 0x852   :  { %v7359_v47 = vpop.f32.mrf.mxu0 }
 0x853   :  { %v1877_v45 = vadd.f32 %v7359_v47, %v9475_v49 }
 0x854   :  { %v1871_v13 = vpop.f32.mrf.mxu0 }
 0x855   :  { %7886 = vtanh.f32 %v1877_v45  ;;  %v1872_v14 = vadd.f32 %v9475_v49, %v1871_v13  ;;  %v1777_v13 = vadd.f32 %v9426_v62, %v9475_v49 }
 0x856   :  { %v7362_v19 = vpop.f32.mrf.mxu0 }
 0x857   :  { %7888 = vtanh.f32 %v1872_v14  ;;  %v1887_v6 = vadd.f32 %v7362_v19, %v9475_v49 }
 0x858   :  { %v1881_v42 = vpop.f32.mrf.mxu0 }
 0x859   :  { %7890 = vtanh.f32 %v1887_v6  ;;  %v1882_v44 = vadd.f32 %v9475_v49, %v1881_v42  ;;  %v1857_v42 = vadd.f32 %v7353_v59, %v9475_v49 }
 0x85a   :  { %v7365_v22 = vpop.f32.mrf.mxu0 }
 0x85b   :  { %7892 = vtanh.f32 %v1882_v44  ;;  %v1897_v21 = vadd.f32 %v7365_v22, %v9475_v49 }
 0x85c   :  { %v1891_v31 = vpop.f32.mrf.mxu0 }
 0x85d   :  { %7894 = vtanh.f32 %v1897_v21  ;;  %v1892_v20 = vadd.f32 %v9475_v49, %v1891_v31  ;;  %v1852_v21 = vadd.f32 %v9475_v49, %v1851_v16 }
 0x85e   :  { %v7368_v1 = vpop.f32.mrf.mxu0 }
 0x85f   :  { %7896 = vtanh.f32 %v1892_v20  ;;  %v1907_v47 = vadd.f32 %v7368_v1, %v9475_v49  ;;  %v1767_v20 = vadd.f32 %v9422_v54, %v9475_v49  ;;  %v1847_v54 = vadd.f32 %v9665_v28, %v9475_v49 }
 0x860   :  { %7898 = vtanh.f32 %v1867_v10  ;;  %v1901_v45 = vpop.f32.mrf.mxu0 }
 0x861   :  { %7900 = vtanh.f32 %v1907_v47  ;;  %v1902_v14 = vadd.f32 %v9475_v49, %v1901_v45  ;;  %v1762_v47 = vadd.f32 %v9475_v49, %v9424_v58  ;;  %v1842_v58 = vadd.f32 %v9475_v49, %v9667_v56 }
 0x862   :  { %v7887_v19 = vpop.eup %7886  ;;  %7902 = vtanh.f32 %v1862_v25  ;;  %v1752_v56 = vadd.f32 %v9475_v49, %v9420_v36  ;;  %v1832_v36 = vadd.f32 %v9475_v49, %v9663_v43 }
 0x863   :  { %7904 = vtanh.f32 %v1902_v14  ;;  %v1974_v30 = vmul.f32 %v7887_v19, %v9539_v9 }
 0x864   :  { %v7889_v6 = vpop.eup %7888  ;;  %7906 = vtanh.f32 %v1777_v13 }
 0x865   :  { %v2056_v44 = vsel %vm315_vm0, %v1974_v30, 0.0  ;;  %v1973_v22 = vmul.f32 %v7889_v6, %v9539_v9  ;;  %7908 = vtanh.f32 %v1772_v7 }
 0x866   :  { %v7891_v62 = vpop.eup %7890  ;;  %2057 = vadd.xlane.f32.xlu0 %v2056_v44  ;;  %7910 = vtanh.f32 %v1857_v42 }
 0x867   :  { %v2053_v10 = vsel %vm315_vm0, %v1973_v22, 0.0  ;;  %v1976_v0 = vmul.f32 %v7891_v62, %v9539_v9  ;;  %7912 = vtanh.f32 %v1852_v21  ;;  %v1757_v62 = vadd.f32 %v9418_v61, %v9475_v49 }
 0x868   :  { %v7893_v31 = vpop.eup %7892  ;;  %2054 = vadd.xlane.f32.xlu1 %v2053_v10  ;;  %7914 = vtanh.f32 %v1767_v20  ;;  %v1837_v61 = vadd.f32 %v9661_v26, %v9475_v49 }
 0x869   :  { %v2062_v59 = vsel %vm315_vm0, %v1976_v0, 0.0  ;;  %v1975_v25 = vmul.f32 %v7893_v31, %v9539_v9  ;;  %7916 = vtanh.f32 %v1762_v47 }
 0x86a   :  { %v7895_v1 = vpop.eup %7894  ;;  %2063 = vadd.xlane.f32.xlu0 %v2062_v59  ;;  %7918 = vtanh.f32 %v1847_v54 }
 0x86b   :  { %v2059_v16 = vsel %vm315_vm0, %v1975_v25, 0.0  ;;  %v1978_v45 = vmul.f32 %v7895_v1, %v9539_v9  ;;  %7920 = vtanh.f32 %v1842_v58 }
 0x86c   :  { %v7897_v13 = vpop.eup %7896  ;;  %2060 = vadd.xlane.f32.xlu1 %v2059_v16  ;;  %7922 = vtanh.f32 %v1757_v62 }
 0x86d   :  { %v7899_v14 = vpop.eup %7898  ;;  %v2068_v19 = vsel %vm315_vm0, %v1978_v45, 0.0  ;;  %v1977_v7 = vmul.f32 %v7897_v13, %v9539_v9  ;;  %7924 = vtanh.f32 %v1752_v56 }
 0x86e   :  { %v7901_v30 = vpop.eup %7900  ;;  %2069 = vadd.xlane.f32.xlu0 %v2068_v19  ;;  %v1972_v10 = vmul.f32 %v7899_v14, %v9539_v9  ;;  %7926 = vtanh.f32 %v1837_v61 }
 0x86f   :  { %v7903_v6 = vpop.eup %7902  ;;  %v2065_v42 = vsel %vm315_vm0, %v1977_v7, 0.0  ;;  %v1980_v44 = vmul.f32 %v7901_v30, %v9539_v9  ;;  %7928 = vtanh.f32 %v1832_v36 }
 0x870   :  { %v7905_v22 = vpop.eup %7904  ;;  %2066 = vadd.xlane.f32.xlu1 %v2065_v42  ;;  %v1971_v20 = vmul.f32 %v7903_v6, %v9539_v9  ;;  %v2050_v25 = vsel %vm315_vm0, %v1972_v10, 0.0 }
 0x871   :  { %v2074_v28 = vsel %vm315_vm0, %v1980_v44, 0.0  ;;  %v1979_v21 = vmul.f32 %v7905_v22, %v9539_v9  ;;  %v7907_v0 = vpop.eup %7906 }
 0x872   :  { %2075 = vadd.xlane.f32.xlu0 %v2074_v28  ;;  %v7909_v59 = vpop.eup %7908  ;;  %v1954_v1 = vmul.f32 %v7907_v0, %v9539_v9  ;;  %v2047_v16 = vsel %vm315_vm0, %v1971_v20, 0.0 }
 0x873   :  { %v2071_v31 = vsel %vm315_vm0, %v1979_v21, 0.0  ;;  %v7911_v47 = vpop.eup %7910  ;;  %v1953_v45 = vmul.f32 %v7909_v59, %v9539_v9 }
 0x874   :  { %2072 = vadd.xlane.f32.xlu1 %v2071_v31  ;;  %v7913_v13 = vpop.eup %7912  ;;  %v1996_v14 = vsel %vm315_vm0, %v1954_v1, 0.0  ;;  %v1970_v26 = vmul.f32 %v7911_v47, %v9539_v9 }
 0x875   :  { %v7915_v54 = vpop.eup %7914  ;;  %v1993_v19 = vsel %vm315_vm0, %v1953_v45, 0.0  ;;  %v1969_v7 = vmul.f32 %v7913_v13, %v9539_v9 }
 0x876   :  { %2051 = vadd.xlane.f32.xlu0 %v2050_v25  ;;  %v7917_v30 = vpop.eup %7916  ;;  %v2044_v49 = vsel %vm315_vm0, %v1970_v26, 0.0  ;;  %v1952_v43 = vmul.f32 %v7915_v54, %v9539_v9  ;;  %v9747_v26 = vpop.xlane.xlu1 %2024 }
 0x877   :  { %v7919_v6 = vpop.eup %7918  ;;  %v2041_v58 = vsel %vm315_vm0, %v1969_v7, 0.0  ;;  %v1951_v42 = vmul.f32 %v7917_v30, %v9539_v9 }
 0x878   :  { %2048 = vadd.xlane.f32.xlu1 %v2047_v16  ;;  %v7921_v44 = vpop.eup %7920  ;;  %v1990_v22 = vsel %vm315_vm0, %v1952_v43, 0.0  ;;  %v1968_v62 = vmul.f32 %v7919_v6, %v9539_v9 }
 0x879   :  { %v7923_v28 = vpop.eup %7922  ;;  %v1987_v21 = vsel %vm315_vm0, %v1951_v42, 0.0  ;;  %v1967_v10 = vmul.f32 %v7921_v44, %v9539_v9 }
 0x87a   :  { %1997 = vadd.xlane.f32.xlu0 %v1996_v14  ;;  %v7925_v0 = vpop.eup %7924  ;;  %v2038_v56 = vsel %vm315_vm0, %v1968_v62, 0.0  ;;  %v1950_v31 = vmul.f32 %v7923_v28, %v9539_v9  ;;  %v9745_v14 = vpop.xlane.xlu0 %2027 }
 0x87b   :  { %v7927_v20 = vpop.eup %7926  ;;  %v2035_v59 = vsel %vm315_vm0, %v1967_v10, 0.0  ;;  %v1949_v61 = vmul.f32 %v7925_v0, %v9539_v9 }
 0x87c   :  { %1994 = vadd.xlane.f32.xlu1 %v1993_v19  ;;  %v7929_v25 = vpop.eup %7928  ;;  %v1984_v1 = vsel %vm315_vm0, %v1950_v31, 0.0  ;;  %v1966_v47 = vmul.f32 %v7927_v20, %v9539_v9  ;;  %v2019_v19 = vpop.xlane.xlu1 %2018 }
 0x87d   :  { %v1981_v36 = vsel %vm315_vm0, %v1949_v61, 0.0  ;;  %v1965_v16 = vmul.f32 %v7929_v25, %v9539_v9 }
 0x87e   :  { %2045 = vadd.xlane.f32.xlu0 %v2044_v49  ;;  %v2032_v45 = vsel %vm315_vm0, %v1966_v47, 0.0  ;;  %v2022_v54 = vpop.xlane.xlu0 %2021 }
 0x87f   :  { %v2029_v13 = vsel %vm315_vm0, %v1965_v16, 0.0 }
 0x880   :  { %2042 = vadd.xlane.f32.xlu1 %v2041_v58  ;;  %v2013_v30 = vpop.xlane.xlu1 %2012 }
 0x882   :  { %1991 = vadd.xlane.f32.xlu0 %v1990_v22  ;;  %v2016_v7 = vpop.xlane.xlu0 %2015 }
 0x884   :  { %1988 = vadd.xlane.f32.xlu1 %v1987_v21  ;;  %v2007_v43 = vpop.xlane.xlu1 %2006  ;;  %v9749_v21 = vld [vmem:[#allocation2] ss:$0 sm:$0xff] }
 0x885   :  { %v2092_v5 = vadd.f32 %v9749_v21, %v2007_v43 }
 0x886   :  { %2039 = vadd.xlane.f32.xlu0 %v2038_v56  ;;  %v2010_v49 = vpop.xlane.xlu0 %2009 }
 0x887   :  { %v2093_v31 = vadd.f32 %v9749_v21, %v2010_v49  ;;  %v2095_v49 = vadd.f32 %v9749_v21, %v2016_v7 }
 0x888   :  { %2036 = vadd.xlane.f32.xlu1 %v2035_v59  ;;  %v2001_v58 = vpop.xlane.xlu1 %2000 }
 0x88a   :  { %1985 = vadd.xlane.f32.xlu0 %v1984_v1  ;;  %v2004_v6 = vpop.xlane.xlu0 %2003 }
 0x88b   :  { %v2091_v59 = vadd.f32 %v9749_v21, %v2004_v6 }
 0x88c   :  { %1982 = vadd.xlane.f32.xlu1 %v1981_v36  ;;  %v2090_v36 = vadd.f32 %v9749_v21, %v2001_v58 }
 0x88e   :  { %2033 = vadd.xlane.f32.xlu0 %v2032_v45 }
 0x890   :  { %2030 = vadd.xlane.f32.xlu1 %v2029_v13 }
 0x8ef   :  { %v2058_v9 = vpop.xlane.xlu0 %2057 }
 0x8f0   :  { %v2109_v0 = vadd.f32 %v9749_v21, %v2058_v9 }
 0x8f1   :  { %v2055_v42 = vpop.xlane.xlu1 %2054 }
 0x8f2   :  { %v2125_v61 = vmax.f32 %v2093_v31, %v2109_v0  ;;  %v2108_v6 = vadd.f32 %v9749_v21, %v2055_v42 }
 0x8f3   :  { %v2064_v44 = vpop.xlane.xlu0 %2063 }
 0x8f4   :  { %v2141_v45 = vsub.f32 %v2093_v31, %v2125_v61  ;;  %v2111_v13 = vadd.f32 %v9749_v21, %v2064_v44  ;;  %v2189_v46 = vsub.f32 %v2109_v0, %v2125_v61  ;;  %v2124_v0 = vmax.f32 %v2092_v5, %v2108_v6 }
 0x8f5   :  { %v2061_v22 = vpop.xlane.xlu1 %2060 }
 0x8f6   :  { %v2127_v40 = vmax.f32 %v2095_v49, %v2111_v13  ;;  %v2214_v58 = vmul.f32 1.442695, %v2189_v46  ;;  %v2110_v31 = vadd.f32 %v9749_v21, %v2061_v22  ;;  %v2140_v22 = vsub.f32 %v2092_v5, %v2124_v0 }
 0x8f7   :  { %v2070_v62 = vpop.xlane.xlu0 %2069 }
 0x8f8   :  { %v2143_v7 = vsub.f32 %v2095_v49, %v2127_v40  ;;  %v2113_v42 = vadd.f32 %v9749_v21, %v2070_v62  ;;  %v2098_v49 = vadd.f32 %v9749_v21, %v9747_v26 }
 0x8f9   :  { %v2067_v28 = vpop.xlane.xlu1 %2066 }
 0x8fa   :  { %v2112_v46 = vadd.f32 %v9749_v21, %v2067_v28  ;;  %v2164_v28 = vmul.f32 1.442695, %v2140_v22 }
 0x8fb   :  { %v2076_v10 = vpop.xlane.xlu0 %2075 }
 0x8fd   :  { %v2073_v56 = vpop.xlane.xlu1 %2072 }
 0x8ff   :  { %v2052_v20 = vpop.xlane.xlu0 %2051 }
 0x900   :  { %v2107_v25 = vadd.f32 %v9749_v21, %v2052_v20  ;;  %v2166_v20 = vmul.f32 1.442695, %v2141_v45 }
 0x901   :  { %v2049_v1 = vpop.xlane.xlu1 %2048 }
 0x902   :  { %v2123_v47 = vmax.f32 %v2091_v59, %v2107_v25  ;;  %v2106_v16 = vadd.f32 %v9749_v21, %v2049_v1 }
 0x904   :  { %v2139_v9 = vsub.f32 %v2091_v59, %v2123_v47  ;;  %v2187_v39 = vsub.f32 %v2107_v25, %v2123_v47  ;;  %v2122_v63 = vmax.f32 %v2090_v36, %v2106_v16  ;;  %v2094_v59 = vadd.f32 %v9749_v21, %v2013_v30 }
 0x905   :  { %v2097_v25 = vadd.f32 %v9749_v21, %v2022_v54  ;;  %v2099_v54 = vadd.f32 %v9749_v21, %v9745_v14 }
 0x906   :  { %v2162_v18 = vmul.f32 1.442695, %v2139_v9  ;;  %v2210_v3 = vmul.f32 1.442695, %v2187_v39  ;;  %v2138_v57 = vsub.f32 %v2090_v36, %v2122_v63  ;;  %v2186_v44 = vsub.f32 %v2106_v16, %v2122_v63  ;;  %v1998_v36 = vpop.xlane.xlu0 %1997 }
 0x907   :  { %v2191_v39 = vsub.f32 %v2111_v13, %v2127_v40  ;;  %v2126_v43 = vmax.f32 %v2094_v59, %v2110_v31  ;;  %v2096_v63 = vadd.f32 %v9749_v21, %v2019_v19  ;;  %v2129_v47 = vmax.f32 %v2097_v25, %v2113_v42 }
 0x908   :  { %7930 = vpow2.f32 %v2162_v18  ;;  %v2160_v61 = vmul.f32 1.442695, %v2138_v57  ;;  %v2208_v1 = vmul.f32 1.442695, %v2186_v44  ;;  %v2188_v18 = vsub.f32 %v2108_v6, %v2124_v0  ;;  %v9768_v57 = vpop.xlane.xlu1 %1994 }
 0x909   :  { %7932 = vpow2.f32 %v2210_v3  ;;  %v2170_v3 = vmul.f32 1.442695, %v2143_v7  ;;  %v2218_v30 = vmul.f32 1.442695, %v2191_v39  ;;  %v2142_v16 = vsub.f32 %v2094_v59, %v2126_v43 }
 0x90a   :  { %7934 = vpow2.f32 %v2166_v20  ;;  %v2128_v62 = vmax.f32 %v2096_v63, %v2112_v46  ;;  %v2115_v40 = vadd.f32 %v9749_v21, %v2076_v10  ;;  %v2190_v5 = vsub.f32 %v2110_v31, %v2126_v43  ;;  %v2046_v14 = vpop.xlane.xlu0 %2045 }
 0x90b   :  { %7936 = vpow2.f32 %v2214_v58  ;;  %v2212_v45 = vmul.f32 1.442695, %v2188_v18  ;;  %v2145_v19 = vsub.f32 %v2097_v25, %v2129_v47  ;;  %v2114_v13 = vadd.f32 %v9749_v21, %v2073_v56 }
 0x90c   :  { %7938 = vpow2.f32 %v2160_v61  ;;  %v2193_v9 = vsub.f32 %v2113_v42, %v2129_v47  ;;  %v2168_v6 = vmul.f32 1.442695, %v2142_v16  ;;  %v2144_v10 = vsub.f32 %v2096_v63, %v2128_v62  ;;  %v2043_v56 = vpop.xlane.xlu1 %2042 }
 0x90d   :  { %7940 = vpow2.f32 %v2208_v1  ;;  %v2131_v20 = vmax.f32 %v2099_v54, %v2115_v40  ;;  %v2216_v44 = vmul.f32 1.442695, %v2190_v5  ;;  %v2174_v31 = vmul.f32 1.442695, %v2145_v19 }
 0x90e   :  { %7942 = vpow2.f32 %v2170_v3  ;;  %v2192_v59 = vsub.f32 %v2112_v46, %v2128_v62  ;;  %v2130_v7 = vmax.f32 %v2098_v49, %v2114_v13  ;;  %v2222_v42 = vmul.f32 1.442695, %v2193_v9  ;;  %v1992_v18 = vpop.xlane.xlu0 %1991 }
 0x90f   :  { %7944 = vpow2.f32 %v2218_v30  ;;  %v2172_v26 = vmul.f32 1.442695, %v2144_v10  ;;  %v2147_v25 = vsub.f32 %v2099_v54, %v2131_v20  ;;  %v2195_v43 = vsub.f32 %v2115_v40, %v2131_v20 }
 0x910   :  { %7946 = vpow2.f32 %v2164_v28  ;;  %v2220_v22 = vmul.f32 1.442695, %v2192_v59  ;;  %v2146_v63 = vsub.f32 %v2098_v49, %v2130_v7  ;;  %v2194_v46 = vsub.f32 %v2114_v13, %v2130_v7  ;;  %v1989_v16 = vpop.xlane.xlu1 %1988 }
 0x911   :  { %7948 = vpow2.f32 %v2212_v45  ;;  %v2178_v30 = vmul.f32 1.442695, %v2147_v25  ;;  %v2226_v40 = vmul.f32 1.442695, %v2195_v43  ;;  %v2105_v54 = vadd.f32 %v9749_v21, %v2046_v14 }
 0x912   :  { %7950 = vpow2.f32 %v2168_v6  ;;  %v2176_v28 = vmul.f32 1.442695, %v2146_v63  ;;  %v2224_v45 = vmul.f32 1.442695, %v2194_v46  ;;  %v2089_v19 = vadd.f32 %v9749_v21, %v1998_v36  ;;  %v2040_v10 = vpop.xlane.xlu0 %2039 }
 0x913   :  { %7952 = vpow2.f32 %v2216_v44  ;;  %v2104_v9 = vadd.f32 %v9749_v21, %v2043_v56  ;;  %v2088_v44 = vadd.f32 %v9749_v21, %v9768_v57  ;;  %v2103_v63 = vadd.f32 %v9749_v21, %v2040_v10 }
 0x914   :  { %7954 = vpow2.f32 %v2174_v31  ;;  %v2121_v6 = vmax.f32 %v2089_v19, %v2105_v54  ;;  %v2037_v14 = vpop.xlane.xlu1 %2036  ;;  %v2086_v10 = vadd.f32 %v9749_v21, %v1989_v16 }
 0x915   :  { %v9775_v58 = vpop.eup %7930  ;;  %7956 = vpow2.f32 %v2222_v42  ;;  %v2120_v59 = vmax.f32 %v2088_v44, %v2104_v9 }
 0x916   :  { %v9777_v0 = vpop.eup %7932  ;;  %7958 = vpow2.f32 %v2172_v26  ;;  %v2137_v56 = vsub.f32 %v2089_v19, %v2121_v6  ;;  %v2185_v26 = vsub.f32 %v2105_v54, %v2121_v6  ;;  %v1986_v57 = vpop.xlane.xlu0 %1985  ;;  %v2087_v19 = vadd.f32 %v9749_v21, %v1992_v18 }
 0x917   :  { %v9779_v39 = vpop.eup %7934  ;;  %v2235_v1 = vadd.f32 %v9777_v0, %v9775_v58 }
 0x918   :  { %v9781_v61 = vpop.eup %7936  ;;  %v1983_v46 = vpop.xlane.xlu1 %1982 }
 0x919   :  { %v2237_v3 = vadd.f32 %v9781_v61, %v9779_v39  ;;  %v9787_v47 = vpop.eup %7938  ;;  %7960 = vrcp.f32 %v2235_v1 }
 0x91a   :  { %v9789_v62 = vpop.eup %7940  ;;  %7962 = vpow2.f32 %v2220_v22  ;;  %v2136_v22 = vsub.f32 %v2088_v44, %v2120_v59  ;;  %v2034_v18 = vpop.xlane.xlu0 %2033 }
 0x91b   :  { %v9792_v5 = vpop.eup %7942  ;;  %7964 = vrcp.f32 %v2237_v3  ;;  %v2234_v49 = vadd.f32 %v9789_v62, %v9787_v47 }
 0x91c   :  { %v9795_v13 = vpop.eup %7944  ;;  %7966 = vpow2.f32 %v2178_v30  ;;  %v2158_v30 = vmul.f32 1.442695, %v2137_v56  ;;  %v2031_v12 = vpop.xlane.xlu1 %2030 }
 0x91d   :  { %7968 = vpow2.f32 %v2226_v40  ;;  %v9800_v20 = vpop.eup %7946  ;;  %v2239_v31 = vadd.f32 %v9795_v13, %v9792_v5  ;;  %v2184_v40 = vsub.f32 %v2104_v9, %v2120_v59  ;;  %v2156_v9 = vmul.f32 1.442695, %v2136_v22 }
 0x91e   :  { %7970 = vpow2.f32 %v2176_v28  ;;  %v9804_v36 = vpop.eup %7948  ;;  %v2102_v28 = vadd.f32 %v9749_v21, %v2037_v14  ;;  %v2119_v59 = vmax.f32 %v2087_v19, %v2103_v63  ;;  %v2100_v2 = vadd.f32 %v9749_v21, %v2031_v12 }
 0x91f   :  { %7972 = vpow2.f32 %v2224_v45  ;;  %v9808_v7 = vpop.eup %7950  ;;  %v2236_v25 = vadd.f32 %v9804_v36, %v9800_v20  ;;  %v2206_v45 = vmul.f32 1.442695, %v2185_v26  ;;  %v2204_v56 = vmul.f32 1.442695, %v2184_v40 }
 0x920   :  { %7974 = vrcp.f32 %v2234_v49  ;;  %v9810_v42 = vpop.eup %7952  ;;  %v2118_v26 = vmax.f32 %v2086_v10, %v2102_v28  ;;  %v2135_v40 = vsub.f32 %v2087_v19, %v2119_v59 }
 0x921   :  { %v9814_v43 = vpop.eup %7954  ;;  %7976 = vrcp.f32 %v2239_v31  ;;  %v2238_v16 = vadd.f32 %v9810_v42, %v9808_v7 }
 0x922   :  { %v9816_v1 = vpop.eup %7956  ;;  %7978 = vrcp.f32 %v2236_v25  ;;  %v2134_v8 = vsub.f32 %v2086_v10, %v2118_v26 }
 0x923   :  { %v9819_v3 = vpop.eup %7958  ;;  %v2241_v6 = vadd.f32 %v9816_v1, %v9814_v43  ;;  %7980 = vpow2.f32 %v2158_v30 }
 0x924   :  { %7982 = vpow2.f32 %v2206_v45  ;;  %v2152_v12 = vmul.f32 1.442695, %v2134_v8 }
 0x925   :  { %7984 = vrcp.f32 %v2241_v6  ;;  %v2182_v6 = vsub.f32 %v2102_v28, %v2118_v26 }
 0x926   :  { %v9822_v54 = vpop.eup %7960  ;;  %7986 = vpow2.f32 %v2156_v9  ;;  %v2183_v9 = vsub.f32 %v2103_v63, %v2119_v59 }
 0x927   :  { %v9825_v49 = vpop.eup %7962  ;;  %v2283_v44 = vmul.f32 %v9822_v54, %v9775_v58  ;;  %7988 = vpow2.f32 %v2204_v56  ;;  %v2154_v56 = vmul.f32 1.442695, %v2135_v40 }
 0x928   :  { %v7965_v31 = vpop.eup %7964  ;;  %v2240_v30 = vadd.f32 %v9825_v49, %v9819_v3  ;;  %7990 = vrcp.f32 %v2238_v16  ;;  %v2202_v16 = vmul.f32 1.442695, %v2183_v9 }
 0x929   :  { %v9832_v14 = vpop.eup %7966  ;;  %2329 = vperm.xlu1 %7759, %v2283_v44   ;;  %v2285_v58 = vmul.f32 %v7965_v31, %v9779_v39  ;;  %v2101_v44 = vadd.f32 %v9749_v21, %v2034_v18  ;;  %v2085_v39 = vadd.f32 %v9749_v21, %v1986_v57  ;;  %v2084_v18 = vadd.f32 %v9749_v21, %v1983_v46 }
 0x92a   :  { %v9834_v25 = vpop.eup %7968  ;;  %v2397_v17 = vmul.f32 %v7965_v31, %v9781_v61  ;;  %7992 = vrcp.f32 %v2240_v30  ;;  %v2200_v57 = vmul.f32 1.442695, %v2182_v6 }
 0x92b   :  { %v9838_v53 = vpop.eup %7970  ;;  %v2243_v45 = vadd.f32 %v9834_v25, %v9832_v14  ;;  %v2117_v10 = vmax.f32 %v2085_v39, %v2101_v44  ;;  %v2116_v28 = vmax.f32 %v2084_v18, %v2100_v2 }
 0x92c   :  { %v9841_v22 = vpop.eup %7972 }
 0x92d   :  { %v7975_v35 = vpop.eup %7974  ;;  %2339 = vperm.xlu1 %7759, %v2285_v58   ;;  %v2242_v19 = vadd.f32 %v9841_v22, %v9838_v53  ;;  %7994 = vrcp.f32 %v2243_v45  ;;  %v2133_v21 = vsub.f32 %v2085_v39, %v2117_v10  ;;  %v2132_v61 = vsub.f32 %v2084_v18, %v2116_v28 }
 0x92e   :  { %v2282_v41 = vmul.f32 %v7975_v35, %v9787_v47  ;;  %v7977_v34 = vpop.eup %7976  ;;  %v2394_v47 = vmul.f32 %v7975_v35, %v9789_v62  ;;  %v2180_v8 = vsub.f32 %v2100_v2, %v2116_v28  ;;  %v2181_v35 = vsub.f32 %v2101_v44, %v2117_v10 }
 0x92f   :  { %v7979_v26 = vpop.eup %7978  ;;  %7996 = vrcp.f32 %v2242_v19  ;;  %v2287_v63 = vmul.f32 %v7977_v34, %v9792_v5  ;;  %v2399_v62 = vmul.f32 %v7977_v34, %v9795_v13  ;;  %v2150_v5 = vmul.f32 1.442695, %v2133_v21 }
 0x930   :  { %2324 = vperm.xlu0 %7758, %v2282_v41   ;;  %7998 = vpow2.f32 %v2154_v56  ;;  %v9857_v41 = vpop.eup %7980  ;;  %v2148_v58 = vmul.f32 1.442695, %v2132_v61  ;;  %v2196_v40 = vmul.f32 1.442695, %v2180_v8  ;;  %v2396_v45 = vmul.f32 %v7979_v26, %v9804_v36 }
 0x931   :  { %2451 = vperm.xlu1 %7759, %v2397_v17   ;;  %8000 = vpow2.f32 %v2152_v12  ;;  %v2284_v17 = vmul.f32 %v7979_v26, %v9800_v20  ;;  %v9860_v46 = vpop.eup %7982  ;;  %v2198_v2 = vmul.f32 1.442695, %v2181_v35 }
 0x932   :  { %8002 = vpow2.f32 %v2200_v57  ;;  %v7985_v31 = vpop.eup %7984  ;;  %v2233_v19 = vadd.f32 %v9860_v46, %v9857_v41 }
 0x933   :  { %8004 = vpow2.f32 %v2202_v16  ;;  %v7987_v59 = vpop.eup %7986  ;;  %v2289_v20 = vmul.f32 %v7985_v31, %v9814_v43  ;;  %v2401_v36 = vmul.f32 %v7985_v31, %v9816_v1 }
 0x934   :  { %2436 = vperm.xlu0 %7758, %v2394_v47   ;;  %v7989_v30 = vpop.eup %7988  ;;  %8006 = vpow2.f32 %v2150_v5 }
 0x935   :  { %2349 = vperm.xlu1 %7759, %v2287_v63   ;;  %v7991_v6 = vpop.eup %7990  ;;  %8008 = vpow2.f32 %v2148_v58  ;;  %v2232_v34 = vadd.f32 %v7989_v30, %v7987_v59 }
 0x936   :  { %8010 = vpow2.f32 %v2196_v40  ;;  %v2286_v13 = vmul.f32 %v7991_v6, %v9808_v7  ;;  %v2398_v56 = vmul.f32 %v7991_v6, %v9810_v42 }
 0x937   :  { %v7993_v44 = vpop.eup %7992  ;;  %8012 = vpow2.f32 %v2198_v2 }
 0x938   :  { %2334 = vperm.xlu0 %7758, %v2284_v17   ;;  %8014 = vrcp.f32 %v2232_v34  ;;  %v2288_v57 = vmul.f32 %v7993_v44, %v9819_v3  ;;  %v2400_v42 = vmul.f32 %v7993_v44, %v9825_v49  ;;  %v9895_v44 = vld [vmem:[%s11672_s21 + $0x50] sm:$0xff]   ;;  %v9901_v34 = vld [vmem:[%s11672_s21 + $0x58] sm:$0xff]  }
 0x939   :  { %2461 = vperm.xlu1 %7759, %v2399_v62   ;;  %8016 = vrcp.f32 %v2233_v19  ;;  %v9919_v19 = vld [vmem:[%s11672_s21 + $0x70] sm:$0xff]  }
 0x93a   :  { %v7995_v39 = vpop.eup %7994 }
 0x93b   :  { %v2403_v12 = vmul.f32 %v7995_v39, %v9834_v25  ;;  %v2291_v3 = vmul.f32 %v7995_v39, %v9832_v14  ;;  %v9913_v39 = vld [vmem:[%s11672_s21 + $0x68] sm:$0xff]  }
 0x93c   :  { %2446 = vperm.xlu0 %7758, %v2396_v45   ;;  %v7997_v9 = vpop.eup %7996 }
 0x93d   :  { %2359 = vperm.xlu1 %7759, %v2289_v20   ;;  %v7999_v18 = vpop.eup %7998  ;;  %v2290_v1 = vmul.f32 %v7997_v9, %v9838_v53  ;;  %v2402_v25 = vmul.f32 %v7997_v9, %v9841_v22  ;;  %v2395_v53 = vmul.f32 %v9822_v54, %v9777_v0  ;;  %v9889_v20 = vld [vmem:[%s11672_s21 + $0x48] sm:$0xff]  }
 0x93e   :  { %v8001_v43 = vpop.eup %8000 }
 0x93f   :  { %v8003_v10 = vpop.eup %8002 }
 0x940   :  { %2344 = vperm.xlu0 %7758, %v2286_v13   ;;  %v8005_v7 = vpop.eup %8004  ;;  %v2230_v28 = vadd.f32 %v8003_v10, %v8001_v43  ;;  %v9907_v13 = vld [vmem:[%s11672_s21 + $0x60] sm:$0xff]  }
 0x941   :  { %2471 = vperm.xlu1 %7759, %v2401_v36   ;;  %v2231_v47 = vadd.f32 %v8005_v7, %v7999_v18  ;;  %v8007_v26 = vpop.eup %8006  ;;  %v9925_v36 = vld [vmem:[%s11672_s21 + $0x78] sm:$0xff]  }
 0x942   :  { %v8009_v16 = vpop.eup %8008  ;;  %8018 = vrcp.f32 %v2230_v28 }
 0x943   :  { %v8011_v63 = vpop.eup %8010  ;;  %8020 = vrcp.f32 %v2231_v47 }
 0x944   :  { %2456 = vperm.xlu0 %7758, %v2398_v56   ;;  %v8013_v21 = vpop.eup %8012  ;;  %v2228_v61 = vadd.f32 %v8011_v63, %v8009_v16 }
 0x945   :  { %2481 = vperm.xlu1 %7759, %v2403_v12   ;;  %v8015_v8 = vpop.eup %8014  ;;  %v2229_v17 = vadd.f32 %v8013_v21, %v8007_v26 }
 0x946   :  { %v8017_v35 = vpop.eup %8016  ;;  %8022 = vrcp.f32 %v2228_v61  ;;  %v2280_v49 = vmul.f32 %v8015_v8, %v7987_v59  ;;  %v2392_v22 = vmul.f32 %v8015_v8, %v7989_v30 }
 0x947   :  { %8024 = vrcp.f32 %v2229_v17  ;;  %v2281_v62 = vmul.f32 %v8017_v35, %v9857_v41  ;;  %v2393_v5 = vmul.f32 %v8017_v35, %v9860_v46  ;;  %v9883_v46 = vld [vmem:[%s11672_s21 + $0x40] sm:$0xff]  }
 0x948   :  { %2354 = vperm.xlu0 %7758, %v2288_v57  }
 0x949   :  { %2364 = vperm.xlu1 %7759, %v2290_v1  }
 0x94c   :  { %2466 = vperm.xlu0 %7758, %v2400_v42  }
 0x94d   :  { %2476 = vperm.xlu1 %7759, %v2402_v25  }
 0x94f   :  { %v8019_v31 = vpop.eup %8018 }
 0x950   :  { %2369 = vperm.xlu0 %7758, %v2291_v3   ;;  %v8021_v14 = vpop.eup %8020  ;;  %v2278_v58 = vmul.f32 %v8019_v31, %v8001_v43  ;;  %v2390_v0 = vmul.f32 %v8019_v31, %v8003_v10 }
 0x951   :  { %2441 = vperm.xlu1 %7759, %v2395_v53   ;;  %v2279_v40 = vmul.f32 %v8021_v14, %v7999_v18  ;;  %v2391_v45 = vmul.f32 %v8021_v14, %v8005_v7 }
 0x953   :  { %v8023_v54 = vpop.eup %8022 }
 0x954   :  { %2314 = vperm.xlu0 %7758, %v2280_v49   ;;  %v8025_v59 = vpop.eup %8024  ;;  %v2276_v41 = vmul.f32 %v8023_v54, %v8009_v16  ;;  %v2388_v30 = vmul.f32 %v8023_v54, %v8011_v63 }
 0x955   :  { %2319 = vperm.xlu1 %7759, %v2281_v62   ;;  %v2277_v6 = vmul.f32 %v8025_v59, %v8007_v26  ;;  %v2389_v2 = vmul.f32 %v8025_v59, %v8013_v21 }
 0x958   :  { %2426 = vperm.xlu0 %7758, %v2392_v22  }
 0x959   :  { %2431 = vperm.xlu1 %7759, %v2393_v5  }
 0x95c   :  { %2304 = vperm.xlu0 %7758, %v2278_v58  }
 0x95d   :  { %2309 = vperm.xlu1 %7759, %v2279_v40  }
 0x960   :  { %2416 = vperm.xlu0 %7758, %v2390_v0  }
 0x961   :  { %2421 = vperm.xlu1 %7759, %v2391_v45  }
 0x964   :  { %2294 = vperm.xlu0 %7758, %v2276_v41  }
 0x965   :  { %2299 = vperm.xlu1 %7759, %v2277_v6  }
 0x968   :  { %2406 = vperm.xlu0 %7758, %v2388_v30  }
 0x969   :  { %2411 = vperm.xlu1 %7759, %v2389_v2  }
 0x986   :  { %2621 = vxpose.xlu0.c.b16.start [1/8] %v9883_v46, 128 }
 0x98a   :  { %2622 = vxpose.xlu0.c.b16.cont [2/8] %v9889_v20, 128 }
 0x98e   :  { %2623 = vxpose.xlu0.c.b16.cont [3/8] %v9895_v44, 128 }
 0x992   :  { %2624 = vxpose.xlu0.c.b16.cont [4/8] %v9901_v34, 128 }
 0x996   :  { %2625 = vxpose.xlu0.c.b16.cont [5/8] %v9907_v13, 128 }
 0x99a   :  { %2626 = vxpose.xlu0.c.b16.cont [6/8] %v9913_v39, 128 }
 0x99e   :  { %2627 = vxpose.xlu0.c.b16.cont [7/8] %v9919_v19, 128 }
 0x9a2   :  { %2628 = vxpose.xlu0.c.b16.end [8/8] %v9925_v36, 128 }
 0x9a4   :  { %v2330_v9 = vpop.permute.xlu1 %2329 }
 0x9a8   :  { %v2340_v18 = vpop.permute.xlu1 %2339 }
 0x9ab   :  { %v2325_v43 = vpop.permute.xlu0 %2324 }
 0x9ac   :  { %v2452_v56 = vpop.permute.xlu1 %2451 }
 0x9ad   :  { %v2493_v41 = vmul.f32 %v9627_v29, %v2452_v56 }
 0x9af   :  { %v2437_v10 = vpop.permute.xlu0 %2436 }
 0x9b0   :  { %v2350_v12 = vpop.permute.xlu1 %2349 }
 0x9b1   :  { %v2383_v54 = vmul.f32 %v2350_v12, %v9218_v38 }
 0x9b3   :  { %v2335_v7 = vpop.permute.xlu0 %2334 }
 0x9b4   :  { %v2462_v28 = vpop.permute.xlu1 %2461  ;;  %v2380_v6 = vmul.f32 %v2335_v7, %v9250_v4 }
 0x9b5   :  { %v2495_v31 = vmul.f32 %v9637_v11, %v2462_v28  ;;  %v9958_v28 = vld [vmem:[#allocation9] ss:$0 sm:$0xff] }
 0x9b7   :  { %v2447_v57 = vpop.permute.xlu0 %2446  ;;  %v9955_v30 = vadd.f32 %v2495_v31, %v2383_v54 }
 0x9b8   :  { %v2360_v47 = vpop.permute.xlu1 %2359  ;;  %v2492_v0 = vmul.f32 %v2447_v57, %v9631_v24 }
 0x9b9   :  { %v2385_v49 = vmul.f32 %v2360_v47, %v9230_v48  ;;  %v2381_v47 = vmul.f32 %v2340_v18, %v9237_v33 }
 0x9bb   :  { %v2345_v1 = vpop.permute.xlu0 %2344 }
 0x9bc   :  { %v2472_v26 = vpop.permute.xlu1 %2471 }
 0x9bd   :  { %v2497_v61 = vmul.f32 %v9643_v50, %v2472_v26  ;;  %v2382_v50 = vmul.f32 %v2345_v1, %v9227_v55  ;;  %v9963_v1 = vadd.f32 %v2492_v0, %v2380_v6  ;;  %v11703_v0 = vld [vmem:[#allocation43_spill] sm:$0xff] }
 0x9bf   :  { %v2457_v16 = vpop.permute.xlu0 %2456  ;;  %v9941_v58 = vadd.f32 %v2497_v61, %v2385_v49 }
 0x9c0   :  { %v2482_v42 = vpop.permute.xlu1 %2481  ;;  %v2494_v62 = vmul.f32 %v2457_v16, %v9639_v37  ;;  %v11697_v16 = vld [vmem:[#allocation41_spill] sm:$0xff] }
 0x9c1   :  { %v2546_v57 = vmax.f32 %v9941_v58, 0.0 }
 0x9c2   :  { %v9948_v45 = vadd.f32 %v2494_v62, %v2382_v50  ;;  %v11700_v62 = vld [vmem:[#allocation53_spill] sm:$0xff] }
 0x9c3   :  { %v2355_v63 = vpop.permute.xlu0 %2354  ;;  %v2562_v18 = vadd.f32 %v9958_v28, %v2546_v57 }
 0x9c4   :  { %v2365_v25 = vpop.permute.xlu1 %2364  ;;  %v2384_v3 = vmul.f32 %v2355_v63, %v9212_v27  ;;  %v2543_v26 = vmax.f32 %v9948_v45, 0.0  ;;  %v9970_v63 = vadd.f32 %v2493_v41, %v2381_v47  ;;  %v11704_v41 = vld [vmem:[#allocation44_spill] sm:$0xff] }
 0x9c5   :  { %v2386_v53 = vmul.f32 %v2365_v25, %v9205_v15 }
 0x9c7   :  { %v2467_v21 = vpop.permute.xlu0 %2466 }
 0x9c8   :  { %v2496_v8 = vmul.f32 %v2467_v21, %v9647_v60  ;;  %v2477_v17 = vpop.permute.xlu1 %2476  ;;  %v2499_v60 = vmul.f32 %v9651_v51, %v2482_v42  ;;  %v2379_v42 = vmul.f32 %v2330_v9, %v11697_v16  ;;  %v11698_v21 = vld [vmem:[#allocation55_spill] sm:$0xff] }
 0x9c9   :  { %v2498_v35 = vmul.f32 %v2477_v17, %v9655_v23  ;;  %v2490_v61 = vmul.f32 %v2437_v10, %v11698_v21  ;;  %v2544_v17 = vmax.f32 %v9955_v30, 0.0  ;;  %v2542_v10 = vmax.f32 %v9970_v63, 0.0 }
 0x9ca   :  { %v9935_v22 = vadd.f32 %v2496_v8, %v2384_v3 }
 0x9cb   :  { %v2370_v5 = vpop.permute.xlu0 %2369  ;;  %v9938_v14 = vadd.f32 %v2498_v35, %v2386_v53  ;;  %v2541_v35 = vmax.f32 %v9963_v1, 0.0  ;;  %v2560_v54 = vadd.f32 %v9958_v28, %v2544_v17 }
 0x9cc   :  { %v2387_v40 = vmul.f32 %v2370_v5, %v9221_v32  ;;  %v2442_v23 = vpop.permute.xlu1 %2441  ;;  %v2545_v59 = vmax.f32 %v9935_v22, 0.0  ;;  %v2559_v5 = vadd.f32 %v9958_v28, %v2543_v26  ;;  %v2558_v26 = vadd.f32 %v9958_v28, %v2542_v10 }
 0x9cd   :  { %v2547_v37 = vmax.f32 %v9938_v14, 0.0  ;;  %v2491_v29 = vmul.f32 %v9619_v52, %v2442_v23  ;;  %v11699_v52 = vld [vmem:[#allocation42_spill] sm:$0xff] }
 0x9ce   :  { %v9950_v11 = vadd.f32 %v2499_v60, %v2387_v40  ;;  %v2561_v7 = vadd.f32 %v9958_v28, %v2545_v59  ;;  %v2378_v53 = vmul.f32 %v2325_v43, %v11699_v52  ;;  %v11702_v40 = vld [vmem:[#allocation54_spill] sm:$0xff]  ;;  %v2557_v59 = vadd.f32 %v9958_v28, %v2541_v35 }
 0x9cf   :  { %v2315_v51 = vpop.permute.xlu0 %2314  ;;  %v2563_v12 = vadd.f32 %v9958_v28, %v2547_v37  ;;  %v9977_v49 = vadd.f32 %v2491_v29, %v2379_v42 }
 0x9d0   :  { %v2320_v2 = vpop.permute.xlu1 %2319  ;;  %v2548_v24 = vmax.f32 %v9950_v11, 0.0  ;;  %v2571_v31 = vpack.c.bf16 %v2562_v18, %v2561_v7  ;;  %v9982_v60 = vadd.f32 %v2490_v61, %v2378_v53  ;;  %v2376_v6 = vmul.f32 %v2315_v51, %v11704_v41  ;;  %v11709_v51 = vld [vmem:[#allocation51_spill] sm:$0xff] }
 0x9d1   :  { %v2377_v43 = vmul.f32 %v2320_v2, %v11703_v0  ;;  %v2540_v57 = vmax.f32 %v9977_v49, 0.0  ;;  %v2569_v18 = vpack.c.bf16 %v2558_v26, %v2557_v59  ;;  %v11714_v59 = vld [vmem:[#allocation50_spill] sm:$0xff] }
 0x9d2   :  { %v2564_v56 = vadd.f32 %v9958_v28, %v2548_v24  ;;  %11701 = vst [vmem:[#allocation55_spill] sm:$0xff] %v9982_v60  ;;  %v2539_v42 = vmax.f32 %v9982_v60, 0.0 }
 0x9d3   :  { %v2427_v25 = vpop.permute.xlu0 %2426  ;;  %v2556_v17 = vadd.f32 %v9958_v28, %v2540_v57 }
 0x9d4   :  { %v2572_v3 = vpack.c.bf16 %v2564_v56, %v2563_v12  ;;  %v2432_v8 = vpop.permute.xlu1 %2431  ;;  %v2488_v23 = vmul.f32 %v2427_v25, %v11702_v40  ;;  %v2570_v12 = vpack.c.bf16 %v2560_v54, %v2559_v5  ;;  %v11707_v56 = vld [vmem:[#allocation52_spill] sm:$0xff]  ;;  %v11708_v25 = vld [vmem:[#allocation45_spill] sm:$0xff]  ;;  %v2555_v5 = vadd.f32 %v9958_v28, %v2539_v42 }
 0x9d5   :  { %v2489_v9 = vmul.f32 %v11700_v62, %v2432_v8 }
 0x9d6   :  { %7369 = vmatprep.subr.bf16.mxu1 %v2572_v3  ;;  %v9992_v29 = vadd.f32 %v2488_v23, %v2376_v6  ;;  %v2568_v40 = vpack.c.bf16 %v2556_v17, %v2555_v5 }
 0x9d7   :  { %v2305_v50 = vpop.permute.xlu0 %2304  ;;  %7370 = vmatpush3.bf16.msra.mxu1 %v2572_v3  ;;  %v9989_v24 = vadd.f32 %v2489_v9, %v2377_v43  ;;  %v11710_v3 = vld [vmem:[#allocation46_spill] sm:$0xff] }
 0x9d8   :  { %7371 = vmatprep.subr.bf16.mxu1 %v2571_v31  ;;  %v2310_v37 = vpop.permute.xlu1 %2309  ;;  %11706 = vst [vmem:[#allocation54_spill] sm:$0xff] %v9992_v29  ;;  %v2374_v8 = vmul.f32 %v2305_v50, %v11710_v3  ;;  %v2537_v10 = vmax.f32 %v9992_v29, 0.0 }
 0x9d9   :  { %11705 = vst [vmem:[#allocation53_spill] sm:$0xff] %v9989_v24  ;;  %v2375_v21 = vmul.f32 %v2310_v37, %v11708_v25  ;;  %v2538_v53 = vmax.f32 %v9989_v24, 0.0  ;;  %v11713_v37 = vld [vmem:[#allocation48_spill] sm:$0xff] }
 0x9da   :  { %v2553_v57 = vadd.f32 %v9958_v28, %v2537_v10 }
 0x9db   :  { %v2417_v47 = vpop.permute.xlu0 %2416  ;;  %7372 = vmatpush3.bf16.msra.mxu1 %v2571_v31  ;;  %v2554_v50 = vadd.f32 %v9958_v28, %v2538_v53 }
 0x9dc   :  { %v2486_v7 = vmul.f32 %v2417_v47, %v11707_v56  ;;  %7373 = vmatprep.subr.bf16.mxu1 %v2570_v12  ;;  %v2422_v2 = vpop.permute.xlu1 %2421  ;;  %v11715_v56 = vld [vmem:[#allocation47_spill] sm:$0xff] }
 0x9dd   :  { %v2487_v61 = vmul.f32 %v11709_v51, %v2422_v2  ;;  %v11716_v2 = vld [vmem:[#allocation49_spill] sm:$0xff] }
 0x9de   :  { %v10004_v9 = vadd.f32 %v2486_v7, %v2374_v8 }
 0x9df   :  { %v2295_v35 = vpop.permute.xlu0 %2294  ;;  %v10002_v62 = vadd.f32 %v2487_v61, %v2375_v21  ;;  %7374 = vmatpush3.bf16.msra.mxu1 %v2570_v12  ;;  %v2567_v21 = vpack.c.bf16 %v2554_v50, %v2553_v57 }
 0x9e0   :  { %11712 = vst [vmem:[#allocation51_spill] sm:$0xff] %v10004_v9  ;;  %7375 = vmatprep.subr.bf16.mxu1 %v2569_v18  ;;  %v2300_v31 = vpop.permute.xlu1 %2299  ;;  %v2372_v54 = vmul.f32 %v2295_v35, %v11713_v37  ;;  %v2535_v47 = vmax.f32 %v10004_v9, 0.0 }
 0x9e1   :  { %11711 = vst [vmem:[#allocation52_spill] sm:$0xff] %v10002_v62  ;;  %v2536_v23 = vmax.f32 %v10002_v62, 0.0  ;;  %v2373_v7 = vmul.f32 %v2300_v31, %v11715_v56 }
 0x9e2   :  { %v2551_v8 = vadd.f32 %v9958_v28, %v2535_v47 }
 0x9e3   :  { %v2407_v43 = vpop.permute.xlu0 %2406  ;;  %7376 = vmatpush3.bf16.msra.mxu1 %v2569_v18  ;;  %v2552_v51 = vadd.f32 %v9958_v28, %v2536_v23 }
 0x9e4   :  { %v2484_v6 = vmul.f32 %v2407_v43, %v11714_v59  ;;  %7377 = vmatprep.subr.bf16.mxu1 %v2568_v40  ;;  %v2412_v12 = vpop.permute.xlu1 %2411 }
 0x9e5   :  { %v2485_v26 = vmul.f32 %v11716_v2, %v2412_v12  ;;  %v2566_v35 = vpack.c.bf16 %v2552_v51, %v2551_v8 }
 0x9e6   :  { %v10016_v42 = vadd.f32 %v2484_v6, %v2372_v54 }
 0x9e7   :  { %v10019_v61 = vadd.f32 %v2485_v26, %v2373_v7  ;;  %7378 = vmatpush3.bf16.msra.mxu1 %v2568_v40 }
 0x9e8   :  { %11717 = vst [vmem:[#allocation50_spill] sm:$0xff] %v10016_v42  ;;  %7379 = vmatprep.subr.bf16.mxu1 %v2567_v21  ;;  %v2629_v18 = vpop.trf.xlu0  ;;  %v2533_v17 = vmax.f32 %v10016_v42, 0.0 }
 0x9e9   :  { %11718 = vst [vmem:[#allocation49_spill] sm:$0xff] %v10019_v61  ;;  %v2534_v53 = vmax.f32 %v10019_v61, 0.0  ;;  %7385 = vmatprep.mubr.bf16.mxu1 %v2629_v18 }
 0x9ea   :  { %v2549_v31 = vadd.f32 %v9958_v28, %v2533_v17 }
 0x9eb   :  { %7380 = vmatpush3.bf16.msra.mxu1 %v2567_v21  ;;  %v2550_v5 = vadd.f32 %v9958_v28, %v2534_v53 }
 0x9ec   :  { %7381 = vmatprep.subr.bf16.mxu1 %v2566_v35  ;;  %v2630_v10 = vpop.trf.xlu0 }
 0x9ed   :  { %v2565_v50 = vpack.c.bf16 %v2550_v5, %v2549_v31 }
 0x9ef   :  { %7382 = vmatpush3.bf16.msra.mxu1 %v2566_v35 }
 0x9f0   :  { %7383 = vmatprep.subr.bf16.mxu1 %v2565_v50  ;;  %v2631_v40 = vpop.trf.xlu0 }
 0x9f3   :  { %7384 = vmatpush3.bf16.msra.mxu1 %v2565_v50 }
 0x9f4   :  { %v2632_v23 = vpop.trf.xlu0 }
 0x9f6   :  { %7386 = vmatmul.mubr.bf16.vlgmr.msra.gmra.mxu1 %v2630_v10 }
 0x9f7   :  { %7389 = vmatprep.mubr.bf16.mxu1 %v2631_v40 }
 0x9f8   :  { %v2633_v43 = vpop.trf.xlu0 }
 0x9fc   :  { %v2634_v54 = vpop.trf.xlu0 }
 0x9fe   :  { %7390 = vmatmul.mubr.bf16.gmra.mxu1 %v2632_v23 }
 0x9ff   :  { %7393 = vmatprep.mubr.bf16.mxu1 %v2633_v43 }
 0xa00   :  { %v2635_v59 = vpop.trf.xlu0 }
 0xa04   :  { %v2636_v6 = vpop.trf.xlu0 }
 0xa06   :  { %7394 = vmatmul.mubr.bf16.gmra.mxu1 %v2634_v54 }
 0xa07   :  { %7397 = vmatprep.mubr.bf16.mxu1 %v2635_v59 }
 0xa0e   :  { %7398 = vmatmul.mubr.bf16.gmra.mxu1 %v2636_v6  ;;  %v8495_v6 = vld [vmem:[#allocation12 + $0x18] sm:$0xff] }
 0xa0f   :  { %7417 = vmatprep.mubr.bf16.mxu1 %v9883_v46 }
 0xab6   :  { %v7387_v28 = vpop.f32.mrf.mxu1 }
 0xab8   :  { %v2671_v12 = vpop.f32.mrf.mxu1 }
 0xaba   :  { %v7388_v57 = vpop.f32.mrf.mxu1 }
 0xabb   :  { %v2735_v54 = vpack.c.bf16 %v7388_v57, %v7387_v28  ;;  %v8498_v28 = vld [vmem:[#allocation12] sm:$0xff] }
 0xabc   :  { %v2674_v47 = vpop.f32.mrf.mxu1 }
 0xabd   :  { %v2734_v59 = vpack.c.bf16 %v2674_v47, %v2671_v12  ;;  %v8499_v12 = vld [vmem:[#allocation10 + $0x18] sm:$0xff] }
 0xabe   :  { %v7391_v7 = vpop.f32.mrf.mxu1 }
 0xac0   :  { %v2687_v2 = vpop.f32.mrf.mxu1 }
 0xac2   :  { %v7392_v26 = vpop.f32.mrf.mxu1 }
 0xac3   :  { %v2737_v23 = vpack.c.bf16 %v7392_v26, %v7391_v7  ;;  %v8496_v7 = vld [vmem:[#allocation12 + $0x10] sm:$0xff] }
 0xac4   :  { %v2690_v21 = vpop.f32.mrf.mxu1 }
 0xac5   :  { %v2736_v43 = vpack.c.bf16 %v2690_v21, %v2687_v2  ;;  %v8497_v2 = vld [vmem:[#allocation12 + $0x8] sm:$0xff] }
 0xac6   :  { %v7395_v51 = vpop.f32.mrf.mxu1 }
 0xac8   :  { %v2703_v8 = vpop.f32.mrf.mxu1 }
 0xaca   :  { %v7396_v18 = vpop.f32.mrf.mxu1 }
 0xacb   :  { %v2739_v46 = vpack.c.bf16 %v7396_v18, %v7395_v51 }
 0xacc   :  { %v2706_v17 = vpop.f32.mrf.mxu1 }
 0xacd   :  { %v2738_v40 = vpack.c.bf16 %v2706_v17, %v2703_v8 }
 0xace   :  { %v7399_v53 = vpop.f32.mrf.mxu1 }
 0xad0   :  { %v2719_v35 = vpop.f32.mrf.mxu1 }
 0xad2   :  { %v7400_v31 = vpop.f32.mrf.mxu1 }
 0xad3   :  { %v2741_v5 = vpack.c.bf16 %v7400_v31, %v7399_v53 }
 0xad4   :  { %v2722_v10 = vpop.f32.mrf.mxu1 }
 0xad5   :  { %v2740_v50 = vpack.c.bf16 %v2722_v10, %v2719_v35  ;;  %7401 = vmatprep.subr.bf16.mxu1 %v2741_v5 }
 0xad6   :  { %7402 = vmatpush3.bf16.msra.mxu1 %v2741_v5 }
 0xad7   :  { %7403 = vmatprep.subr.bf16.mxu1 %v2740_v50 }
 0xada   :  { %7404 = vmatpush3.bf16.msra.mxu1 %v2740_v50 }
 0xadb   :  { %7405 = vmatprep.subr.bf16.mxu1 %v2739_v46 }
 0xade   :  { %7406 = vmatpush3.bf16.msra.mxu1 %v2739_v46 }
 0xadf   :  { %7407 = vmatprep.subr.bf16.mxu1 %v2738_v40 }
 0xae2   :  { %7408 = vmatpush3.bf16.msra.mxu1 %v2738_v40 }
 0xae3   :  { %7409 = vmatprep.subr.bf16.mxu1 %v2737_v23 }
 0xae6   :  { %7410 = vmatpush3.bf16.msra.mxu1 %v2737_v23 }
 0xae7   :  { %7411 = vmatprep.subr.bf16.mxu1 %v2736_v43 }
 0xaea   :  { %7412 = vmatpush3.bf16.msra.mxu1 %v2736_v43 }
 0xaeb   :  { %7413 = vmatprep.subr.bf16.mxu1 %v2735_v54 }
 0xaee   :  { %7414 = vmatpush3.bf16.msra.mxu1 %v2735_v54 }
 0xaef   :  { %7415 = vmatprep.subr.bf16.mxu1 %v2734_v59 }
 0xaf2   :  { %7416 = vmatpush3.bf16.msra.mxu1 %v2734_v59 }
 0xaf3   :  { %7465 = vmatprep.subr.mxu1 %v8495_v6 }
 0xaf5   :  { %7418 = vmatmul.mubr.bf16.vlgmr.msra.gmra.mxu1 %v9889_v20  ;;  %v8500_v20 = vld [vmem:[#allocation10 + $0x10] sm:$0xff] }
 0xaf6   :  { %7421 = vmatprep.mubr.bf16.mxu1 %v9895_v44  ;;  %7466 = vmatpush3.msra.mxu1 %v8495_v6  ;;  %v8501_v44 = vld [vmem:[#allocation10 + $0x8] sm:$0xff] }
 0xaf7   :  { %7467 = vmatprep.subr.mxu1 %v8496_v7 }
 0xaf8   :  { %7468 = vmatpush3.msra.mxu1 %v8496_v7 }
 0xaf9   :  { %7469 = vmatprep.subr.mxu1 %v8497_v2 }
 0xafa   :  { %7470 = vmatpush3.msra.mxu1 %v8497_v2 }
 0xafb   :  { %7471 = vmatprep.subr.mxu1 %v8498_v28 }
 0xafc   :  { %7472 = vmatpush3.msra.mxu1 %v8498_v28 }
 0xafd   :  { %7422 = vmatmul.mubr.bf16.gmra.mxu1 %v9901_v34  ;;  %7585 = vmatprep.subr.mxu1 %v8499_v12  ;;  %v8502_v34 = vld [vmem:[#allocation10] sm:$0xff] }
 0xafe   :  { %7425 = vmatprep.mubr.bf16.mxu1 %v9907_v13 }
 0xb05   :  { %7426 = vmatmul.mubr.bf16.gmra.mxu1 %v9913_v39 }
 0xb06   :  { %7429 = vmatprep.mubr.bf16.mxu1 %v9919_v19 }
 0xb0d   :  { %7430 = vmatmul.mubr.bf16.gmra.mxu1 %v9925_v36 }
 0xb0e   :  { %7473 = vmatprep.mubr.msk.f32.mxu1 %vm315_vm0, %v10016_v42 }
 0xb15   :  { %7474 = vmatmul.mubr.msk.f32.vlgmr.msra.gmra.mxu1 %vm315_vm0, %v10019_v61 }
 0xb16   :  { %7586 = vmatpush3.msra.mxu1 %v8499_v12  ;;  %7476 = vmatprep.mubr.msk.f32.mxu1 %vm315_vm0, %v10004_v9 }
 0xb17   :  { %7587 = vmatprep.subr.mxu1 %v8500_v20 }
 0xb18   :  { %7588 = vmatpush3.msra.mxu1 %v8500_v20 }
 0xb19   :  { %7589 = vmatprep.subr.mxu1 %v8501_v44  ;;  %7477 = vmatmul.mubr.msk.f32.gmra.mxu1 %vm315_vm0, %v10002_v62 }
 0xb1a   :  { %7590 = vmatpush3.msra.mxu1 %v8501_v44  ;;  %7479 = vmatprep.mubr.msk.f32.mxu1 %vm315_vm0, %v9992_v29 }
 0xb1b   :  { %7591 = vmatprep.subr.mxu1 %v8502_v34 }
 0xb1c   :  { %7592 = vmatpush3.msra.mxu1 %v8502_v34 }
 0xb1d   :  { %7021 = vmatprep.subr.mxu1 %v9950_v11  ;;  %7480 = vmatmul.mubr.msk.f32.gmra.mxu1 %vm315_vm0, %v9989_v24 }
 0xb1e   :  { %7482 = vmatprep.mubr.msk.f32.mxu1 %vm315_vm0, %v9982_v60 }
 0xb21   :  { %7483 = vmatmul.mubr.msk.f32.gmra.mxu1 %vm315_vm0, %v9977_v49 }
 0xb22   :  { %7485 = vmatprep.mubr.msk.f32.mxu1 %vm315_vm0, %v9963_v1 }
 0xb25   :  { %7486 = vmatmul.mubr.msk.f32.gmra.mxu1 %vm315_vm0, %v9970_v63 }
 0xb26   :  { %7488 = vmatprep.mubr.msk.f32.mxu1 %vm315_vm0, %v9948_v45 }
 0xb29   :  { %7489 = vmatmul.mubr.msk.f32.gmra.mxu1 %vm315_vm0, %v9955_v30 }
 0xb2a   :  { %7491 = vmatprep.mubr.msk.f32.mxu1 %vm315_vm0, %v9935_v22 }
 0xb2d   :  { %7492 = vmatmul.mubr.msk.f32.gmra.mxu1 %vm315_vm0, %v9941_v58 }
 0xb2e   :  { %7494 = vmatprep.mubr.msk.f32.mxu1 %vm315_vm0, %v9938_v14 }
 0xb31   :  { %7495 = vmatmul.mubr.msk.f32.gmra.mxu1 %vm315_vm0, %v9950_v11 }
 0xbb5   :  { %v7419_v13 = vpop.f32.mrf.mxu1 }
 0xbb6   :  { %v2845_v39 = vsel %vm315_vm0, %v7419_v13, -inf }
 0xbb7   :  { %2846 = vmax.xlane.f32.xlu1 %v2845_v39  ;;  %v2776_v19 = vpop.f32.mrf.mxu1 }
 0xbb8   :  { %v2839_v57 = vsel %vm315_vm0, %v2776_v19, -inf }
 0xbb9   :  { %v10068_v36 = vpop.f32.mrf.mxu1 }
 0xbba   :  { %v2848_v21 = vsel %vm315_vm0, %v10068_v36, -inf }
 0xbbb   :  { %2840 = vmax.xlane.f32.xlu1 %v2839_v57  ;;  %v10071_v47 = vpop.f32.mrf.mxu1 }
 0xbbc   :  { %v2842_v18 = vsel %vm315_vm0, %v10071_v47, -inf }
 0xbbd   :  { %v10073_v26 = vpop.f32.mrf.mxu1 }
 0xbbe   :  { %v2857_v35 = vsel %vm315_vm0, %v10073_v26, -inf }
 0xbbf   :  { %2849 = vmax.xlane.f32.xlu1 %v2848_v21  ;;  %v10077_v51 = vpop.f32.mrf.mxu1 }
 0xbc0   :  { %v2851_v50 = vsel %vm315_vm0, %v10077_v51, -inf }
 0xbc1   :  { %v10079_v8 = vpop.f32.mrf.mxu1 }
 0xbc2   :  { %v2860_v17 = vsel %vm315_vm0, %v10079_v8, -inf }
 0xbc3   :  { %2843 = vmax.xlane.f32.xlu1 %v2842_v18  ;;  %2861 = vmax.xlane.f32.xlu0 %v2860_v17  ;;  %v10085_v53 = vpop.f32.mrf.mxu1 }
 0xbc4   :  { %v2854_v43 = vsel %vm315_vm0, %v10085_v53, -inf }
 0xbc5   :  { %v10089_v31 = vpop.f32.mrf.mxu1 }
 0xbc6   :  { %v2869_v20 = vsel %vm315_vm0, %v10089_v31, -inf }
 0xbc7   :  { %2858 = vmax.xlane.f32.xlu1 %v2857_v35  ;;  %v10091_v5 = vpop.f32.mrf.mxu1 }
 0xbc8   :  { %v2863_v6 = vsel %vm315_vm0, %v10091_v5, -inf }
 0xbc9   :  { %v10093_v10 = vpop.f32.mrf.mxu1 }
 0xbca   :  { %v2872_v46 = vsel %vm315_vm0, %v10093_v10, -inf }
 0xbcb   :  { %2852 = vmax.xlane.f32.xlu1 %v2851_v50  ;;  %2873 = vmax.xlane.f32.xlu0 %v2872_v46  ;;  %v10099_v40 = vpop.f32.mrf.mxu1 }
 0xbcc   :  { %v2866_v28 = vsel %vm315_vm0, %v10099_v40, -inf }
 0xbcd   :  { %v10101_v23 = vpop.f32.mrf.mxu1 }
 0xbce   :  { %v2881_v34 = vsel %vm315_vm0, %v10101_v23, -inf }
 0xbcf   :  { %2855 = vmax.xlane.f32.xlu1 %v2854_v43  ;;  %v10105_v54 = vpop.f32.mrf.mxu1 }
 0xbd0   :  { %v2875_v44 = vsel %vm315_vm0, %v10105_v54, -inf }
 0xbd1   :  { %v10107_v59 = vpop.f32.mrf.mxu1 }
 0xbd2   :  { %v2884_v12 = vsel %vm315_vm0, %v10107_v59, -inf }
 0xbd3   :  { %2864 = vmax.xlane.f32.xlu1 %v2863_v6  ;;  %v10111_v7 = vpop.f32.mrf.mxu1 }
 0xbd4   :  { %v2878_v2 = vsel %vm315_vm0, %v10111_v7, -inf }
 0xbd5   :  { %2879 = vmax.xlane.f32.xlu0 %v2878_v2  ;;  %v10125_v39 = vpop.f32.mrf.mxu1 }
 0xbd7   :  { %2867 = vmax.xlane.f32.xlu1 %v2866_v28  ;;  %v10127_v57 = vpop.f32.mrf.mxu1 }
 0xbd9   :  { %2885 = vmax.xlane.f32.xlu0 %v2884_v12  ;;  %v10129_v21 = vpop.f32.mrf.mxu1 }
 0xbdb   :  { %2870 = vmax.xlane.f32.xlu1 %v2869_v20  ;;  %v10131_v18 = vpop.f32.mrf.mxu1 }
 0xbdd   :  { %v10133_v17 = vpop.f32.mrf.mxu1 }
 0xbdf   :  { %2876 = vmax.xlane.f32.xlu1 %v2875_v44  ;;  %v10135_v35 = vpop.f32.mrf.mxu1 }
 0xbe1   :  { %v10137_v46 = vpop.f32.mrf.mxu1 }
 0xbe3   :  { %2882 = vmax.xlane.f32.xlu1 %v2881_v34  ;;  %v10139_v28 = vpop.f32.mrf.mxu1 }
 0xbe5   :  { %v10141_v34 = vpop.f32.mrf.mxu1 }
 0xbe7   :  { %v10145_v25 = vpop.f32.mrf.mxu1 }
 0xc40   :  { %v2847_v50 = vpop.xlane.xlu1 %2846 }
 0xc41   :  { %v2889_v43 = vsub.f32 %v7419_v13, %v2847_v50 }
 0xc43   :  { %v2907_v12 = vmul.f32 1.442695, %v2889_v43 }
 0xc44   :  { %v2841_v6 = vpop.xlane.xlu1 %2840 }
 0xc45   :  { %v2887_v2 = vsub.f32 %v2776_v19, %v2841_v6  ;;  %v10147_v19 = vpop.f32.mrf.mxu1 }
 0xc47   :  { %v2903_v20 = vmul.f32 1.442695, %v2887_v2 }
 0xc48   :  { %v2850_v44 = vpop.xlane.xlu1 %2849 }
 0xc49   :  { %8026 = vpow2.f32 %v2903_v20  ;;  %v2890_v37 = vsub.f32 %v10068_v36, %v2850_v44  ;;  %v10153_v36 = vpop.f32.mrf.mxu1 }
 0xc4a   :  { %8028 = vpow2.f32 %v2907_v12 }
 0xc4b   :  { %v2909_v41 = vmul.f32 1.442695, %v2890_v37 }
 0xc4c   :  { %v2844_v56 = vpop.xlane.xlu1 %2843  ;;  %v2862_v6 = vpop.xlane.xlu0 %2861 }
 0xc4d   :  { %v2888_v3 = vsub.f32 %v10071_v47, %v2844_v56  ;;  %v2894_v56 = vsub.f32 %v10079_v8, %v2862_v6 }
 0xc4f   :  { %v2905_v13 = vmul.f32 1.442695, %v2888_v3 }
 0xc50   :  { %v2859_v50 = vpop.xlane.xlu1 %2858 }
 0xc51   :  { %8030 = vpow2.f32 %v2905_v13  ;;  %v2893_v43 = vsub.f32 %v10073_v26, %v2859_v50  ;;  %v2917_v50 = vmul.f32 1.442695, %v2894_v56 }
 0xc52   :  { %8032 = vpow2.f32 %v2909_v41 }
 0xc53   :  { %v2915_v47 = vmul.f32 1.442695, %v2893_v43 }
 0xc54   :  { %v2853_v2 = vpop.xlane.xlu1 %2852  ;;  %v2874_v13 = vpop.xlane.xlu0 %2873 }
 0xc55   :  { %v2891_v12 = vsub.f32 %v10077_v51, %v2853_v2  ;;  %v7493_v51 = vpop.f32.mrf.mxu1 }
 0xc56   :  { %v10151_v20 = vpop.eup %8026 }
 0xc57   :  { %v2911_v37 = vmul.f32 1.442695, %v2891_v12  ;;  %v2935_v3 = vsel %vm315_vm0, %v10151_v20, 0.0  ;;  %v10158_v44 = vpop.eup %8028 }
 0xc58   :  { %v2856_v41 = vpop.xlane.xlu1 %2855  ;;  %2936 = vadd.xlane.f32.xlu1 %v2935_v3  ;;  %v2941_v8 = vsel %vm315_vm0, %v10158_v44, 0.0  ;;  %v3430_v3 = vpop.f32.mrf.mxu1 }
 0xc59   :  { %8034 = vpow2.f32 %v2911_v37  ;;  %v2892_v26 = vsub.f32 %v10085_v53, %v2856_v41  ;;  %v2898_v53 = vsub.f32 %v10093_v10, %v2874_v13 }
 0xc5a   :  { %8036 = vpow2.f32 %v2915_v47 }
 0xc5b   :  { %v2913_v2 = vmul.f32 1.442695, %v2892_v26 }
 0xc5c   :  { %v2865_v43 = vpop.xlane.xlu1 %2864  ;;  %2942 = vadd.xlane.f32.xlu1 %v2941_v8  ;;  %v2925_v8 = vmul.f32 1.442695, %v2898_v53 }
 0xc5d   :  { %8038 = vpow2.f32 %v2913_v2  ;;  %v2895_v6 = vsub.f32 %v10091_v5, %v2865_v43  ;;  %v7496_v2 = vpop.f32.mrf.mxu1 }
 0xc5e   :  { %v10164_v12 = vpop.eup %8030  ;;  %v2880_v0 = vpop.xlane.xlu0 %2879  ;;  %8040 = vpow2.f32 %v2917_v50 }
 0xc5f   :  { %v2919_v37 = vmul.f32 1.442695, %v2895_v6  ;;  %v2938_v56 = vsel %vm315_vm0, %v10164_v12, 0.0  ;;  %v10169_v47 = vpop.eup %8032  ;;  %v2900_v5 = vsub.f32 %v10111_v7, %v2880_v0 }
 0xc60   :  { %v2868_v41 = vpop.xlane.xlu1 %2867  ;;  %2939 = vadd.xlane.f32.xlu0 %v2938_v56  ;;  %v2944_v50 = vsel %vm315_vm0, %v10169_v47, 0.0 }
 0xc61   :  { %8042 = vpow2.f32 %v2919_v37  ;;  %v2896_v26 = vsub.f32 %v10099_v40, %v2868_v41  ;;  %v2929_v56 = vmul.f32 1.442695, %v2900_v5  ;;  %v3440_v37 = vpop.f32.mrf.mxu1  ;;  %v10183_v41 = vld [vmem:[#allocation13] ss:$0 sm:$0xff] }
 0xc62   :  { %v2886_v10 = vpop.xlane.xlu0 %2885 }
 0xc63   :  { %v2921_v43 = vmul.f32 1.442695, %v2896_v26  ;;  %v2902_v40 = vsub.f32 %v10107_v59, %v2886_v10  ;;  %v3446_v26 = vadd.f32 %v10183_v41, %v7496_v2 }
 0xc64   :  { %v2871_v13 = vpop.xlane.xlu1 %2870  ;;  %2945 = vadd.xlane.f32.xlu0 %v2944_v50 }
 0xc65   :  { %8044 = vpow2.f32 %v2921_v43  ;;  %v2897_v6 = vsub.f32 %v10089_v31, %v2871_v13  ;;  %v2933_v59 = vmul.f32 1.442695, %v2902_v40 }
 0xc66   :  { %v10176_v52 = vpop.eup %8034  ;;  %8046 = vpow2.f32 %v2925_v8  ;;  %v3441_v8 = vadd.f32 %v10183_v41, %v3440_v37  ;;  %v3431_v37 = vadd.f32 %v10183_v41, %v3430_v3 }
 0xc67   :  { %v2923_v0 = vmul.f32 1.442695, %v2897_v6  ;;  %v2947_v7 = vsel %vm315_vm0, %v10176_v52, 0.0  ;;  %v10181_v53 = vpop.eup %8036 }
 0xc68   :  { %2948 = vadd.xlane.f32.xlu1 %v2947_v7  ;;  %v2877_v43 = vpop.xlane.xlu1 %2876  ;;  %v2953_v10 = vsel %vm315_vm0, %v10181_v53, 0.0 }
 0xc69   :  { %8048 = vpow2.f32 %v2923_v0  ;;  %v2899_v31 = vsub.f32 %v10105_v54, %v2877_v43 }
 0xc6a   :  { %v10187_v5 = vpop.eup %8038  ;;  %8050 = vpow2.f32 %v2929_v56  ;;  %v3436_v56 = vadd.f32 %v10183_v41, %v7493_v51  ;;  %v3421_v51 = vadd.f32 %v10183_v41, %v10153_v36 }
 0xc6b   :  { %v2927_v50 = vmul.f32 1.442695, %v2899_v31  ;;  %v2950_v13 = vsel %vm315_vm0, %v10187_v5, 0.0  ;;  %v10194_v6 = vpop.eup %8040  ;;  %8052 = vtanh.f32 %v3446_v26 }
 0xc6c   :  { %2954 = vadd.xlane.f32.xlu1 %v2953_v10  ;;  %v2883_v2 = vpop.xlane.xlu1 %2882  ;;  %2951 = vadd.xlane.f32.xlu0 %v2950_v13  ;;  %v2956_v26 = vsel %vm315_vm0, %v10194_v6, 0.0 }
 0xc6d   :  { %8054 = vpow2.f32 %v2927_v50  ;;  %v2901_v54 = vsub.f32 %v10101_v23, %v2883_v2  ;;  %v3426_v23 = vadd.f32 %v10183_v41, %v10147_v19  ;;  %v3411_v19 = vadd.f32 %v10183_v41, %v10145_v25 }
 0xc6e   :  { %v10197_v0 = vpop.eup %8042  ;;  %8056 = vtanh.f32 %v3441_v8  ;;  %v3406_v2 = vadd.f32 %v10183_v41, %v10137_v46 }
 0xc6f   :  { %8058 = vpow2.f32 %v2933_v59  ;;  %v2931_v40 = vmul.f32 1.442695, %v2901_v54  ;;  %v2959_v7 = vsel %vm315_vm0, %v10197_v0, 0.0  ;;  %v3416_v59 = vadd.f32 %v10183_v41, %v10141_v34 }
 0xc70   :  { %2960 = vadd.xlane.f32.xlu1 %v2959_v7  ;;  %2957 = vadd.xlane.f32.xlu0 %v2956_v26  ;;  %v3401_v54 = vadd.f32 %v10183_v41, %v10139_v28 }
 0xc71   :  { %8060 = vpow2.f32 %v2931_v40 }
 0xc72   :  { %v10205_v43 = vpop.eup %8044  ;;  %8062 = vtanh.f32 %v3436_v56 }
 0xc73   :  { %8064 = vtanh.f32 %v3431_v37  ;;  %v2962_v3 = vsel %vm315_vm0, %v10205_v43, 0.0  ;;  %v10213_v31 = vpop.eup %8046 }
 0xc74   :  { %2963 = vadd.xlane.f32.xlu0 %v2962_v3  ;;  %8066 = vtanh.f32 %v3426_v23  ;;  %v2968_v10 = vsel %vm315_vm0, %v10213_v31, 0.0  ;;  %v10245_v23 = vld [vmem:[#allocation15] ss:$0 sm:$0xff] }
 0xc75   :  { %8068 = vtanh.f32 %v3421_v51 }
 0xc76   :  { %v10215_v8 = vpop.eup %8048  ;;  %8070 = vtanh.f32 %v3416_v59 }
 0xc77   :  { %v10219_v50 = vpop.eup %8050  ;;  %v2965_v36 = vsel %vm315_vm0, %v10215_v8, 0.0  ;;  %8072 = vtanh.f32 %v3411_v19 }
 0xc78   :  { %2966 = vadd.xlane.f32.xlu1 %v2965_v36  ;;  %2969 = vadd.xlane.f32.xlu0 %v2968_v10  ;;  %v8053_v13 = vpop.eup %8052  ;;  %v2974_v37 = vsel %vm315_vm0, %v10219_v50, 0.0  ;;  %8074 = vtanh.f32 %v3406_v2 }
 0xc79   :  { %8076 = vtanh.f32 %v3401_v54  ;;  %v3576_v3 = vmul.f32 %v10245_v23, %v8053_v13 }
 0xc7a   :  { %v10229_v34 = vpop.eup %8054 }
 0xc7b   :  { %v8057_v25 = vpop.eup %8056  ;;  %v2971_v56 = vsel %vm315_vm0, %v10229_v34, 0.0  ;;  %v3638_v10 = vsel %vm315_vm0, %v3576_v3, 0.0 }
 0xc7c   :  { %v10237_v40 = vpop.eup %8058  ;;  %2972 = vadd.xlane.f32.xlu1 %v2971_v56  ;;  %2975 = vadd.xlane.f32.xlu0 %v2974_v37  ;;  %v3575_v51 = vmul.f32 %v10245_v23, %v8057_v25 }
 0xc7d   :  { %v2980_v26 = vsel %vm315_vm0, %v10237_v40, 0.0 }
 0xc7e   :  { %v10239_v46 = vpop.eup %8060  ;;  %v3635_v36 = vsel %vm315_vm0, %v3575_v51, 0.0 }
 0xc7f   :  { %v8063_v7 = vpop.eup %8062  ;;  %v2977_v28 = vsel %vm315_vm0, %v10239_v46, 0.0 }
 0xc80   :  { %v8065_v59 = vpop.eup %8064  ;;  %2978 = vadd.xlane.f32.xlu1 %v2977_v28  ;;  %2981 = vadd.xlane.f32.xlu0 %v2980_v26  ;;  %v3574_v54 = vmul.f32 %v10245_v23, %v8063_v7 }
 0xc81   :  { %v8067_v19 = vpop.eup %8066  ;;  %v3573_v2 = vmul.f32 %v10245_v23, %v8065_v59 }
 0xc82   :  { %v8069_v56 = vpop.eup %8068  ;;  %v3632_v13 = vsel %vm315_vm0, %v3574_v54, 0.0  ;;  %v3572_v26 = vmul.f32 %v10245_v23, %v8067_v19 }
 0xc83   :  { %v8071_v37 = vpop.eup %8070  ;;  %v3629_v25 = vsel %vm315_vm0, %v3573_v2, 0.0  ;;  %v3571_v28 = vmul.f32 %v10245_v23, %v8069_v56 }
 0xc84   :  { %3636 = vadd.xlane.f32.xlu1 %v3635_v36  ;;  %3639 = vadd.xlane.f32.xlu0 %v3638_v10  ;;  %v8073_v16 = vpop.eup %8072  ;;  %v3626_v7 = vsel %vm315_vm0, %v3572_v26, 0.0  ;;  %v3570_v10 = vmul.f32 %v10245_v23, %v8071_v37 }
 0xc85   :  { %v8075_v51 = vpop.eup %8074  ;;  %v3623_v59 = vsel %vm315_vm0, %v3571_v28, 0.0  ;;  %v3569_v36 = vmul.f32 %v10245_v23, %v8073_v16 }
 0xc86   :  { %v8077_v3 = vpop.eup %8076  ;;  %v3620_v54 = vsel %vm315_vm0, %v3570_v10, 0.0  ;;  %v3568_v56 = vmul.f32 %v10245_v23, %v8075_v51 }
 0xc87   :  { %v3617_v2 = vsel %vm315_vm0, %v3569_v36, 0.0  ;;  %v3567_v19 = vmul.f32 %v10245_v23, %v8077_v3 }
 0xc88   :  { %3630 = vadd.xlane.f32.xlu1 %v3629_v25  ;;  %3633 = vadd.xlane.f32.xlu0 %v3632_v13  ;;  %v3614_v13 = vsel %vm315_vm0, %v3568_v56, 0.0 }
 0xc89   :  { %v3611_v25 = vsel %vm315_vm0, %v3567_v19, 0.0 }
 0xc8c   :  { %3624 = vadd.xlane.f32.xlu1 %v3623_v59  ;;  %3627 = vadd.xlane.f32.xlu0 %v3626_v7 }
 0xc90   :  { %3618 = vadd.xlane.f32.xlu1 %v3617_v2  ;;  %3621 = vadd.xlane.f32.xlu0 %v3620_v54 }
 0xc94   :  { %3612 = vadd.xlane.f32.xlu1 %v3611_v25  ;;  %3615 = vadd.xlane.f32.xlu0 %v3614_v13 }
 0xce1   :  { %v2937_v16 = vpop.xlane.xlu1 %2936 }
 0xce2   :  { %8078 = vrcp.f32 %v2937_v16 }
 0xce5   :  { %v2943_v37 = vpop.xlane.xlu1 %2942 }
 0xce6   :  { %8080 = vrcp.f32 %v2943_v37 }
 0xce9   :  { %v2940_v28 = vpop.xlane.xlu0 %2939 }
 0xcea   :  { %8082 = vrcp.f32 %v2940_v28 }
 0xced   :  { %v2946_v26 = vpop.xlane.xlu0 %2945 }
 0xcee   :  { %8084 = vrcp.f32 %v2946_v26 }
 0xcef   :  { %v8079_v59 = vpop.eup %8078 }
 0xcf0   :  { %v2984_v3 = vmul.f32 %v8079_v59, %v10151_v20 }
 0xcf1   :  { %v2949_v51 = vpop.xlane.xlu1 %2948 }
 0xcf2   :  { %8086 = vrcp.f32 %v2949_v51  ;;  %7441 = vmatprep.mubr.msk.f32.mxu0 %vm315_vm0, %v2984_v3 }
 0xcf3   :  { %v8081_v10 = vpop.eup %8080 }
 0xcf4   :  { %v2988_v25 = vmul.f32 %v8081_v10, %v10158_v44 }
 0xcf5   :  { %v2955_v7 = vpop.xlane.xlu1 %2954  ;;  %v2952_v36 = vpop.xlane.xlu0 %2951 }
 0xcf6   :  { %8088 = vrcp.f32 %v2955_v7 }
 0xcf7   :  { %v8083_v2 = vpop.eup %8082  ;;  %8090 = vrcp.f32 %v2952_v36 }
 0xcf8   :  { %v2986_v54 = vmul.f32 %v8083_v2, %v10164_v12 }
 0xcf9   :  { %v2961_v19 = vpop.xlane.xlu1 %2960  ;;  %v2958_v56 = vpop.xlane.xlu0 %2957 }
 0xcfa   :  { %8092 = vrcp.f32 %v2961_v19  ;;  %7442 = vmatmul.mubr.msk.f32.vlgmr.msra.gmra.mxu0 %vm315_vm0, %v2986_v54 }
 0xcfb   :  { %v8085_v20 = vpop.eup %8084  ;;  %8094 = vrcp.f32 %v2958_v56  ;;  %7444 = vmatprep.mubr.msk.f32.mxu0 %vm315_vm0, %v2988_v25 }
 0xcfc   :  { %v2990_v13 = vmul.f32 %v8085_v20, %v10169_v47 }
 0xcfd   :  { %v2964_v16 = vpop.xlane.xlu0 %2963 }
 0xcfe   :  { %8096 = vrcp.f32 %v2964_v16  ;;  %7445 = vmatmul.mubr.msk.f32.gmra.mxu0 %vm315_vm0, %v2990_v13 }
 0xcff   :  { %v8087_v37 = vpop.eup %8086 }
 0xd00   :  { %v2992_v12 = vmul.f32 %v8087_v37, %v10176_v52 }
 0xd01   :  { %v2967_v28 = vpop.xlane.xlu1 %2966  ;;  %v2970_v26 = vpop.xlane.xlu0 %2969 }
 0xd02   :  { %8098 = vrcp.f32 %v2967_v28  ;;  %7447 = vmatprep.mubr.msk.f32.mxu0 %vm315_vm0, %v2992_v12 }
 0xd03   :  { %v8089_v44 = vpop.eup %8088  ;;  %8100 = vrcp.f32 %v2970_v26 }
 0xd04   :  { %v8091_v59 = vpop.eup %8090  ;;  %v2996_v3 = vmul.f32 %v8089_v44, %v10181_v53 }
 0xd05   :  { %v2973_v51 = vpop.xlane.xlu1 %2972  ;;  %v2976_v7 = vpop.xlane.xlu0 %2975  ;;  %v2994_v47 = vmul.f32 %v8091_v59, %v10187_v5 }
 0xd06   :  { %8102 = vrcp.f32 %v2973_v51 }
 0xd07   :  { %v8093_v36 = vpop.eup %8092  ;;  %8104 = vrcp.f32 %v2976_v7  ;;  %7448 = vmatmul.mubr.msk.f32.gmra.mxu0 %vm315_vm0, %v2994_v47 }
 0xd08   :  { %v8095_v52 = vpop.eup %8094  ;;  %7450 = vmatprep.mubr.msk.f32.mxu0 %vm315_vm0, %v2996_v3  ;;  %v3000_v10 = vmul.f32 %v8093_v36, %v10197_v0 }
 0xd09   :  { %v2979_v2 = vpop.xlane.xlu1 %2978  ;;  %v2982_v54 = vpop.xlane.xlu0 %2981  ;;  %v2998_v19 = vmul.f32 %v8095_v52, %v10194_v6 }
 0xd0a   :  { %8106 = vrcp.f32 %v2979_v2 }
 0xd0b   :  { %v8097_v53 = vpop.eup %8096  ;;  %8108 = vrcp.f32 %v2982_v54  ;;  %7451 = vmatmul.mubr.msk.f32.gmra.mxu0 %vm315_vm0, %v2998_v19 }
 0xd0c   :  { %7453 = vmatprep.mubr.msk.f32.mxu0 %vm315_vm0, %v3000_v10  ;;  %v3002_v5 = vmul.f32 %v8097_v53, %v10205_v43 }
 0xd0f   :  { %v8099_v56 = vpop.eup %8098  ;;  %7454 = vmatmul.mubr.msk.f32.gmra.mxu0 %vm315_vm0, %v3002_v5 }
 0xd10   :  { %v8101_v25 = vpop.eup %8100  ;;  %v3004_v20 = vmul.f32 %v8099_v56, %v10215_v8 }
 0xd11   :  { %v3006_v0 = vmul.f32 %v8101_v25, %v10213_v31 }
 0xd12   :  { %7456 = vmatprep.mubr.msk.f32.mxu0 %vm315_vm0, %v3004_v20 }
 0xd13   :  { %v8103_v6 = vpop.eup %8102  ;;  %7457 = vmatmul.mubr.msk.f32.gmra.mxu0 %vm315_vm0, %v3006_v0 }
 0xd14   :  { %v8105_v13 = vpop.eup %8104  ;;  %v3008_v16 = vmul.f32 %v8103_v6, %v10229_v34 }
 0xd15   :  { %v3010_v37 = vmul.f32 %v8105_v13, %v10219_v50 }
 0xd16   :  { %7459 = vmatprep.mubr.msk.f32.mxu0 %vm315_vm0, %v3008_v16 }
 0xd17   :  { %v8107_v43 = vpop.eup %8106  ;;  %7460 = vmatmul.mubr.msk.f32.gmra.mxu0 %vm315_vm0, %v3010_v37 }
 0xd18   :  { %v8109_v12 = vpop.eup %8108  ;;  %v3012_v8 = vmul.f32 %v8107_v43, %v10239_v46 }
 0xd19   :  { %v3014_v31 = vmul.f32 %v8109_v12, %v10237_v40 }
 0xd1a   :  { %7462 = vmatprep.mubr.msk.f32.mxu0 %vm315_vm0, %v3012_v8 }
 0xd1b   :  { %7463 = vmatmul.mubr.msk.f32.gmra.mxu0 %vm315_vm0, %v3014_v31 }
 0xdba   :  { %v10299_v28 = vpop.f32.mrf.mxu0 }
 0xdbb   :  { %11719 = vst [vmem:[#allocation56_spill] sm:$0xff] %v10299_v28 }
 0xdbc   :  { %v10301_v26 = vpop.f32.mrf.mxu0 }
 0xdbd   :  { %11720 = vst [vmem:[#allocation57_spill] sm:$0xff] %v10301_v26  ;;  %7497 = vmatprep.mubr.msk.f32.mxu1 %vm315_vm0, %v10301_v26 }
 0xdbe   :  { %v10305_v50 = vpop.f32.mrf.mxu0  ;;  %7498 = vmatmul.mubr.msk.f32.gmra.mxu1 %vm315_vm0, %v10299_v28 }
 0xdbf   :  { %11721 = vst [vmem:[#allocation58_spill] sm:$0xff] %v10305_v50 }
 0xdc0   :  { %v10309_v34 = vpop.f32.mrf.mxu0 }
 0xdc1   :  { %11722 = vst [vmem:[#allocation59_spill] sm:$0xff] %v10309_v34  ;;  %7500 = vmatprep.mubr.msk.f32.mxu1 %vm315_vm0, %v10309_v34 }
 0xdc2   :  { %7501 = vmatmul.mubr.msk.f32.gmra.mxu1 %vm315_vm0, %v10305_v50 }
 0xdc7   :  { %v10315_v40 = vpop.f32.mrf.mxu0 }
 0xdc8   :  { %11723 = vst [vmem:[#allocation60_spill] sm:$0xff] %v10315_v40 }
 0xdc9   :  { %v10317_v46 = vpop.f32.mrf.mxu0 }
 0xdca   :  { %11724 = vst [vmem:[#allocation61_spill] sm:$0xff] %v10317_v46  ;;  %7503 = vmatprep.mubr.msk.f32.mxu1 %vm315_vm0, %v10317_v46 }
 0xdcb   :  { %v10321_v44 = vpop.f32.mrf.mxu0  ;;  %7504 = vmatmul.mubr.msk.f32.gmra.mxu1 %vm315_vm0, %v10315_v40 }
 0xdcd   :  { %v10325_v59 = vpop.f32.mrf.mxu0 }
 0xdce   :  { %11725 = vst [vmem:[#allocation62_spill] sm:$0xff] %v10325_v59  ;;  %7506 = vmatprep.mubr.msk.f32.mxu1 %vm315_vm0, %v10325_v59 }
 0xdcf   :  { %v10329_v3 = vpop.f32.mrf.mxu0  ;;  %7507 = vmatmul.mubr.msk.f32.gmra.mxu1 %vm315_vm0, %v10321_v44 }
 0xdd1   :  { %v10333_v51 = vpop.f32.mrf.mxu0 }
 0xdd2   :  { %7509 = vmatprep.mubr.msk.f32.mxu1 %vm315_vm0, %v10333_v51 }
 0xdd3   :  { %7510 = vmatmul.mubr.msk.f32.gmra.mxu1 %vm315_vm0, %v10329_v3  ;;  %v10339_v7 = vpop.f32.mrf.mxu0 }
 0xdd5   :  { %v10341_v47 = vpop.f32.mrf.mxu0 }
 0xdd6   :  { %7512 = vmatprep.mubr.msk.f32.mxu1 %vm315_vm0, %v10341_v47 }
 0xdd7   :  { %v10345_v36 = vpop.f32.mrf.mxu0  ;;  %7513 = vmatmul.mubr.msk.f32.gmra.mxu1 %vm315_vm0, %v10339_v7 }
 0xdd9   :  { %v10349_v52 = vpop.f32.mrf.mxu0 }
 0xdda   :  { %7515 = vmatprep.mubr.msk.f32.mxu1 %vm315_vm0, %v10349_v52 }
 0xddb   :  { %v10353_v10 = vpop.f32.mrf.mxu0  ;;  %7516 = vmatmul.mubr.msk.f32.gmra.mxu1 %vm315_vm0, %v10345_v36 }
 0xddd   :  { %v10357_v2 = vpop.f32.mrf.mxu0 }
 0xdde   :  { %7518 = vmatprep.mubr.msk.f32.mxu1 %vm315_vm0, %v10357_v2 }
 0xddf   :  { %7519 = vmatmul.mubr.msk.f32.gmra.mxu1 %vm315_vm0, %v10353_v10 }
 0xe7e   :  { %v10363_v54 = vpop.f32.mrf.mxu1 }
 0xe80   :  { %v10365_v19 = vpop.f32.mrf.mxu1 }
 0xe82   :  { %v10367_v53 = vpop.f32.mrf.mxu1 }
 0xe84   :  { %v10369_v5 = vpop.f32.mrf.mxu1 }
 0xe8b   :  { %v7505_v56 = vpop.f32.mrf.mxu1 }
 0xe8d   :  { %v3470_v25 = vpop.f32.mrf.mxu1 }
 0xe8f   :  { %v7508_v20 = vpop.f32.mrf.mxu1 }
 0xe90   :  { %v3486_v55 = vadd.f32 %v10183_v41, %v7508_v20 }
 0xe91   :  { %v3480_v0 = vpop.f32.mrf.mxu1 }
 0xe93   :  { %v7511_v6 = vpop.f32.mrf.mxu1 }
 0xe94   :  { %v3496_v13 = vadd.f32 %v10183_v41, %v7511_v6 }
 0xe95   :  { %v3490_v16 = vpop.f32.mrf.mxu1 }
 0xe96   :  { %8110 = vtanh.f32 %v3496_v13  ;;  %v3491_v37 = vadd.f32 %v10183_v41, %v3490_v16  ;;  %v3481_v13 = vadd.f32 %v10183_v41, %v3480_v0  ;;  %v3476_v0 = vadd.f32 %v10183_v41, %v7505_v56 }
 0xe97   :  { %v7514_v43 = vpop.f32.mrf.mxu1 }
 0xe98   :  { %8112 = vtanh.f32 %v3491_v37  ;;  %v3506_v12 = vadd.f32 %v10183_v41, %v7514_v43 }
 0xe99   :  { %v3500_v8 = vpop.f32.mrf.mxu1 }
 0xe9a   :  { %8114 = vtanh.f32 %v3506_v12  ;;  %v3501_v31 = vadd.f32 %v10183_v41, %v3500_v8  ;;  %v3396_v12 = vadd.f32 %v10183_v41, %v10133_v17 }
 0xe9b   :  { %v7517_v4 = vpop.f32.mrf.mxu1 }
 0xe9c   :  { %8116 = vtanh.f32 %v3501_v31  ;;  %v3516_v33 = vadd.f32 %v10183_v41, %v7517_v4 }
 0xe9d   :  { %v3510_v38 = vpop.f32.mrf.mxu1 }
 0xe9e   :  { %8118 = vtanh.f32 %v3516_v33  ;;  %v3511_v6 = vadd.f32 %v10183_v41, %v3510_v38  ;;  %v3391_v33 = vadd.f32 %v10183_v41, %v10135_v35 }
 0xe9f   :  { %v7520_v16 = vpop.f32.mrf.mxu1 }
 0xea0   :  { %8120 = vtanh.f32 %v3511_v6  ;;  %v3526_v37 = vadd.f32 %v10183_v41, %v7520_v16  ;;  %v3471_v6 = vadd.f32 %v10183_v41, %v3470_v25 }
 0xea1   :  { %8122 = vtanh.f32 %v3486_v55  ;;  %v3520_v43 = vpop.f32.mrf.mxu1 }
 0xea2   :  { %8124 = vtanh.f32 %v3526_v37  ;;  %v3521_v4 = vadd.f32 %v10183_v41, %v3520_v43  ;;  %v3386_v37 = vadd.f32 %v10183_v41, %v10129_v21  ;;  %v3466_v21 = vadd.f32 %v10183_v41, %v10367_v53 }
 0xea3   :  { %v8111_v8 = vpop.eup %8110  ;;  %8126 = vtanh.f32 %v3481_v13 }
 0xea4   :  { %8128 = vtanh.f32 %v3521_v4  ;;  %v3586_v38 = vmul.f32 %v10245_v23, %v8111_v8  ;;  %v3381_v4 = vadd.f32 %v10183_v41, %v10131_v18  ;;  %v3461_v18 = vadd.f32 %v10183_v41, %v10369_v5 }
 0xea5   :  { %v8113_v20 = vpop.eup %8112  ;;  %8130 = vtanh.f32 %v3396_v12  ;;  %v3371_v5 = vadd.f32 %v10183_v41, %v10127_v57  ;;  %v3451_v57 = vadd.f32 %v10183_v41, %v10365_v19 }
 0xea6   :  { %v3668_v55 = vsel %vm315_vm0, %v3586_v38, 0.0  ;;  %v3585_v31 = vmul.f32 %v10245_v23, %v8113_v20  ;;  %8132 = vtanh.f32 %v3391_v33 }
 0xea7   :  { %v8115_v17 = vpop.eup %8114  ;;  %3669 = vadd.xlane.f32.xlu0 %v3668_v55  ;;  %8134 = vtanh.f32 %v3476_v0 }
 0xea8   :  { %v3665_v13 = vsel %vm315_vm0, %v3585_v31, 0.0  ;;  %v3588_v35 = vmul.f32 %v10245_v23, %v8115_v17  ;;  %8136 = vtanh.f32 %v3471_v6 }
 0xea9   :  { %v8117_v16 = vpop.eup %8116  ;;  %3666 = vadd.xlane.f32.xlu1 %v3665_v13  ;;  %8138 = vtanh.f32 %v3386_v37 }
 0xeaa   :  { %v3674_v56 = vsel %vm315_vm0, %v3588_v35, 0.0  ;;  %v3587_v43 = vmul.f32 %v10245_v23, %v8117_v16  ;;  %8140 = vtanh.f32 %v3381_v4  ;;  %v3376_v35 = vadd.f32 %v10183_v41, %v10125_v39 }
 0xeab   :  { %v8119_v12 = vpop.eup %8118  ;;  %3675 = vadd.xlane.f32.xlu0 %v3674_v56  ;;  %8142 = vtanh.f32 %v3466_v21  ;;  %v3456_v39 = vadd.f32 %v10183_v41, %v10363_v54 }
 0xeac   :  { %v3671_v25 = vsel %vm315_vm0, %v3587_v43, 0.0  ;;  %v3590_v8 = vmul.f32 %v10245_v23, %v8119_v12  ;;  %8144 = vtanh.f32 %v3461_v18 }
 0xead   :  { %v8121_v33 = vpop.eup %8120  ;;  %3672 = vadd.xlane.f32.xlu1 %v3671_v25  ;;  %8146 = vtanh.f32 %v3376_v35 }
 0xeae   :  { %v8123_v38 = vpop.eup %8122  ;;  %v3680_v20 = vsel %vm315_vm0, %v3590_v8, 0.0  ;;  %v3589_v0 = vmul.f32 %v10245_v23, %v8121_v33  ;;  %8148 = vtanh.f32 %v3371_v5 }
 0xeaf   :  { %v8125_v55 = vpop.eup %8124  ;;  %3681 = vadd.xlane.f32.xlu0 %v3680_v20  ;;  %v3584_v37 = vmul.f32 %v10245_v23, %v8123_v38  ;;  %8150 = vtanh.f32 %v3456_v39 }
 0xeb0   :  { %v8127_v31 = vpop.eup %8126  ;;  %v3677_v17 = vsel %vm315_vm0, %v3589_v0, 0.0  ;;  %v3592_v6 = vmul.f32 %v10245_v23, %v8125_v55  ;;  %8152 = vtanh.f32 %v3451_v57 }
 0xeb1   :  { %v8129_v13 = vpop.eup %8128  ;;  %3678 = vadd.xlane.f32.xlu1 %v3677_v17  ;;  %v3583_v12 = vmul.f32 %v10245_v23, %v8127_v31  ;;  %v3662_v25 = vsel %vm315_vm0, %v3584_v37, 0.0 }
 0xeb2   :  { %v3686_v53 = vsel %vm315_vm0, %v3592_v6, 0.0  ;;  %v3591_v16 = vmul.f32 %v10245_v23, %v8129_v13  ;;  %v8131_v56 = vpop.eup %8130 }
 0xeb3   :  { %3687 = vadd.xlane.f32.xlu0 %v3686_v53  ;;  %v8133_v4 = vpop.eup %8132  ;;  %v3566_v8 = vmul.f32 %v10245_v23, %v8131_v56  ;;  %v3659_v38 = vsel %vm315_vm0, %v3583_v12, 0.0 }
 0xeb4   :  { %v3683_v43 = vsel %vm315_vm0, %v3591_v16, 0.0  ;;  %v8135_v33 = vpop.eup %8134  ;;  %v3565_v21 = vmul.f32 %v10245_v23, %v8133_v4 }
 0xeb5   :  { %3684 = vadd.xlane.f32.xlu1 %v3683_v43  ;;  %v8137_v20 = vpop.eup %8136  ;;  %v3608_v0 = vsel %vm315_vm0, %v3566_v8, 0.0  ;;  %v3582_v54 = vmul.f32 %v10245_v23, %v8135_v33 }
 0xeb6   :  { %v8139_v55 = vpop.eup %8138  ;;  %v3605_v31 = vsel %vm315_vm0, %v3565_v21, 0.0  ;;  %v3581_v18 = vmul.f32 %v10245_v23, %v8137_v20 }
 0xeb7   :  { %3663 = vadd.xlane.f32.xlu0 %v3662_v25  ;;  %v8141_v17 = vpop.eup %8140  ;;  %v3656_v41 = vsel %vm315_vm0, %v3582_v54, 0.0  ;;  %v3564_v19 = vmul.f32 %v10245_v23, %v8139_v55 }
 0xeb8   :  { %v8143_v6 = vpop.eup %8142  ;;  %v3653_v13 = vsel %vm315_vm0, %v3581_v18, 0.0  ;;  %v3563_v35 = vmul.f32 %v10245_v23, %v8141_v17  ;;  %v10449_v18 = vpop.xlane.xlu1 %3636 }
 0xeb9   :  { %3660 = vadd.xlane.f32.xlu1 %v3659_v38  ;;  %v8145_v53 = vpop.eup %8144  ;;  %v3602_v16 = vsel %vm315_vm0, %v3564_v19, 0.0  ;;  %v3580_v37 = vmul.f32 %v10245_v23, %v8143_v6 }
 0xeba   :  { %v8147_v56 = vpop.eup %8146  ;;  %v3599_v5 = vsel %vm315_vm0, %v3563_v35, 0.0  ;;  %v3579_v43 = vmul.f32 %v10245_v23, %v8145_v53 }
 0xebb   :  { %3609 = vadd.xlane.f32.xlu0 %v3608_v0  ;;  %v8149_v12 = vpop.eup %8148  ;;  %v3650_v4 = vsel %vm315_vm0, %v3580_v37, 0.0  ;;  %v3562_v39 = vmul.f32 %v10245_v23, %v8147_v56 }
 0xebc   :  { %v8151_v25 = vpop.eup %8150  ;;  %v3647_v8 = vsel %vm315_vm0, %v3579_v43, 0.0  ;;  %v3561_v33 = vmul.f32 %v10245_v23, %v8149_v12 }
 0xebd   :  { %3606 = vadd.xlane.f32.xlu1 %v3605_v31  ;;  %v8153_v57 = vpop.eup %8152  ;;  %v3596_v38 = vsel %vm315_vm0, %v3562_v39, 0.0  ;;  %v3578_v21 = vmul.f32 %v10245_v23, %v8151_v25  ;;  %v10447_v31 = vpop.xlane.xlu0 %3639 }
 0xebe   :  { %v3593_v20 = vsel %vm315_vm0, %v3561_v33, 0.0  ;;  %v3577_v0 = vmul.f32 %v10245_v23, %v8153_v57 }
 0xebf   :  { %3657 = vadd.xlane.f32.xlu0 %v3656_v41  ;;  %v3644_v54 = vsel %vm315_vm0, %v3578_v21, 0.0  ;;  %v3631_v41 = vpop.xlane.xlu1 %3630 }
 0xec0   :  { %v3641_v55 = vsel %vm315_vm0, %v3577_v0, 0.0 }
 0xec1   :  { %3654 = vadd.xlane.f32.xlu1 %v3653_v13  ;;  %v3634_v17 = vpop.xlane.xlu0 %3633 }
 0xec3   :  { %3603 = vadd.xlane.f32.xlu0 %v3602_v16  ;;  %v3625_v6 = vpop.xlane.xlu1 %3624 }
 0xec5   :  { %3600 = vadd.xlane.f32.xlu1 %v3599_v5  ;;  %v3628_v19 = vpop.xlane.xlu0 %3627 }
 0xec7   :  { %3651 = vadd.xlane.f32.xlu0 %v3650_v4  ;;  %v3619_v35 = vpop.xlane.xlu1 %3618  ;;  %v10451_v4 = vld [vmem:[#allocation2] ss:$0 sm:$0xff] }
 0xec9   :  { %3648 = vadd.xlane.f32.xlu1 %v3647_v8  ;;  %v3622_v13 = vpop.xlane.xlu0 %3621 }
 0xeca   :  { %v3698_v8 = vadd.f32 %v10451_v4, %v3622_v13 }
 0xecb   :  { %3597 = vadd.xlane.f32.xlu0 %v3596_v38  ;;  %v3613_v16 = vpop.xlane.xlu1 %3612 }
 0xecc   :  { %v3695_v13 = vadd.f32 %v10451_v4, %v3613_v16 }
 0xecd   :  { %3594 = vadd.xlane.f32.xlu1 %v3593_v20  ;;  %v3616_v53 = vpop.xlane.xlu0 %3615  ;;  %v3697_v20 = vadd.f32 %v10451_v4, %v3619_v35 }
 0xece   :  { %v3696_v0 = vadd.f32 %v10451_v4, %v3616_v53 }
 0xecf   :  { %3645 = vadd.xlane.f32.xlu0 %v3644_v54 }
 0xed1   :  { %3642 = vadd.xlane.f32.xlu1 %v3641_v55 }
 0xf30   :  { %v3670_v23 = vpop.xlane.xlu0 %3669 }
 0xf31   :  { %v3714_v39 = vadd.f32 %v10451_v4, %v3670_v23 }
 0xf32   :  { %v3667_v37 = vpop.xlane.xlu1 %3666 }
 0xf33   :  { %v3730_v57 = vmax.f32 %v3698_v8, %v3714_v39  ;;  %v3713_v38 = vadd.f32 %v10451_v4, %v3667_v37  ;;  %v3700_v37 = vadd.f32 %v10451_v4, %v3628_v19 }
 0xf34   :  { %v3676_v56 = vpop.xlane.xlu0 %3675 }
 0xf35   :  { %v3746_v27 = vsub.f32 %v3698_v8, %v3730_v57  ;;  %v3729_v48 = vmax.f32 %v3697_v20, %v3713_v38  ;;  %v3716_v23 = vadd.f32 %v10451_v4, %v3676_v56  ;;  %v3794_v32 = vsub.f32 %v3714_v39, %v3730_v57 }
 0xf36   :  { %v3673_v5 = vpop.xlane.xlu1 %3672  ;;  %v3699_v56 = vadd.f32 %v10451_v4, %v3625_v6  ;;  %v3702_v57 = vadd.f32 %v10451_v4, %v3634_v17 }
 0xf37   :  { %v3771_v42 = vmul.f32 1.442695, %v3746_v27  ;;  %v3745_v53 = vsub.f32 %v3697_v20, %v3729_v48  ;;  %v3732_v50 = vmax.f32 %v3700_v37, %v3716_v23  ;;  %v3819_v8 = vmul.f32 1.442695, %v3794_v32 }
 0xf38   :  { %v3682_v43 = vpop.xlane.xlu0 %3681  ;;  %v3793_v9 = vsub.f32 %v3713_v38, %v3729_v48  ;;  %v3701_v48 = vadd.f32 %v10451_v4, %v3631_v41 }
 0xf39   :  { %v3718_v16 = vadd.f32 %v10451_v4, %v3682_v43  ;;  %8154 = vpow2.f32 %v3771_v42  ;;  %v3796_v20 = vsub.f32 %v3716_v23, %v3732_v50 }
 0xf3a   :  { %v3679_v12 = vpop.xlane.xlu1 %3678  ;;  %8156 = vpow2.f32 %v3819_v8 }
 0xf3b   :  { %v3823_v17 = vmul.f32 1.442695, %v3796_v20 }
 0xf3c   :  { %v3688_v25 = vpop.xlane.xlu0 %3687 }
 0xf3e   :  { %v10455_v33 = vpop.xlane.xlu1 %3684 }
 0xf40   :  { %v3664_v21 = vpop.xlane.xlu0 %3663 }
 0xf41   :  { %v3712_v54 = vadd.f32 %v10451_v4, %v3664_v21  ;;  %v3715_v21 = vadd.f32 %v10451_v4, %v3673_v5  ;;  %v3717_v5 = vadd.f32 %v10451_v4, %v3679_v12 }
 0xf42   :  { %v3661_v55 = vpop.xlane.xlu1 %3660 }
 0xf43   :  { %v3728_v15 = vmax.f32 %v3696_v0, %v3712_v54  ;;  %v3711_v28 = vadd.f32 %v10451_v4, %v3661_v55  ;;  %v3731_v27 = vmax.f32 %v3699_v56, %v3715_v21 }
 0xf44   :  { %v3610_v12 = vpop.xlane.xlu0 %3609 }
 0xf45   :  { %v3744_v61 = vsub.f32 %v3696_v0, %v3728_v15  ;;  %v3792_v26 = vsub.f32 %v3712_v54, %v3728_v15  ;;  %v3727_v35 = vmax.f32 %v3695_v13, %v3711_v28  ;;  %v3769_v15 = vmul.f32 1.442695, %v3745_v53 }
 0xf46   :  { %v3748_v0 = vsub.f32 %v3700_v37, %v3732_v50  ;;  %v3817_v54 = vmul.f32 1.442695, %v3793_v9  ;;  %v10471_v6 = vpop.xlane.xlu1 %3606  ;;  %v3747_v42 = vsub.f32 %v3699_v56, %v3731_v27  ;;  %v3795_v43 = vsub.f32 %v3715_v21, %v3731_v27 }
 0xf47   :  { %v3743_v62 = vsub.f32 %v3695_v13, %v3727_v35  ;;  %v3767_v39 = vmul.f32 1.442695, %v3744_v61  ;;  %v3815_v55 = vmul.f32 1.442695, %v3792_v26  ;;  %v3791_v19 = vsub.f32 %v3711_v28, %v3727_v35 }
 0xf48   :  { %v3734_v13 = vmax.f32 %v3702_v57, %v3718_v16  ;;  %v3775_v28 = vmul.f32 1.442695, %v3748_v0  ;;  %v3720_v26 = vadd.f32 %v10451_v4, %v3688_v25  ;;  %v3733_v50 = vmax.f32 %v3701_v48, %v3717_v5 }
 0xf49   :  { %v3765_v32 = vmul.f32 1.442695, %v3743_v62  ;;  %8158 = vpow2.f32 %v3767_v39  ;;  %v3813_v61 = vmul.f32 1.442695, %v3791_v19  ;;  %v3704_v62 = vadd.f32 %v10451_v4, %v10447_v31 }
 0xf4a   :  { %8160 = vpow2.f32 %v3815_v55  ;;  %v3750_v9 = vsub.f32 %v3702_v57, %v3734_v13  ;;  %v3798_v41 = vsub.f32 %v3718_v16, %v3734_v13  ;;  %v3773_v38 = vmul.f32 1.442695, %v3747_v42  ;;  %v3655_v53 = vpop.xlane.xlu1 %3654  ;;  %v3658_v16 = vpop.xlane.xlu0 %3657 }
 0xf4b   :  { %8162 = vpow2.f32 %v3769_v15  ;;  %v3736_v23 = vmax.f32 %v3704_v62, %v3720_v26  ;;  %v3821_v37 = vmul.f32 1.442695, %v3795_v43  ;;  %v3749_v35 = vsub.f32 %v3701_v48, %v3733_v50  ;;  %v10480_v57 = vpop.eup %8154 }
 0xf4c   :  { %8164 = vpow2.f32 %v3765_v32  ;;  %v3779_v25 = vmul.f32 1.442695, %v3750_v9  ;;  %v3797_v8 = vsub.f32 %v3717_v5, %v3733_v50  ;;  %v3719_v21 = vadd.f32 %v10451_v4, %v10455_v33  ;;  %v10482_v19 = vpop.eup %8156 }
 0xf4d   :  { %8166 = vpow2.f32 %v3817_v54  ;;  %v3827_v56 = vmul.f32 1.442695, %v3798_v41  ;;  %v3703_v31 = vadd.f32 %v10451_v4, %v10449_v18  ;;  %v3752_v39 = vsub.f32 %v3704_v62, %v3736_v23 }
 0xf4e   :  { %8168 = vpow2.f32 %v3813_v61  ;;  %v3777_v55 = vmul.f32 1.442695, %v3749_v35  ;;  %v3825_v15 = vmul.f32 1.442695, %v3797_v8  ;;  %v3800_v0 = vsub.f32 %v3720_v26, %v3736_v23  ;;  %v3601_v33 = vpop.xlane.xlu1 %3600  ;;  %v3604_v42 = vpop.xlane.xlu0 %3603 }
 0xf4f   :  { %8170 = vpow2.f32 %v3775_v28  ;;  %v3735_v27 = vmax.f32 %v3703_v31, %v3719_v21  ;;  %v3783_v18 = vmul.f32 1.442695, %v3752_v39  ;;  %v3842_v54 = vadd.f32 %v10482_v19, %v10480_v57 }
 0xf50   :  { %8172 = vpow2.f32 %v3823_v17  ;;  %v3831_v61 = vmul.f32 1.442695, %v3800_v0  ;;  %v3709_v50 = vadd.f32 %v10451_v4, %v3655_v53  ;;  %v3694_v39 = vadd.f32 %v10451_v4, %v3610_v12 }
 0xf51   :  { %8174 = vpow2.f32 %v3773_v38  ;;  %v3751_v28 = vsub.f32 %v3703_v31, %v3735_v27  ;;  %v3799_v17 = vsub.f32 %v3719_v21, %v3735_v27  ;;  %v3692_v34 = vadd.f32 %v10451_v4, %v3604_v42 }
 0xf52   :  { %8176 = vpow2.f32 %v3821_v37  ;;  %v3649_v41 = vpop.xlane.xlu1 %3648  ;;  %v3693_v37 = vadd.f32 %v10451_v4, %v10471_v6  ;;  %v3652_v21 = vpop.xlane.xlu0 %3651 }
 0xf53   :  { %8178 = vpow2.f32 %v3779_v25  ;;  %v3781_v23 = vmul.f32 1.442695, %v3751_v28  ;;  %v3829_v35 = vmul.f32 1.442695, %v3799_v17  ;;  %v3710_v25 = vadd.f32 %v10451_v4, %v3658_v16 }
 0xf54   :  { %8180 = vpow2.f32 %v3827_v56  ;;  %v3725_v8 = vmax.f32 %v3693_v37, %v3709_v50 }
 0xf55   :  { %8182 = vpow2.f32 %v3777_v55 }
 0xf56   :  { %v10484_v20 = vpop.eup %8158  ;;  %8184 = vpow2.f32 %v3825_v15  ;;  %v3726_v15 = vmax.f32 %v3694_v39, %v3710_v25  ;;  %v3595_v16 = vpop.xlane.xlu1 %3594  ;;  %v3741_v27 = vsub.f32 %v3693_v37, %v3725_v8  ;;  %v3708_v37 = vadd.f32 %v10451_v4, %v3652_v21 }
 0xf57   :  { %v10486_v5 = vpop.eup %8160  ;;  %v3598_v28 = vpop.xlane.xlu0 %3597 }
 0xf58   :  { %v10488_v32 = vpop.eup %8162  ;;  %v3840_v13 = vadd.f32 %v10486_v5, %v10484_v20 }
 0xf59   :  { %v10494_v48 = vpop.eup %8164 }
 0xf5a   :  { %v10496_v26 = vpop.eup %8166  ;;  %8186 = vrcp.f32 %v3840_v13 }
 0xf5b   :  { %v10498_v43 = vpop.eup %8168  ;;  %8188 = vpow2.f32 %v3783_v18  ;;  %v3841_v53 = vadd.f32 %v10496_v26, %v10488_v32  ;;  %v3707_v18 = vadd.f32 %v10451_v4, %v3649_v41  ;;  %v3790_v41 = vsub.f32 %v3710_v25, %v3726_v15  ;;  %v3646_v46 = vpop.xlane.xlu0 %3645 }
 0xf5c   :  { %v10501_v62 = vpop.eup %8170  ;;  %8190 = vrcp.f32 %v3842_v54  ;;  %v3839_v9 = vadd.f32 %v10498_v43, %v10494_v48  ;;  %v3789_v54 = vsub.f32 %v3709_v50, %v3725_v8  ;;  %v3761_v50 = vmul.f32 1.442695, %v3741_v27 }
 0xf5d   :  { %v10505_v38 = vpop.eup %8172  ;;  %8192 = vpow2.f32 %v3831_v61  ;;  %v3691_v61 = vadd.f32 %v10451_v4, %v3601_v33  ;;  %v3643_v33 = vpop.xlane.xlu1 %3642 }
 0xf5e   :  { %8194 = vrcp.f32 %v3839_v9  ;;  %v10512_v56 = vpop.eup %8174  ;;  %v3844_v31 = vadd.f32 %v10505_v38, %v10501_v62 }
 0xf5f   :  { %v10517_v55 = vpop.eup %8176  ;;  %8196 = vpow2.f32 %v3781_v23  ;;  %v3742_v23 = vsub.f32 %v3694_v39, %v3726_v15  ;;  %v3724_v39 = vmax.f32 %v3692_v34, %v3708_v37  ;;  %v3811_v15 = vmul.f32 1.442695, %v3790_v41 }
 0xf60   :  { %v10519_v6 = vpop.eup %8178  ;;  %8198 = vpow2.f32 %v3829_v35  ;;  %v3843_v12 = vadd.f32 %v10517_v55, %v10512_v56  ;;  %v3706_v41 = vadd.f32 %v10451_v4, %v3646_v46 }
 0xf61   :  { %v10521_v0 = vpop.eup %8180  ;;  %8200 = vrcp.f32 %v3841_v53  ;;  %v3723_v53 = vmax.f32 %v3691_v61, %v3707_v18  ;;  %v3763_v21 = vmul.f32 1.442695, %v3742_v23 }
 0xf62   :  { %8202 = vrcp.f32 %v3844_v31  ;;  %v10524_v13 = vpop.eup %8182  ;;  %v3846_v9 = vadd.f32 %v10521_v0, %v10519_v6  ;;  %v3809_v31 = vmul.f32 1.442695, %v3789_v54  ;;  %v3705_v54 = vadd.f32 %v10451_v4, %v3643_v33 }
 0xf63   :  { %v10529_v17 = vpop.eup %8184  ;;  %8204 = vrcp.f32 %v3843_v12  ;;  %v3739_v27 = vsub.f32 %v3691_v61, %v3723_v53  ;;  %v3787_v42 = vsub.f32 %v3707_v18, %v3723_v53  ;;  %v3740_v61 = vsub.f32 %v3692_v34, %v3724_v39 }
 0xf64   :  { %8206 = vrcp.f32 %v3846_v9  ;;  %v3845_v12 = vadd.f32 %v10529_v17, %v10524_v13  ;;  %v3689_v9 = vadd.f32 %v10451_v4, %v3595_v16  ;;  %v3690_v16 = vadd.f32 %v10451_v4, %v3598_v28 }
 0xf65   :  { %8208 = vpow2.f32 %v3761_v50  ;;  %v3759_v34 = vmul.f32 1.442695, %v3740_v61 }
 0xf66   :  { %8210 = vpow2.f32 %v3809_v31  ;;  %v3721_v50 = vmax.f32 %v3689_v9, %v3705_v54  ;;  %v3805_v31 = vmul.f32 1.442695, %v3787_v42 }
 0xf67   :  { %v10534_v35 = vpop.eup %8186  ;;  %8212 = vpow2.f32 %v3763_v21 }
 0xf68   :  { %v10536_v8 = vpop.eup %8188  ;;  %v3888_v29 = vmul.f32 %v10534_v35, %v10484_v20  ;;  %8214 = vpow2.f32 %v3811_v15  ;;  %v3785_v15 = vsub.f32 %v3705_v54, %v3721_v50 }
 0xf69   :  { %v8191_v40 = vpop.eup %8190  ;;  %8216 = vrcp.f32 %v3845_v12 }
 0xf6a   :  { %v10541_v24 = vpop.eup %8192  ;;  %3934 = vperm.xlu1 %7759, %v3888_v29   ;;  %v3890_v20 = vmul.f32 %v8191_v40, %v10480_v57  ;;  %v3788_v57 = vsub.f32 %v3708_v37, %v3724_v39  ;;  %v4002_v59 = vmul.f32 %v8191_v40, %v10482_v19  ;;  %v3737_v39 = vsub.f32 %v3689_v9, %v3721_v50 }
 0xf6b   :  { %v8195_v25 = vpop.eup %8194  ;;  %v3848_v29 = vadd.f32 %v10541_v24, %v10536_v8  ;;  %v3801_v42 = vmul.f32 1.442695, %v3785_v15 }
 0xf6c   :  { %v3887_v60 = vmul.f32 %v8195_v25, %v10494_v48  ;;  %v10549_v23 = vpop.eup %8196  ;;  %v3757_v48 = vmul.f32 1.442695, %v3739_v27  ;;  %v3999_v33 = vmul.f32 %v8195_v25, %v10498_v43  ;;  %v3807_v37 = vmul.f32 1.442695, %v3788_v57 }
 0xf6d   :  { %v10554_v18 = vpop.eup %8198  ;;  %8218 = vrcp.f32 %v3848_v29  ;;  %v3753_v25 = vmul.f32 1.442695, %v3737_v39 }
 0xf6e   :  { %3929 = vperm.xlu0 %7758, %v3887_v60   ;;  %3944 = vperm.xlu1 %7759, %v3890_v20   ;;  %v8201_v53 = vpop.eup %8200  ;;  %v3722_v60 = vmax.f32 %v3690_v16, %v3706_v41  ;;  %v3847_v46 = vadd.f32 %v10554_v18, %v10549_v23  ;;  %8220 = vpow2.f32 %v3757_v48 }
 0xf6f   :  { %v8203_v21 = vpop.eup %8202  ;;  %8222 = vpow2.f32 %v3805_v31  ;;  %v3889_v4 = vmul.f32 %v8201_v53, %v10488_v32  ;;  %v4001_v20 = vmul.f32 %v8201_v53, %v10496_v26 }
 0xf70   :  { %v3892_v43 = vmul.f32 %v8203_v21, %v10501_v62  ;;  %v8205_v40 = vpop.eup %8204  ;;  %8224 = vpow2.f32 %v3759_v34  ;;  %v3738_v19 = vsub.f32 %v3690_v16, %v3722_v60  ;;  %v4004_v54 = vmul.f32 %v8203_v21, %v10505_v38 }
 0xf71   :  { %v8207_v28 = vpop.eup %8206  ;;  %8226 = vrcp.f32 %v3847_v46  ;;  %v4003_v53 = vmul.f32 %v8205_v40, %v10517_v55 }
 0xf72   :  { %4041 = vperm.xlu0 %7758, %v3999_v33   ;;  %4056 = vperm.xlu1 %7759, %v4002_v59   ;;  %v3786_v59 = vsub.f32 %v3706_v41, %v3722_v60  ;;  %v8209_v27 = vpop.eup %8208  ;;  %8228 = vpow2.f32 %v3807_v37  ;;  %v3755_v32 = vmul.f32 1.442695, %v3738_v19  ;;  %v3891_v41 = vmul.f32 %v8205_v40, %v10512_v56 }
 0xf73   :  { %v8211_v12 = vpop.eup %8210  ;;  %8230 = vpow2.f32 %v3753_v25  ;;  %v3894_v57 = vmul.f32 %v8207_v28, %v10519_v6  ;;  %v4006_v31 = vmul.f32 %v8207_v28, %v10521_v0 }
 0xf74   :  { %v8213_v62 = vpop.eup %8212  ;;  %v3803_v9 = vmul.f32 1.442695, %v3786_v59  ;;  %v3837_v61 = vadd.f32 %v8211_v12, %v8209_v27  ;;  %8232 = vpow2.f32 %v3801_v42 }
 0xf75   :  { %v8215_v29 = vpop.eup %8214  ;;  %8234 = vpow2.f32 %v3755_v32 }
 0xf76   :  { %3939 = vperm.xlu0 %7758, %v3889_v4   ;;  %3954 = vperm.xlu1 %7759, %v3892_v43   ;;  %v8217_v48 = vpop.eup %8216  ;;  %8236 = vpow2.f32 %v3803_v9  ;;  %v3838_v50 = vadd.f32 %v8215_v29, %v8213_v62 }
 0xf77   :  { %8238 = vrcp.f32 %v3837_v61  ;;  %v3893_v21 = vmul.f32 %v8217_v48, %v10524_v13  ;;  %v4005_v55 = vmul.f32 %v8217_v48, %v10529_v17  ;;  %v4000_v17 = vmul.f32 %v10534_v35, %v10486_v5  ;;  %v10598_v48 = vld [vmem:[%s11672_s21 + $0x98] sm:$0xff]  }
 0xf78   :  { %8240 = vrcp.f32 %v3838_v50  ;;  %v10616_v50 = vld [vmem:[%s11672_s21 + $0xb0] sm:$0xff]  }
 0xf7a   :  { %4051 = vperm.xlu0 %7758, %v4001_v20   ;;  %4066 = vperm.xlu1 %7759, %v4004_v54   ;;  %v8219_v26 = vpop.eup %8218 }
 0xf7b   :  { %v8221_v38 = vpop.eup %8220  ;;  %v4008_v34 = vmul.f32 %v8219_v26, %v10541_v24  ;;  %v3896_v13 = vmul.f32 %v8219_v26, %v10536_v8  ;;  %v10604_v26 = vld [vmem:[%s11672_s21 + $0xa0] sm:$0xff]  }
 0xf7c   :  { %v8223_v16 = vpop.eup %8222 }
 0xf7d   :  { %v8225_v33 = vpop.eup %8224  ;;  %v3835_v6 = vadd.f32 %v8223_v16, %v8221_v38 }
 0xf7e   :  { %3949 = vperm.xlu0 %7758, %v3891_v41   ;;  %3964 = vperm.xlu1 %7759, %v3894_v57   ;;  %v8227_v56 = vpop.eup %8226  ;;  %v10586_v41 = vld [vmem:[%s11672_s21 + $0x88] sm:$0xff]   ;;  %v10592_v57 = vld [vmem:[%s11672_s21 + $0x90] sm:$0xff]  }
 0xf7f   :  { %v8229_v60 = vpop.eup %8228  ;;  %8242 = vrcp.f32 %v3835_v6  ;;  %v3895_v0 = vmul.f32 %v8227_v56, %v10549_v23  ;;  %v4007_v24 = vmul.f32 %v8227_v56, %v10554_v18 }
 0xf80   :  { %v8231_v46 = vpop.eup %8230  ;;  %v3836_v37 = vadd.f32 %v8229_v60, %v8225_v33 }
 0xf81   :  { %v8233_v39 = vpop.eup %8232 }
 0xf82   :  { %4061 = vperm.xlu0 %7758, %v4003_v53   ;;  %4076 = vperm.xlu1 %7759, %v4006_v31   ;;  %v8235_v15 = vpop.eup %8234  ;;  %8244 = vrcp.f32 %v3836_v37  ;;  %v3833_v43 = vadd.f32 %v8233_v39, %v8231_v46  ;;  %v10622_v53 = vld [vmem:[%s11672_s21 + $0xb8] sm:$0xff]  }
 0xf83   :  { %v8237_v4 = vpop.eup %8236 }
 0xf84   :  { %v8239_v40 = vpop.eup %8238  ;;  %v3834_v19 = vadd.f32 %v8237_v4, %v8235_v15  ;;  %8246 = vrcp.f32 %v3833_v43 }
 0xf85   :  { %v3885_v28 = vmul.f32 %v8239_v40, %v8209_v27  ;;  %v8241_v23 = vpop.eup %8240  ;;  %v3997_v59 = vmul.f32 %v8239_v40, %v8211_v12 }
 0xf86   :  { %3959 = vperm.xlu0 %7758, %v3893_v21   ;;  %4086 = vperm.xlu1 %7759, %v4008_v34   ;;  %8248 = vrcp.f32 %v3834_v19  ;;  %v3886_v25 = vmul.f32 %v8241_v23, %v8213_v62  ;;  %v3998_v18 = vmul.f32 %v8241_v23, %v8215_v29  ;;  %v10580_v29 = vld [vmem:[%s11672_s21 + $0x80] sm:$0xff]  }
 0xf8a   :  { %4071 = vperm.xlu0 %7758, %v4005_v55   ;;  %3969 = vperm.xlu1 %7759, %v3895_v0  }
 0xf8c   :  { %v8243_v42 = vpop.eup %8242 }
 0xf8d   :  { %v3883_v8 = vmul.f32 %v8243_v42, %v8221_v38  ;;  %v3995_v54 = vmul.f32 %v8243_v42, %v8223_v16  ;;  %v10610_v38 = vld [vmem:[%s11672_s21 + $0xa8] sm:$0xff]  }
 0xf8e   :  { %3974 = vperm.xlu0 %7758, %v3896_v13   ;;  %4081 = vperm.xlu1 %7759, %v4007_v24  }
 0xf8f   :  { %v8245_v20 = vpop.eup %8244 }
 0xf90   :  { %v3884_v32 = vmul.f32 %v8245_v20, %v8225_v33  ;;  %v3996_v35 = vmul.f32 %v8245_v20, %v8229_v60 }
 0xf91   :  { %v8247_v27 = vpop.eup %8246 }
 0xf92   :  { %3919 = vperm.xlu0 %7758, %v3885_v28   ;;  %4046 = vperm.xlu1 %7759, %v4000_v17   ;;  %v3881_v5 = vmul.f32 %v8247_v27, %v8231_v46  ;;  %v3993_v12 = vmul.f32 %v8247_v27, %v8233_v39 }
 0xf93   :  { %v8249_v9 = vpop.eup %8248 }
 0xf94   :  { %v3882_v62 = vmul.f32 %v8249_v9, %v8235_v15  ;;  %v3994_v61 = vmul.f32 %v8249_v9, %v8237_v4 }
 0xf96   :  { %4031 = vperm.xlu0 %7758, %v3997_v59   ;;  %3924 = vperm.xlu1 %7759, %v3886_v25  }
 0xf9a   :  { %3909 = vperm.xlu0 %7758, %v3883_v8   ;;  %4036 = vperm.xlu1 %7759, %v3998_v18  }
 0xf9e   :  { %4021 = vperm.xlu0 %7758, %v3995_v54   ;;  %3914 = vperm.xlu1 %7759, %v3884_v32  }
 0xfa2   :  { %3899 = vperm.xlu0 %7758, %v3881_v5   ;;  %4026 = vperm.xlu1 %7759, %v3996_v35  }
 0xfa6   :  { %4011 = vperm.xlu0 %7758, %v3993_v12   ;;  %3904 = vperm.xlu1 %7759, %v3882_v62  }
 0xfaa   :  { %4016 = vperm.xlu1 %7759, %v3994_v61  }
 0xfc4   :  { %4226 = vxpose.xlu0.c.b16.start [1/8] %v10580_v29, 128 }
 0xfc8   :  { %4227 = vxpose.xlu0.c.b16.cont [2/8] %v10586_v41, 128 }
 0xfcc   :  { %4228 = vxpose.xlu0.c.b16.cont [3/8] %v10592_v57, 128 }
 0xfd0   :  { %4229 = vxpose.xlu0.c.b16.cont [4/8] %v10598_v48, 128 }
 0xfd4   :  { %4230 = vxpose.xlu0.c.b16.cont [5/8] %v10604_v26, 128 }
 0xfd8   :  { %4231 = vxpose.xlu0.c.b16.cont [6/8] %v10610_v38, 128 }
 0xfdc   :  { %4232 = vxpose.xlu0.c.b16.cont [7/8] %v10616_v50, 128 }
 0xfe0   :  { %4233 = vxpose.xlu0.c.b16.end [8/8] %v10622_v53, 128 }
 0xfe5   :  { %v3935_v31 = vpop.permute.xlu1 %3934 }
 0xfe9   :  { %v3930_v16 = vpop.permute.xlu0 %3929  ;;  %v3945_v33 = vpop.permute.xlu1 %3944 }
 0xfed   :  { %v4042_v56 = vpop.permute.xlu0 %4041  ;;  %v4057_v6 = vpop.permute.xlu1 %4056 }
 0xff1   :  { %v3940_v21 = vpop.permute.xlu0 %3939  ;;  %v3955_v34 = vpop.permute.xlu1 %3954 }
 0xff2   :  { %v3985_v9 = vmul.f32 %v3940_v21, %v9963_v1 }
 0xff5   :  { %v4052_v60 = vpop.permute.xlu0 %4051  ;;  %v4067_v46 = vpop.permute.xlu1 %4066 }
 0xff6   :  { %v4100_v59 = vmul.f32 %v10339_v7, %v4067_v46  ;;  %v3988_v7 = vmul.f32 %v3955_v34, %v9955_v30  ;;  %v3986_v34 = vmul.f32 %v3945_v33, %v9970_v63 }
 0xff8   :  { %v10651_v62 = vadd.f32 %v4100_v59, %v3988_v7 }
 0xff9   :  { %v3950_v37 = vpop.permute.xlu0 %3949  ;;  %v3965_v55 = vpop.permute.xlu1 %3964 }
 0xffa   :  { %v3990_v28 = vmul.f32 %v3965_v55, %v9941_v58  ;;  %v3987_v25 = vmul.f32 %v3950_v37, %v9948_v45  ;;  %11731 = vst [vmem:[#allocation68_spill] sm:$0xff] %v10651_v62 }
 0xffd   :  { %v4062_v0 = vpop.permute.xlu0 %4061  ;;  %v4077_v39 = vpop.permute.xlu1 %4076 }
 0xffe   :  { %v4102_v43 = vmul.f32 %v10345_v36, %v4077_v39  ;;  %v4099_v17 = vmul.f32 %v4062_v0, %v10341_v47  ;;  %v4097_v47 = vmul.f32 %v4052_v60, %v10333_v51  ;;  %v3984_v0 = vmul.f32 %v3935_v31, %v9977_v49  ;;  %v11733_v39 = vld [vmem:[#allocation62_spill] sm:$0xff] }
0x1000   :  { %v10634_v42 = vadd.f32 %v4102_v43, %v3990_v28  ;;  %v10641_v32 = vadd.f32 %v4099_v17, %v3987_v25  ;;  %v10657_v60 = vadd.f32 %v4097_v47, %v3985_v9  ;;  %v11738_v25 = vld [vmem:[#allocation61_spill] sm:$0xff] }
0x1001   :  { %v3960_v15 = vpop.permute.xlu0 %3959  ;;  %v4087_v4 = vpop.permute.xlu1 %4086 }
0x1002   :  { %v3989_v40 = vmul.f32 %v3960_v15, %v9935_v22  ;;  %11727 = vst [vmem:[#allocation64_spill] sm:$0xff] %v10634_v42  ;;  %v4104_v18 = vmul.f32 %v10353_v10, %v4087_v4  ;;  %11728 = vst [vmem:[#allocation65_spill] sm:$0xff] %v10641_v32  ;;  %v4098_v10 = vmul.f32 %v10329_v3, %v4057_v6  ;;  %v4151_v61 = vmax.f32 %v10634_v42, 0.0  ;;  %v10661_v6 = vld [vmem:[#allocation9] ss:$0 sm:$0xff] }
0x1003   :  { %11732 = vst [vmem:[#allocation69_spill] sm:$0xff] %v10657_v60  ;;  %v4148_v46 = vmax.f32 %v10641_v32, 0.0  ;;  %v4095_v15 = vmul.f32 %v4042_v56, %v11733_v39  ;;  %v4146_v31 = vmax.f32 %v10657_v60, 0.0 }
0x1004   :  { %v10668_v43 = vadd.f32 %v4098_v10, %v3986_v34 }
0x1005   :  { %v4072_v13 = vpop.permute.xlu0 %4071  ;;  %v3970_v24 = vpop.permute.xlu1 %3969  ;;  %v4164_v59 = vadd.f32 %v10661_v6, %v4148_v46 }
0x1006   :  { %v4101_v19 = vmul.f32 %v4072_v13, %v10349_v52  ;;  %v3991_v20 = vmul.f32 %v3970_v24, %v9938_v14  ;;  %11734 = vst [vmem:[#allocation62_spill] sm:$0xff] %v10668_v43  ;;  %v4167_v24 = vadd.f32 %v10661_v6, %v4151_v61  ;;  %v4147_v7 = vmax.f32 %v10668_v43, 0.0 }
0x1008   :  { %v10630_v23 = vadd.f32 %v4101_v19, %v3989_v40  ;;  %v11735_v40 = vld [vmem:[#allocation55_spill] sm:$0xff] }
0x1009   :  { %v3975_v8 = vpop.permute.xlu0 %3974  ;;  %v4082_v36 = vpop.permute.xlu1 %4081  ;;  %v3983_v19 = vmul.f32 %v3930_v16, %v11735_v40 }
0x100a   :  { %11726 = vst [vmem:[#allocation63_spill] sm:$0xff] %v10630_v23  ;;  %v3992_v52 = vmul.f32 %v3975_v8, %v9950_v11  ;;  %v4103_v54 = vmul.f32 %v4082_v36, %v10357_v2  ;;  %v4150_v35 = vmax.f32 %v10630_v23, 0.0 }
0x100b   :  { %v10677_v56 = vadd.f32 %v4095_v15, %v3983_v19  ;;  %v11747_v19 = vld [vmem:[#allocation52_spill] sm:$0xff] }
0x100c   :  { %v10644_v27 = vadd.f32 %v4104_v18, %v3992_v52  ;;  %v10646_v5 = vadd.f32 %v4103_v54, %v3991_v20  ;;  %v4166_v55 = vadd.f32 %v10661_v6, %v4150_v35  ;;  %v11739_v20 = vld [vmem:[#allocation53_spill] sm:$0xff]  ;;  %v11740_v54 = vld [vmem:[#allocation60_spill] sm:$0xff]  ;;  %v11741_v35 = vld [vmem:[#allocation54_spill] sm:$0xff] }
0x100d   :  { %v3920_v12 = vpop.permute.xlu0 %3919  ;;  %v4047_v11 = vpop.permute.xlu1 %4046  ;;  %11737 = vst [vmem:[#allocation70_spill] sm:$0xff] %v10677_v56 }
0x100e   :  { %11729 = vst [vmem:[#allocation66_spill] sm:$0xff] %v10644_v27  ;;  %11730 = vst [vmem:[#allocation67_spill] sm:$0xff] %v10646_v5  ;;  %v4152_v51 = vmax.f32 %v10646_v5, 0.0  ;;  %v4153_v2 = vmax.f32 %v10644_v27, 0.0  ;;  %v4096_v3 = vmul.f32 %v10321_v44, %v4047_v11  ;;  %v4149_v44 = vmax.f32 %v10651_v62, 0.0 }
0x100f   :  { %v4176_v17 = vpack.c.bf16 %v4167_v24, %v4166_v55  ;;  %v3981_v10 = vmul.f32 %v3920_v12, %v11741_v35  ;;  %v4144_v55 = vmax.f32 %v10677_v56, 0.0  ;;  %v11745_v12 = vld [vmem:[#allocation51_spill] sm:$0xff] }
0x1010   :  { %v4168_v21 = vadd.f32 %v10661_v6, %v4152_v51  ;;  %v4169_v37 = vadd.f32 %v10661_v6, %v4153_v2  ;;  %v10673_v28 = vadd.f32 %v4096_v3, %v3984_v0  ;;  %v4165_v16 = vadd.f32 %v10661_v6, %v4149_v44  ;;  %v11744_v3 = vld [vmem:[#allocation59_spill] sm:$0xff] }
0x1011   :  { %v4032_v4 = vpop.permute.xlu0 %4031  ;;  %v3925_v33 = vpop.permute.xlu1 %3924  ;;  %v4162_v51 = vadd.f32 %v10661_v6, %v4146_v31 }
0x1012   :  { %v4177_v13 = vpack.c.bf16 %v4169_v37, %v4168_v21  ;;  %11736 = vst [vmem:[#allocation55_spill] sm:$0xff] %v10673_v28  ;;  %v4093_v8 = vmul.f32 %v4032_v4, %v11738_v25  ;;  %v3982_v52 = vmul.f32 %v3925_v33, %v11739_v20  ;;  %v4175_v11 = vpack.c.bf16 %v4165_v16, %v4164_v59  ;;  %v11748_v59 = vld [vmem:[#allocation58_spill] sm:$0xff] }
0x1013   :  { %v4145_v2 = vmax.f32 %v10673_v28, 0.0  ;;  %v4163_v37 = vadd.f32 %v10661_v6, %v4147_v7  ;;  %v4160_v25 = vadd.f32 %v10661_v6, %v4144_v55  ;;  %v11750_v16 = vld [vmem:[#allocation50_spill] sm:$0xff] }
0x1014   :  { %7521 = vmatprep.subr.bf16.mxu0 %v4177_v13  ;;  %v10689_v61 = vadd.f32 %v4093_v8, %v3981_v10  ;;  %v11751_v10 = vld [vmem:[#allocation57_spill] sm:$0xff] }
0x1015   :  { %v3910_v36 = vpop.permute.xlu0 %3909  ;;  %v4037_v18 = vpop.permute.xlu1 %4036  ;;  %7522 = vmatpush3.bf16.msra.mxu0 %v4177_v13  ;;  %v4174_v39 = vpack.c.bf16 %v4163_v37, %v4162_v51  ;;  %v4161_v15 = vadd.f32 %v10661_v6, %v4145_v2  ;;  %v11753_v37 = vld [vmem:[#allocation49_spill] sm:$0xff] }
0x1016   :  { %v4094_v47 = vmul.f32 %v11740_v54, %v4037_v18  ;;  %7523 = vmatprep.subr.bf16.mxu0 %v4176_v17  ;;  %11743 = vst [vmem:[#allocation53_spill] sm:$0xff] %v10689_v61  ;;  %v3979_v0 = vmul.f32 %v3910_v36, %v11745_v12  ;;  %v4142_v24 = vmax.f32 %v10689_v61, 0.0 }
0x1017   :  { %v4173_v36 = vpack.c.bf16 %v4161_v15, %v4160_v25 }
0x1018   :  { %v10685_v9 = vadd.f32 %v4094_v47, %v3982_v52  ;;  %v4158_v47 = vadd.f32 %v10661_v6, %v4142_v24 }
0x1019   :  { %v4022_v34 = vpop.permute.xlu0 %4021  ;;  %v3915_v46 = vpop.permute.xlu1 %3914  ;;  %7524 = vmatpush3.bf16.msra.mxu0 %v4176_v17 }
0x101a   :  { %11742 = vst [vmem:[#allocation61_spill] sm:$0xff] %v10685_v9  ;;  %v4091_v21 = vmul.f32 %v4022_v34, %v11744_v3  ;;  %7525 = vmatprep.subr.bf16.mxu0 %v4175_v11  ;;  %v4143_v4 = vmax.f32 %v10685_v9, 0.0  ;;  %v3980_v17 = vmul.f32 %v3915_v46, %v11747_v19 }
0x101c   :  { %v10698_v44 = vadd.f32 %v4091_v21, %v3979_v0  ;;  %v4159_v18 = vadd.f32 %v10661_v6, %v4143_v4  ;;  %v11754_v0 = vld [vmem:[#allocation56_spill] sm:$0xff] }
0x101d   :  { %v3900_v33 = vpop.permute.xlu0 %3899  ;;  %v4027_v13 = vpop.permute.xlu1 %4026  ;;  %7526 = vmatpush3.bf16.msra.mxu0 %v4175_v11 }
0x101e   :  { %11746 = vst [vmem:[#allocation60_spill] sm:$0xff] %v10698_v44  ;;  %v4092_v31 = vmul.f32 %v11748_v59, %v4027_v13  ;;  %7527 = vmatprep.subr.bf16.mxu0 %v4174_v39  ;;  %v3977_v7 = vmul.f32 %v3900_v33, %v11750_v16  ;;  %v4140_v51 = vmax.f32 %v10698_v44, 0.0  ;;  %v4172_v46 = vpack.c.bf16 %v4159_v18, %v4158_v47 }
0x1020   :  { %v10703_v8 = vadd.f32 %v4092_v31, %v3980_v17  ;;  %v4156_v15 = vadd.f32 %v10661_v6, %v4140_v51 }
0x1021   :  { %v4012_v52 = vpop.permute.xlu0 %4011  ;;  %v3905_v54 = vpop.permute.xlu1 %3904  ;;  %7528 = vmatpush3.bf16.msra.mxu0 %v4174_v39 }
0x1022   :  { %11749 = vst [vmem:[#allocation54_spill] sm:$0xff] %v10703_v8  ;;  %v4089_v11 = vmul.f32 %v4012_v52, %v11751_v10  ;;  %7529 = vmatprep.subr.bf16.mxu0 %v4173_v36  ;;  %v4141_v2 = vmax.f32 %v10703_v8, 0.0  ;;  %v3978_v55 = vmul.f32 %v3905_v54, %v11753_v37 }
0x1024   :  { %v10711_v34 = vadd.f32 %v4089_v11, %v3977_v7  ;;  %v4157_v3 = vadd.f32 %v10661_v6, %v4141_v2 }
0x1025   :  { %v4017_v21 = vpop.permute.xlu1 %4016  ;;  %7530 = vmatpush3.bf16.msra.mxu0 %v4173_v36 }
0x1026   :  { %11752 = vst [vmem:[#allocation59_spill] sm:$0xff] %v10711_v34  ;;  %v4090_v39 = vmul.f32 %v11754_v0, %v4017_v21  ;;  %7531 = vmatprep.subr.bf16.mxu0 %v4172_v46  ;;  %v4234_v4 = vpop.trf.xlu0  ;;  %v4171_v13 = vpack.c.bf16 %v4157_v3, %v4156_v15  ;;  %v4138_v24 = vmax.f32 %v10711_v34, 0.0 }
0x1027   :  { %7537 = vmatprep.mubr.bf16.mxu0 %v4234_v4 }
0x1028   :  { %v10717_v33 = vadd.f32 %v4090_v39, %v3978_v55  ;;  %v4154_v31 = vadd.f32 %v10661_v6, %v4138_v24 }
0x1029   :  { %7532 = vmatpush3.bf16.msra.mxu0 %v4172_v46 }
0x102a   :  { %11755 = vst [vmem:[#allocation51_spill] sm:$0xff] %v10717_v33  ;;  %7533 = vmatprep.subr.bf16.mxu0 %v4171_v13  ;;  %v4139_v17 = vmax.f32 %v10717_v33, 0.0  ;;  %v4235_v59 = vpop.trf.xlu0 }
0x102c   :  { %v4155_v25 = vadd.f32 %v10661_v6, %v4139_v17 }
0x102d   :  { %7534 = vmatpush3.bf16.msra.mxu0 %v4171_v13 }
0x102e   :  { %v4170_v36 = vpack.c.bf16 %v4155_v25, %v4154_v31  ;;  %v4236_v18 = vpop.trf.xlu0 }
0x1030   :  { %7535 = vmatprep.subr.bf16.mxu0 %v4170_v36 }
0x1031   :  { %7536 = vmatpush3.bf16.msra.mxu0 %v4170_v36 }
0x1032   :  { %v4237_v52 = vpop.trf.xlu0 }
0x1034   :  { %7538 = vmatmul.mubr.bf16.vlgmr.msra.gmra.mxu0 %v4235_v59 }
0x1035   :  { %7541 = vmatprep.mubr.bf16.mxu0 %v4236_v18 }
0x1036   :  { %v4238_v54 = vpop.trf.xlu0 }
0x103a   :  { %v4239_v47 = vpop.trf.xlu0 }
0x103c   :  { %7542 = vmatmul.mubr.bf16.gmra.mxu0 %v4237_v52 }
0x103d   :  { %7545 = vmatprep.mubr.bf16.mxu0 %v4238_v54 }
0x103e   :  { %v4240_v7 = vpop.trf.xlu0 }
0x1042   :  { %v4241_v10 = vpop.trf.xlu0 }
0x1044   :  { %7546 = vmatmul.mubr.bf16.gmra.mxu0 %v4239_v47 }
0x1045   :  { %7549 = vmatprep.mubr.bf16.mxu0 %v4240_v7  ;;  %v8507_v7 = vld [vmem:[#allocation12 + $0x18] sm:$0xff] }
0x104c   :  { %7550 = vmatmul.mubr.bf16.gmra.mxu0 %v4241_v10  ;;  %v8508_v10 = vld [vmem:[#allocation12 + $0x10] sm:$0xff] }
0x104d   :  { %7569 = vmatprep.mubr.bf16.mxu0 %v10580_v29 }
0x10f4   :  { %v7539_v6 = vpop.f32.mrf.mxu0 }
0x10f6   :  { %v4276_v11 = vpop.f32.mrf.mxu0 }
0x10f8   :  { %v7540_v51 = vpop.f32.mrf.mxu0 }
0x10f9   :  { %v4340_v54 = vpack.c.bf16 %v7540_v51, %v7539_v6  ;;  %v8510_v6 = vld [vmem:[#allocation12] sm:$0xff] }
0x10fa   :  { %v4279_v2 = vpop.f32.mrf.mxu0  ;;  %v11764_v51 = vld [vmem:[#allocation41_spill] sm:$0xff] }
0x10fb   :  { %v4339_v47 = vpack.c.bf16 %v4279_v2, %v4276_v11  ;;  %v11756_v11 = vld [vmem:[#allocation36_spill] sm:$0xff]  ;;  %v11765_v2 = vld [vmem:[#allocation42_spill] sm:$0xff] }
0x10fc   :  { %v7543_v46 = vpop.f32.mrf.mxu0 }
0x10fe   :  { %v4292_v3 = vpop.f32.mrf.mxu0 }
0x1100   :  { %v7544_v21 = vpop.f32.mrf.mxu0 }
0x1101   :  { %v4342_v18 = vpack.c.bf16 %v7544_v21, %v7543_v46  ;;  %v8509_v46 = vld [vmem:[#allocation12 + $0x8] sm:$0xff]  ;;  %v11767_v21 = vld [vmem:[#allocation44_spill] sm:$0xff] }
0x1102   :  { %v4295_v55 = vpop.f32.mrf.mxu0 }
0x1103   :  { %v4341_v52 = vpack.c.bf16 %v4295_v55, %v4292_v3  ;;  %v11766_v3 = vld [vmem:[#allocation43_spill] sm:$0xff]  ;;  %v11768_v55 = vld [vmem:[#allocation45_spill] sm:$0xff] }
0x1104   :  { %v7547_v0 = vpop.f32.mrf.mxu0 }
0x1106   :  { %v4308_v39 = vpop.f32.mrf.mxu0 }
0x1108   :  { %v7548_v15 = vpop.f32.mrf.mxu0 }
0x1109   :  { %v4344_v29 = vpack.c.bf16 %v7548_v15, %v7547_v0  ;;  %v11769_v0 = vld [vmem:[#allocation46_spill] sm:$0xff]  ;;  %v11771_v15 = vld [vmem:[#allocation48_spill] sm:$0xff] }
0x110a   :  { %v4311_v4 = vpop.f32.mrf.mxu0 }
0x110b   :  { %v4343_v36 = vpack.c.bf16 %v4311_v4, %v4308_v39  ;;  %v11770_v39 = vld [vmem:[#allocation47_spill] sm:$0xff] }
0x110c   :  { %v7551_v13 = vpop.f32.mrf.mxu0 }
0x110e   :  { %v4324_v24 = vpop.f32.mrf.mxu0 }
0x1110   :  { %v7552_v17 = vpop.f32.mrf.mxu0 }
0x1111   :  { %v4346_v59 = vpack.c.bf16 %v7552_v17, %v7551_v13 }
0x1112   :  { %v4327_v31 = vpop.f32.mrf.mxu0 }
0x1113   :  { %v4345_v25 = vpack.c.bf16 %v4327_v31, %v4324_v24  ;;  %7553 = vmatprep.subr.bf16.mxu0 %v4346_v59 }
0x1114   :  { %7554 = vmatpush3.bf16.msra.mxu0 %v4346_v59 }
0x1115   :  { %7555 = vmatprep.subr.bf16.mxu0 %v4345_v25 }
0x1118   :  { %7556 = vmatpush3.bf16.msra.mxu0 %v4345_v25 }
0x1119   :  { %7557 = vmatprep.subr.bf16.mxu0 %v4344_v29 }
0x111c   :  { %7558 = vmatpush3.bf16.msra.mxu0 %v4344_v29 }
0x111d   :  { %7559 = vmatprep.subr.bf16.mxu0 %v4343_v36 }
0x1120   :  { %7560 = vmatpush3.bf16.msra.mxu0 %v4343_v36 }
0x1121   :  { %7561 = vmatprep.subr.bf16.mxu0 %v4342_v18 }
0x1124   :  { %7562 = vmatpush3.bf16.msra.mxu0 %v4342_v18 }
0x1125   :  { %7563 = vmatprep.subr.bf16.mxu0 %v4341_v52 }
0x1128   :  { %7564 = vmatpush3.bf16.msra.mxu0 %v4341_v52 }
0x1129   :  { %7565 = vmatprep.subr.bf16.mxu0 %v4340_v54 }
0x112c   :  { %7566 = vmatpush3.bf16.msra.mxu0 %v4340_v54 }
0x112d   :  { %7567 = vmatprep.subr.bf16.mxu0 %v4339_v47 }
0x1130   :  { %7568 = vmatpush3.bf16.msra.mxu0 %v4339_v47 }
0x1131   :  { %7617 = vmatprep.subr.mxu0 %v8507_v7 }
0x1133   :  { %7570 = vmatmul.mubr.bf16.vlgmr.msra.gmra.mxu0 %v10586_v41  ;;  %v11757_v41 = vld [vmem:[#allocation33_spill] sm:$0xff] }
0x1134   :  { %7618 = vmatpush3.msra.mxu0 %v8507_v7  ;;  %7573 = vmatprep.mubr.bf16.mxu0 %v10592_v57  ;;  %v11758_v57 = vld [vmem:[#allocation38_spill] sm:$0xff] }
0x1135   :  { %7619 = vmatprep.subr.mxu0 %v8508_v10 }
0x1136   :  { %7620 = vmatpush3.msra.mxu0 %v8508_v10 }
0x1137   :  { %7621 = vmatprep.subr.mxu0 %v8509_v46 }
0x1138   :  { %7622 = vmatpush3.msra.mxu0 %v8509_v46 }
0x1139   :  { %7623 = vmatprep.subr.mxu0 %v8510_v6 }
0x113a   :  { %7624 = vmatpush3.msra.mxu0 %v8510_v6 }
0x113b   :  { %7574 = vmatmul.mubr.bf16.gmra.mxu0 %v10598_v48  ;;  %7673 = vmatprep.subr.mxu0 %v11756_v11  ;;  %v11759_v48 = vld [vmem:[#allocation34_spill] sm:$0xff] }
0x113c   :  { %7577 = vmatprep.mubr.bf16.mxu0 %v10604_v26  ;;  %v11760_v26 = vld [vmem:[#allocation35_spill] sm:$0xff] }
0x1143   :  { %7578 = vmatmul.mubr.bf16.gmra.mxu0 %v10610_v38  ;;  %v11761_v38 = vld [vmem:[#allocation37_spill] sm:$0xff] }
0x1144   :  { %7581 = vmatprep.mubr.bf16.mxu0 %v10616_v50  ;;  %v11762_v50 = vld [vmem:[#allocation39_spill] sm:$0xff] }
0x114b   :  { %7582 = vmatmul.mubr.bf16.gmra.mxu0 %v10622_v53  ;;  %v11763_v53 = vld [vmem:[#allocation40_spill] sm:$0xff] }
0x114c   :  { %7625 = vmatprep.mubr.msk.f32.mxu0 %vm315_vm0, %v10711_v34 }
0x1153   :  { %7626 = vmatmul.mubr.msk.f32.vlgmr.msra.gmra.mxu0 %vm315_vm0, %v10717_v33 }
0x1154   :  { %7674 = vmatpush3.msra.mxu0 %v11756_v11  ;;  %7628 = vmatprep.mubr.msk.f32.mxu0 %vm315_vm0, %v10698_v44 }
0x1155   :  { %7675 = vmatprep.subr.mxu0 %v11757_v41 }
0x1156   :  { %7676 = vmatpush3.msra.mxu0 %v11757_v41 }
0x1157   :  { %7677 = vmatprep.subr.mxu0 %v11758_v57  ;;  %7629 = vmatmul.mubr.msk.f32.gmra.mxu0 %vm315_vm0, %v10703_v8 }
0x1158   :  { %7678 = vmatpush3.msra.mxu0 %v11758_v57  ;;  %7631 = vmatprep.mubr.msk.f32.mxu0 %vm315_vm0, %v10689_v61 }
0x1159   :  { %7679 = vmatprep.subr.mxu0 %v11759_v48 }
0x115a   :  { %7680 = vmatpush3.msra.mxu0 %v11759_v48 }
0x115b   :  { %7681 = vmatprep.subr.mxu0 %v11760_v26  ;;  %7632 = vmatmul.mubr.msk.f32.gmra.mxu0 %vm315_vm0, %v10685_v9 }
0x115c   :  { %7682 = vmatpush3.msra.mxu0 %v11760_v26  ;;  %7634 = vmatprep.mubr.msk.f32.mxu0 %vm315_vm0, %v10677_v56 }
0x115d   :  { %7683 = vmatprep.subr.mxu0 %v11761_v38 }
0x115e   :  { %7684 = vmatpush3.msra.mxu0 %v11761_v38 }
0x115f   :  { %7685 = vmatprep.subr.mxu0 %v11762_v50  ;;  %7635 = vmatmul.mubr.msk.f32.gmra.mxu0 %vm315_vm0, %v10673_v28 }
0x1160   :  { %7686 = vmatpush3.msra.mxu0 %v11762_v50  ;;  %7637 = vmatprep.mubr.msk.f32.mxu0 %vm315_vm0, %v10657_v60 }
0x1161   :  { %7687 = vmatprep.subr.mxu0 %v11763_v53 }
0x1162   :  { %7688 = vmatpush3.msra.mxu0 %v11763_v53 }
0x1163   :  { %7689 = vmatprep.subr.mxu0 %v11764_v51  ;;  %7638 = vmatmul.mubr.msk.f32.gmra.mxu0 %vm315_vm0, %v10668_v43 }
0x1164   :  { %7690 = vmatpush3.msra.mxu0 %v11764_v51  ;;  %7640 = vmatprep.mubr.msk.f32.mxu0 %vm315_vm0, %v10641_v32 }
0x1165   :  { %7691 = vmatprep.subr.mxu0 %v11765_v2 }
0x1166   :  { %7692 = vmatpush3.msra.mxu0 %v11765_v2 }
0x1167   :  { %7693 = vmatprep.subr.mxu0 %v11766_v3  ;;  %7641 = vmatmul.mubr.msk.f32.gmra.mxu0 %vm315_vm0, %v10651_v62 }
0x1168   :  { %7694 = vmatpush3.msra.mxu0 %v11766_v3  ;;  %7643 = vmatprep.mubr.msk.f32.mxu0 %vm315_vm0, %v10630_v23 }
0x1169   :  { %7695 = vmatprep.subr.mxu0 %v11767_v21 }
0x116a   :  { %7696 = vmatpush3.msra.mxu0 %v11767_v21 }
0x116b   :  { %7697 = vmatprep.subr.mxu0 %v11768_v55  ;;  %7644 = vmatmul.mubr.msk.f32.gmra.mxu0 %vm315_vm0, %v10634_v42 }
0x116c   :  { %7698 = vmatpush3.msra.mxu0 %v11768_v55  ;;  %7646 = vmatprep.mubr.msk.f32.mxu0 %vm315_vm0, %v10646_v5 }
0x116d   :  { %7699 = vmatprep.subr.mxu0 %v11769_v0 }
0x116e   :  { %7700 = vmatpush3.msra.mxu0 %v11769_v0 }
0x116f   :  { %7701 = vmatprep.subr.mxu0 %v11770_v39  ;;  %7647 = vmatmul.mubr.msk.f32.gmra.mxu0 %vm315_vm0, %v10644_v27 }
0x1170   :  { %7702 = vmatpush3.msra.mxu0 %v11770_v39 }
0x1171   :  { %7703 = vmatprep.subr.mxu0 %v11771_v15 }
0x1172   :  { %7704 = vmatpush3.msra.mxu0 %v11771_v15 }
0x11f3   :  { %v7571_v4 = vpop.f32.mrf.mxu0 }
0x11f4   :  { %v4450_v13 = vsel %vm315_vm0, %v7571_v4, -inf }
0x11f5   :  { %4451 = vmax.xlane.f32.xlu1 %v4450_v13  ;;  %v4381_v24 = vpop.f32.mrf.mxu0 }
0x11f6   :  { %v4444_v59 = vsel %vm315_vm0, %v4381_v24, -inf }
0x11f7   :  { %v10796_v17 = vpop.f32.mrf.mxu0 }
0x11f8   :  { %v4453_v29 = vsel %vm315_vm0, %v10796_v17, -inf }
0x11f9   :  { %4445 = vmax.xlane.f32.xlu1 %v4444_v59  ;;  %v10799_v31 = vpop.f32.mrf.mxu0 }
0x11fa   :  { %v4447_v52 = vsel %vm315_vm0, %v10799_v31, -inf }
0x11fb   :  { %v10801_v25 = vpop.f32.mrf.mxu0 }
0x11fc   :  { %v4462_v7 = vsel %vm315_vm0, %v10801_v25, -inf }
0x11fd   :  { %4454 = vmax.xlane.f32.xlu1 %v4453_v29  ;;  %v10805_v36 = vpop.f32.mrf.mxu0 }
0x11fe   :  { %v4456_v13 = vsel %vm315_vm0, %v10805_v36, -inf }
0x11ff   :  { %v10807_v18 = vpop.f32.mrf.mxu0 }
0x1200   :  { %v4465_v54 = vsel %vm315_vm0, %v10807_v18, -inf }
0x1201   :  { %4448 = vmax.xlane.f32.xlu1 %v4447_v52  ;;  %4466 = vmax.xlane.f32.xlu0 %v4465_v54  ;;  %v10813_v47 = vpop.f32.mrf.mxu0 }
0x1202   :  { %v4459_v54 = vsel %vm315_vm0, %v10813_v47, -inf }
0x1203   :  { %v10817_v10 = vpop.f32.mrf.mxu0 }
0x1204   :  { %v4474_v8 = vsel %vm315_vm0, %v10817_v10, -inf }
0x1205   :  { %4463 = vmax.xlane.f32.xlu1 %v4462_v7  ;;  %v10819_v46 = vpop.f32.mrf.mxu0 }
0x1206   :  { %v4468_v33 = vsel %vm315_vm0, %v10819_v46, -inf }
0x1207   :  { %v10821_v6 = vpop.f32.mrf.mxu0 }
0x1208   :  { %v4477_v59 = vsel %vm315_vm0, %v10821_v6, -inf }
0x1209   :  { %4457 = vmax.xlane.f32.xlu1 %v4456_v13  ;;  %4478 = vmax.xlane.f32.xlu0 %v4477_v59  ;;  %v10827_v29 = vpop.f32.mrf.mxu0 }
0x120a   :  { %v4471_v59 = vsel %vm315_vm0, %v10827_v29, -inf }
0x120b   :  { %v10829_v52 = vpop.f32.mrf.mxu0 }
0x120c   :  { %v4486_v61 = vsel %vm315_vm0, %v10829_v52, -inf }
0x120d   :  { %4460 = vmax.xlane.f32.xlu1 %v4459_v54  ;;  %v10833_v7 = vpop.f32.mrf.mxu0 }
0x120f   :  { %v10835_v34 = vpop.f32.mrf.mxu0 }
0x1210   :  { %v4489_v54 = vsel %vm315_vm0, %v10835_v34, -inf }
0x1211   :  { %4469 = vmax.xlane.f32.xlu1 %v4468_v33  ;;  %v10839_v44 = vpop.f32.mrf.mxu0  ;;  %v4480_v33 = vsel %vm315_vm0, %v10833_v7, -inf }
0x1212   :  { %v4483_v13 = vsel %vm315_vm0, %v10839_v44, -inf }
0x1213   :  { %4484 = vmax.xlane.f32.xlu0 %v4483_v13  ;;  %v10853_v13 = vpop.f32.mrf.mxu0 }
0x1215   :  { %4472 = vmax.xlane.f32.xlu1 %v4471_v59  ;;  %v10855_v9 = vpop.f32.mrf.mxu0 }
0x1217   :  { %4490 = vmax.xlane.f32.xlu0 %v4489_v54  ;;  %v10857_v56 = vpop.f32.mrf.mxu0 }
0x1219   :  { %4475 = vmax.xlane.f32.xlu1 %v4474_v8  ;;  %v10859_v59 = vpop.f32.mrf.mxu0 }
0x121b   :  { %v10861_v54 = vpop.f32.mrf.mxu0 }
0x121d   :  { %4481 = vmax.xlane.f32.xlu1 %v4480_v33  ;;  %v10863_v8 = vpop.f32.mrf.mxu0 }
0x121f   :  { %v10865_v32 = vpop.f32.mrf.mxu0 }
0x1221   :  { %4487 = vmax.xlane.f32.xlu1 %v4486_v61  ;;  %v10867_v5 = vpop.f32.mrf.mxu0 }
0x1223   :  { %v10871_v16 = vpop.f32.mrf.mxu0 }
0x127e   :  { %v4452_v28 = vpop.xlane.xlu1 %4451 }
0x127f   :  { %v4494_v60 = vsub.f32 %v7571_v4, %v4452_v28 }
0x1281   :  { %v4512_v62 = vmul.f32 1.442695, %v4494_v60 }
0x1282   :  { %v4446_v43 = vpop.xlane.xlu1 %4445 }
0x1283   :  { %v4492_v33 = vsub.f32 %v4381_v24, %v4446_v43  ;;  %v10873_v43 = vpop.f32.mrf.mxu0 }
0x1285   :  { %v4508_v61 = vmul.f32 1.442695, %v4492_v33 }
0x1286   :  { %v4455_v23 = vpop.xlane.xlu1 %4454 }
0x1287   :  { %8250 = vpow2.f32 %v4508_v61  ;;  %v4495_v42 = vsub.f32 %v10796_v17, %v4455_v23  ;;  %v10879_v23 = vpop.f32.mrf.mxu0 }
0x1288   :  { %8252 = vpow2.f32 %v4512_v62 }
0x1289   :  { %v4514_v39 = vmul.f32 1.442695, %v4495_v42 }
0x128a   :  { %v4449_v27 = vpop.xlane.xlu1 %4448  ;;  %v4467_v24 = vpop.xlane.xlu0 %4466 }
0x128b   :  { %v4493_v15 = vsub.f32 %v10799_v31, %v4449_v27  ;;  %v4499_v27 = vsub.f32 %v10807_v18, %v4467_v24 }
0x128d   :  { %v4510_v28 = vmul.f32 1.442695, %v4493_v15 }
0x128e   :  { %v4464_v4 = vpop.xlane.xlu1 %4463 }
0x128f   :  { %8254 = vpow2.f32 %v4510_v28  ;;  %v4498_v60 = vsub.f32 %v10801_v25, %v4464_v4  ;;  %v4522_v4 = vmul.f32 1.442695, %v4499_v27 }
0x1290   :  { %8256 = vpow2.f32 %v4514_v39 }
0x1291   :  { %v4520_v17 = vmul.f32 1.442695, %v4498_v60 }
0x1292   :  { %v4458_v33 = vpop.xlane.xlu1 %4457  ;;  %v4479_v28 = vpop.xlane.xlu0 %4478 }
0x1293   :  { %v4496_v62 = vsub.f32 %v10805_v36, %v4458_v33  ;;  %v10887_v36 = vpop.f32.mrf.mxu0 }
0x1294   :  { %v10877_v61 = vpop.eup %8250 }
0x1295   :  { %v4516_v42 = vmul.f32 1.442695, %v4496_v62  ;;  %v4540_v15 = vsel %vm315_vm0, %v10877_v61, 0.0  ;;  %v10884_v31 = vpop.eup %8252 }
0x1296   :  { %v4461_v39 = vpop.xlane.xlu1 %4460  ;;  %4541 = vadd.xlane.f32.xlu1 %v4540_v15  ;;  %v4546_v18 = vsel %vm315_vm0, %v10884_v31, 0.0 }
0x1297   :  { %8258 = vpow2.f32 %v4516_v42  ;;  %v4497_v25 = vsub.f32 %v10813_v47, %v4461_v39  ;;  %v7645_v42 = vpop.f32.mrf.mxu0  ;;  %v4503_v47 = vsub.f32 %v10821_v6, %v4479_v28 }
0x1298   :  { %8260 = vpow2.f32 %v4520_v17 }
0x1299   :  { %v4518_v33 = vmul.f32 1.442695, %v4497_v25 }
0x129a   :  { %v4470_v60 = vpop.xlane.xlu1 %4469  ;;  %4547 = vadd.xlane.f32.xlu1 %v4546_v18  ;;  %v5035_v18 = vpop.f32.mrf.mxu0 }
0x129b   :  { %8262 = vpow2.f32 %v4518_v33  ;;  %v4500_v24 = vsub.f32 %v10819_v46, %v4470_v60  ;;  %v4530_v60 = vmul.f32 1.442695, %v4503_v47 }
0x129c   :  { %v10892_v62 = vpop.eup %8254  ;;  %v4485_v15 = vpop.xlane.xlu0 %4484  ;;  %8264 = vpow2.f32 %v4522_v4 }
0x129d   :  { %v4524_v39 = vmul.f32 1.442695, %v4500_v24  ;;  %v4543_v27 = vsel %vm315_vm0, %v10892_v62, 0.0  ;;  %v10897_v17 = vpop.eup %8256  ;;  %v4505_v46 = vsub.f32 %v10839_v44, %v4485_v15 }
0x129e   :  { %v4473_v25 = vpop.xlane.xlu1 %4472  ;;  %4544 = vadd.xlane.f32.xlu0 %v4543_v27  ;;  %v4549_v4 = vsel %vm315_vm0, %v10897_v17, 0.0 }
0x129f   :  { %8266 = vpow2.f32 %v4524_v39  ;;  %v4501_v33 = vsub.f32 %v10827_v29, %v4473_v25  ;;  %v4534_v27 = vmul.f32 1.442695, %v4505_v46  ;;  %v7648_v39 = vpop.f32.mrf.mxu0 }
0x12a0   :  { %v4491_v6 = vpop.xlane.xlu0 %4490 }
0x12a1   :  { %v4526_v37 = vmul.f32 1.442695, %v4501_v33  ;;  %v4507_v29 = vsub.f32 %v10835_v34, %v4491_v6 }
0x12a2   :  { %v4476_v28 = vpop.xlane.xlu1 %4475  ;;  %4550 = vadd.xlane.f32.xlu0 %v4549_v4 }
0x12a3   :  { %8268 = vpow2.f32 %v4526_v37  ;;  %v4502_v24 = vsub.f32 %v10817_v10, %v4476_v28  ;;  %v10914_v10 = vld [vmem:[#allocation13] ss:$0 sm:$0xff]  ;;  %v4538_v34 = vmul.f32 1.442695, %v4507_v29 }
0x12a4   :  { %v10904_v0 = vpop.eup %8258  ;;  %8270 = vpow2.f32 %v4530_v60  ;;  %v5051_v46 = vadd.f32 %v10914_v10, %v7648_v39  ;;  %v5045_v60 = vpop.f32.mrf.mxu0 }
0x12a5   :  { %v4528_v44 = vmul.f32 1.442695, %v4502_v24  ;;  %v4552_v15 = vsel %vm315_vm0, %v10904_v0, 0.0  ;;  %v10909_v47 = vpop.eup %8260 }
0x12a6   :  { %4553 = vadd.xlane.f32.xlu1 %v4552_v15  ;;  %v4482_v25 = vpop.xlane.xlu1 %4481  ;;  %v4558_v6 = vsel %vm315_vm0, %v10909_v47, 0.0 }
0x12a7   :  { %8272 = vpow2.f32 %v4528_v44  ;;  %v4504_v37 = vsub.f32 %v10833_v7, %v4482_v25 }
0x12a8   :  { %v10912_v33 = vpop.eup %8262  ;;  %8274 = vpow2.f32 %v4534_v27  ;;  %v5046_v27 = vadd.f32 %v10914_v10, %v5045_v60 }
0x12a9   :  { %v4532_v4 = vmul.f32 1.442695, %v4504_v37  ;;  %v4555_v28 = vsel %vm315_vm0, %v10912_v33, 0.0  ;;  %v10921_v24 = vpop.eup %8264 }
0x12aa   :  { %4559 = vadd.xlane.f32.xlu1 %v4558_v6  ;;  %v4488_v7 = vpop.xlane.xlu1 %4487  ;;  %4556 = vadd.xlane.f32.xlu0 %v4555_v28  ;;  %v4561_v25 = vsel %vm315_vm0, %v10921_v24, 0.0  ;;  %v5036_v6 = vadd.f32 %v10914_v10, %v5035_v18 }
0x12ab   :  { %8276 = vpow2.f32 %v4532_v4  ;;  %v4506_v44 = vsub.f32 %v10829_v52, %v4488_v7  ;;  %v5041_v52 = vadd.f32 %v10914_v10, %v7645_v42 }
0x12ac   :  { %v10924_v15 = vpop.eup %8266  ;;  %8278 = vtanh.f32 %v5051_v46 }
0x12ad   :  { %8280 = vpow2.f32 %v4538_v34  ;;  %v4536_v39 = vmul.f32 1.442695, %v4506_v44  ;;  %v4564_v29 = vsel %vm315_vm0, %v10924_v15, 0.0  ;;  %v5031_v44 = vadd.f32 %v10914_v10, %v10879_v23 }
0x12ae   :  { %4565 = vadd.xlane.f32.xlu1 %v4564_v29  ;;  %4562 = vadd.xlane.f32.xlu0 %v4561_v25 }
0x12af   :  { %8282 = vpow2.f32 %v4536_v39 }
0x12b0   :  { %v10931_v37 = vpop.eup %8268  ;;  %8284 = vtanh.f32 %v5046_v27 }
0x12b1   :  { %v4567_v46 = vsel %vm315_vm0, %v10931_v37, 0.0  ;;  %v10936_v60 = vpop.eup %8270  ;;  %8286 = vtanh.f32 %v5041_v52  ;;  %v5026_v52 = vadd.f32 %v10914_v10, %v10887_v36 }
0x12b2   :  { %4568 = vadd.xlane.f32.xlu0 %v4567_v46  ;;  %v4573_v42 = vsel %vm315_vm0, %v10936_v60, 0.0  ;;  %8288 = vtanh.f32 %v5036_v6  ;;  %v10965_v6 = vld [vmem:[#allocation15] ss:$0 sm:$0xff] }
0x12b3   :  { %8290 = vtanh.f32 %v5031_v44 }
0x12b4   :  { %v10938_v34 = vpop.eup %8272  ;;  %8292 = vtanh.f32 %v5026_v52 }
0x12b5   :  { %v10940_v4 = vpop.eup %8274  ;;  %v4570_v28 = vsel %vm315_vm0, %v10938_v34, 0.0 }
0x12b6   :  { %4571 = vadd.xlane.f32.xlu1 %v4570_v28  ;;  %4574 = vadd.xlane.f32.xlu0 %v4573_v42  ;;  %v4579_v18 = vsel %vm315_vm0, %v10940_v4, 0.0 }
0x12b8   :  { %v10947_v7 = vpop.eup %8276 }
0x12b9   :  { %v8279_v27 = vpop.eup %8278  ;;  %v4576_v39 = vsel %vm315_vm0, %v10947_v7, 0.0 }
0x12ba   :  { %v10955_v29 = vpop.eup %8280  ;;  %4577 = vadd.xlane.f32.xlu1 %v4576_v39  ;;  %4580 = vadd.xlane.f32.xlu0 %v4579_v18  ;;  %v5181_v28 = vmul.f32 %v10965_v6, %v8279_v27  ;;  %v5021_v39 = vadd.f32 %v10914_v10, %v10871_v16  ;;  %v5011_v16 = vadd.f32 %v10914_v10, %v10865_v32 }
0x12bb   :  { %11772 = vst [vmem:[#allocation52_spill] sm:$0xff] %v10955_v29  ;;  %v4585_v46 = vsel %vm315_vm0, %v10955_v29, 0.0  ;;  %v5016_v29 = vadd.f32 %v10914_v10, %v10873_v43  ;;  %v5006_v43 = vadd.f32 %v10914_v10, %v10867_v5  ;;  %v4996_v5 = vadd.f32 %v10914_v10, %v10863_v8 }
0x12bc   :  { %v10957_v25 = vpop.eup %8282  ;;  %v5243_v44 = vsel %vm315_vm0, %v5181_v28, 0.0  ;;  %8294 = vtanh.f32 %v5021_v39  ;;  %v4986_v8 = vadd.f32 %v10914_v10, %v10859_v59  ;;  %v4976_v59 = vadd.f32 %v10914_v10, %v10855_v9 }
0x12bd   :  { %11773 = vst [vmem:[#allocation58_spill] sm:$0xff] %v10957_v25  ;;  %v4582_v23 = vsel %vm315_vm0, %v10957_v25, 0.0  ;;  %v8285_v42 = vpop.eup %8284  ;;  %8296 = vtanh.f32 %v5016_v29 }
0x12be   :  { %4583 = vadd.xlane.f32.xlu1 %v4582_v23  ;;  %4586 = vadd.xlane.f32.xlu0 %v4585_v46  ;;  %v5180_v36 = vmul.f32 %v10965_v6, %v8285_v42  ;;  %v8287_v18 = vpop.eup %8286  ;;  %8298 = vtanh.f32 %v5011_v16 }
0x12bf   :  { %v5179_v27 = vmul.f32 %v10965_v6, %v8287_v18  ;;  %v8289_v23 = vpop.eup %8288  ;;  %8300 = vtanh.f32 %v5006_v43 }
0x12c0   :  { %v5240_v25 = vsel %vm315_vm0, %v5180_v36, 0.0  ;;  %v8291_v46 = vpop.eup %8290  ;;  %v5178_v28 = vmul.f32 %v10965_v6, %v8289_v23 }
0x12c1   :  { %v5237_v52 = vsel %vm315_vm0, %v5179_v27, 0.0  ;;  %v5177_v39 = vmul.f32 %v10965_v6, %v8291_v46 }
0x12c2   :  { %5244 = vadd.xlane.f32.xlu1 %v5243_v44  ;;  %v5234_v42 = vsel %vm315_vm0, %v5178_v28, 0.0  ;;  %v8293_v44 = vpop.eup %8292 }
0x12c3   :  { %v5231_v32 = vsel %vm315_vm0, %v5177_v39, 0.0  ;;  %v5176_v29 = vmul.f32 %v10965_v6, %v8293_v44 }
0x12c5   :  { %v5228_v18 = vsel %vm315_vm0, %v5176_v29, 0.0 }
0x12c6   :  { %5241 = vadd.xlane.f32.xlu1 %v5240_v25  ;;  %v5001_v25 = vadd.f32 %v10914_v10, %v10861_v54  ;;  %v4991_v54 = vadd.f32 %v10914_v10, %v10857_v56  ;;  %v4981_v56 = vadd.f32 %v10914_v10, %v10853_v13 }
0x12c8   :  { %8302 = vtanh.f32 %v5001_v25 }
0x12c9   :  { %v8295_v36 = vpop.eup %8294  ;;  %8304 = vtanh.f32 %v4996_v5 }
0x12ca   :  { %5238 = vadd.xlane.f32.xlu1 %v5237_v52  ;;  %v5175_v27 = vmul.f32 %v10965_v6, %v8295_v36  ;;  %v8297_v23 = vpop.eup %8296  ;;  %8306 = vtanh.f32 %v4991_v54 }
0x12cb   :  { %v5174_v16 = vmul.f32 %v10965_v6, %v8297_v23  ;;  %v8299_v52 = vpop.eup %8298  ;;  %8308 = vtanh.f32 %v4986_v8 }
0x12cc   :  { %v5225_v46 = vsel %vm315_vm0, %v5175_v27, 0.0  ;;  %v5173_v43 = vmul.f32 %v10965_v6, %v8299_v52  ;;  %8310 = vtanh.f32 %v4981_v56 }
0x12cd   :  { %v5222_v28 = vsel %vm315_vm0, %v5174_v16, 0.0  ;;  %8312 = vtanh.f32 %v4976_v59 }
0x12ce   :  { %5235 = vadd.xlane.f32.xlu1 %v5234_v42  ;;  %v8301_v42 = vpop.eup %8300  ;;  %v5219_v39 = vsel %vm315_vm0, %v5173_v43, 0.0 }
0x12cf   :  { %v5172_v44 = vmul.f32 %v10965_v6, %v8301_v42 }
0x12d2   :  { %5232 = vadd.xlane.f32.xlu1 %v5231_v32  ;;  %v5216_v32 = vsel %vm315_vm0, %v5172_v44, 0.0  ;;  %v11774_v44 = vmov 0  }
0x12d5   :  { %v8303_v25 = vpop.eup %8302 }
0x12d6   :  { %5229 = vadd.xlane.f32.xlu1 %v5228_v18  ;;  %v5171_v29 = vmul.f32 %v10965_v6, %v8303_v25  ;;  %v8305_v36 = vpop.eup %8304 }
0x12d7   :  { %v5170_v5 = vmul.f32 %v10965_v6, %v8305_v36  ;;  %v8307_v18 = vpop.eup %8306 }
0x12d8   :  { %v5213_v13 = vsel %vm315_vm0, %v5171_v29, 0.0  ;;  %v5169_v23 = vmul.f32 %v10965_v6, %v8307_v18  ;;  %v8309_v54 = vpop.eup %8308 }
0x12d9   :  { %v5210_v27 = vsel %vm315_vm0, %v5170_v5, 0.0  ;;  %v8311_v16 = vpop.eup %8310 }
0x12da   :  { %5226 = vadd.xlane.f32.xlu1 %v5225_v46  ;;  %v5207_v9 = vsel %vm315_vm0, %v5169_v23, 0.0  ;;  %v5168_v46 = vmul.f32 %v10965_v6, %v8309_v54  ;;  %v5167_v8 = vmul.f32 %v10965_v6, %v8311_v16 }
0x12dc   :  { %v5204_v52 = vsel %vm315_vm0, %v5168_v46, 0.0  ;;  %v5201_v43 = vsel %vm315_vm0, %v5167_v8, 0.0 }
0x12de   :  { %5223 = vadd.xlane.f32.xlu1 %v5222_v28  ;;  %v8313_v28 = vpop.eup %8312 }
0x12df   :  { %v5166_v42 = vmul.f32 %v10965_v6, %v8313_v28 }
0x12e1   :  { %v5198_v56 = vsel %vm315_vm0, %v5166_v42, 0.0 }
0x12e2   :  { %5220 = vadd.xlane.f32.xlu1 %v5219_v39  ;;  %v11022_v39 = vld [vmem:[%s11544_s14] sm:$0xff] }
0x12e3   :  { %vm5769_vm1 = vcmp.ne.s32.totalorder %v11022_v39, 0 }
0x12e4   :  { %v5771_v25 = vsel %vm5769_vm1, 1, %v11774_v44 }
0x12e6   :  { %5217 = vadd.xlane.f32.xlu1 %v5216_v32 }
0x12ea   :  { %5214 = vadd.xlane.f32.xlu1 %v5213_v13 }
0x12ee   :  { %5211 = vadd.xlane.f32.xlu1 %v5210_v27 }
0x12f2   :  { %5208 = vadd.xlane.f32.xlu1 %v5207_v9 }
0x12f6   :  { %5205 = vadd.xlane.f32.xlu1 %v5204_v52 }
0x12fa   :  { %5202 = vadd.xlane.f32.xlu1 %v5201_v43 }
0x12fe   :  { %5199 = vadd.xlane.f32.xlu1 %v5198_v56 }
0x130f   :  { %5774 = vperm.xlu1 %7759, %v5771_v25  }
0x131f   :  { %v4542_v59 = vpop.xlane.xlu1 %4541 }
0x1320   :  { %8314 = vrcp.f32 %v4542_v59 }
0x1323   :  { %v4548_v32 = vpop.xlane.xlu1 %4547 }
0x1324   :  { %8316 = vrcp.f32 %v4548_v32 }
0x1327   :  { %v4545_v29 = vpop.xlane.xlu0 %4544 }
0x1328   :  { %8318 = vrcp.f32 %v4545_v29 }
0x132b   :  { %v4551_v36 = vpop.xlane.xlu0 %4550 }
0x132c   :  { %8320 = vrcp.f32 %v4551_v36 }
0x132d   :  { %v8315_v13 = vpop.eup %8314 }
0x132e   :  { %v4589_v5 = vmul.f32 %v8315_v13, %v10877_v61 }
0x132f   :  { %v4554_v18 = vpop.xlane.xlu1 %4553 }
0x1330   :  { %8322 = vrcp.f32 %v4554_v18  ;;  %7593 = vmatprep.mubr.msk.f32.mxu1 %vm315_vm0, %v4589_v5 }
0x1331   :  { %v8317_v54 = vpop.eup %8316 }
0x1332   :  { %v4593_v8 = vmul.f32 %v8317_v54, %v10884_v31 }
0x1333   :  { %v4560_v27 = vpop.xlane.xlu1 %4559  ;;  %v4557_v23 = vpop.xlane.xlu0 %4556 }
0x1334   :  { %8324 = vrcp.f32 %v4560_v27 }
0x1335   :  { %v8319_v9 = vpop.eup %8318  ;;  %8326 = vrcp.f32 %v4557_v23 }
0x1336   :  { %v4591_v46 = vmul.f32 %v8319_v9, %v10892_v62 }
0x1337   :  { %v4566_v16 = vpop.xlane.xlu1 %4565  ;;  %v4563_v52 = vpop.xlane.xlu0 %4562 }
0x1338   :  { %8328 = vrcp.f32 %v4566_v16  ;;  %7594 = vmatmul.mubr.msk.f32.vlgmr.msra.gmra.mxu1 %vm315_vm0, %v4591_v46 }
0x1339   :  { %v8321_v61 = vpop.eup %8320  ;;  %8330 = vrcp.f32 %v4563_v52  ;;  %7022 = vmatpush3.msra.mxu1 %v11756_v11  ;;  %7596 = vmatprep.mubr.msk.f32.mxu1 %vm315_vm0, %v4593_v8 }
0x133a   :  { %7023 = vmatprep.subr.mxu1 %v9938_v14  ;;  %v4595_v28 = vmul.f32 %v8321_v61, %v10897_v17 }
0x133b   :  { %7024 = vmatpush3.msra.mxu1 %v11757_v41  ;;  %v4569_v62 = vpop.xlane.xlu0 %4568 }
0x133c   :  { %7025 = vmatprep.subr.mxu1 %v9941_v58  ;;  %8332 = vrcp.f32 %v4569_v62  ;;  %7597 = vmatmul.mubr.msk.f32.gmra.mxu1 %vm315_vm0, %v4595_v28 }
0x133d   :  { %v8323_v31 = vpop.eup %8322  ;;  %7026 = vmatpush3.msra.mxu1 %v11758_v57 }
0x133e   :  { %7027 = vmatprep.subr.mxu1 %v9935_v22  ;;  %v4597_v11 = vmul.f32 %v8323_v31, %v10904_v0 }
0x133f   :  { %7028 = vmatpush3.msra.mxu1 %v11759_v48  ;;  %v4572_v14 = vpop.xlane.xlu1 %4571  ;;  %v4575_v43 = vpop.xlane.xlu0 %4574 }
0x1340   :  { %8334 = vrcp.f32 %v4572_v14  ;;  %7029 = vmatprep.subr.mxu1 %v9955_v30  ;;  %7599 = vmatprep.mubr.msk.f32.mxu1 %vm315_vm0, %v4597_v11 }
0x1341   :  { %v8325_v58 = vpop.eup %8324  ;;  %8336 = vrcp.f32 %v4575_v43  ;;  %7030 = vmatpush3.msra.mxu1 %v11760_v26 }
0x1342   :  { %v8327_v41 = vpop.eup %8326  ;;  %7031 = vmatprep.subr.mxu1 %v9948_v45  ;;  %v4601_v22 = vmul.f32 %v8325_v58, %v10909_v47 }
0x1343   :  { %7032 = vmatpush3.msra.mxu1 %v11761_v38  ;;  %v4578_v57 = vpop.xlane.xlu1 %4577  ;;  %v4581_v48 = vpop.xlane.xlu0 %4580  ;;  %v4599_v0 = vmul.f32 %v8327_v41, %v10912_v33  ;;  %v11776_v33 = vld [vmem:[#allocation49_spill] sm:$0xff] }
0x1344   :  { %8338 = vrcp.f32 %v4578_v57  ;;  %7033 = vmatprep.subr.mxu1 %v9970_v63 }
0x1345   :  { %v8329_v30 = vpop.eup %8328  ;;  %8340 = vrcp.f32 %v4581_v48  ;;  %7600 = vmatmul.mubr.msk.f32.gmra.mxu1 %vm315_vm0, %v4599_v0 }
0x1346   :  { %v8331_v17 = vpop.eup %8330  ;;  %7034 = vmatpush3.msra.mxu1 %v11762_v50  ;;  %7602 = vmatprep.mubr.msk.f32.mxu1 %vm315_vm0, %v4601_v22  ;;  %v4605_v45 = vmul.f32 %v8329_v30, %v10924_v15  ;;  %v11778_v15 = vld [vmem:[#allocation58_spill] sm:$0xff] }
0x1347   :  { %7035 = vmatprep.subr.mxu1 %v9963_v1  ;;  %v4584_v26 = vpop.xlane.xlu1 %4583  ;;  %v4587_v38 = vpop.xlane.xlu0 %4586  ;;  %v4603_v47 = vmul.f32 %v8331_v17, %v10921_v24  ;;  %v11777_v24 = vld [vmem:[#allocation47_spill] sm:$0xff] }
0x1348   :  { %7036 = vmatpush3.msra.mxu1 %v11763_v53  ;;  %8342 = vrcp.f32 %v4584_v26 }
0x1349   :  { %v8333_v63 = vpop.eup %8332  ;;  %7037 = vmatprep.subr.mxu1 %v9977_v49  ;;  %8344 = vrcp.f32 %v4587_v38  ;;  %7603 = vmatmul.mubr.msk.f32.gmra.mxu1 %vm315_vm0, %v4603_v47 }
0x134a   :  { %7038 = vmatpush3.msra.mxu1 %v11764_v51  ;;  %7605 = vmatprep.mubr.msk.f32.mxu1 %vm315_vm0, %v4605_v45  ;;  %v4607_v50 = vmul.f32 %v8333_v63, %v10931_v37  ;;  %v11779_v37 = vld [vmem:[#allocation50_spill] sm:$0xff] }
0x134b   :  { %7039 = vmatprep.subr.mxu1 %v11735_v40 }
0x134c   :  { %7040 = vmatpush3.msra.mxu1 %v11765_v2 }
0x134d   :  { %v8335_v1 = vpop.eup %8334  ;;  %7041 = vmatprep.subr.mxu1 %v11739_v20  ;;  %7606 = vmatmul.mubr.msk.f32.gmra.mxu1 %vm315_vm0, %v4607_v50 }
0x134e   :  { %v8337_v53 = vpop.eup %8336  ;;  %7042 = vmatpush3.msra.mxu1 %v11766_v3  ;;  %v4609_v49 = vmul.f32 %v8335_v1, %v10938_v34  ;;  %v11775_v3 = vld [vmem:[#allocation46_spill] sm:$0xff]  ;;  %v11781_v34 = vld [vmem:[#allocation48_spill] sm:$0xff] }
0x134f   :  { %7043 = vmatprep.subr.mxu1 %v11741_v35  ;;  %v4611_v51 = vmul.f32 %v8337_v53, %v10936_v60  ;;  %v11780_v60 = vld [vmem:[#allocation52_spill] sm:$0xff] }
0x1350   :  { %7044 = vmatpush3.msra.mxu1 %v11767_v21  ;;  %7608 = vmatprep.mubr.msk.f32.mxu1 %vm315_vm0, %v4609_v49 }
0x1351   :  { %v8339_v40 = vpop.eup %8338  ;;  %7045 = vmatprep.subr.mxu1 %v11747_v19  ;;  %7609 = vmatmul.mubr.msk.f32.gmra.mxu1 %vm315_vm0, %v4611_v51 }
0x1352   :  { %v8341_v20 = vpop.eup %8340  ;;  %7046 = vmatpush3.msra.mxu1 %v11768_v55  ;;  %v4613_v2 = vmul.f32 %v8339_v40, %v10947_v7 }
0x1353   :  { %7047 = vmatprep.subr.mxu1 %v11745_v12  ;;  %v4615_v35 = vmul.f32 %v8341_v20, %v10940_v4 }
0x1354   :  { %7048 = vmatpush3.msra.mxu1 %v11775_v3  ;;  %7611 = vmatprep.mubr.msk.f32.mxu1 %vm315_vm0, %v4613_v2 }
0x1355   :  { %v8343_v21 = vpop.eup %8342  ;;  %7049 = vmatprep.subr.mxu1 %v11776_v33  ;;  %7612 = vmatmul.mubr.msk.f32.gmra.mxu1 %vm315_vm0, %v4615_v35 }
0x1356   :  { %v8345_v19 = vpop.eup %8344  ;;  %7050 = vmatpush3.msra.mxu1 %v11777_v24  ;;  %v4617_v55 = vmul.f32 %v8343_v21, %v11778_v15 }
0x1357   :  { %7051 = vmatprep.subr.mxu1 %v11779_v37  ;;  %v4619_v12 = vmul.f32 %v8345_v19, %v11780_v60 }
0x1358   :  { %7052 = vmatpush3.msra.mxu1 %v11781_v34  ;;  %7614 = vmatprep.mubr.msk.f32.mxu1 %vm315_vm0, %v4617_v55 }
0x1359   :  { %7615 = vmatmul.mubr.msk.f32.gmra.mxu1 %vm315_vm0, %v4619_v12 }
0x13f8   :  { %v11089_v4 = vpop.f32.mrf.mxu1 }
0x13fa   :  { %v11091_v7 = vpop.f32.mrf.mxu1 }
0x13fb   :  { %7649 = vmatprep.mubr.msk.f32.mxu0 %vm315_vm0, %v11091_v7 }
0x13fc   :  { %v11095_v42 = vpop.f32.mrf.mxu1  ;;  %7650 = vmatmul.mubr.msk.f32.gmra.mxu0 %vm315_vm0, %v11089_v4 }
0x13fe   :  { %v11099_v56 = vpop.f32.mrf.mxu1 }
0x13ff   :  { %7652 = vmatprep.mubr.msk.f32.mxu0 %vm315_vm0, %v11099_v56 }
0x1400   :  { %7653 = vmatmul.mubr.msk.f32.gmra.mxu0 %vm315_vm0, %v11095_v42 }
0x1405   :  { %v11105_v25 = vpop.f32.mrf.mxu1 }
0x1407   :  { %v11107_v59 = vpop.f32.mrf.mxu1 }
0x1408   :  { %7655 = vmatprep.mubr.msk.f32.mxu0 %vm315_vm0, %v11107_v59 }
0x1409   :  { %v11111_v32 = vpop.f32.mrf.mxu1  ;;  %7656 = vmatmul.mubr.msk.f32.gmra.mxu0 %vm315_vm0, %v11105_v25 }
0x140b   :  { %v11115_v29 = vpop.f32.mrf.mxu1 }
0x140c   :  { %7658 = vmatprep.mubr.msk.f32.mxu0 %vm315_vm0, %v11115_v29 }
0x140d   :  { %v11119_v36 = vpop.f32.mrf.mxu1  ;;  %7659 = vmatmul.mubr.msk.f32.gmra.mxu0 %vm315_vm0, %v11111_v32 }
0x140f   :  { %v11123_v13 = vpop.f32.mrf.mxu1 }
0x1410   :  { %7661 = vmatprep.mubr.msk.f32.mxu0 %vm315_vm0, %v11123_v13 }
0x1411   :  { %7662 = vmatmul.mubr.msk.f32.gmra.mxu0 %vm315_vm0, %v11119_v36  ;;  %v11129_v5 = vpop.f32.mrf.mxu1 }
0x1413   :  { %v11131_v18 = vpop.f32.mrf.mxu1 }
0x1414   :  { %7664 = vmatprep.mubr.msk.f32.mxu0 %vm315_vm0, %v11131_v18 }
0x1415   :  { %v11135_v27 = vpop.f32.mrf.mxu1  ;;  %7665 = vmatmul.mubr.msk.f32.gmra.mxu0 %vm315_vm0, %v11129_v5 }
0x1417   :  { %v11139_v23 = vpop.f32.mrf.mxu1 }
0x1418   :  { %7667 = vmatprep.mubr.msk.f32.mxu0 %vm315_vm0, %v11139_v23 }
0x1419   :  { %v11143_v54 = vpop.f32.mrf.mxu1  ;;  %7668 = vmatmul.mubr.msk.f32.gmra.mxu0 %vm315_vm0, %v11135_v27 }
0x141b   :  { %v11147_v9 = vpop.f32.mrf.mxu1 }
0x141c   :  { %7670 = vmatprep.mubr.msk.f32.mxu0 %vm315_vm0, %v11147_v9 }
0x141d   :  { %7671 = vmatmul.mubr.msk.f32.gmra.mxu0 %vm315_vm0, %v11143_v54 }
0x14bc   :  { %v11153_v46 = vpop.f32.mrf.mxu0 }
0x14be   :  { %v11155_v16 = vpop.f32.mrf.mxu0 }
0x14c0   :  { %v11157_v52 = vpop.f32.mrf.mxu0 }
0x14c2   :  { %v11159_v8 = vpop.f32.mrf.mxu0 }
0x14c9   :  { %v7657_v61 = vpop.f32.mrf.mxu0 }
0x14ca   :  { %v5081_v60 = vadd.f32 %v10914_v10, %v7657_v61 }
0x14cb   :  { %v5075_v28 = vpop.f32.mrf.mxu0 }
0x14cd   :  { %v7660_v62 = vpop.f32.mrf.mxu0 }
0x14ce   :  { %v5091_v31 = vadd.f32 %v10914_v10, %v7660_v62 }
0x14cf   :  { %v5085_v11 = vpop.f32.mrf.mxu0 }
0x14d0   :  { %8346 = vtanh.f32 %v5091_v31  ;;  %v5086_v24 = vadd.f32 %v10914_v10, %v5085_v11  ;;  %v5076_v31 = vadd.f32 %v10914_v10, %v5075_v28  ;;  %v5066_v28 = vadd.f32 %v10914_v10, %v11159_v8 }
0x14d1   :  { %v7663_v14 = vpop.f32.mrf.mxu0  ;;  %v5056_v8 = vadd.f32 %v10914_v10, %v11155_v16 }
0x14d2   :  { %v5101_v43 = vadd.f32 %v10914_v10, %v7663_v14 }
0x14d3   :  { %v5095_v58 = vpop.f32.mrf.mxu0 }
0x14d4   :  { %8348 = vtanh.f32 %v5101_v43  ;;  %v5096_v41 = vadd.f32 %v10914_v10, %v5095_v58  ;;  %v5071_v58 = vadd.f32 %v10914_v10, %v11157_v52  ;;  %v5061_v52 = vadd.f32 %v10914_v10, %v11153_v46 }
0x14d5   :  { %v7666_v22 = vpop.f32.mrf.mxu0 }
0x14d6   :  { %8350 = vtanh.f32 %v5096_v41  ;;  %v5111_v57 = vadd.f32 %v10914_v10, %v7666_v22 }
0x14d7   :  { %v5105_v48 = vpop.f32.mrf.mxu0 }
0x14d8   :  { %8352 = vtanh.f32 %v5111_v57  ;;  %v5106_v0 = vadd.f32 %v10914_v10, %v5105_v48 }
0x14d9   :  { %v7669_v30 = vpop.f32.mrf.mxu0 }
0x14da   :  { %8354 = vtanh.f32 %v5106_v0  ;;  %v5121_v17 = vadd.f32 %v10914_v10, %v7669_v30 }
0x14db   :  { %v5115_v26 = vpop.f32.mrf.mxu0 }
0x14dc   :  { %8356 = vtanh.f32 %v5121_v17  ;;  %v5116_v47 = vadd.f32 %v10914_v10, %v5115_v26 }
0x14dd   :  { %v8347_v45 = vpop.eup %8346  ;;  %v7672_v1 = vpop.f32.mrf.mxu0 }
0x14de   :  { %v5189_v38 = vmul.f32 %v10965_v6, %v8347_v45  ;;  %8358 = vtanh.f32 %v5116_v47  ;;  %v5131_v51 = vadd.f32 %v10914_v10, %v7672_v1 }
0x14df   :  { %v5125_v35 = vpop.f32.mrf.mxu0 }
0x14e0   :  { %v5267_v63 = vsel %vm315_vm0, %v5189_v38, 0.0  ;;  %8360 = vtanh.f32 %v5131_v51  ;;  %v5126_v3 = vadd.f32 %v10914_v10, %v5125_v35 }
0x14e1   :  { %v8349_v50 = vpop.eup %8348  ;;  %5268 = vadd.xlane.f32.xlu0 %v5267_v63 }
0x14e2   :  { %v5191_v53 = vmul.f32 %v10965_v6, %v8349_v50  ;;  %8362 = vtanh.f32 %v5126_v3 }
0x14e3   :  { %v8351_v49 = vpop.eup %8350  ;;  %8364 = vtanh.f32 %v5086_v24 }
0x14e4   :  { %v5273_v40 = vsel %vm315_vm0, %v5191_v53, 0.0  ;;  %v5190_v20 = vmul.f32 %v10965_v6, %v8351_v49  ;;  %8366 = vtanh.f32 %v5081_v60 }
0x14e5   :  { %v8353_v2 = vpop.eup %8352  ;;  %5274 = vadd.xlane.f32.xlu0 %v5273_v40  ;;  %8368 = vtanh.f32 %v5076_v31 }
0x14e6   :  { %v5270_v21 = vsel %vm315_vm0, %v5190_v20, 0.0  ;;  %v5193_v33 = vmul.f32 %v10965_v6, %v8353_v2  ;;  %8370 = vtanh.f32 %v5071_v58 }
0x14e7   :  { %v8355_v19 = vpop.eup %8354  ;;  %8372 = vtanh.f32 %v5066_v28 }
0x14e8   :  { %v5279_v15 = vsel %vm315_vm0, %v5193_v33, 0.0  ;;  %v5192_v55 = vmul.f32 %v10965_v6, %v8355_v19  ;;  %8374 = vtanh.f32 %v5061_v52 }
0x14e9   :  { %5271 = vadd.xlane.f32.xlu0 %v5270_v21  ;;  %v8357_v37 = vpop.eup %8356  ;;  %8376 = vtanh.f32 %v5056_v8  ;;  %v5728_v21 = vld [vmem:[%s11545_s15] sm:$0xff] }
0x14ea   :  { %v5276_v12 = vsel %vm315_vm0, %v5192_v55, 0.0  ;;  %v5195_v34 = vmul.f32 %v10965_v6, %v8357_v37  ;;  %vm5730_vm2 = vcmp.gt.f32.partialorder %v5728_v21, 1.0  ;;  %vm5734_vm3 = vcmp.gt.f32.partialorder %v5728_v21, 2.0 }
0x14eb   :  { %v8359_v62 = vpop.eup %8358  ;;  %v5732_v19 = vsel %vm5730_vm2, 1, %v11774_v44  ;;  %v5736_v24 = vsel %vm5734_vm3, 1, %v11774_v44  ;;  %vm5740_vm4 = vcmp.gt.f32.partialorder %v5728_v21, 3.0 }
0x14ec   :  { %v5285_v11 = vsel %vm315_vm0, %v5195_v34, 0.0  ;;  %v5194_v14 = vmul.f32 %v10965_v6, %v8359_v62  ;;  %v5742_v55 = vsel %vm5740_vm4, 1, %v11774_v44 }
0x14ed   :  { %5280 = vadd.xlane.f32.xlu0 %v5279_v15  ;;  %v8361_v43 = vpop.eup %8360  ;;  %v5738_v15 = vadd.s32 %v5736_v24, %v5732_v19 }
0x14ee   :  { %v5282_v61 = vsel %vm315_vm0, %v5194_v14, 0.0  ;;  %v5197_v41 = vmul.f32 %v10965_v6, %v8361_v43 }
0x14ef   :  { %v8363_v22 = vpop.eup %8362  ;;  %v5744_v37 = vadd.s32 %v5742_v55, %v5738_v15 }
0x14f0   :  { %v5291_v57 = vsel %vm315_vm0, %v5197_v41, 0.0  ;;  %v5196_v48 = vmul.f32 %v10965_v6, %v8363_v22  ;;  %v8365_v0 = vpop.eup %8364  ;;  %v11224_v22 = vld [vmem:[#allocation2] ss:$0 sm:$0xff] }
0x14f1   :  { %5277 = vadd.xlane.f32.xlu0 %v5276_v12  ;;  %v5188_v17 = vmul.f32 %v10965_v6, %v8365_v0  ;;  %v8367_v45 = vpop.eup %8366  ;;  %v11220_v12 = vpop.xlane.xlu1 %5244 }
0x14f2   :  { %v5288_v30 = vsel %vm315_vm0, %v5196_v48, 0.0  ;;  %v5187_v38 = vmul.f32 %v10965_v6, %v8367_v45  ;;  %v8369_v47 = vpop.eup %8368 }
0x14f3   :  { %v5264_v26 = vsel %vm315_vm0, %v5188_v17, 0.0  ;;  %v5186_v63 = vmul.f32 %v10965_v6, %v8369_v47  ;;  %v8371_v50 = vpop.eup %8370 }
0x14f4   :  { %v5261_v46 = vsel %vm315_vm0, %v5187_v38, 0.0  ;;  %v5185_v53 = vmul.f32 %v10965_v6, %v8371_v50  ;;  %v8373_v49 = vpop.eup %8372 }
0x14f5   :  { %5286 = vadd.xlane.f32.xlu0 %v5285_v11  ;;  %v5258_v1 = vsel %vm315_vm0, %v5186_v63, 0.0  ;;  %v5184_v16 = vmul.f32 %v10965_v6, %v8373_v49  ;;  %v8375_v51 = vpop.eup %8374  ;;  %v11222_v34 = vpop.xlane.xlu1 %5241 }
0x14f6   :  { %v5255_v10 = vsel %vm315_vm0, %v5185_v53, 0.0  ;;  %v5183_v20 = vmul.f32 %v10965_v6, %v8375_v51  ;;  %v8377_v2 = vpop.eup %8376 }
0x14f7   :  { %v5252_v40 = vsel %vm315_vm0, %v5184_v16, 0.0  ;;  %v5182_v3 = vmul.f32 %v10965_v6, %v8377_v2  ;;  %v5751_v6 = vmul.u32 128, %v5744_v37 }
0x14f8   :  { %v5249_v35 = vsel %vm315_vm0, %v5183_v20, 0.0 }
0x14f9   :  { %5283 = vadd.xlane.f32.xlu0 %v5282_v61  ;;  %v5246_v33 = vsel %vm315_vm0, %v5182_v3, 0.0  ;;  %v5753_v60 = vadd.s32 %v5751_v6, %v11022_v39  ;;  %v5239_v62 = vpop.xlane.xlu1 %5238 }
0x14fd   :  { %5292 = vadd.xlane.f32.xlu0 %v5291_v57  ;;  %v5236_v31 = vpop.xlane.xlu1 %5235 }
0x1501   :  { %5289 = vadd.xlane.f32.xlu0 %v5288_v30  ;;  %v5233_v11 = vpop.xlane.xlu1 %5232 }
0x1505   :  { %5265 = vadd.xlane.f32.xlu0 %v5264_v26  ;;  %v5230_v14 = vpop.xlane.xlu1 %5229 }
0x1506   :  { %v5304_v21 = vadd.f32 %v11224_v22, %v5230_v14 }
0x1509   :  { %5262 = vadd.xlane.f32.xlu0 %v5261_v46  ;;  %v5227_v43 = vpop.xlane.xlu1 %5226 }
0x150a   :  { %v5303_v0 = vadd.f32 %v11224_v22, %v5227_v43 }
0x150d   :  { %5259 = vadd.xlane.f32.xlu0 %v5258_v1  ;;  %v5224_v58 = vpop.xlane.xlu1 %5223 }
0x150e   :  { %v5302_v38 = vadd.f32 %v11224_v22, %v5224_v58 }
0x1511   :  { %5256 = vadd.xlane.f32.xlu0 %v5255_v10  ;;  %v5221_v61 = vpop.xlane.xlu1 %5220  ;;  %v5305_v10 = vadd.f32 %v11224_v22, %v5233_v11 }
0x1512   :  { %v5301_v28 = vadd.f32 %v11224_v22, %v5221_v61 }
0x1515   :  { %5253 = vadd.xlane.f32.xlu0 %v5252_v40  ;;  %v5218_v11 = vpop.xlane.xlu1 %5217 }
0x1519   :  { %5250 = vadd.xlane.f32.xlu0 %v5249_v35 }
0x151d   :  { %5247 = vadd.xlane.f32.xlu0 %v5246_v33 }
0x1533   :  { %5756 = vperm.xlu0 %7758, %v5753_v60   ;;  %v5307_v60 = vadd.f32 %v11224_v22, %v5239_v62 }
0x156a   :  { %v5269_v41 = vpop.xlane.xlu0 %5268 }
0x156b   :  { %v5317_v57 = vadd.f32 %v11224_v22, %v5269_v41 }
0x156d   :  { %v5333_v39 = vmax.f32 %v5301_v28, %v5317_v57 }
0x156e   :  { %v5275_v48 = vpop.xlane.xlu0 %5274 }
0x156f   :  { %v5349_v52 = vsub.f32 %v5301_v28, %v5333_v39  ;;  %v5397_v30 = vsub.f32 %v5317_v57, %v5333_v39  ;;  %v5319_v17 = vadd.f32 %v11224_v22, %v5275_v48 }
0x1571   :  { %v5372_v45 = vmul.f32 1.442695, %v5349_v52  ;;  %v5420_v8 = vmul.f32 1.442695, %v5397_v30  ;;  %v5335_v26 = vmax.f32 %v5303_v0, %v5319_v17 }
0x1572   :  { %v5272_v47 = vpop.xlane.xlu0 %5271 }
0x1573   :  { %8378 = vpow2.f32 %v5372_v45  ;;  %v5351_v46 = vsub.f32 %v5303_v0, %v5335_v26  ;;  %v5399_v63 = vsub.f32 %v5319_v17, %v5335_v26  ;;  %v5318_v50 = vadd.f32 %v11224_v22, %v5272_v47  ;;  %v5215_v26 = vpop.xlane.xlu1 %5214 }
0x1574   :  { %8380 = vpow2.f32 %v5420_v8  ;;  %v5306_v0 = vadd.f32 %v11224_v22, %v5236_v31  ;;  %v5309_v31 = vadd.f32 %v11224_v22, %v11220_v12  ;;  %v5308_v12 = vadd.f32 %v11224_v22, %v11222_v34 }
0x1575   :  { %v5376_v1 = vmul.f32 1.442695, %v5351_v46  ;;  %v5424_v53 = vmul.f32 1.442695, %v5399_v63  ;;  %v5334_v49 = vmax.f32 %v5302_v38, %v5318_v50  ;;  %v5300_v34 = vadd.f32 %v11224_v22, %v5218_v11 }
0x1576   :  { %v5281_v16 = vpop.xlane.xlu0 %5280 }
0x1577   :  { %8382 = vpow2.f32 %v5376_v1  ;;  %v5350_v51 = vsub.f32 %v5302_v38, %v5334_v49  ;;  %v5398_v40 = vsub.f32 %v5318_v50, %v5334_v49  ;;  %v5321_v20 = vadd.f32 %v11224_v22, %v5281_v16 }
0x1578   :  { %8384 = vpow2.f32 %v5424_v53 }
0x1579   :  { %v5374_v2 = vmul.f32 1.442695, %v5350_v51  ;;  %v5422_v35 = vmul.f32 1.442695, %v5398_v40  ;;  %v5337_v3 = vmax.f32 %v5305_v10, %v5321_v20 }
0x157a   :  { %v5278_v33 = vpop.xlane.xlu0 %5277 }
0x157b   :  { %8386 = vpow2.f32 %v5374_v2  ;;  %v5353_v19 = vsub.f32 %v5305_v10, %v5337_v3  ;;  %v5401_v24 = vsub.f32 %v5321_v20, %v5337_v3  ;;  %v5320_v15 = vadd.f32 %v11224_v22, %v5278_v33 }
0x157c   :  { %8388 = vpow2.f32 %v5422_v35  ;;  %v5212_v35 = vpop.xlane.xlu1 %5211 }
0x157d   :  { %v5380_v55 = vmul.f32 1.442695, %v5353_v19  ;;  %v5428_v37 = vmul.f32 1.442695, %v5401_v24  ;;  %v5336_v6 = vmax.f32 %v5304_v21, %v5320_v15 }
0x157e   :  { %v5287_v43 = vpop.xlane.xlu0 %5286 }
0x157f   :  { %8390 = vpow2.f32 %v5380_v55  ;;  %v5352_v58 = vsub.f32 %v5304_v21, %v5336_v6  ;;  %v5400_v61 = vsub.f32 %v5320_v15, %v5336_v6  ;;  %v5323_v41 = vadd.f32 %v11224_v22, %v5287_v43 }
0x1580   :  { %v11238_v14 = vpop.eup %8378  ;;  %8392 = vpow2.f32 %v5428_v37 }
0x1581   :  { %v11240_v28 = vpop.eup %8380  ;;  %v5378_v57 = vmul.f32 1.442695, %v5352_v58  ;;  %v5426_v39 = vmul.f32 1.442695, %v5400_v61  ;;  %v5339_v48 = vmax.f32 %v5307_v60, %v5323_v41 }
0x1582   :  { %v5445_v62 = vadd.f32 %v11240_v28, %v11238_v14  ;;  %v5284_v52 = vpop.xlane.xlu0 %5283 }
0x1583   :  { %8394 = vpow2.f32 %v5378_v57  ;;  %v5355_v30 = vsub.f32 %v5307_v60, %v5339_v48  ;;  %v5403_v17 = vsub.f32 %v5323_v41, %v5339_v48  ;;  %v5322_v45 = vadd.f32 %v11224_v22, %v5284_v52  ;;  %v5209_v48 = vpop.xlane.xlu1 %5208 }
0x1584   :  { %v11246_v8 = vpop.eup %8382  ;;  %8396 = vrcp.f32 %v5445_v62 }
0x1585   :  { %v11248_v38 = vpop.eup %8384  ;;  %8398 = vpow2.f32 %v5426_v39  ;;  %v5384_v47 = vmul.f32 1.442695, %v5355_v30  ;;  %v5432_v46 = vmul.f32 1.442695, %v5403_v17  ;;  %v5338_v63 = vmax.f32 %v5306_v0, %v5322_v45 }
0x1586   :  { %v5447_v50 = vadd.f32 %v11248_v38, %v11246_v8  ;;  %v5293_v1 = vpop.xlane.xlu0 %5292 }
0x1587   :  { %8400 = vpow2.f32 %v5384_v47  ;;  %v5354_v53 = vsub.f32 %v5306_v0, %v5338_v63  ;;  %v5402_v49 = vsub.f32 %v5322_v45, %v5338_v63  ;;  %v5325_v10 = vadd.f32 %v11224_v22, %v5293_v1 }
0x1588   :  { %v11255_v16 = vpop.eup %8386  ;;  %8402 = vrcp.f32 %v5447_v50  ;;  %v5299_v1 = vadd.f32 %v11224_v22, %v5215_v26  ;;  %v5298_v26 = vadd.f32 %v11224_v22, %v5212_v35 }
0x1589   :  { %v11257_v51 = vpop.eup %8388  ;;  %8404 = vpow2.f32 %v5432_v46  ;;  %v5382_v40 = vmul.f32 1.442695, %v5354_v53  ;;  %v5430_v20 = vmul.f32 1.442695, %v5402_v49  ;;  %v5341_v2 = vmax.f32 %v5309_v31, %v5325_v10 }
0x158a   :  { %v5446_v3 = vadd.f32 %v11257_v51, %v11255_v16  ;;  %v5290_v21 = vpop.xlane.xlu0 %5289 }
0x158b   :  { %8406 = vpow2.f32 %v5382_v40  ;;  %v5357_v33 = vsub.f32 %v5309_v31, %v5341_v2  ;;  %v5405_v19 = vsub.f32 %v5325_v10, %v5341_v2  ;;  %v5324_v24 = vadd.f32 %v11224_v22, %v5290_v21  ;;  %v5206_v40 = vpop.xlane.xlu1 %5205 }
0x158c   :  { %v11264_v15 = vpop.eup %8390  ;;  %8408 = vrcp.f32 %v5446_v3 }
0x158d   :  { %v11266_v55 = vpop.eup %8392  ;;  %8410 = vpow2.f32 %v5430_v20  ;;  %v5388_v37 = vmul.f32 1.442695, %v5357_v33  ;;  %v5436_v6 = vmul.f32 1.442695, %v5405_v19  ;;  %v5340_v60 = vmax.f32 %v5308_v12, %v5324_v24 }
0x158e   :  { %v5449_v43 = vadd.f32 %v11266_v55, %v11264_v15  ;;  %v5266_v58 = vpop.xlane.xlu0 %5265 }
0x158f   :  { %8412 = vpow2.f32 %v5388_v37  ;;  %v5356_v61 = vsub.f32 %v5308_v12, %v5340_v60  ;;  %v5404_v41 = vsub.f32 %v5324_v24, %v5340_v60  ;;  %v5316_v57 = vadd.f32 %v11224_v22, %v5266_v58 }
0x1590   :  { %v11272_v39 = vpop.eup %8394  ;;  %8414 = vrcp.f32 %v5449_v43 }
0x1591   :  { %v8397_v0 = vpop.eup %8396  ;;  %8416 = vpow2.f32 %v5436_v6  ;;  %v5386_v62 = vmul.f32 1.442695, %v5356_v61  ;;  %v5434_v52 = vmul.f32 1.442695, %v5404_v41  ;;  %v5332_v30 = vmax.f32 %v5300_v34, %v5316_v57 }
0x1592   :  { %v11274_v17 = vpop.eup %8398  ;;  %v5263_v11 = vpop.xlane.xlu0 %5262  ;;  %v5605_v45 = vmul.f32 %v8397_v0, %v11240_v28  ;;  %v5493_v47 = vmul.f32 %v8397_v0, %v11238_v14 }
0x1593   :  { %v5448_v46 = vadd.f32 %v11274_v17, %v11272_v39  ;;  %8418 = vpow2.f32 %v5386_v62  ;;  %v5348_v63 = vsub.f32 %v5300_v34, %v5332_v30  ;;  %v5396_v31 = vsub.f32 %v5316_v57, %v5332_v30 }
0x1594   :  { %v11280_v50 = vpop.eup %8400  ;;  %8420 = vpow2.f32 %v5434_v52  ;;  %v5315_v53 = vadd.f32 %v11224_v22, %v5263_v11  ;;  %5651 = vperm.xlu1 %7759, %v5605_v45   ;;  %5539 = vperm.xlu0 %7758, %v5493_v47  }
0x1595   :  { %v8403_v49 = vpop.eup %8402  ;;  %8422 = vrcp.f32 %v5448_v46  ;;  %v5370_v28 = vmul.f32 1.442695, %v5348_v63  ;;  %v5418_v10 = vmul.f32 1.442695, %v5396_v31 }
0x1596   :  { %v11284_v14 = vpop.eup %8404  ;;  %v5331_v20 = vmax.f32 %v5299_v1, %v5315_v53  ;;  %v5260_v2 = vpop.xlane.xlu0 %5259  ;;  %v5607_v12 = vmul.f32 %v8403_v49, %v11248_v38  ;;  %v5495_v3 = vmul.f32 %v8403_v49, %v11246_v8  ;;  %v5297_v38 = vadd.f32 %v11224_v22, %v5209_v48 }
0x1597   :  { %v5451_v21 = vadd.f32 %v11284_v14, %v11280_v50  ;;  %8424 = vpow2.f32 %v5370_v28  ;;  %v5314_v33 = vadd.f32 %v11224_v22, %v5260_v2  ;;  %v5203_v48 = vpop.xlane.xlu1 %5202  ;;  %v5296_v28 = vadd.f32 %v11224_v22, %v5206_v40 }
0x1598   :  { %v11292_v19 = vpop.eup %8406  ;;  %8426 = vpow2.f32 %v5418_v10  ;;  %v5347_v24 = vsub.f32 %v5299_v1, %v5331_v20  ;;  %v5395_v37 = vsub.f32 %v5315_v53, %v5331_v20  ;;  %5661 = vperm.xlu1 %7759, %v5607_v12   ;;  %5549 = vperm.xlu0 %7758, %v5495_v3   ;;  %v5295_v12 = vadd.f32 %v11224_v22, %v5203_v48 }
0x1599   :  { %v8409_v6 = vpop.eup %8408  ;;  %8428 = vrcp.f32 %v5451_v21  ;;  %v5330_v8 = vmax.f32 %v5298_v26, %v5314_v33 }
0x159a   :  { %v11295_v60 = vpop.eup %8410  ;;  %v5368_v35 = vmul.f32 1.442695, %v5347_v24  ;;  %v5416_v34 = vmul.f32 1.442695, %v5395_v37  ;;  %v5257_v43 = vpop.xlane.xlu0 %5256  ;;  %v5606_v58 = vmul.f32 %v8409_v6, %v11257_v51  ;;  %v5494_v61 = vmul.f32 %v8409_v6, %v11255_v16 }
0x159b   :  { %v5450_v41 = vadd.f32 %v11295_v60, %v11292_v19  ;;  %v5346_v57 = vsub.f32 %v5298_v26, %v5330_v8  ;;  %v5394_v0 = vsub.f32 %v5314_v33, %v5330_v8  ;;  %v5313_v62 = vadd.f32 %v11224_v22, %v5257_v43  ;;  %v5200_v3 = vpop.xlane.xlu1 %5199 }
0x159c   :  { %v11302_v52 = vpop.eup %8412  ;;  %8430 = vpow2.f32 %v5368_v35  ;;  %5656 = vperm.xlu1 %7759, %v5606_v58   ;;  %5544 = vperm.xlu0 %7758, %v5494_v61   ;;  %v5746_v35 = vlaneseq  ;;  %v5294_v43 = vadd.f32 %v11224_v22, %v5200_v3 }
0x159d   :  { %v8415_v30 = vpop.eup %8414  ;;  %8432 = vrcp.f32 %v5450_v41  ;;  %v5366_v11 = vmul.f32 1.442695, %v5346_v57  ;;  %v5414_v45 = vmul.f32 1.442695, %v5394_v0  ;;  %v5329_v51 = vmax.f32 %v5297_v38, %v5313_v62 }
0x159e   :  { %v11304_v47 = vpop.eup %8416  ;;  %8434 = vpow2.f32 %v5416_v34  ;;  %v5254_v16 = vpop.xlane.xlu0 %5253  ;;  %v5609_v46 = vmul.f32 %v8415_v30, %v11266_v55  ;;  %v5497_v63 = vmul.f32 %v8415_v30, %v11264_v15 }
0x159f   :  { %v5453_v31 = vadd.f32 %v11304_v47, %v11302_v52  ;;  %8436 = vpow2.f32 %v5366_v11  ;;  %v5345_v1 = vsub.f32 %v5297_v38, %v5329_v51  ;;  %v5393_v53 = vsub.f32 %v5313_v62, %v5329_v51 }
0x15a0   :  { %v11310_v49 = vpop.eup %8418  ;;  %8438 = vpow2.f32 %v5414_v45  ;;  %v5312_v10 = vadd.f32 %v11224_v22, %v5254_v16  ;;  %5671 = vperm.xlu1 %7759, %v5609_v46   ;;  %5559 = vperm.xlu0 %7758, %v5497_v63   ;;  %v11332_v45 = vand.u32 127, %v5746_v35 }
0x15a1   :  { %v11314_v20 = vpop.eup %8420  ;;  %8440 = vrcp.f32 %v5453_v31  ;;  %v5364_v55 = vmul.f32 1.442695, %v5345_v1  ;;  %v5412_v15 = vmul.f32 1.442695, %v5393_v53 }
0x15a2   :  { %v8423_v2 = vpop.eup %8422  ;;  %v5452_v26 = vadd.f32 %v11314_v20, %v11310_v49  ;;  %v5328_v21 = vmax.f32 %v5296_v28, %v5312_v10  ;;  %v5251_v33 = vpop.xlane.xlu0 %5250 }
0x15a3   :  { %8442 = vpow2.f32 %v5364_v55  ;;  %v5311_v40 = vadd.f32 %v11224_v22, %v5251_v33  ;;  %v5608_v24 = vmul.f32 %v8423_v2, %v11274_v17  ;;  %v5496_v37 = vmul.f32 %v8423_v2, %v11272_v39 }
0x15a4   :  { %v11322_v6 = vpop.eup %8424  ;;  %v5344_v38 = vsub.f32 %v5296_v28, %v5328_v21  ;;  %v5392_v8 = vsub.f32 %v5312_v10, %v5328_v21  ;;  %8444 = vpow2.f32 %v5412_v15  ;;  %v11339_v28 = vpop.permute.xlu1 %5774  ;;  %v11345_v15 = vadd.s32 128, %v11332_v45 }
0x15a5   :  { %v11324_v34 = vpop.eup %8426  ;;  %v5327_v58 = vmax.f32 %v5295_v12, %v5311_v40  ;;  %5666 = vperm.xlu1 %7759, %v5608_v24   ;;  %5554 = vperm.xlu0 %7758, %v5496_v37   ;;  %8446 = vrcp.f32 %v5452_v26  ;;  %vm5779_vm5 = vcmp.eq.s32.totalorder %v11339_v28, 1  ;;  %v6042_v28 = vld [vmem:[#allocation16] sm:$0xff] }
0x15a6   :  { %v8429_v61 = vpop.eup %8428  ;;  %v5444_v17 = vadd.f32 %v11324_v34, %v11322_v6  ;;  %v5362_v41 = vmul.f32 1.442695, %v5344_v38  ;;  %v5410_v39 = vmul.f32 1.442695, %v5392_v8  ;;  %v5248_v57 = vpop.xlane.xlu0 %5247 }
0x15a7   :  { %v5343_v0 = vsub.f32 %v5295_v12, %v5327_v58  ;;  %v5391_v62 = vsub.f32 %v5311_v40, %v5327_v58  ;;  %v5310_v48 = vadd.f32 %v11224_v22, %v5248_v57  ;;  %v5611_v30 = vmul.f32 %v8429_v61, %v11284_v14 }
0x15a8   :  { %8448 = vrcp.f32 %v5444_v17  ;;  %v5499_v11 = vmul.f32 %v8429_v61, %v11280_v50 }
0x15a9   :  { %v11334_v51 = vpop.eup %8430  ;;  %8450 = vpow2.f32 %v5362_v41  ;;  %v5360_v16 = vmul.f32 1.442695, %v5343_v0  ;;  %v5408_v46 = vmul.f32 1.442695, %v5391_v62  ;;  %v5326_v63 = vmax.f32 %v5294_v43, %v5310_v48  ;;  %5681 = vperm.xlu1 %7759, %v5611_v30  }
0x15aa   :  { %v8433_v31 = vpop.eup %8432  ;;  %8452 = vpow2.f32 %v5410_v39  ;;  %5569 = vperm.xlu0 %7758, %v5499_v11   ;;  %v5729_v39 = vld [vmem:[%s11545_s15 + $0x8] sm:$0xff] }
0x15ab   :  { %v11336_v1 = vpop.eup %8434  ;;  %8454 = vpow2.f32 %v5360_v16  ;;  %v5342_v22 = vsub.f32 %v5294_v43, %v5326_v63  ;;  %v5390_v14 = vsub.f32 %v5310_v48, %v5326_v63  ;;  %v5610_v53 = vmul.f32 %v8433_v31, %v11295_v60 }
0x15ac   :  { %v8437_v50 = vpop.eup %8436  ;;  %v5443_v10 = vadd.f32 %v11336_v1, %v11334_v51  ;;  %8456 = vpow2.f32 %v5408_v46  ;;  %v5498_v55 = vmul.f32 %v8433_v31, %v11292_v19  ;;  %vm5731_vm10 = vcmp.gt.f32.partialorder %v5729_v39, 1.0 }
0x15ad   :  { %v11347_v2 = vpop.eup %8438  ;;  %v5358_v12 = vmul.f32 1.442695, %v5342_v22  ;;  %v5406_v3 = vmul.f32 1.442695, %v5390_v14  ;;  %5676 = vperm.xlu1 %7759, %v5610_v53   ;;  %vm5735_vm11 = vcmp.gt.f32.partialorder %v5729_v39, 2.0  ;;  %v5733_v46 = vsel %vm5731_vm10, 1, %v11774_v44 }
0x15ae   :  { %v8441_v26 = vpop.eup %8440  ;;  %8458 = vrcp.f32 %v5443_v10  ;;  %v5442_v60 = vadd.f32 %v11347_v2, %v8437_v50  ;;  %5564 = vperm.xlu0 %7758, %v5498_v55   ;;  %v11350_v21 = vpop.permute.xlu0 %5756  ;;  %v5737_v63 = vsel %vm5735_vm11, 1, %v11774_v44  ;;  %vm5741_vm12 = vcmp.gt.f32.partialorder %v5729_v39, 3.0 }
0x15af   :  { %8460 = vpow2.f32 %v5358_v12  ;;  %vm5761_vm6 = vcmp.eq.s32.totalorder %v11332_v45, %v11350_v21  ;;  %v5613_v19 = vmul.f32 %v8441_v26, %v11304_v47  ;;  %v5501_v40 = vmul.f32 %v8441_v26, %v11302_v52 }
0x15b0   :  { %v8443_v33 = vpop.eup %8442  ;;  %8462 = vrcp.f32 %v5442_v60  ;;  %vm5762_vm7 = vcmp.eq.s32.totalorder %v11345_v15, %v11350_v21  ;;  %vm5781_vm8 = vmand %vm5761_vm6, %vm5779_vm5  ;;  %v8806_v47 = vmov 1.0   ;;  %v5743_v53 = vsel %vm5741_vm12, 1, %v11774_v44 }
0x15b1   :  { %8464 = vpow2.f32 %v5406_v3  ;;  %v8445_v24 = vpop.eup %8444  ;;  %5579 = vperm.xlu1 %7759, %v5501_v40   ;;  %vm5782_vm9 = vmand %vm5762_vm7, %vm5779_vm5 }
0x15b2   :  { %5691 = vperm.xlu0 %7758, %v5613_v19   ;;  %v8447_v37 = vpop.eup %8446  ;;  %v5441_v38 = vadd.f32 %v8445_v24, %v8443_v33  ;;  %6689 = vmatprep.mubr.msk.f32.mxu1 %vm5782_vm9, %v8806_v47 }
0x15b3   :  { %6690 = vmatmul.mubr.msk.f32.vlgmr.msra.gmra.mxu1 %vm5781_vm8, %v8806_v47  ;;  %v5500_v0 = vmul.f32 %v8447_v37, %v11310_v49  ;;  %v5612_v11 = vmul.f32 %v8447_v37, %v11314_v20 }
0x15b4   :  { %8466 = vrcp.f32 %v5441_v38 }
0x15b5   :  { %v8449_v52 = vpop.eup %8448 }
0x15b6   :  { %v8451_v8 = vpop.eup %8450  ;;  %v5604_v35 = vmul.f32 %v8449_v52, %v11324_v34  ;;  %v5492_v43 = vmul.f32 %v8449_v52, %v11322_v6 }
0x15b7   :  { %v8453_v58 = vpop.eup %8452 }
0x15b8   :  { %v8455_v61 = vpop.eup %8454  ;;  %v5440_v17 = vadd.f32 %v8453_v58, %v8451_v8  ;;  %5646 = vperm.xlu1 %7759, %v5604_v35   ;;  %5534 = vperm.xlu0 %7758, %v5492_v43  }
0x15b9   :  { %v8457_v41 = vpop.eup %8456 }
0x15ba   :  { %8468 = vrcp.f32 %v5440_v17  ;;  %v5439_v57 = vadd.f32 %v8457_v41, %v8455_v61 }
0x15bb   :  { %v8459_v62 = vpop.eup %8458 }
0x15bc   :  { %v8461_v48 = vpop.eup %8460  ;;  %8470 = vrcp.f32 %v5439_v57  ;;  %5574 = vperm.xlu1 %7759, %v5500_v0   ;;  %v5491_v6 = vmul.f32 %v8459_v62, %v11334_v51  ;;  %v5603_v22 = vmul.f32 %v8459_v62, %v11336_v1  ;;  %v5739_v51 = vadd.s32 %v5737_v63, %v5733_v46  ;;  %v5727_v1 = vld [vmem:[%s11544_s14 + $0x8] sm:$0xff] }
0x15bd   :  { %v8463_v34 = vpop.eup %8462  ;;  %vm5770_vm13 = vcmp.ne.s32.totalorder %v5727_v1, 0 }
0x15be   :  { %v8465_v30 = vpop.eup %8464  ;;  %5529 = vperm.xlu0 %7758, %v5491_v6   ;;  %v5490_v16 = vmul.f32 %v8463_v34, %v8437_v50  ;;  %v5602_v20 = vmul.f32 %v8463_v34, %v11347_v2  ;;  %v5745_v50 = vadd.s32 %v5743_v53, %v5739_v51  ;;  %v5772_v38 = vsel %vm5770_vm13, 1, %v11774_v44 }
0x15bf   :  { %v5438_v31 = vadd.f32 %v8465_v30, %v8461_v48 }
0x15c0   :  { %5686 = vperm.xlu1 %7759, %v5612_v11   ;;  %v5752_v60 = vmul.u32 128, %v5745_v50 }
0x15c1   :  { %v8467_v49 = vpop.eup %8466  ;;  %8472 = vrcp.f32 %v5438_v31 }
0x15c2   :  { %5524 = vperm.xlu0 %7758, %v5490_v16   ;;  %v5489_v14 = vmul.f32 %v8467_v49, %v8443_v33  ;;  %v5601_v3 = vmul.f32 %v8467_v49, %v8445_v24  ;;  %v5754_v33 = vadd.s32 %v5752_v60, %v5727_v1  ;;  %v8514_v24 = vld [vmem:[%s11544_s14] sm:$0xff]  ;;  %v11782_v16 = vld [vmem:[#allocation66_spill] sm:$0xff] }
0x15c4   :  { %5641 = vperm.xlu1 %7759, %v5603_v22  }
0x15c6   :  { %5519 = vperm.xlu0 %7758, %v5489_v14  }
0x15c7   :  { %v8469_v10 = vpop.eup %8468 }
0x15c8   :  { %5636 = vperm.xlu1 %7759, %v5602_v20   ;;  %v5488_v55 = vmul.f32 %v8469_v10, %v8451_v8  ;;  %v5600_v19 = vmul.f32 %v8469_v10, %v8453_v58  ;;  %v11783_v20 = vld [vmem:[#allocation64_spill] sm:$0xff]  ;;  %v11784_v10 = vld [vmem:[#allocation67_spill] sm:$0xff] }
0x15c9   :  { %v8471_v12 = vpop.eup %8470 }
0x15ca   :  { %5514 = vperm.xlu0 %7758, %v5488_v55   ;;  %v5487_v26 = vmul.f32 %v8471_v12, %v8455_v61  ;;  %v5599_v2 = vmul.f32 %v8471_v12, %v8457_v41 }
0x15cc   :  { %5631 = vperm.xlu1 %7759, %v5601_v3  }
0x15ce   :  { %5509 = vperm.xlu0 %7758, %v5487_v26   ;;  %v8473_v40 = vpop.eup %8472  ;;  %v11785_v26 = vld [vmem:[#allocation63_spill] sm:$0xff] }
0x15cf   :  { %v5486_v37 = vmul.f32 %v8473_v40, %v8461_v48  ;;  %v5598_v52 = vmul.f32 %v8473_v40, %v8465_v30  ;;  %v11786_v40 = vld [vmem:[#allocation68_spill] sm:$0xff] }
0x15d0   :  { %5626 = vperm.xlu1 %7759, %v5600_v19  }
0x15d2   :  { %5759 = vperm.xlu0 %7758, %v5754_v33  }
0x15d4   :  { %5621 = vperm.xlu1 %7759, %v5599_v2  }
0x15d6   :  { %5504 = vperm.xlu0 %7758, %v5486_v37  }
0x15d8   :  { %5777 = vperm.xlu1 %7759, %v5772_v38  }
0x15da   :  { %5956 = vperm.xlu0 %7758, %v8514_v24   ;;  %v11787_v24 = vld [vmem:[#allocation65_spill] sm:$0xff] }
0x15dc   :  { %5616 = vperm.xlu1 %7759, %v5598_v52  }
0x15e0   :  { %5959 = vperm.xlu1 %7759, %v5727_v1  }
0x160f   :  { %v5652_v8 = vpop.permute.xlu1 %5651  ;;  %v5540_v35 = vpop.permute.xlu0 %5539 }
0x1613   :  { %v5662_v43 = vpop.permute.xlu1 %5661  ;;  %v5550_v58 = vpop.permute.xlu0 %5549 }
0x1617   :  { %v5657_v61 = vpop.permute.xlu1 %5656  ;;  %v5545_v17 = vpop.permute.xlu0 %5544 }
0x161b   :  { %v5672_v41 = vpop.permute.xlu1 %5671  ;;  %v5560_v39 = vpop.permute.xlu0 %5559 }
0x161c   :  { %v5705_v33 = vmul.f32 %v11129_v5, %v5672_v41  ;;  %v5593_v2 = vmul.f32 %v5560_v39, %v11786_v40 }
0x161e   :  { %v5721_v41 = vadd.f32 %v5705_v33, %v5593_v2  ;;  %v11799_v2 = vld [vmem:[#allocation59_spill] sm:$0xff] }
0x1620   :  { %v5667_v57 = vpop.permute.xlu1 %5666  ;;  %v5555_v44 = vpop.permute.xlu0 %5554 }
0x1621   :  { %v5704_v38 = vmul.f32 %v5667_v57, %v11131_v18 }
0x1624   :  { %v5682_v0 = vpop.permute.xlu1 %5681 }
0x1625   :  { %v5570_v62 = vpop.permute.xlu0 %5569  ;;  %v5707_v53 = vmul.f32 %v11135_v27, %v5682_v0  ;;  %v5703_v0 = vmul.f32 %v11119_v36, %v5662_v43 }
0x1626   :  { %v5595_v50 = vmul.f32 %v5570_v62, %v11783_v20  ;;  %v11788_v62 = vld [vmem:[#allocation62_spill] sm:$0xff] }
0x1627   :  { %v5591_v5 = vmul.f32 %v5550_v58, %v11788_v62 }
0x1628   :  { %v5677_v48 = vpop.permute.xlu1 %5676  ;;  %v5723_v37 = vadd.f32 %v5707_v53, %v5595_v50  ;;  %v11794_v50 = vld [vmem:[#allocation54_spill] sm:$0xff] }
0x1629   :  { %v5565_v6 = vpop.permute.xlu0 %5564  ;;  %v5719_v43 = vadd.f32 %v5703_v0, %v5591_v5 }
0x162a   :  { %v5594_v60 = vmul.f32 %v5565_v6, %v11785_v26  ;;  %v11789_v6 = vld [vmem:[#allocation69_spill] sm:$0xff] }
0x162b   :  { %v5590_v18 = vmul.f32 %v5545_v17, %v11789_v6 }
0x162c   :  { %v5580_v34 = vpop.permute.xlu1 %5579 }
0x162d   :  { %v5692_v11 = vpop.permute.xlu0 %5691  ;;  %v5597_v30 = vmul.f32 %v5580_v34, %v11782_v16  ;;  %v5701_v34 = vmul.f32 %v11111_v32, %v5652_v8 }
0x162e   :  { %v5709_v46 = vmul.f32 %v11143_v54, %v5692_v11  ;;  %v5706_v54 = vmul.f32 %v5677_v48, %v11139_v23  ;;  %v5702_v48 = vmul.f32 %v5657_v61, %v11123_v13  ;;  %v11790_v11 = vld [vmem:[#allocation55_spill] sm:$0xff]  ;;  %v11791_v13 = vld [vmem:[#allocation70_spill] sm:$0xff] }
0x162f   :  { %v5589_v36 = vmul.f32 %v5540_v35, %v11790_v11  ;;  %v11792_v35 = vld [vmem:[#allocation61_spill] sm:$0xff] }
0x1630   :  { %v5725_v63 = vadd.f32 %v5709_v46, %v5597_v30  ;;  %v5722_v52 = vadd.f32 %v5706_v54, %v5594_v60  ;;  %v11795_v54 = vld [vmem:[#allocation60_spill] sm:$0xff] }
0x1631   :  { %v5717_v46 = vadd.f32 %v5701_v34, %v5589_v36 }
0x1632   :  { %7059 = vmatprep.subr.mxu1 %v5725_v63 }
0x1633   :  { %7060 = vmatpush3.msra.mxu1 %v11782_v16  ;;  %v5647_v31 = vpop.permute.xlu1 %5646  ;;  %v5535_v49 = vpop.permute.xlu0 %5534  ;;  %v5718_v16 = vadd.f32 %v5702_v48, %v5590_v18 }
0x1634   :  { %v5700_v30 = vmul.f32 %v5647_v31, %v11115_v29  ;;  %v5588_v61 = vmul.f32 %v5535_v49, %v11791_v13  ;;  %v11793_v31 = vld [vmem:[#allocation53_spill] sm:$0xff] }
0x1636   :  { %v5716_v8 = vadd.f32 %v5700_v30, %v5588_v61 }
0x1637   :  { %v5575_v22 = vpop.permute.xlu1 %5574 }
0x1638   :  { %v5596_v55 = vmul.f32 %v5575_v22, %v11784_v10 }
0x1639   :  { %v5530_v51 = vpop.permute.xlu0 %5529 }
0x163a   :  { %v5587_v22 = vmul.f32 %v5530_v51, %v11792_v35 }
0x163b   :  { %v5687_v14 = vpop.permute.xlu1 %5686 }
0x163c   :  { %v5708_v12 = vmul.f32 %v5687_v14, %v11147_v9  ;;  %v5592_v9 = vmul.f32 %v5555_v44, %v11787_v24 }
0x163d   :  { %v5525_v3 = vpop.permute.xlu0 %5524 }
0x163e   :  { %v5724_v1 = vadd.f32 %v5708_v12, %v5596_v55  ;;  %v5720_v57 = vadd.f32 %v5704_v38, %v5592_v9  ;;  %v5586_v49 = vmul.f32 %v5525_v3, %v11793_v31  ;;  %v6043_v9 = vld [vmem:[#allocation16 + $0x8] sm:$0xff] }
0x163f   :  { %v5642_v19 = vpop.permute.xlu1 %5641 }
0x1640   :  { %7061 = vmatprep.subr.mxu1 %v5724_v1  ;;  %v5699_v63 = vmul.f32 %v11105_v25, %v5642_v19  ;;  %v11798_v19 = vld [vmem:[#allocation51_spill] sm:$0xff] }
0x1641   :  { %v5520_v27 = vpop.permute.xlu0 %5519  ;;  %7062 = vmatpush3.msra.mxu1 %v11784_v10 }
0x1642   :  { %7063 = vmatprep.subr.mxu1 %v5723_v37  ;;  %v5715_v53 = vadd.f32 %v5699_v63, %v5587_v22  ;;  %v5585_v10 = vmul.f32 %v5520_v27, %v11794_v50  ;;  %v6706_v22 = vld [vmem:[#allocation19] ss:$0 sm:$0xff] }
0x1643   :  { %v5637_v23 = vpop.permute.xlu1 %5636  ;;  %7064 = vmatpush3.msra.mxu1 %v11783_v20 }
0x1644   :  { %7065 = vmatprep.subr.mxu1 %v5722_v52  ;;  %v5698_v14 = vmul.f32 %v5637_v23, %v11107_v59  ;;  %v5750_v59 = vadd.s32 384, %v11332_v45 }
0x1645   :  { %v5515_v39 = vpop.permute.xlu0 %5514  ;;  %7066 = vmatpush3.msra.mxu1 %v11785_v26 }
0x1646   :  { %7067 = vmatprep.subr.mxu1 %v5721_v41  ;;  %v5714_v55 = vadd.f32 %v5698_v14, %v5586_v49  ;;  %v5584_v3 = vmul.f32 %v5515_v39, %v11795_v54  ;;  %vm5764_vm4 = vcmp.eq.s32.totalorder %v5750_v59, %v11350_v21 }
0x1647   :  { %v5632_v44 = vpop.permute.xlu1 %5631  ;;  %7068 = vmatpush3.msra.mxu1 %v11786_v40  ;;  %vm5784_vm7 = vmand %vm5764_vm4, %vm5779_vm5 }
0x1648   :  { %7069 = vmatprep.subr.mxu1 %v5720_v57  ;;  %v5697_v20 = vmul.f32 %v11095_v42, %v5632_v44 }
0x1649   :  { %v5510_v58 = vpop.permute.xlu0 %5509  ;;  %7070 = vmatpush3.msra.mxu1 %v11787_v24 }
0x164a   :  { %7071 = vmatprep.subr.mxu1 %v5719_v43  ;;  %v5713_v26 = vadd.f32 %v5697_v20, %v5585_v10  ;;  %v5583_v33 = vmul.f32 %v5510_v58, %v11798_v19  ;;  %v6701_v58 = vld [vmem:[#allocation18] ss:$0 sm:$0xff] }
0x164b   :  { %v5627_v17 = vpop.permute.xlu1 %5626  ;;  %7072 = vmatpush3.msra.mxu1 %v11788_v62 }
0x164c   :  { %7073 = vmatprep.subr.mxu1 %v5718_v16  ;;  %v5696_v51 = vmul.f32 %v5627_v17, %v11099_v56 }
0x164d   :  { %v11413_v32 = vpop.permute.xlu0 %5759  ;;  %7074 = vmatpush3.msra.mxu1 %v11789_v6 }
0x164e   :  { %7075 = vmatprep.subr.mxu1 %v5717_v46  ;;  %vm5765_vm15 = vcmp.eq.s32.totalorder %v11332_v45, %v11413_v32  ;;  %v5712_v56 = vadd.f32 %v5696_v51, %v5584_v3  ;;  %vm5766_vm3 = vcmp.eq.s32.totalorder %v11345_v15, %v11413_v32  ;;  %vm5768_vm11 = vcmp.eq.s32.totalorder %v5750_v59, %v11413_v32  ;;  %v6707_v51 = vld [vmem:[#allocation3] ss:$0 sm:$0xff] }
0x164f   :  { %v5622_v29 = vpop.permute.xlu1 %5621  ;;  %7076 = vmatpush3.msra.mxu1 %v11790_v11 }
0x1650   :  { %7077 = vmatprep.subr.mxu1 %v5716_v8  ;;  %v5695_v42 = vmul.f32 %v11089_v4, %v5622_v29  ;;  %v5749_v4 = vadd.s32 256, %v11332_v45 }
0x1651   :  { %v5505_v25 = vpop.permute.xlu0 %5504  ;;  %7078 = vmatpush3.msra.mxu1 %v11791_v13 }
0x1652   :  { %7079 = vmatprep.subr.mxu1 %v5715_v53  ;;  %v5582_v37 = vmul.f32 %v5505_v25, %v11799_v2  ;;  %v5711_v27 = vadd.f32 %v5695_v42, %v5583_v33  ;;  %vm5763_vm8 = vcmp.eq.s32.totalorder %v5749_v4, %v11350_v21  ;;  %v6044_v21 = vld [vmem:[#allocation16 + $0x10] sm:$0xff]  ;;  %vm5767_vm13 = vcmp.eq.s32.totalorder %v5749_v4, %v11413_v32 }
0x1653   :  { %v5778_v12 = vpop.permute.xlu1 %5777  ;;  %7080 = vmatpush3.msra.mxu1 %v11792_v35  ;;  %vm5783_vm10 = vmand %vm5763_vm8, %vm5779_vm5  ;;  %vm6332_vm5 = vcmask 130048  }
0x1654   :  { %vm5780_vm14 = vcmp.eq.s32.totalorder %v5778_v12, 1  ;;  %7081 = vmatprep.subr.mxu1 %v5714_v55 }
0x1655   :  { %v11430_v60 = vpop.permute.xlu0 %5956  ;;  %7082 = vmatpush3.msra.mxu1 %v11793_v31  ;;  %vm11434_vm1 = vmand %vm5765_vm15, %vm5780_vm14 }
0x1656   :  { %vm5961_vm2 = vcmp.eq.s32.totalorder %v11332_v45, %v11430_v60  ;;  %7083 = vmatprep.subr.mxu1 %v5713_v26  ;;  %vm5786_vm6 = vmand %vm5766_vm3, %vm5780_vm14 }
0x1657   :  { %7705 = vmatprep.mubr.msk.f32.mxu0 %vm5961_vm2, %v8806_v47  ;;  %v5617_v40 = vpop.permute.xlu1 %5616  ;;  %7084 = vmatpush3.msra.mxu1 %v11794_v50  ;;  %vm5788_vm12 = vmand %vm5768_vm11, %vm5780_vm14 }
0x1658   :  { %6691 = vmatprep.mubr.msk.f32.mxu1 %vm5786_vm6, %v8806_v47  ;;  %v5694_v15 = vmul.f32 %v5617_v40, %v11091_v7  ;;  %7085 = vmatprep.subr.mxu1 %v5712_v56  ;;  %v6045_v7 = vld [vmem:[#allocation16 + $0x18] sm:$0xff]  ;;  %vm5787_vm15 = vmand %vm5767_vm13, %vm5780_vm14 }
0x1659   :  { %6692 = vmatmul.mubr.msk.f32.gmra.mxu1 %vm11434_vm1, %v8806_v47  ;;  %vm6416_vm1 = vcmp.eq.s32.totalorder %v11332_v45, 0 }
0x165a   :  { %v5710_v38 = vadd.f32 %v5694_v15, %v5582_v37  ;;  %6693 = vmatprep.mubr.msk.f32.mxu1 %vm5784_vm7, %v8806_v47  ;;  %7086 = vmatpush3.msra.mxu1 %v11795_v54 }
0x165b   :  { %7087 = vmatprep.subr.mxu1 %v5711_v27  ;;  %v5960_v24 = vpop.permute.xlu1 %5959 }
0x165c   :  { %vm5962_vm9 = vcmp.eq.s32.totalorder %v11332_v45, %v5960_v24  ;;  %7088 = vmatpush3.msra.mxu1 %v11798_v19 }
0x165d   :  { %7089 = vmatprep.subr.mxu1 %v5710_v38  ;;  %7706 = vmatmul.mubr.msk.f32.vlgmr.msra.gmra.mxu0 %vm5962_vm9, %v8806_v47 }
0x165e   :  { %7090 = vmatpush3.msra.mxu1 %v11799_v2 }
0x165f   :  { %6694 = vmatmul.mubr.msk.f32.vlgmr.msra.gmra.mxu1 %vm5783_vm10, %v8806_v47  ;;  %7708 = vmatprep.subr.mxu1 %v6045_v7 }
0x1660   :  { %6695 = vmatprep.mubr.msk.f32.mxu1 %vm5788_vm12, %v8806_v47  ;;  %7709 = vmatpush3.msra.mxu1 %v6045_v7 }
0x1661   :  { %7710 = vmatprep.subr.mxu1 %v6044_v21 }
0x1662   :  { %7711 = vmatpush3.msra.mxu1 %v6044_v21 }
0x1663   :  { %6696 = vmatmul.mubr.msk.f32.gmra.mxu1 %vm5787_vm15, %v8806_v47  ;;  %7712 = vmatprep.subr.mxu1 %v6043_v9 }
0x1664   :  { %7713 = vmatpush3.msra.mxu1 %v6043_v9 }
0x1665   :  { %7714 = vmatprep.subr.mxu1 %v6042_v28 }
0x1666   :  { %7715 = vmatpush3.msra.mxu1 %v6042_v28 }
0x1667   :  { %7733 = vmatprep.subr.msk.mxu1 %vm5962_vm9, %v8806_v47 }
0x1673   :  { %v7053_v52 = vpop.f32.mrf.mxu1 }
0x1675   :  { %v7054_v23 = vpop.f32.mrf.mxu1 }
0x1676   :  { %v7055_v39 = vadd.f32 %v7054_v23, %v7053_v52 }
0x1719   :  { %v7056_v0 = vpop.f32.mrf.mxu1 }
0x171b   :  { %v7057_v62 = vpop.f32.mrf.mxu1 }
0x171c   :  { %v7058_v44 = vadd.f32 %v7057_v62, %v7056_v0  ;;  %v6241_v62 = vld [vmem:[#allocation21 + $0x18] sm:$0xff] }
0x171d   :  { %v11482_v34 = vpop.f32.mrf.mxu0  ;;  %7722 = vmatprep.subr.mxu0 %v6241_v62 }
0x171e   :  { %7723 = vmatpush3.msra.mxu0 %v6241_v62 }
0x171f   :  { %v7091_v5 = vpop.f32.mrf.mxu1  ;;  %v11488_v43 = vpop.f32.mrf.mxu0 }
0x1721   :  { %v7092_v41 = vpop.f32.mrf.mxu1 }
0x1722   :  { %v7093_v48 = vadd.f32 %v7092_v41, %v7091_v5  ;;  %v6240_v5 = vld [vmem:[#allocation21 + $0x10] sm:$0xff] }
0x1723   :  { %v7094_v6 = vpop.f32.mrf.mxu1  ;;  %7724 = vmatprep.subr.mxu0 %v6240_v5 }
0x1724   :  { %v11480_v18 = vadd.f32 %v7093_v48, %v7055_v39  ;;  %7725 = vmatpush3.msra.mxu0 %v6240_v5 }
0x1725   :  { %v7095_v57 = vpop.f32.mrf.mxu1 }
0x1726   :  { %v7096_v11 = vadd.f32 %v7095_v57, %v7094_v6  ;;  %7716 = vmatprep.mubr.msk.f32.mxu1 %vm315_vm0, %v11480_v18  ;;  %v6239_v6 = vld [vmem:[#allocation21 + $0x8] sm:$0xff]  ;;  %v6330_v57 = vld [vmem:[%s11546_s16] sm:$0xff] }
0x1727   :  { %7726 = vmatprep.subr.mxu0 %v6239_v6 }
0x1728   :  { %v11486_v36 = vadd.f32 %v7096_v11, %v7058_v44  ;;  %v6238_v44 = vld [vmem:[#allocation21] sm:$0xff]  ;;  %v6331_v11 = vld [vmem:[%s11546_s16 + $0x8] sm:$0xff]  ;;  %7727 = vmatpush3.msra.mxu0 %v6239_v6  ;;  %s8808_s16 = smov [#allocation24]  }
0x1729   :  { %7728 = vmatprep.subr.mxu0 %v6238_v44  ;;  %s6430_s13 = sshll.u32 %s8808_s16, 4  ;;  %s6431_s13 = int_to_ptr.vmem [resolvable:$true] %s6430_s13 }
0x172a   :  { %7717 = vmatmul.mubr.msk.f32.vlgmr.msra.gmra.mxu1 %vm315_vm0, %v11486_v36  ;;  %7729 = vmatpush3.msra.mxu0 %v6238_v44  ;;  %s8755_s6 = scalar_lea.vmem %s6431_s13, 256  ;;  %p8760_p5 = scmp.lt.s32.totalorder %s6431_s13, %s6431_s13 }
0x172b   :  { %7734 = vmatpush3.msk.msra.mxu1 %vm5962_vm9, %v8806_v47  ;;  %7719 = vmatprep.mubr.msk.f32.mxu1 %vm315_vm0, %v11488_v43  ;;  %p8756_p4 = scmp.ne.s32.totalorder %s6431_s13, %s8755_s6  ;;  %p8761_p6 = scmp.lt.s32.totalorder %s8755_s6, %s8755_s6 }
0x172c   :  { %7735 = vmatprep.subr.msk.mxu1 %vm5961_vm2, %v8806_v47 }
0x172d   :  { %7736 = vmatpush3.msk.msra.mxu1 %vm5961_vm2, %v8806_v47  ;;  %p8762_p7 = por %p8761_p6, %p8760_p5 }
0x172e   :  { %7720 = vmatmul.mubr.msk.f32.gmra.mxu1 %vm315_vm0, %v11482_v34 }
0x172f   :  { %7737 = vmatprep.mubr.msk.f32.mxu1 %vm6332_vm5, %v6330_v57  ;;  %p8763_p8 = pnand %p8762_p7, %p8756_p4 }
0x1732   :  { %7738 = vmatmul.mubr.msk.f32.vlgmr.msra.gmra.mxu1 %vm6332_vm5, %v6331_v11 }
0x17ea   :  { %v7718_v16 = vpop.f32.mrf.mxu1 }
0x17eb   :  { %v6137_v30 = vadd.f32 %v7718_v16, %v6701_v58 }
0x17ec   :  { %v6131_v13 = vpop.f32.mrf.mxu1 }
0x17ed   :  { %v6132_v61 = vadd.f32 %v6701_v58, %v6131_v13  ;;  %8474 = vtanh.f32 %v6137_v30 }
0x17ee   :  { %v7721_v17 = vpop.f32.mrf.mxu1 }
0x17ef   :  { %8476 = vtanh.f32 %v6132_v61  ;;  %v6147_v46 = vadd.f32 %v7721_v17, %v6701_v58 }
0x17f0   :  { %v6141_v63 = vpop.f32.mrf.mxu1 }
0x17f1   :  { %v6142_v32 = vadd.f32 %v6701_v58, %v6141_v63  ;;  %8478 = vtanh.f32 %v6147_v46 }
0x17f3   :  { %8480 = vtanh.f32 %v6142_v32 }
0x17fa   :  { %v8475_v8 = vpop.eup %8474 }
0x17fb   :  { %v6162_v31 = vmul.f32 %v8475_v8, %v6706_v22 }
0x17fc   :  { %v8477_v35 = vpop.eup %8476 }
0x17fd   :  { %v6161_v47 = vmul.f32 %v8477_v35, %v6706_v22  ;;  %v6168_v20 = vsel %vm315_vm0, %v6162_v31, 0.0  ;;  %v7739_v35 = vpop.f32.mrf.mxu1 }
0x17fe   :  { %v8479_v14 = vpop.eup %8478  ;;  %vm6415_vm14 = vcmp.gt.f32.partialorder %v7739_v35, 0.5 }
0x17ff   :  { %v6165_v29 = vsel %vm315_vm0, %v6161_v47, 0.0  ;;  %v6164_v50 = vmul.f32 %v8479_v14, %v6706_v22  ;;  %vm6418_vm2 = vmor %vm6415_vm14, %vm6416_vm1 }
0x1800   :  { %v8481_v49 = vpop.eup %8480  ;;  %6166 = vadd.xlane.f32.xlu0 %v6165_v29 }
0x1801   :  { %v6163_v53 = vmul.f32 %v8481_v49, %v6706_v22  ;;  %v6174_v10 = vsel %vm315_vm0, %v6164_v50, 0.0  ;;  %v6405_v22 = vpop.f32.mrf.mxu1 }
0x1802   :  { %vm6414_vm3 = vcmp.gt.f32.partialorder %v6405_v22, 0.5 }
0x1803   :  { %v6171_v25 = vsel %vm315_vm0, %v6163_v53, 0.0  ;;  %vm6417_vm4 = vmor %vm6414_vm3, %vm6416_vm1 }
0x1804   :  { %6169 = vadd.xlane.f32.xlu0 %v6168_v20  ;;  %6172 = vadd.xlane.f32.xlu1 %v6171_v25 }
0x1808   :  { %6175 = vadd.xlane.f32.xlu0 %v6174_v10 }
0x1889   :  { %v6167_v55 = vpop.xlane.xlu0 %6166 }
0x188a   :  { %v6184_v54 = vadd.f32 %v6707_v51, %v6167_v55 }
0x188d   :  { %v6173_v59 = vpop.xlane.xlu1 %6172  ;;  %v6170_v12 = vpop.xlane.xlu0 %6169 }
0x188e   :  { %v6186_v3 = vadd.f32 %v6707_v51, %v6173_v59  ;;  %v6185_v1 = vadd.f32 %v6707_v51, %v6170_v12 }
0x1890   :  { %v6188_v26 = vmax.f32 %v6184_v54, %v6186_v3 }
0x1891   :  { %v6176_v42 = vpop.xlane.xlu0 %6175 }
0x1892   :  { %v6190_v60 = vsub.f32 %v6184_v54, %v6188_v26  ;;  %v6196_v56 = vsub.f32 %v6186_v3, %v6188_v26  ;;  %v6187_v4 = vadd.f32 %v6707_v51, %v6176_v42 }
0x1894   :  { %v6192_v19 = vmul.f32 1.442695, %v6190_v60  ;;  %v6198_v33 = vmul.f32 1.442695, %v6196_v56  ;;  %v6189_v40 = vmax.f32 %v6185_v1, %v6187_v4 }
0x1896   :  { %8482 = vpow2.f32 %v6192_v19  ;;  %v6191_v2 = vsub.f32 %v6185_v1, %v6189_v40  ;;  %v6197_v37 = vsub.f32 %v6187_v4, %v6189_v40 }
0x1897   :  { %8484 = vpow2.f32 %v6198_v33 }
0x1898   :  { %v6194_v15 = vmul.f32 1.442695, %v6191_v2  ;;  %v6200_v27 = vmul.f32 1.442695, %v6197_v37 }
0x189a   :  { %8486 = vpow2.f32 %v6194_v15 }
0x189b   :  { %8488 = vpow2.f32 %v6200_v27 }
0x18a3   :  { %v8483_v38 = vpop.eup %8482 }
0x18a4   :  { %v8485_v24 = vpop.eup %8484 }
0x18a5   :  { %v6202_v7 = vadd.f32 %v8485_v24, %v8483_v38 }
0x18a7   :  { %v8487_v21 = vpop.eup %8486  ;;  %8490 = vrcp.f32 %v6202_v7 }
0x18a8   :  { %v8489_v9 = vpop.eup %8488 }
0x18a9   :  { %v6203_v28 = vadd.f32 %v8489_v9, %v8487_v21 }
0x18ab   :  { %8492 = vrcp.f32 %v6203_v28 }
0x18b4   :  { %v8491_v52 = vpop.eup %8490 }
0x18b5   :  { %v6222_v23 = vmul.f32 %v8491_v52, %v8485_v24  ;;  %v6208_v0 = vmul.f32 %v8491_v52, %v8483_v38 }
0x18b7   :  { %6226 = vperm.xlu0 %7758, %v6222_v23   ;;  %6212 = vperm.xlu1 %7759, %v6208_v0  }
0x18b8   :  { %v8493_v41 = vpop.eup %8492 }
0x18b9   :  { %v6209_v39 = vmul.f32 %v8493_v41, %v8487_v21  ;;  %v6223_v48 = vmul.f32 %v8493_v41, %v8489_v9 }
0x18bb   :  { %6217 = vperm.xlu1 %7759, %v6209_v39  }
0x18bf   :  { %6231 = vperm.xlu1 %7759, %v6223_v48  }
0x1932   :  { %v6213_v58 = vpop.permute.xlu1 %6212  ;;  %v6227_v16 = vpop.permute.xlu0 %6226 }
0x1933   :  { %v6220_v30 = vmul.f32 %v6213_v58, %v11480_v18  ;;  %v6234_v13 = vmul.f32 %v6227_v16, %v11488_v43  ;;  %v6708_v18 = vld [vmem:[#allocation22] ss:$0 sm:$0xff]  ;;  %v8807_v43 = vmov 0.0  }
0x1934   :  { %v6420_v47 = vsel %vm6418_vm2, -1000.0, %v8807_v43  ;;  %v6419_v49 = vsel %vm6417_vm4, -1000.0, %v8807_v43 }
0x1935   :  { %v6236_v61 = vadd.f32 %v6234_v13, %v6220_v30 }
0x1936   :  { %v6218_v17 = vpop.permute.xlu1 %6217 }
0x1937   :  { %7730 = vmatprep.mubr.msk.f32.mxu0 %vm315_vm0, %v6236_v61  ;;  %v6221_v63 = vmul.f32 %v6218_v17, %v11486_v36 }
0x193a   :  { %v6232_v46 = vpop.permute.xlu1 %6231 }
0x193b   :  { %v6235_v32 = vmul.f32 %v11482_v34, %v6232_v46 }
0x193d   :  { %v6237_v8 = vadd.f32 %v6235_v32, %v6221_v63 }
0x193f   :  { %7731 = vmatmul.mubr.msk.f32.vlgmr.msra.gmra.mxu0 %vm315_vm0, %v6237_v8 }
0x19ff   :  { %v7732_v14 = vpop.f32.mrf.mxu0 }
0x1a00   :  { %v6327_v29 = vadd.f32 %v7732_v14, %v6708_v18 }
0x1a01   :  { %v6321_v31 = vpop.f32.mrf.mxu0 }
0x1a02   :  { %v6422_v34 = vadd.f32 %v6420_v47, %v6327_v29  ;;  %v6322_v36 = vadd.f32 %v6708_v18, %v6321_v31 }
0x1a04   :  { %6424 = vst [vmem:[#allocation24 + $0x8] sm:$0xff] %v6422_v34  ;;  %v6421_v53 = vadd.f32 %v6419_v49, %v6322_v36 }
0x1a06   :  { %6423 = vst [vmem:[#allocation24] sm:$0xff] %v6421_v53 }
0x1a07   :  { %8766 = shalt.err (!%p8763_p8)
}
0x1a08   :  { %6436 = dma.vmem_to_hbm [thread:$0]  %s6431_s13, 256, %s11552_s23, [#allocation6], %s8793_s29, %s8793_s29, %s8794_s3  }
0x1a09   :  { %8789 = dma.done.wait [#allocation6], 256  }
0x1a0a   :  { %8790 = vsyncadd [#allocation6], 4294967040 }
0x1a0b   :  { %6440 = vsyncpa [#allocation5], 1 }
0x1a0c   :  { %6441 = vsyncpa [#allocation8], 1 }
0x1a0d   :  { %6442 = vsyncpa [#allocation11], 1 }
0x1a0e   :  { %6443 = vsyncpa [#allocation14], 1 }
0x1a0f   :  { %6444 = vsyncpa [#allocation17], 1 }
0x1a10   :  { %6445 = vsyncpa [#allocation20], 1 }
0x1a11   :  { %6446 = vsyncpa [#allocation23], 1 }
0x1a12   :  { %6447 = vsyncpa [#allocation6], 1 }

</bundles_post_ra>
